<compile_context>
chip_gen: v5e
topology: v5e:2x2
jax: 0.10.0
libtpu: 0.0.40
codegen_flags: <defaults>
</compile_context>

<pallas_src>
import functools

import jax
import jax.numpy as jnp
from jax.experimental import pallas as pl
from jax.experimental.pallas import tpu as pltpu

TM = 2048           # M tile (rows): large tiles amortize per-grid-step overhead
TN = 128            # N tile, fallback path only (TODO(synk): 256 on v6e/v7x)
TK = 128            # K tile, fallback path only
K_SINGLE_MAX = 1024  # single full-K block when K <= this (true for this model)
N_SINGLE_MAX = 256   # single full-N block when N <= this (true for this model)


def _round_up(x, m):
    return (x + m - 1) // m * m


# ----------------------------------------------------------------------------
# Pallas kernel: GEMM + fused bias / PReLU / BatchNorm-statistics epilogue
# ----------------------------------------------------------------------------
def _gemm_kernel(a_ref, b_ref, bias_ref, alpha_ref, *rest,
                 apply_prelu, compute_stats, multi_k):
    n_out = 3 if compute_stats else 1
    o_ref = rest[0]
    sum_ref = rest[1] if compute_stats else None
    ssq_ref = rest[2] if compute_stats else None
    acc_ref = rest[n_out] if multi_k else None

    def epilogue(res):
        out = res + bias_ref[...]                    # (tm, tn) + (1, tn)
        if apply_prelu:
            alpha = alpha_ref[0]                     # scalar, lives in SMEM
            out = jnp.where(out > 0, out, alpha * out)
        o_ref[...] = out.astype(o_ref.dtype)
        if compute_stats:
            # Per-channel partial sums for BatchNorm; single sublane row per
            # tile (no broadcast store).  Padded M rows are NOT masked here:
            # they contribute exactly PReLU(bias) each, which the wrapper
            # subtracts analytically.
            csum = jnp.sum(out, axis=0, keepdims=True)           # (1, tn)
            cssq = jnp.sum(out * out, axis=0, keepdims=True)     # (1, tn)
            sum_ref[...] = csum[None]                            # (1, 1, tn)
            ssq_ref[...] = cssq[None]

    if multi_k:
        # General fallback: K reduction grid axis with a VMEM accumulator.
        @pl.when(pl.program_id(2) == 0)
        def _():
            acc_ref[...] = jnp.zeros_like(acc_ref)

        acc_ref[...] += jnp.dot(a_ref[...], b_ref[...],
                                preferred_element_type=jnp.float32)

        @pl.when(pl.program_id(2) == pl.num_programs(2) - 1)
        def _():
            epilogue(acc_ref[...])
    else:
        # Fast path for this model: single K block, no accumulator, no phases.
        epilogue(jnp.dot(a_ref[...], b_ref[...],
                         preferred_element_type=jnp.float32))


def _pack_gemm(w2d, bias):
    """Pack a (K, N) f32 GEMM weight + (N,) bias into padded bf16 layout."""
    K, N = w2d.shape
    small = (K <= K_SINGLE_MAX) and (N <= N_SINGLE_MAX)
    if small:
        # Lane-dense output stores once N >= 32; tiny N stays unpadded.
        Np = _round_up(N, 128) if N >= 32 else N
        # Full-lane A loads / clean MXU K feed once K is near a lane width.
        Kp = _round_up(K, 128) if K >= 96 else _round_up(K, 16)
    else:
        Kp, Np = _round_up(K, TK), _round_up(N, TN)
    w_p = jnp.pad(w2d.astype(jnp.float32),
                  ((0, Kp - K), (0, Np - N))).astype(jnp.bfloat16)
    b_p = jnp.pad(bias.astype(jnp.float32), (0, Np - N)).reshape(1, Np)
    return dict(w=w_p, b=b_p, k=K, n=N)


def matmul_packed(a, packed, *, alpha=None, compute_stats=False,
                  out_dtype=jnp.float32, in_scale=None, in_shift=None):
    """out = a @ W + b (optional PReLU); optional per-channel sum / sumsq.

    If in_scale/in_shift are given, a per-input-channel affine (the producer's
    BatchNorm) is folded into the weights/bias:
        (a*s + t) @ W + b == a @ (s*W) + (t @ W + b)
    Only valid when `a` is not a zero-padded im2col matrix (ConvTranspose
    inputs and the final 1x1 conv here).
    """
    M, K = a.shape
    Kp, Np = packed["w"].shape
    N = packed["n"]
    small = (packed["k"] <= K_SINGLE_MAX) and (N <= N_SINGLE_MAX)

    if in_scale is not None:
        w_f32 = packed["w"].astype(jnp.float32)
        scale_k = jnp.pad(in_scale.astype(jnp.float32), (0, Kp - K))
        shift_k = jnp.pad(in_shift.astype(jnp.float32), (0, Kp - K))
        w_use = (w_f32 * scale_k[:, None]).astype(jnp.bfloat16)
        b_use = packed["b"] + shift_k[None, :] @ w_f32
    else:
        w_use, b_use = packed["w"], packed["b"]

    # Cap TM_eff so the (only) parallel M axis has >= 2 tiles per call, so
    # both v7x TensorCores get work; costs at most one extra tiny grid step
    # on the single-TC v5e/v6e generations.
    TM_eff = max(8, min(TM, _round_up(-(-M // 2), 8)))
    Mp = _round_up(M, TM_eff)
    mt = Mp // TM_eff

    a_p = jnp.pad(a.astype(jnp.bfloat16), ((0, Mp - M), (0, Kp - K)))

    apply_prelu = alpha is not None
    alpha_val = jnp.asarray(alpha if apply_prelu else 0.0, jnp.float32)
    alpha_arr = jnp.reshape(alpha_val, (1,))
    alpha_spec = pl.BlockSpec(memory_space=pltpu.MemorySpace.SMEM)

    if small:
        multi_k = False
        grid = (mt,)
        in_specs = [
            pl.BlockSpec((TM_eff, Kp), lambda i: (i, 0)),
            pl.BlockSpec((Kp, Np), lambda i: (0, 0)),
            pl.BlockSpec((1, Np), lambda i: (0, 0)),
            alpha_spec,
        ]
        out_specs = [pl.BlockSpec((TM_eff, Np), lambda i: (i, 0))]
        stat_spec = pl.BlockSpec((1, 1, Np), lambda i: (i, 0, 0))
        dims = ("parallel",)
        scratch = []
    else:
        nt, nk = Np // TN, Kp // TK
        multi_k = nk > 1
        if multi_k:
            grid = (mt, nt, nk)
            in_specs = [
                pl.BlockSpec((TM_eff, TK), lambda i, j, k: (i, k)),
                pl.BlockSpec((TK, TN), lambda i, j, k: (k, j)),
                pl.BlockSpec((1, TN), lambda i, j, k: (0, j)),
                alpha_spec,
            ]
            out_specs = [pl.BlockSpec((TM_eff, TN), lambda i, j, k: (i, j))]
            stat_spec = pl.BlockSpec((1, 1, TN), lambda i, j, k: (i, 0, j))
            dims = ("parallel", "parallel", "arbitrary")
            scratch = [pltpu.VMEM((TM_eff, TN), jnp.float32)]
        else:
            grid = (mt, nt)
            in_specs = [
                pl.BlockSpec((TM_eff, TK), lambda i, j: (i, 0)),
                pl.BlockSpec((TK, TN), lambda i, j: (0, j)),
                pl.BlockSpec((1, TN), lambda i, j: (0, j)),
                alpha_spec,
            ]
            out_specs = [pl.BlockSpec((TM_eff, TN), lambda i, j: (i, j))]
            stat_spec = pl.BlockSpec((1, 1, TN), lambda i, j: (i, 0, j))
            dims = ("parallel", "parallel")
            scratch = []

    out_shape = [jax.ShapeDtypeStruct((Mp, Np), out_dtype)]
    all_out_specs = list(out_specs)
    if compute_stats:
        out_shape += [jax.ShapeDtypeStruct((mt, 1, Np), jnp.float32)] * 2
        all_out_specs += [stat_spec, stat_spec]

    kernel = functools.partial(
        _gemm_kernel, apply_prelu=apply_prelu, compute_stats=compute_stats,
        multi_k=multi_k)

    results = pl.pallas_call(
        kernel,
        out_shape=tuple(out_shape),
        grid_spec=pltpu.PrefetchScalarGridSpec(
            num_scalar_prefetch=0,
            grid=grid,
            in_specs=in_specs,
            out_specs=tuple(all_out_specs),
            scratch_shapes=scratch,
        ),
        compiler_params=pltpu.CompilerParams(
            dimension_semantics=dims,
            vmem_limit_bytes=32 * 1024 * 1024),
    )(a_p, w_use, b_use, alpha_arr)

    out = results[0][:M, :N]
    if compute_stats:
        ch_sum = jnp.sum(results[1][:, 0, :], axis=0)[:N]
        ch_ssq = jnp.sum(results[2][:, 0, :], axis=0)[:N]
        n_pad = Mp - M
        if n_pad:
            # Zero-padded A rows contribute exactly PReLU(bias) each; remove
            # them from the channel statistics analytically (no in-kernel mask).
            pad_row = b_use[0, :N]
            if apply_prelu:
                pad_row = jnp.where(pad_row > 0, pad_row, alpha_val * pad_row)
            ch_sum = ch_sum - n_pad * pad_row
            ch_ssq = ch_ssq - n_pad * pad_row * pad_row
        return out, (ch_sum, ch_ssq)
    return out


# ----------------------------------------------------------------------------
# Conv layers expressed as GEMMs feeding the Pallas kernel
# ----------------------------------------------------------------------------
def conv3d_k3s2p1(x, packed):
    """Conv3d k=3 s=2 p=1 via im2col GEMM. x: (N, D, H, W, Cin) bf16."""
    N, D, H, W, C = x.shape
    Do, Ho, Wo = (D - 1) // 2 + 1, (H - 1) // 2 + 1, (W - 1) // 2 + 1
    xp = jnp.pad(x, ((0, 0), (1, 1), (1, 1), (1, 1), (0, 0)))
    # TODO(synk): im2col is still materialized in HBM (27x blowup, bf16); the
    # stride-2 pattern needs Element-offset index_maps for an implicit im2col.
    cols = [xp[:, kd:kd + 2 * Do:2, kh:kh + 2 * Ho:2, kw:kw + 2 * Wo:2, :]
            for kd in range(3) for kh in range(3) for kw in range(3)]
    a = jnp.stack(cols, axis=-2).reshape(N * Do * Ho * Wo, 27 * C)
    out, stats = matmul_packed(a, packed, compute_stats=True,
                               out_dtype=jnp.bfloat16)
    return out.reshape(N, Do, Ho, Wo, -1), stats


def convtranspose3d_k2s2(x, packed, in_scale=None, in_shift=None):
    """ConvTranspose3d k=2 s=2 via GEMM + pixel shuffle. x: (N,D,H,W,Cin)."""
    N, D, H, W, C = x.shape
    Cout = packed["n"] // 8
    out = matmul_packed(x.reshape(N * D * H * W, C), packed,
                        out_dtype=jnp.bfloat16,
                        in_scale=in_scale, in_shift=in_shift)
    out = out.reshape(N, D, H, W, 2, 2, 2, Cout)   # columns: (kd,kh,kw,cout)
    # TODO(synk): absorb this pixel-shuffle transpose (a full HBM round trip of
    # the 8x-upsampled activation) into the next conv's patch construction.
    out = out.transpose(0, 1, 4, 2, 5, 3, 6, 7)
    return out.reshape(N, 2 * D, 2 * H, 2 * W, Cout)


def conv2d_k3_same(x, packed, alpha):
    """Conv2d k=3 padding='same' with fused PReLU + BN stats. x: (B,H,W,Cin)."""
    B, H, W, C = x.shape
    xp = jnp.pad(x, ((0, 0), (1, 1), (1, 1), (0, 0)))
    # TODO(synk): implicit im2col (tap reduction grid axis over the padded
    # activation) would remove the 9x HBM read amplification here.
    cols = [xp[:, kh:kh + H, kw:kw + W, :]
            for kh in range(3) for kw in range(3)]
    a = jnp.stack(cols, axis=-2).reshape(B * H * W, 9 * C)
    out, stats = matmul_packed(a, packed, alpha=alpha, compute_stats=True,
                               out_dtype=jnp.bfloat16)
    return out.reshape(B, H, W, -1), stats


def conv2d_1x1(x, packed, in_scale=None, in_shift=None):
    """Conv2d kernel=1. x: (B, H, W, Cin)."""
    B, H, W, C = x.shape
    out = matmul_packed(x.reshape(B * H * W, C), packed, out_dtype=jnp.float32,
                        in_scale=in_scale, in_shift=in_shift)
    return out.reshape(B, H, W, -1)


def bn_scale_shift(stats, count, gamma, beta, eps=1e-5):
    """BatchNorm3d (training-mode batch stats, biased variance) as a per-channel
    affine computed from the sum / sum-of-squares produced in the GEMM epilogue."""
    s, ssq = stats
    mean = s / count
    # TODO(synk): E[x^2]-E[x]^2 in f32 can cancel for large counts; move to a
    # centered / Welford-style reduction if tolerances tighten.
    var = jnp.maximum(ssq / count - mean * mean, 0.0)
    scale = gamma * jax.lax.rsqrt(var + eps)
    shift = beta - mean * scale
    return scale, shift


def apply_bn(x, scale, shift):
    return (x.astype(jnp.float32) * scale + shift).astype(jnp.bfloat16)


# ----------------------------------------------------------------------------
# UNet3D forward
# ----------------------------------------------------------------------------
def unet3d_forward(packed, x_ncdhw):
    x = jnp.transpose(x_ncdhw, (0, 2, 3, 4, 1)).astype(jnp.bfloat16)  # NDHWC

    # Encoder: [Conv3d stride-2 -> BatchNorm3d] * depth
    carry_scale = carry_shift = None
    n_enc = len(packed["enc"])
    for idx, blk in enumerate(packed["enc"]):
        y, st = conv3d_k3s2p1(x, blk["conv"])
        cnt = y.shape[0] * y.shape[1] * y.shape[2] * y.shape[3]
        scale, shift = bn_scale_shift(st, cnt, blk["bn_g"], blk["bn_b"])
        if idx == n_enc - 1:
            # Consumer is the first ConvTranspose (no zero padding): fold BN
            # into its weights instead of a standalone elementwise pass.
            x, carry_scale, carry_shift = y, scale, shift
        else:
            # Consumer is a zero-padded conv3d im2col: shift does not commute
            # with the zero padding, keep the standalone BN apply.
            x = apply_bn(y, scale, shift)

    # Decoder: [ConvTranspose3d -> (Conv2d + PReLU + BN3d) x 2] * depth
    for blk in packed["dec"]:
        x = convtranspose3d_k2s2(x, blk["up"],
                                 in_scale=carry_scale, in_shift=carry_shift)
        carry_scale = carry_shift = None
        N, D, H, W, C = x.shape
        cnt = N * D * H * W
        # TODO(synk): nn.Conv2d on a 5-D tensor raises in PyTorch; interpreted
        # here as a 2-D conv per depth slice (depth folded into batch).
        x2d = x.reshape(N * D, H, W, C)
        y, st = conv2d_k3_same(x2d, blk["c1"], blk["a1"])
        s1, t1 = bn_scale_shift(st, cnt, blk["bn1_g"], blk["bn1_b"])
        x2d = apply_bn(y, s1, t1)                # consumer is padded conv2d #2
        y, st = conv2d_k3_same(x2d, blk["c2"], blk["a2"])
        s2, t2 = bn_scale_shift(st, cnt, blk["bn2_g"], blk["bn2_b"])
        # Consumer (next ConvTranspose or final 1x1) has no padding: fold BN2.
        x = y.reshape(N, D, H, W, -1)
        carry_scale, carry_shift = s2, t2

    # Final 1x1 Conv2d (per depth slice), with the last BN2 folded in.
    N, D, H, W, C = x.shape
    y = conv2d_1x1(x.reshape(N * D, H, W, C), packed["last"],
                   in_scale=carry_scale, in_shift=carry_shift)
    y = y.reshape(N, D, H, W, -1)
    return jnp.transpose(y, (0, 4, 1, 2, 3)).astype(jnp.float32)  # NCDHW


# ----------------------------------------------------------------------------
# Parameters: PyTorch-layout init + one-time packing into GEMM layout
# ----------------------------------------------------------------------------
def init_params(key, in_channels=1, n_classes=2, depth=2, wf=2):
    def normal(k, shape, scale=0.1):
        return scale * jax.random.normal(k, shape, jnp.float32)

    keys = iter(jax.random.split(key, 64))
    params = {"enc": [], "dec": []}

    c_in = in_channels
    for i in range(depth):
        c_out = 2 ** (wf + i)
        params["enc"].append(dict(
            w=normal(next(keys), (c_out, c_in, 3, 3, 3)),
            b=normal(next(keys), (c_out,)),
            bn_g=jnp.ones((c_out,), jnp.float32),
            bn_b=jnp.zeros((c_out,), jnp.float32),
        ))
        c_in = c_out

    for i in reversed(range(depth)):
        c_out = 2 ** (wf + i)
        params["dec"].append(dict(
            up_w=normal(next(keys), (c_in, c_out, 2, 2, 2)),
            up_b=normal(next(keys), (c_out,)),
            c1_w=normal(next(keys), (c_out, c_out, 3, 3)),
            c1_b=normal(next(keys), (c_out,)),
            a1=jnp.asarray(0.25, jnp.float32),          # nn.PReLU() default
            bn1_g=jnp.ones((c_out,), jnp.float32),
            bn1_b=jnp.zeros((c_out,), jnp.float32),
            c2_w=normal(next(keys), (c_out, c_out, 3, 3)),
            c2_b=normal(next(keys), (c_out,)),
            a2=jnp.asarray(0.25, jnp.float32),
            bn2_g=jnp.ones((c_out,), jnp.float32),
            bn2_b=jnp.zeros((c_out,), jnp.float32),
        ))
        c_in = c_out

    params["last_w"] = normal(next(keys), (n_classes, c_in, 1, 1))
    params["last_b"] = normal(next(keys), (n_classes,))
    return params


def pack_params(params):
    """One-time packing of all weights into padded bf16 GEMM layout."""
    packed = {"enc": [], "dec": []}
    for blk in params["enc"]:
        w = blk["w"]                                    # (Cout, Cin, 3, 3, 3)
        bm = jnp.transpose(w, (2, 3, 4, 1, 0)).reshape(-1, w.shape[0])
        packed["enc"].append(dict(
            conv=_pack_gemm(bm, blk["b"]),
            bn_g=blk["bn_g"], bn_b=blk["bn_b"]))
    for blk in params["dec"]:
        uw = blk["up_w"]                                # (Cin, Cout, 2, 2, 2)
        cout = uw.shape[1]
        ubm = jnp.transpose(uw, (0, 2, 3, 4, 1)).reshape(uw.shape[0], 8 * cout)
        ub = jnp.tile(blk["up_b"], 8)                   # (kd,kh,kw,cout) order
        c1 = jnp.transpose(blk["c1_w"], (2, 3, 1, 0)).reshape(-1, blk["c1_w"].shape[0])
        c2 = jnp.transpose(blk["c2_w"], (2, 3, 1, 0)).reshape(-1, blk["c2_w"].shape[0])
        packed["dec"].append(dict(
            up=_pack_gemm(ubm, ub),
            c1=_pack_gemm(c1, blk["c1_b"]), a1=blk["a1"],
            c2=_pack_gemm(c2, blk["c2_b"]), a2=blk["a2"],
            bn1_g=blk["bn1_g"], bn1_b=blk["bn1_b"],
            bn2_g=blk["bn2_g"], bn2_b=blk["bn2_b"]))
    lw = params["last_w"].reshape(params["last_w"].shape[0], -1).T  # (Cin, ncls)
    packed["last"] = _pack_gemm(lw, params["last_b"])
    return packed


if __name__ == "__main__":
    key = jax.random.PRNGKey(0)
    pkey, xkey = jax.random.split(key)

    # Small config consistent with the module: depth=2, wf=2, in_channels=1,
    # n_classes=2, input (N=2, C=1, D=H=W=16).
    params = init_params(pkey, in_channels=1, n_classes=2, depth=2, wf=2)
    packed = pack_params(params)        # one-time GEMM-layout weight packing
    x = jax.random.normal(xkey, (2, 1, 16, 16, 16), jnp.float32)

    fwd = jax.jit(functools.partial(unet3d_forward, packed))
    out = jax.block_until_ready(fwd(x))

    assert out.shape == (2, 2, 16, 16, 16), out.shape
    assert bool(jnp.all(jnp.isfinite(out)))
    print("KERNEL_OK")
</pallas_src>

<mosaic_0001>
module attributes {stable_mosaic.version = 11 : i64} {
  func.func @_gemm_kernel(%arg0: i32, %arg1: memref<512x32xbf16, #tpu.memory_space<vmem>>, %arg2: memref<32x4xbf16, #tpu.memory_space<vmem>>, %arg3: memref<1x4xf32, #tpu.memory_space<vmem>>, %arg4: memref<1xf32, #tpu.memory_space<smem>>, %arg5: memref<512x4xbf16, #tpu.memory_space<vmem>>, %arg6: memref<1x1x4xf32, #tpu.memory_space<vmem>>, %arg7: memref<1x1x4xf32, #tpu.memory_space<vmem>>) attributes {dimension_semantics = [#tpu.dimension_semantics<parallel>], iteration_bounds = array<i64: 2>, scalar_prefetch = 0 : i64, scratch_operands = 0 : i64, tpu.core_type = #tpu.core_type<tc>, window_params = [{transform_indices = @transform_0, window_bounds = array<i64: 512, 32>}, {pipeline_mode = #tpu.pipeline_mode<synchronous>, transform_indices = @transform_1, window_bounds = array<i64: 32, 4>}, {pipeline_mode = #tpu.pipeline_mode<synchronous>, transform_indices = @transform_2, window_bounds = array<i64: 1, 4>}, {transform_indices = @transform_3, window_bounds = array<i64: 1>}, {transform_indices = @transform_4, window_bounds = array<i64: 512, 4>}, {transform_indices = @transform_5, window_bounds = array<i64: 1, 1, 4>}, {transform_indices = @transform_6, window_bounds = array<i64: 1, 1, 4>}]} {
    %c0 = arith.constant 0 : index
    %c0_0 = arith.constant 0 : index
    %0 = vector.load %arg1[%c0, %c0_0] : memref<512x32xbf16, #tpu.memory_space<vmem>>, vector<512x32xbf16>
    %c0_1 = arith.constant 0 : index
    %c0_2 = arith.constant 0 : index
    %1 = vector.load %arg2[%c0_1, %c0_2] : memref<32x4xbf16, #tpu.memory_space<vmem>>, vector<32x4xbf16>
    %cst = arith.constant dense<0.000000e+00> : vector<512x4xf32>
    %2 = tpu.matmul %0, %1, %cst {dimension_numbers = #tpu.dot_dimension_numbers<[1], [0], [0], [1], [0, 0, 1, 1], [], []>} : vector<512x32xbf16>, vector<32x4xbf16>, vector<512x4xf32> -> vector<512x4xf32>
    %c0_3 = arith.constant 0 : index
    %c0_4 = arith.constant 0 : index
    %3 = vector.load %arg3[%c0_3, %c0_4] : memref<1x4xf32, #tpu.memory_space<vmem>>, vector<1x4xf32>
    %4 = vector.broadcast %3 : vector<1x4xf32> to vector<512x4xf32>
    %5 = arith.addf %2, %4 : vector<512x4xf32>
    %6 = arith.truncf %5 : vector<512x4xf32> to vector<512x4xbf16>
    %c0_5 = arith.constant 0 : index
    %c0_6 = arith.constant 0 : index
    %7 = vector.load %arg5[%c0_5, %c0_6] : memref<512x4xbf16, #tpu.memory_space<vmem>>, vector<512x4xbf16>
    tpu.vector_store %arg5[%c0_5, %c0_6], %6 {strides = array<i32>} : memref<512x4xbf16, #tpu.memory_space<vmem>>, vector<512x4xbf16>,
    %cst_7 = arith.constant dense<0.000000e+00> : vector<4xf32>
    %8 = vector.multi_reduction <add>, %5, %cst_7 [0] : vector<512x4xf32> to vector<4xf32>
    %9 = vector.shape_cast %8 : vector<4xf32> to vector<1x4xf32>
    %10 = arith.mulf %5, %5 : vector<512x4xf32>
    %cst_8 = arith.constant dense<0.000000e+00> : vector<4xf32>
    %11 = vector.multi_reduction <add>, %10, %cst_8 [0] : vector<512x4xf32> to vector<4xf32>
    %12 = vector.shape_cast %11 : vector<4xf32> to vector<1x4xf32>
    %13 = vector.shape_cast %9 : vector<1x4xf32> to vector<1x1x4xf32>
    %c0_9 = arith.constant 0 : index
    %c0_10 = arith.constant 0 : index
    %c0_11 = arith.constant 0 : index
    %14 = vector.load %arg6[%c0_9, %c0_10, %c0_11] : memref<1x1x4xf32, #tpu.memory_space<vmem>>, vector<1x1x4xf32>
    tpu.vector_store %arg6[%c0_9, %c0_10, %c0_11], %13 {strides = array<i32>} : memref<1x1x4xf32, #tpu.memory_space<vmem>>, vector<1x1x4xf32>,
    %15 = vector.shape_cast %12 : vector<1x4xf32> to vector<1x1x4xf32>
    %c0_12 = arith.constant 0 : index
    %c0_13 = arith.constant 0 : index
    %c0_14 = arith.constant 0 : index
    %16 = vector.load %arg7[%c0_12, %c0_13, %c0_14] : memref<1x1x4xf32, #tpu.memory_space<vmem>>, vector<1x1x4xf32>
    tpu.vector_store %arg7[%c0_12, %c0_13, %c0_14], %15 {strides = array<i32>} : memref<1x1x4xf32, #tpu.memory_space<vmem>>, vector<1x1x4xf32>,
    return
  }
  func.func @transform_0(%arg0: i32) -> (i32, i32) {
    %c0_i32 = arith.constant 0 : i32
    %c0_i32_0 = arith.constant 0 : i32
    return %arg0, %c0_i32 : i32, i32
  }
  func.func @transform_1(%arg0: i32) -> (i32, i32) {
    %c0_i32 = arith.constant 0 : i32
    %c0_i32_0 = arith.constant 0 : i32
    %c0_i32_1 = arith.constant 0 : i32
    return %c0_i32, %c0_i32_0 : i32, i32
  }
  func.func @transform_2(%arg0: i32) -> (i32, i32) {
    %c0_i32 = arith.constant 0 : i32
    %c0_i32_0 = arith.constant 0 : i32
    %c0_i32_1 = arith.constant 0 : i32
    return %c0_i32, %c0_i32_0 : i32, i32
  }
  func.func @transform_3(%arg0: i32) -> i32 {
    %c0_i32 = arith.constant 0 : i32
    %c0_i32_0 = arith.constant 0 : i32
    return %c0_i32 : i32
  }
  func.func @transform_4(%arg0: i32) -> (i32, i32) {
    %c0_i32 = arith.constant 0 : i32
    %c0_i32_0 = arith.constant 0 : i32
    return %arg0, %c0_i32 : i32, i32
  }
  func.func @transform_5(%arg0: i32) -> (i32, i32, i32) {
    %c0_i32 = arith.constant 0 : i32
    %c0_i32_0 = arith.constant 0 : i32
    %c0_i32_1 = arith.constant 0 : i32
    return %arg0, %c0_i32, %c0_i32_0 : i32, i32, i32
  }
  func.func @transform_6(%arg0: i32) -> (i32, i32, i32) {
    %c0_i32 = arith.constant 0 : i32
    %c0_i32_0 = arith.constant 0 : i32
    %c0_i32_1 = arith.constant 0 : i32
    return %arg0, %c0_i32, %c0_i32_0 : i32, i32, i32
  }
}

module attributes {stable_mosaic.version = 11 : i64} {
  func.func @_gemm_kernel(%arg0: i32, %arg1: memref<64x128xbf16, #tpu.memory_space<vmem>>, %arg2: memref<128x8xbf16, #tpu.memory_space<vmem>>, %arg3: memref<1x8xf32, #tpu.memory_space<vmem>>, %arg4: memref<1xf32, #tpu.memory_space<smem>>, %arg5: memref<64x8xbf16, #tpu.memory_space<vmem>>, %arg6: memref<1x1x8xf32, #tpu.memory_space<vmem>>, %arg7: memref<1x1x8xf32, #tpu.memory_space<vmem>>) attributes {dimension_semantics = [#tpu.dimension_semantics<parallel>], iteration_bounds = array<i64: 2>, scalar_prefetch = 0 : i64, scratch_operands = 0 : i64, tpu.core_type = #tpu.core_type<tc>, window_params = [{transform_indices = @transform_0, window_bounds = array<i64: 64, 128>}, {pipeline_mode = #tpu.pipeline_mode<synchronous>, transform_indices = @transform_1, window_bounds = array<i64: 128, 8>}, {pipeline_mode = #tpu.pipeline_mode<synchronous>, transform_indices = @transform_2, window_bounds = array<i64: 1, 8>}, {transform_indices = @transform_3, window_bounds = array<i64: 1>}, {transform_indices = @transform_4, window_bounds = array<i64: 64, 8>}, {transform_indices = @transform_5, window_bounds = array<i64: 1, 1, 8>}, {transform_indices = @transform_6, window_bounds = array<i64: 1, 1, 8>}]} {
    %c0 = arith.constant 0 : index
    %c0_0 = arith.constant 0 : index
    %0 = vector.load %arg1[%c0, %c0_0] : memref<64x128xbf16, #tpu.memory_space<vmem>>, vector<64x128xbf16>
    %c0_1 = arith.constant 0 : index
    %c0_2 = arith.constant 0 : index
    %1 = vector.load %arg2[%c0_1, %c0_2] : memref<128x8xbf16, #tpu.memory_space<vmem>>, vector<128x8xbf16>
    %cst = arith.constant dense<0.000000e+00> : vector<64x8xf32>
    %2 = tpu.matmul %0, %1, %cst {dimension_numbers = #tpu.dot_dimension_numbers<[1], [0], [0], [1], [0, 0, 1, 1], [], []>} : vector<64x128xbf16>, vector<128x8xbf16>, vector<64x8xf32> -> vector<64x8xf32>
    %c0_3 = arith.constant 0 : index
    %c0_4 = arith.constant 0 : index
    %3 = vector.load %arg3[%c0_3, %c0_4] : memref<1x8xf32, #tpu.memory_space<vmem>>, vector<1x8xf32>
    %4 = vector.broadcast %3 : vector<1x8xf32> to vector<64x8xf32>
    %5 = arith.addf %2, %4 : vector<64x8xf32>
    %6 = arith.truncf %5 : vector<64x8xf32> to vector<64x8xbf16>
    %c0_5 = arith.constant 0 : index
    %c0_6 = arith.constant 0 : index
    %7 = vector.load %arg5[%c0_5, %c0_6] : memref<64x8xbf16, #tpu.memory_space<vmem>>, vector<64x8xbf16>
    tpu.vector_store %arg5[%c0_5, %c0_6], %6 {strides = array<i32>} : memref<64x8xbf16, #tpu.memory_space<vmem>>, vector<64x8xbf16>,
    %cst_7 = arith.constant dense<0.000000e+00> : vector<8xf32>
    %8 = vector.multi_reduction <add>, %5, %cst_7 [0] : vector<64x8xf32> to vector<8xf32>
    %9 = vector.shape_cast %8 : vector<8xf32> to vector<1x8xf32>
    %10 = arith.mulf %5, %5 : vector<64x8xf32>
    %cst_8 = arith.constant dense<0.000000e+00> : vector<8xf32>
    %11 = vector.multi_reduction <add>, %10, %cst_8 [0] : vector<64x8xf32> to vector<8xf32>
    %12 = vector.shape_cast %11 : vector<8xf32> to vector<1x8xf32>
    %13 = vector.shape_cast %9 : vector<1x8xf32> to vector<1x1x8xf32>
    %c0_9 = arith.constant 0 : index
    %c0_10 = arith.constant 0 : index
    %c0_11 = arith.constant 0 : index
    %14 = vector.load %arg6[%c0_9, %c0_10, %c0_11] : memref<1x1x8xf32, #tpu.memory_space<vmem>>, vector<1x1x8xf32>
    tpu.vector_store %arg6[%c0_9, %c0_10, %c0_11], %13 {strides = array<i32>} : memref<1x1x8xf32, #tpu.memory_space<vmem>>, vector<1x1x8xf32>,
    %15 = vector.shape_cast %12 : vector<1x8xf32> to vector<1x1x8xf32>
    %c0_12 = arith.constant 0 : index
    %c0_13 = arith.constant 0 : index
    %c0_14 = arith.constant 0 : index
    %16 = vector.load %arg7[%c0_12, %c0_13, %c0_14] : memref<1x1x8xf32, #tpu.memory_space<vmem>>, vector<1x1x8xf32>
    tpu.vector_store %arg7[%c0_12, %c0_13, %c0_14], %15 {strides = array<i32>} : memref<1x1x8xf32, #tpu.memory_space<vmem>>, vector<1x1x8xf32>,
    return
  }
  func.func @transform_0(%arg0: i32) -> (i32, i32) {
    %c0_i32 = arith.constant 0 : i32
    %c0_i32_0 = arith.constant 0 : i32
    return %arg0, %c0_i32 : i32, i32
  }
  func.func @transform_1(%arg0: i32) -> (i32, i32) {
    %c0_i32 = arith.constant 0 : i32
    %c0_i32_0 = arith.constant 0 : i32
    %c0_i32_1 = arith.constant 0 : i32
    return %c0_i32, %c0_i32_0 : i32, i32
  }
  func.func @transform_2(%arg0: i32) -> (i32, i32) {
    %c0_i32 = arith.constant 0 : i32
    %c0_i32_0 = arith.constant 0 : i32
    %c0_i32_1 = arith.constant 0 : i32
    return %c0_i32, %c0_i32_0 : i32, i32
  }
  func.func @transform_3(%arg0: i32) -> i32 {
    %c0_i32 = arith.constant 0 : i32
    %c0_i32_0 = arith.constant 0 : i32
    return %c0_i32 : i32
  }
  func.func @transform_4(%arg0: i32) -> (i32, i32) {
    %c0_i32 = arith.constant 0 : i32
    %c0_i32_0 = arith.constant 0 : i32
    return %arg0, %c0_i32 : i32, i32
  }
  func.func @transform_5(%arg0: i32) -> (i32, i32, i32) {
    %c0_i32 = arith.constant 0 : i32
    %c0_i32_0 = arith.constant 0 : i32
    %c0_i32_1 = arith.constant 0 : i32
    return %arg0, %c0_i32, %c0_i32_0 : i32, i32, i32
  }
  func.func @transform_6(%arg0: i32) -> (i32, i32, i32) {
    %c0_i32 = arith.constant 0 : i32
    %c0_i32_0 = arith.constant 0 : i32
    %c0_i32_1 = arith.constant 0 : i32
    return %arg0, %c0_i32, %c0_i32_0 : i32, i32, i32
  }
}

module attributes {stable_mosaic.version = 11 : i64} {
  func.func @_gemm_kernel(%arg0: i32, %arg1: memref<64x16xbf16, #tpu.memory_space<vmem>>, %arg2: memref<16x128xbf16, #tpu.memory_space<vmem>>, %arg3: memref<1x128xf32, #tpu.memory_space<vmem>>, %arg4: memref<1xf32, #tpu.memory_space<smem>>, %arg5: memref<64x128xbf16, #tpu.memory_space<vmem>>) attributes {dimension_semantics = [#tpu.dimension_semantics<parallel>], iteration_bounds = array<i64: 2>, scalar_prefetch = 0 : i64, scratch_operands = 0 : i64, tpu.core_type = #tpu.core_type<tc>, window_params = [{transform_indices = @transform_0, window_bounds = array<i64: 64, 16>}, {pipeline_mode = #tpu.pipeline_mode<synchronous>, transform_indices = @transform_1, window_bounds = array<i64: 16, 128>}, {pipeline_mode = #tpu.pipeline_mode<synchronous>, transform_indices = @transform_2, window_bounds = array<i64: 1, 128>}, {transform_indices = @transform_3, window_bounds = array<i64: 1>}, {transform_indices = @transform_4, window_bounds = array<i64: 64, 128>}]} {
    %c0 = arith.constant 0 : index
    %c0_0 = arith.constant 0 : index
    %0 = vector.load %arg1[%c0, %c0_0] : memref<64x16xbf16, #tpu.memory_space<vmem>>, vector<64x16xbf16>
    %c0_1 = arith.constant 0 : index
    %c0_2 = arith.constant 0 : index
    %1 = vector.load %arg2[%c0_1, %c0_2] : memref<16x128xbf16, #tpu.memory_space<vmem>>, vector<16x128xbf16>
    %cst = arith.constant dense<0.000000e+00> : vector<64x128xf32>
    %2 = tpu.matmul %0, %1, %cst {dimension_numbers = #tpu.dot_dimension_numbers<[1], [0], [0], [1], [0, 0, 1, 1], [], []>} : vector<64x16xbf16>, vector<16x128xbf16>, vector<64x128xf32> -> vector<64x128xf32>
    %c0_3 = arith.constant 0 : index
    %c0_4 = arith.constant 0 : index
    %3 = vector.load %arg3[%c0_3, %c0_4] : memref<1x128xf32, #tpu.memory_space<vmem>>, vector<1x128xf32>
    %4 = vector.broadcast %3 : vector<1x128xf32> to vector<64x128xf32>
    %5 = arith.addf %2, %4 : vector<64x128xf32>
    %6 = arith.truncf %5 : vector<64x128xf32> to vector<64x128xbf16>
    %c0_5 = arith.constant 0 : index
    %c0_6 = arith.constant 0 : index
    %7 = vector.load %arg5[%c0_5, %c0_6] : memref<64x128xbf16, #tpu.memory_space<vmem>>, vector<64x128xbf16>
    tpu.vector_store %arg5[%c0_5, %c0_6], %6 {strides = array<i32>} : memref<64x128xbf16, #tpu.memory_space<vmem>>, vector<64x128xbf16>,
    return
  }
  func.func @transform_0(%arg0: i32) -> (i32, i32) {
    %c0_i32 = arith.constant 0 : i32
    %c0_i32_0 = arith.constant 0 : i32
    return %arg0, %c0_i32 : i32, i32
  }
  func.func @transform_1(%arg0: i32) -> (i32, i32) {
    %c0_i32 = arith.constant 0 : i32
    %c0_i32_0 = arith.constant 0 : i32
    %c0_i32_1 = arith.constant 0 : i32
    return %c0_i32, %c0_i32_0 : i32, i32
  }
  func.func @transform_2(%arg0: i32) -> (i32, i32) {
    %c0_i32 = arith.constant 0 : i32
    %c0_i32_0 = arith.constant 0 : i32
    %c0_i32_1 = arith.constant 0 : i32
    return %c0_i32, %c0_i32_0 : i32, i32
  }
  func.func @transform_3(%arg0: i32) -> i32 {
    %c0_i32 = arith.constant 0 : i32
    %c0_i32_0 = arith.constant 0 : i32
    return %c0_i32 : i32
  }
  func.func @transform_4(%arg0: i32) -> (i32, i32) {
    %c0_i32 = arith.constant 0 : i32
    %c0_i32_0 = arith.constant 0 : i32
    return %arg0, %c0_i32 : i32, i32
  }
}

module attributes {stable_mosaic.version = 11 : i64} {
  func.func @_gemm_kernel(%arg0: i32, %arg1: memref<512x80xbf16, #tpu.memory_space<vmem>>, %arg2: memref<80x8xbf16, #tpu.memory_space<vmem>>, %arg3: memref<1x8xf32, #tpu.memory_space<vmem>>, %arg4: memref<1xf32, #tpu.memory_space<smem>>, %arg5: memref<512x8xbf16, #tpu.memory_space<vmem>>, %arg6: memref<1x1x8xf32, #tpu.memory_space<vmem>>, %arg7: memref<1x1x8xf32, #tpu.memory_space<vmem>>) attributes {dimension_semantics = [#tpu.dimension_semantics<parallel>], iteration_bounds = array<i64: 2>, scalar_prefetch = 0 : i64, scratch_operands = 0 : i64, tpu.core_type = #tpu.core_type<tc>, window_params = [{transform_indices = @transform_0, window_bounds = array<i64: 512, 80>}, {pipeline_mode = #tpu.pipeline_mode<synchronous>, transform_indices = @transform_1, window_bounds = array<i64: 80, 8>}, {pipeline_mode = #tpu.pipeline_mode<synchronous>, transform_indices = @transform_2, window_bounds = array<i64: 1, 8>}, {transform_indices = @transform_3, window_bounds = array<i64: 1>}, {transform_indices = @transform_4, window_bounds = array<i64: 512, 8>}, {transform_indices = @transform_5, window_bounds = array<i64: 1, 1, 8>}, {transform_indices = @transform_6, window_bounds = array<i64: 1, 1, 8>}]} {
    %c0 = arith.constant 0 : index
    %c0_0 = arith.constant 0 : index
    %0 = vector.load %arg1[%c0, %c0_0] : memref<512x80xbf16, #tpu.memory_space<vmem>>, vector<512x80xbf16>
    %c0_1 = arith.constant 0 : index
    %c0_2 = arith.constant 0 : index
    %1 = vector.load %arg2[%c0_1, %c0_2] : memref<80x8xbf16, #tpu.memory_space<vmem>>, vector<80x8xbf16>
    %cst = arith.constant dense<0.000000e+00> : vector<512x8xf32>
    %2 = tpu.matmul %0, %1, %cst {dimension_numbers = #tpu.dot_dimension_numbers<[1], [0], [0], [1], [0, 0, 1, 1], [], []>} : vector<512x80xbf16>, vector<80x8xbf16>, vector<512x8xf32> -> vector<512x8xf32>
    %c0_3 = arith.constant 0 : index
    %c0_4 = arith.constant 0 : index
    %3 = vector.load %arg3[%c0_3, %c0_4] : memref<1x8xf32, #tpu.memory_space<vmem>>, vector<1x8xf32>
    %4 = vector.broadcast %3 : vector<1x8xf32> to vector<512x8xf32>
    %5 = arith.addf %2, %4 : vector<512x8xf32>
    %c0_5 = arith.constant 0 : index
    %6 = memref.load %arg4[%c0_5] : memref<1xf32, #tpu.memory_space<smem>>
    %cst_6 = arith.constant 0.000000e+00 : f32
    %7 = vector.broadcast %cst_6 : f32 to vector<512x8xf32>
    %8 = arith.cmpf ogt, %5, %7 : vector<512x8xf32>
    %9 = vector.broadcast %6 : f32 to vector<512x8xf32>
    %10 = arith.mulf %9, %5 : vector<512x8xf32>
    %11 = arith.select %8, %5, %10 : vector<512x8xi1>, vector<512x8xf32>
    %12 = arith.truncf %11 : vector<512x8xf32> to vector<512x8xbf16>
    %c0_7 = arith.constant 0 : index
    %c0_8 = arith.constant 0 : index
    %13 = vector.load %arg5[%c0_7, %c0_8] : memref<512x8xbf16, #tpu.memory_space<vmem>>, vector<512x8xbf16>
    tpu.vector_store %arg5[%c0_7, %c0_8], %12 {strides = array<i32>} : memref<512x8xbf16, #tpu.memory_space<vmem>>, vector<512x8xbf16>,
    %cst_9 = arith.constant dense<0.000000e+00> : vector<8xf32>
    %14 = vector.multi_reduction <add>, %11, %cst_9 [0] : vector<512x8xf32> to vector<8xf32>
    %15 = vector.shape_cast %14 : vector<8xf32> to vector<1x8xf32>
    %16 = arith.mulf %11, %11 : vector<512x8xf32>
    %cst_10 = arith.constant dense<0.000000e+00> : vector<8xf32>
    %17 = vector.multi_reduction <add>, %16, %cst_10 [0] : vector<512x8xf32> to vector<8xf32>
    %18 = vector.shape_cast %17 : vector<8xf32> to vector<1x8xf32>
    %19 = vector.shape_cast %15 : vector<1x8xf32> to vector<1x1x8xf32>
    %c0_11 = arith.constant 0 : index
    %c0_12 = arith.constant 0 : index
    %c0_13 = arith.constant 0 : index
    %20 = vector.load %arg6[%c0_11, %c0_12, %c0_13] : memref<1x1x8xf32, #tpu.memory_space<vmem>>, vector<1x1x8xf32>
    tpu.vector_store %arg6[%c0_11, %c0_12, %c0_13], %19 {strides = array<i32>} : memref<1x1x8xf32, #tpu.memory_space<vmem>>, vector<1x1x8xf32>,
    %21 = vector.shape_cast %18 : vector<1x8xf32> to vector<1x1x8xf32>
    %c0_14 = arith.constant 0 : index
    %c0_15 = arith.constant 0 : index
    %c0_16 = arith.constant 0 : index
    %22 = vector.load %arg7[%c0_14, %c0_15, %c0_16] : memref<1x1x8xf32, #tpu.memory_space<vmem>>, vector<1x1x8xf32>
    tpu.vector_store %arg7[%c0_14, %c0_15, %c0_16], %21 {strides = array<i32>} : memref<1x1x8xf32, #tpu.memory_space<vmem>>, vector<1x1x8xf32>,
    return
  }
  func.func @transform_0(%arg0: i32) -> (i32, i32) {
    %c0_i32 = arith.constant 0 : i32
    %c0_i32_0 = arith.constant 0 : i32
    return %arg0, %c0_i32 : i32, i32
  }
  func.func @transform_1(%arg0: i32) -> (i32, i32) {
    %c0_i32 = arith.constant 0 : i32
    %c0_i32_0 = arith.constant 0 : i32
    %c0_i32_1 = arith.constant 0 : i32
    return %c0_i32, %c0_i32_0 : i32, i32
  }
  func.func @transform_2(%arg0: i32) -> (i32, i32) {
    %c0_i32 = arith.constant 0 : i32
    %c0_i32_0 = arith.constant 0 : i32
    %c0_i32_1 = arith.constant 0 : i32
    return %c0_i32, %c0_i32_0 : i32, i32
  }
  func.func @transform_3(%arg0: i32) -> i32 {
    %c0_i32 = arith.constant 0 : i32
    %c0_i32_0 = arith.constant 0 : i32
    return %c0_i32 : i32
  }
  func.func @transform_4(%arg0: i32) -> (i32, i32) {
    %c0_i32 = arith.constant 0 : i32
    %c0_i32_0 = arith.constant 0 : i32
    return %arg0, %c0_i32 : i32, i32
  }
  func.func @transform_5(%arg0: i32) -> (i32, i32, i32) {
    %c0_i32 = arith.constant 0 : i32
    %c0_i32_0 = arith.constant 0 : i32
    %c0_i32_1 = arith.constant 0 : i32
    return %arg0, %c0_i32, %c0_i32_0 : i32, i32, i32
  }
  func.func @transform_6(%arg0: i32) -> (i32, i32, i32) {
    %c0_i32 = arith.constant 0 : i32
    %c0_i32_0 = arith.constant 0 : i32
    %c0_i32_1 = arith.constant 0 : i32
    return %arg0, %c0_i32, %c0_i32_0 : i32, i32, i32
  }
}

module attributes {stable_mosaic.version = 11 : i64} {
  func.func @_gemm_kernel(%arg0: i32, %arg1: memref<512x16xbf16, #tpu.memory_space<vmem>>, %arg2: memref<16x128xbf16, #tpu.memory_space<vmem>>, %arg3: memref<1x128xf32, #tpu.memory_space<vmem>>, %arg4: memref<1xf32, #tpu.memory_space<smem>>, %arg5: memref<512x128xbf16, #tpu.memory_space<vmem>>) attributes {dimension_semantics = [#tpu.dimension_semantics<parallel>], iteration_bounds = array<i64: 2>, scalar_prefetch = 0 : i64, scratch_operands = 0 : i64, tpu.core_type = #tpu.core_type<tc>, window_params = [{transform_indices = @transform_0, window_bounds = array<i64: 512, 16>}, {pipeline_mode = #tpu.pipeline_mode<synchronous>, transform_indices = @transform_1, window_bounds = array<i64: 16, 128>}, {pipeline_mode = #tpu.pipeline_mode<synchronous>, transform_indices = @transform_2, window_bounds = array<i64: 1, 128>}, {transform_indices = @transform_3, window_bounds = array<i64: 1>}, {transform_indices = @transform_4, window_bounds = array<i64: 512, 128>}]} {
    %c0 = arith.constant 0 : index
    %c0_0 = arith.constant 0 : index
    %0 = vector.load %arg1[%c0, %c0_0] : memref<512x16xbf16, #tpu.memory_space<vmem>>, vector<512x16xbf16>
    %c0_1 = arith.constant 0 : index
    %c0_2 = arith.constant 0 : index
    %1 = vector.load %arg2[%c0_1, %c0_2] : memref<16x128xbf16, #tpu.memory_space<vmem>>, vector<16x128xbf16>
    %cst = arith.constant dense<0.000000e+00> : vector<512x128xf32>
    %2 = tpu.matmul %0, %1, %cst {dimension_numbers = #tpu.dot_dimension_numbers<[1], [0], [0], [1], [0, 0, 1, 1], [], []>} : vector<512x16xbf16>, vector<16x128xbf16>, vector<512x128xf32> -> vector<512x128xf32>
    %c0_3 = arith.constant 0 : index
    %c0_4 = arith.constant 0 : index
    %3 = vector.load %arg3[%c0_3, %c0_4] : memref<1x128xf32, #tpu.memory_space<vmem>>, vector<1x128xf32>
    %4 = vector.broadcast %3 : vector<1x128xf32> to vector<512x128xf32>
    %5 = arith.addf %2, %4 : vector<512x128xf32>
    %6 = arith.truncf %5 : vector<512x128xf32> to vector<512x128xbf16>
    %c0_5 = arith.constant 0 : index
    %c0_6 = arith.constant 0 : index
    %7 = vector.load %arg5[%c0_5, %c0_6] : memref<512x128xbf16, #tpu.memory_space<vmem>>, vector<512x128xbf16>
    tpu.vector_store %arg5[%c0_5, %c0_6], %6 {strides = array<i32>} : memref<512x128xbf16, #tpu.memory_space<vmem>>, vector<512x128xbf16>,
    return
  }
  func.func @transform_0(%arg0: i32) -> (i32, i32) {
    %c0_i32 = arith.constant 0 : i32
    %c0_i32_0 = arith.constant 0 : i32
    return %arg0, %c0_i32 : i32, i32
  }
  func.func @transform_1(%arg0: i32) -> (i32, i32) {
    %c0_i32 = arith.constant 0 : i32
    %c0_i32_0 = arith.constant 0 : i32
    %c0_i32_1 = arith.constant 0 : i32
    return %c0_i32, %c0_i32_0 : i32, i32
  }
  func.func @transform_2(%arg0: i32) -> (i32, i32) {
    %c0_i32 = arith.constant 0 : i32
    %c0_i32_0 = arith.constant 0 : i32
    %c0_i32_1 = arith.constant 0 : i32
    return %c0_i32, %c0_i32_0 : i32, i32
  }
  func.func @transform_3(%arg0: i32) -> i32 {
    %c0_i32 = arith.constant 0 : i32
    %c0_i32_0 = arith.constant 0 : i32
    return %c0_i32 : i32
  }
  func.func @transform_4(%arg0: i32) -> (i32, i32) {
    %c0_i32 = arith.constant 0 : i32
    %c0_i32_0 = arith.constant 0 : i32
    return %arg0, %c0_i32 : i32, i32
  }
}

module attributes {stable_mosaic.version = 11 : i64} {
  func.func @_gemm_kernel(%arg0: i32, %arg1: memref<2048x48xbf16, #tpu.memory_space<vmem>>, %arg2: memref<48x4xbf16, #tpu.memory_space<vmem>>, %arg3: memref<1x4xf32, #tpu.memory_space<vmem>>, %arg4: memref<1xf32, #tpu.memory_space<smem>>, %arg5: memref<2048x4xbf16, #tpu.memory_space<vmem>>, %arg6: memref<1x1x4xf32, #tpu.memory_space<vmem>>, %arg7: memref<1x1x4xf32, #tpu.memory_space<vmem>>) attributes {dimension_semantics = [#tpu.dimension_semantics<parallel>], iteration_bounds = array<i64: 4>, scalar_prefetch = 0 : i64, scratch_operands = 0 : i64, tpu.core_type = #tpu.core_type<tc>, window_params = [{transform_indices = @transform_0, window_bounds = array<i64: 2048, 48>}, {pipeline_mode = #tpu.pipeline_mode<synchronous>, transform_indices = @transform_1, window_bounds = array<i64: 48, 4>}, {pipeline_mode = #tpu.pipeline_mode<synchronous>, transform_indices = @transform_2, window_bounds = array<i64: 1, 4>}, {transform_indices = @transform_3, window_bounds = array<i64: 1>}, {transform_indices = @transform_4, window_bounds = array<i64: 2048, 4>}, {transform_indices = @transform_5, window_bounds = array<i64: 1, 1, 4>}, {transform_indices = @transform_6, window_bounds = array<i64: 1, 1, 4>}]} {
    %c0 = arith.constant 0 : index
    %c0_0 = arith.constant 0 : index
    %0 = vector.load %arg1[%c0, %c0_0] : memref<2048x48xbf16, #tpu.memory_space<vmem>>, vector<2048x48xbf16>
    %c0_1 = arith.constant 0 : index
    %c0_2 = arith.constant 0 : index
    %1 = vector.load %arg2[%c0_1, %c0_2] : memref<48x4xbf16, #tpu.memory_space<vmem>>, vector<48x4xbf16>
    %cst = arith.constant dense<0.000000e+00> : vector<2048x4xf32>
    %2 = tpu.matmul %0, %1, %cst {dimension_numbers = #tpu.dot_dimension_numbers<[1], [0], [0], [1], [0, 0, 1, 1], [], []>} : vector<2048x48xbf16>, vector<48x4xbf16>, vector<2048x4xf32> -> vector<2048x4xf32>
    %c0_3 = arith.constant 0 : index
    %c0_4 = arith.constant 0 : index
    %3 = vector.load %arg3[%c0_3, %c0_4] : memref<1x4xf32, #tpu.memory_space<vmem>>, vector<1x4xf32>
    %4 = vector.broadcast %3 : vector<1x4xf32> to vector<2048x4xf32>
    %5 = arith.addf %2, %4 : vector<2048x4xf32>
    %c0_5 = arith.constant 0 : index
    %6 = memref.load %arg4[%c0_5] : memref<1xf32, #tpu.memory_space<smem>>
    %cst_6 = arith.constant 0.000000e+00 : f32
    %7 = vector.broadcast %cst_6 : f32 to vector<2048x4xf32>
    %8 = arith.cmpf ogt, %5, %7 : vector<2048x4xf32>
    %9 = vector.broadcast %6 : f32 to vector<2048x4xf32>
    %10 = arith.mulf %9, %5 : vector<2048x4xf32>
    %11 = arith.select %8, %5, %10 : vector<2048x4xi1>, vector<2048x4xf32>
    %12 = arith.truncf %11 : vector<2048x4xf32> to vector<2048x4xbf16>
    %c0_7 = arith.constant 0 : index
    %c0_8 = arith.constant 0 : index
    %13 = vector.load %arg5[%c0_7, %c0_8] : memref<2048x4xbf16, #tpu.memory_space<vmem>>, vector<2048x4xbf16>
    tpu.vector_store %arg5[%c0_7, %c0_8], %12 {strides = array<i32>} : memref<2048x4xbf16, #tpu.memory_space<vmem>>, vector<2048x4xbf16>,
    %cst_9 = arith.constant dense<0.000000e+00> : vector<4xf32>
    %14 = vector.multi_reduction <add>, %11, %cst_9 [0] : vector<2048x4xf32> to vector<4xf32>
    %15 = vector.shape_cast %14 : vector<4xf32> to vector<1x4xf32>
    %16 = arith.mulf %11, %11 : vector<2048x4xf32>
    %cst_10 = arith.constant dense<0.000000e+00> : vector<4xf32>
    %17 = vector.multi_reduction <add>, %16, %cst_10 [0] : vector<2048x4xf32> to vector<4xf32>
    %18 = vector.shape_cast %17 : vector<4xf32> to vector<1x4xf32>
    %19 = vector.shape_cast %15 : vector<1x4xf32> to vector<1x1x4xf32>
    %c0_11 = arith.constant 0 : index
    %c0_12 = arith.constant 0 : index
    %c0_13 = arith.constant 0 : index
    %20 = vector.load %arg6[%c0_11, %c0_12, %c0_13] : memref<1x1x4xf32, #tpu.memory_space<vmem>>, vector<1x1x4xf32>
    tpu.vector_store %arg6[%c0_11, %c0_12, %c0_13], %19 {strides = array<i32>} : memref<1x1x4xf32, #tpu.memory_space<vmem>>, vector<1x1x4xf32>,
    %21 = vector.shape_cast %18 : vector<1x4xf32> to vector<1x1x4xf32>
    %c0_14 = arith.constant 0 : index
    %c0_15 = arith.constant 0 : index
    %c0_16 = arith.constant 0 : index
    %22 = vector.load %arg7[%c0_14, %c0_15, %c0_16] : memref<1x1x4xf32, #tpu.memory_space<vmem>>, vector<1x1x4xf32>
    tpu.vector_store %arg7[%c0_14, %c0_15, %c0_16], %21 {strides = array<i32>} : memref<1x1x4xf32, #tpu.memory_space<vmem>>, vector<1x1x4xf32>,
    return
  }
  func.func @transform_0(%arg0: i32) -> (i32, i32) {
    %c0_i32 = arith.constant 0 : i32
    %c0_i32_0 = arith.constant 0 : i32
    return %arg0, %c0_i32 : i32, i32
  }
  func.func @transform_1(%arg0: i32) -> (i32, i32) {
    %c0_i32 = arith.constant 0 : i32
    %c0_i32_0 = arith.constant 0 : i32
    %c0_i32_1 = arith.constant 0 : i32
    return %c0_i32, %c0_i32_0 : i32, i32
  }
  func.func @transform_2(%arg0: i32) -> (i32, i32) {
    %c0_i32 = arith.constant 0 : i32
    %c0_i32_0 = arith.constant 0 : i32
    %c0_i32_1 = arith.constant 0 : i32
    return %c0_i32, %c0_i32_0 : i32, i32
  }
  func.func @transform_3(%arg0: i32) -> i32 {
    %c0_i32 = arith.constant 0 : i32
    %c0_i32_0 = arith.constant 0 : i32
    return %c0_i32 : i32
  }
  func.func @transform_4(%arg0: i32) -> (i32, i32) {
    %c0_i32 = arith.constant 0 : i32
    %c0_i32_0 = arith.constant 0 : i32
    return %arg0, %c0_i32 : i32, i32
  }
  func.func @transform_5(%arg0: i32) -> (i32, i32, i32) {
    %c0_i32 = arith.constant 0 : i32
    %c0_i32_0 = arith.constant 0 : i32
    %c0_i32_1 = arith.constant 0 : i32
    return %arg0, %c0_i32, %c0_i32_0 : i32, i32, i32
  }
  func.func @transform_6(%arg0: i32) -> (i32, i32, i32) {
    %c0_i32 = arith.constant 0 : i32
    %c0_i32_0 = arith.constant 0 : i32
    %c0_i32_1 = arith.constant 0 : i32
    return %arg0, %c0_i32, %c0_i32_0 : i32, i32, i32
  }
}

module attributes {stable_mosaic.version = 11 : i64} {
  func.func @_gemm_kernel(%arg0: i32, %arg1: memref<2048x16xbf16, #tpu.memory_space<vmem>>, %arg2: memref<16x2xbf16, #tpu.memory_space<vmem>>, %arg3: memref<1x2xf32, #tpu.memory_space<vmem>>, %arg4: memref<1xf32, #tpu.memory_space<smem>>, %arg5: memref<2048x2xf32, #tpu.memory_space<vmem>>) attributes {dimension_semantics = [#tpu.dimension_semantics<parallel>], iteration_bounds = array<i64: 4>, scalar_prefetch = 0 : i64, scratch_operands = 0 : i64, tpu.core_type = #tpu.core_type<tc>, window_params = [{transform_indices = @transform_0, window_bounds = array<i64: 2048, 16>}, {pipeline_mode = #tpu.pipeline_mode<synchronous>, transform_indices = @transform_1, window_bounds = array<i64: 16, 2>}, {pipeline_mode = #tpu.pipeline_mode<synchronous>, transform_indices = @transform_2, window_bounds = array<i64: 1, 2>}, {transform_indices = @transform_3, window_bounds = array<i64: 1>}, {transform_indices = @transform_4, window_bounds = array<i64: 2048, 2>}]} {
    %c0 = arith.constant 0 : index
    %c0_0 = arith.constant 0 : index
    %0 = vector.load %arg1[%c0, %c0_0] : memref<2048x16xbf16, #tpu.memory_space<vmem>>, vector<2048x16xbf16>
    %c0_1 = arith.constant 0 : index
    %c0_2 = arith.constant 0 : index
    %1 = vector.load %arg2[%c0_1, %c0_2] : memref<16x2xbf16, #tpu.memory_space<vmem>>, vector<16x2xbf16>
    %cst = arith.constant dense<0.000000e+00> : vector<2048x2xf32>
    %2 = tpu.matmul %0, %1, %cst {dimension_numbers = #tpu.dot_dimension_numbers<[1], [0], [0], [1], [0, 0, 1, 1], [], []>} : vector<2048x16xbf16>, vector<16x2xbf16>, vector<2048x2xf32> -> vector<2048x2xf32>
    %c0_3 = arith.constant 0 : index
    %c0_4 = arith.constant 0 : index
    %3 = vector.load %arg3[%c0_3, %c0_4] : memref<1x2xf32, #tpu.memory_space<vmem>>, vector<1x2xf32>
    %4 = vector.broadcast %3 : vector<1x2xf32> to vector<2048x2xf32>
    %5 = arith.addf %2, %4 : vector<2048x2xf32>
    %c0_5 = arith.constant 0 : index
    %c0_6 = arith.constant 0 : index
    %6 = vector.load %arg5[%c0_5, %c0_6] : memref<2048x2xf32, #tpu.memory_space<vmem>>, vector<2048x2xf32>
    tpu.vector_store %arg5[%c0_5, %c0_6], %5 {strides = array<i32>} : memref<2048x2xf32, #tpu.memory_space<vmem>>, vector<2048x2xf32>,
    return
  }
  func.func @transform_0(%arg0: i32) -> (i32, i32) {
    %c0_i32 = arith.constant 0 : i32
    %c0_i32_0 = arith.constant 0 : i32
    return %arg0, %c0_i32 : i32, i32
  }
  func.func @transform_1(%arg0: i32) -> (i32, i32) {
    %c0_i32 = arith.constant 0 : i32
    %c0_i32_0 = arith.constant 0 : i32
    %c0_i32_1 = arith.constant 0 : i32
    return %c0_i32, %c0_i32_0 : i32, i32
  }
  func.func @transform_2(%arg0: i32) -> (i32, i32) {
    %c0_i32 = arith.constant 0 : i32
    %c0_i32_0 = arith.constant 0 : i32
    %c0_i32_1 = arith.constant 0 : i32
    return %c0_i32, %c0_i32_0 : i32, i32
  }
  func.func @transform_3(%arg0: i32) -> i32 {
    %c0_i32 = arith.constant 0 : i32
    %c0_i32_0 = arith.constant 0 : i32
    return %c0_i32 : i32
  }
  func.func @transform_4(%arg0: i32) -> (i32, i32) {
    %c0_i32 = arith.constant 0 : i32
    %c0_i32_0 = arith.constant 0 : i32
    return %arg0, %c0_i32 : i32, i32
  }
}

</mosaic_0001>

<bundles_post_ra>
// kernel: unet3d_forward.9
= control target key start
LH: loop header
LB: loop body
LE: loop exit
PB: predicated region body
PF: predicated region fallthrough
CT: control target
= control target key end

     0   :  { %s1624_s21 = smov 0   ;;  %s2456_s0 = inlined_call_operand.vmem [shape: bf16[1024,32], index: 0, kind: input, shape index: {}]   ;;  %s2457_s1 = inlined_call_operand.vmem [shape: bf16[32,4], index: 1, kind: input, shape index: {}]   ;;  %s2458_s2 = inlined_call_operand.vmem [shape: f32[1,4], index: 2, kind: input, shape index: {}]   ;;  %s2459_s3 = inlined_call_operand.<no memory space> [shape: f32[1], index: 3, kind: input, shape index: {}]   ;;  %s2460_s4 = inlined_call_operand.vmem [shape: bf16[1024,4], index: 4, kind: output, shape index: {0}]   ;;  %s2461_s5 = inlined_call_operand.vmem [shape: f32[2,1,4], index: 5, kind: output, shape index: {1}]   ;;  %s2462_s6 = inlined_call_operand.vmem [shape: f32[2,1,4], index: 6, kind: output, shape index: {2}]  }
   0x1 LB: > { %s1630_s3 = sadd.s32 4294967295, %s1587_s21   ;;  %p1357_p0 = scmp.ge.s32.totalorder %s1587_s21, 1  ;;  %s1587_s21 = sphi %s1624_s21, %s18_s21  }
   0x2   : > { %p219_p1 = scmp.lt.s32.totalorder %s1587_s21, 3 }
   0x4   : > { %p220_p2 = pnand %p1357_p0, %p219_p1 }
   0x5   : > { %s1358_s24 = sshll.u32 (!%p220_p2), %s1630_s3, 6  ;;  %p267_p4 = scmp.lt.s32.totalorder (!%p220_p2), %s1630_s3, 1 }
   0x6   : > { %223 = sbr.rel (%p220_p2) target bundleno = 381 (0x17d), region = 36  ;;  %p256_p3 = scmp.lt.s32.totalorder (!%p220_p2), %s1358_s24, 127 }
   0xb   : > { %v1565_v0 = vld [vmem:[%s2457_s1 + $0x8] sm:$0xff]  ;;  %v1564_v1 = vld [vmem:[%s2457_s1] sm:$0xff]  ;;  %s2464_s24 = smov (!%p256_p3, %s1358_s24), 127  ;;  %vm518_vm0 = vcmask 261120   ;;  %vm848_vm1 = vcmask 27648   ;;  %vm913_vm2 = vcmask 31744  }
   0xc   : > { %621 = vmatpush.bf16.msra.mxu0 %v1565_v0  ;;  %1566 = vmatpush.bf16.msra.mxu1 %v1565_v0  ;;  %s1359_s27 = sshll.u32 %s2464_s24, 2  ;;  %v1710_v30 = vld [vmem:[%s2458_s2] ss:$0 sm:$0xff]  ;;  %s2466_s3 = smov (!%p267_p4, %s1630_s3), 1  ;;  %vm1244_vm3 = vcmask 24576  }
   0xd   : > { %1567 = vmatpush.bf16.msra.mxu2 %v1565_v0  ;;  %1568 = vmatpush.bf16.msra.mxu3 %v1565_v0  ;;  %s1649_s30 = scalar_lea.vmem %s2456_s0, %s1359_s27  ;;  %s1721_s11 = scalar_lea.vmem %s2460_s4, %s1359_s27 }
   0xe   : > { %v1532_v2 = vld [vmem:[%s1649_s30] sm:$0xff]  ;;  %v1533_v4 = vld [vmem:[%s1649_s30 + $0x8] sm:$0xff]  ;;  %v1534_v7 = vld [vmem:[%s1649_s30 + $0x10] sm:$0xff]  ;;  %s269_s14 = scalar_lea.vmem %s2461_s5, %s2466_s3  ;;  %s272_s17 = scalar_lea.vmem %s2462_s6, %s2466_s3 }
   0xf   : > { %v1540_v3 = vld [vmem:[%s1649_s30 + $0x40] sm:$0xff]  ;;  %v1541_v5 = vld [vmem:[%s1649_s30 + $0x48] sm:$0xff]  ;;  %v1542_v8 = vld [vmem:[%s1649_s30 + $0x50] sm:$0xff] }
  0x10   : > { %622 = vmatpush.bf16.msra.mxu0 %v1564_v1  ;;  %1569 = vmatpush.bf16.msra.mxu1 %v1564_v1  ;;  %v1548_v6 = vld [vmem:[%s1649_s30 + $0x80] sm:$0xff]  ;;  %v1549_v9 = vld [vmem:[%s1649_s30 + $0x88] sm:$0xff]  ;;  %v1535_v10 = vld [vmem:[%s1649_s30 + $0x18] sm:$0xff] }
  0x11   : > { %1570 = vmatpush.bf16.msra.mxu2 %v1564_v1  ;;  %1571 = vmatpush.bf16.msra.mxu3 %v1564_v1  ;;  %v1543_v11 = vld [vmem:[%s1649_s30 + $0x58] sm:$0xff]  ;;  %v1550_v12 = vld [vmem:[%s1649_s30 + $0x90] sm:$0xff]  ;;  %v1556_v13 = vld [vmem:[%s1649_s30 + $0xc0] sm:$0xff] }
  0x12   : > { %v1536_v14 = vld [vmem:[%s1649_s30 + $0x20] sm:$0xff]  ;;  %v1551_v16 = vld [vmem:[%s1649_s30 + $0x98] sm:$0xff]  ;;  %v1557_v17 = vld [vmem:[%s1649_s30 + $0xc8] sm:$0xff] }
  0x13   : > { %1498 = vmatmul.msk.bf16.vlgmr.msra.gmra.mxu0 %vm518_vm0, %v1532_v2  ;;  %1506 = vmatmul.msk.bf16.vlgmr.msra.gmra.mxu1 %vm518_vm0, %v1540_v3  ;;  %v1544_v15 = vld [vmem:[%s1649_s30 + $0x60] sm:$0xff]  ;;  %v1537_v18 = vld [vmem:[%s1649_s30 + $0x28] sm:$0xff]  ;;  %v1558_v21 = vld [vmem:[%s1649_s30 + $0xd0] sm:$0xff] }
  0x14   : > { %1514 = vmatmul.msk.bf16.vlgmr.msra.gmra.mxu2 %vm518_vm0, %v1548_v6  ;;  %1522 = vmatmul.msk.bf16.vlgmr.msra.gmra.mxu3 %vm518_vm0, %v1556_v13  ;;  %v1545_v19 = vld [vmem:[%s1649_s30 + $0x68] sm:$0xff]  ;;  %v1552_v20 = vld [vmem:[%s1649_s30 + $0xa0] sm:$0xff]  ;;  %v1538_v22 = vld [vmem:[%s1649_s30 + $0x30] sm:$0xff] }
  0x15   : > { %v1546_v23 = vld [vmem:[%s1649_s30 + $0x70] sm:$0xff]  ;;  %v1553_v24 = vld [vmem:[%s1649_s30 + $0xa8] sm:$0xff]  ;;  %v1559_v25 = vld [vmem:[%s1649_s30 + $0xd8] sm:$0xff] }
  0x16   : > { %v1539_v26 = vld [vmem:[%s1649_s30 + $0x38] sm:$0xff]  ;;  %v1554_v28 = vld [vmem:[%s1649_s30 + $0xb0] sm:$0xff]  ;;  %v1560_v29 = vld [vmem:[%s1649_s30 + $0xe0] sm:$0xff] }
  0x17   : > { %v1547_v27 = vld [vmem:[%s1649_s30 + $0x78] sm:$0xff]  ;;  %v1561_v38 = vld [vmem:[%s1649_s30 + $0xe8] sm:$0xff]  ;;  %v1562_v61 = vld [vmem:[%s1649_s30 + $0xf0] sm:$0xff] }
  0x18   : > { %v1555_v37 = vld [vmem:[%s1649_s30 + $0xb8] sm:$0xff] }
  0x23   : > { %1499 = vmatmul.msk.bf16.gmra.mxu0 %vm518_vm0, %v1533_v4  ;;  %1507 = vmatmul.msk.bf16.gmra.mxu1 %vm518_vm0, %v1541_v5 }
  0x24   : > { %1515 = vmatmul.msk.bf16.gmra.mxu2 %vm518_vm0, %v1549_v9  ;;  %1523 = vmatmul.msk.bf16.gmra.mxu3 %vm518_vm0, %v1557_v17 }
  0x33   : > { %1500 = vmatmul.msk.bf16.gmra.mxu0 %vm518_vm0, %v1534_v7  ;;  %1508 = vmatmul.msk.bf16.gmra.mxu1 %vm518_vm0, %v1542_v8 }
  0x34   : > { %1516 = vmatmul.msk.bf16.gmra.mxu2 %vm518_vm0, %v1550_v12  ;;  %1524 = vmatmul.msk.bf16.gmra.mxu3 %vm518_vm0, %v1558_v21 }
  0x43   : > { %1501 = vmatmul.msk.bf16.gmra.mxu0 %vm518_vm0, %v1535_v10  ;;  %1509 = vmatmul.msk.bf16.gmra.mxu1 %vm518_vm0, %v1543_v11 }
  0x44   : > { %1517 = vmatmul.msk.bf16.gmra.mxu2 %vm518_vm0, %v1551_v16  ;;  %1525 = vmatmul.msk.bf16.gmra.mxu3 %vm518_vm0, %v1559_v25  ;;  %v1563_v25 = vld [vmem:[%s1649_s30 + $0xf8] sm:$0xff] }
  0x53   : > { %1502 = vmatmul.msk.bf16.gmra.mxu0 %vm518_vm0, %v1536_v14  ;;  %1510 = vmatmul.msk.bf16.gmra.mxu1 %vm518_vm0, %v1544_v15 }
  0x54   : > { %1518 = vmatmul.msk.bf16.gmra.mxu2 %vm518_vm0, %v1552_v20  ;;  %1526 = vmatmul.msk.bf16.gmra.mxu3 %vm518_vm0, %v1560_v29 }
  0x63   : > { %1503 = vmatmul.msk.bf16.gmra.mxu0 %vm518_vm0, %v1537_v18  ;;  %1511 = vmatmul.msk.bf16.gmra.mxu1 %vm518_vm0, %v1545_v19 }
  0x64   : > { %1519 = vmatmul.msk.bf16.gmra.mxu2 %vm518_vm0, %v1553_v24  ;;  %1527 = vmatmul.msk.bf16.gmra.mxu3 %vm518_vm0, %v1561_v38 }
  0x73   : > { %1504 = vmatmul.msk.bf16.gmra.mxu0 %vm518_vm0, %v1538_v22  ;;  %1512 = vmatmul.msk.bf16.gmra.mxu1 %vm518_vm0, %v1546_v23 }
  0x74   : > { %1520 = vmatmul.msk.bf16.gmra.mxu2 %vm518_vm0, %v1554_v28  ;;  %1528 = vmatmul.msk.bf16.gmra.mxu3 %vm518_vm0, %v1562_v61 }
  0x83   : > { %1505 = vmatmul.msk.bf16.gmra.mxu0 %vm518_vm0, %v1539_v26  ;;  %1513 = vmatmul.msk.bf16.gmra.mxu1 %vm518_vm0, %v1547_v27 }
  0x84   : > { %1521 = vmatmul.msk.bf16.gmra.mxu2 %vm518_vm0, %v1555_v37  ;;  %1529 = vmatmul.msk.bf16.gmra.mxu3 %vm518_vm0, %v1563_v25 }
  0x90   : > { %v624_v31 = vpop.f32.mrf.mxu0  ;;  %v664_v32 = vpop.f32.mrf.mxu1 }
  0x91   : > { %v625_v33 = vadd.f32 %v1710_v30, %v624_v31  ;;  %v1714_v34 = vadd.f32 %v1710_v30, %v664_v32 }
  0x93   : > { %v784_v35 = vpack.c.bf16 %v625_v33, %v625_v33  ;;  %v800_v36 = vpack.c.bf16 %v1714_v34, %v1714_v34  ;;  %v1047_v41 = vmul.f32 %v625_v33, %v625_v33  ;;  %v914_v44 = vsel %vm913_vm2, %v625_v33, 0.0 }
  0x95   : > { %849 = vst.msk [vmem:[%s1721_s11] sm:$0xf] %vm848_vm1, %v784_v35  ;;  %v1111_v50 = vsel %vm913_vm2, %v1047_v41, 0.0 }
  0x96   : > { %865 = vst.msk [vmem:[%s1721_s11 + $0x40] sm:$0xf] %vm848_vm1, %v800_v36 }
  0x97   : > { %v704_v5 = vpop.f32.mrf.mxu2 }
  0x98   : > { %v626_v39 = vpop.f32.mrf.mxu0  ;;  %v666_v40 = vpop.f32.mrf.mxu1  ;;  %v1774_v13 = vadd.f32 %v1710_v30, %v704_v5 }
  0x99   : > { %v627_v42 = vadd.f32 %v1710_v30, %v626_v39  ;;  %v1735_v43 = vadd.f32 %v1710_v30, %v666_v40 }
  0x9a   : > { %v816_v16 = vpack.c.bf16 %v1774_v13, %v1774_v13 }
  0x9b   : > { %v785_v45 = vpack.c.bf16 %v627_v42, %v627_v42  ;;  %v915_v46 = vsel %vm913_vm2, %v627_v42, 0.0  ;;  %v1048_v47 = vmul.f32 %v627_v42, %v627_v42  ;;  %v801_v48 = vpack.c.bf16 %v1735_v43, %v1735_v43 }
  0x9c   : > { %v916_v49 = vadd.f32 %v915_v46, %v914_v44  ;;  %881 = vst.msk [vmem:[%s1721_s11 + $0x80] sm:$0xf] %vm848_vm1, %v816_v16 }
  0x9d   : > { %850 = vst.msk [vmem:[%s1721_s11 + $0x4] sm:$0xf] %vm848_vm1, %v785_v45  ;;  %v1112_v51 = vsel %vm913_vm2, %v1048_v47, 0.0 }
  0x9e   : > { %v1113_v52 = vadd.f32 %v1112_v51, %v1111_v50  ;;  %866 = vst.msk [vmem:[%s1721_s11 + $0x44] sm:$0xf] %vm848_vm1, %v801_v48 }
  0x9f   : > { %v706_v19 = vpop.f32.mrf.mxu2 }
  0xa0   : > { %v629_v53 = vpop.f32.mrf.mxu0  ;;  %v669_v54 = vpop.f32.mrf.mxu1  ;;  %v1785_v20 = vadd.f32 %v1710_v30, %v706_v19 }
  0xa1   : > { %v630_v55 = vadd.f32 %v1710_v30, %v629_v53  ;;  %v1749_v56 = vadd.f32 %v1710_v30, %v669_v54 }
  0xa2   : > { %v817_v27 = vpack.c.bf16 %v1785_v20, %v1785_v20 }
  0xa3   : > { %v786_v57 = vpack.c.bf16 %v630_v55, %v630_v55  ;;  %v917_v58 = vsel %vm913_vm2, %v630_v55, 0.0  ;;  %v1049_v59 = vmul.f32 %v630_v55, %v630_v55  ;;  %v802_v60 = vpack.c.bf16 %v1749_v56, %v1749_v56 }
  0xa4   : > { %v918_v62 = vadd.f32 %v917_v58, %v916_v49  ;;  %882 = vst.msk [vmem:[%s1721_s11 + $0x84] sm:$0xf] %vm848_vm1, %v817_v27 }
  0xa5   : > { %851 = vst.msk [vmem:[%s1721_s11 + $0x8] sm:$0xf] %vm848_vm1, %v786_v57  ;;  %v1114_v63 = vsel %vm913_vm2, %v1049_v59, 0.0  ;;  %v744_v57 = vpop.f32.mrf.mxu3 }
  0xa6   : > { %v1115_v0 = vadd.f32 %v1114_v63, %v1113_v52  ;;  %867 = vst.msk [vmem:[%s1721_s11 + $0x48] sm:$0xf] %vm848_vm1, %v802_v60  ;;  %v1865_v61 = vadd.f32 %v1710_v30, %v744_v57 }
  0xa7   : > { %v709_v36 = vpop.f32.mrf.mxu2 }
  0xa8   : > { %v631_v1 = vpop.f32.mrf.mxu0  ;;  %v671_v2 = vpop.f32.mrf.mxu1  ;;  %v1820_v39 = vadd.f32 %v1710_v30, %v709_v36 }
  0xa9   : > { %v632_v3 = vadd.f32 %v1710_v30, %v631_v1  ;;  %v1763_v4 = vadd.f32 %v1710_v30, %v671_v2  ;;  %v832_v1 = vpack.c.bf16 %v1865_v61, %v1865_v61 }
  0xaa   : > { %v818_v42 = vpack.c.bf16 %v1820_v39, %v1820_v39 }
  0xab   : > { %v787_v6 = vpack.c.bf16 %v632_v3, %v632_v3  ;;  %v919_v7 = vsel %vm913_vm2, %v632_v3, 0.0  ;;  %v1050_v8 = vmul.f32 %v632_v3, %v632_v3  ;;  %v803_v9 = vpack.c.bf16 %v1763_v4, %v1763_v4  ;;  %897 = vst.msk [vmem:[%s1721_s11 + $0xc0] sm:$0xf] %vm848_vm1, %v832_v1 }
  0xac   : > { %v920_v10 = vadd.f32 %v919_v7, %v918_v62  ;;  %883 = vst.msk [vmem:[%s1721_s11 + $0x88] sm:$0xf] %vm848_vm1, %v818_v42 }
  0xad   : > { %852 = vst.msk [vmem:[%s1721_s11 + $0xc] sm:$0xf] %vm848_vm1, %v787_v6  ;;  %v1116_v11 = vsel %vm913_vm2, %v1050_v8, 0.0  ;;  %v746_v6 = vpop.f32.mrf.mxu3 }
  0xae   : > { %v1117_v12 = vadd.f32 %v1116_v11, %v1115_v0  ;;  %868 = vst.msk [vmem:[%s1721_s11 + $0x4c] sm:$0xf] %vm848_vm1, %v803_v9  ;;  %v1883_v8 = vadd.f32 %v1710_v30, %v746_v6 }
  0xaf   : > { %v711_v46 = vpop.f32.mrf.mxu2 }
  0xb0   : > { %v634_v14 = vpop.f32.mrf.mxu0  ;;  %v674_v15 = vpop.f32.mrf.mxu1  ;;  %v1833_v47 = vadd.f32 %v1710_v30, %v711_v46 }
  0xb1   : > { %v635_v17 = vadd.f32 %v1710_v30, %v634_v14  ;;  %v1780_v18 = vadd.f32 %v1710_v30, %v674_v15 }
  0xb2   : > { %v819_v50 = vpack.c.bf16 %v1833_v47, %v1833_v47 }
  0xb3   : > { %v788_v21 = vpack.c.bf16 %v635_v17, %v635_v17  ;;  %v921_v22 = vsel %vm913_vm2, %v635_v17, 0.0  ;;  %v1051_v23 = vmul.f32 %v635_v17, %v635_v17  ;;  %v804_v24 = vpack.c.bf16 %v1780_v18, %v1780_v18 }
  0xb4   : > { %v1791_v26 = vadd.f32 %v921_v22, %v920_v10  ;;  %884 = vst.msk [vmem:[%s1721_s11 + $0x8c] sm:$0xf] %vm848_vm1, %v819_v50 }
  0xb5   : > { %853 = vst.msk [vmem:[%s1721_s11 + $0x10] sm:$0xf] %vm848_vm1, %v788_v21  ;;  %v1118_v28 = vsel %vm913_vm2, %v1051_v23, 0.0  ;;  %v749_v21 = vpop.f32.mrf.mxu3 }
  0xb6   : > { %v1799_v29 = vadd.f32 %v1118_v28, %v1117_v12  ;;  %869 = vst.msk [vmem:[%s1721_s11 + $0x50] sm:$0xf] %vm848_vm1, %v804_v24  ;;  %v833_v12 = vpack.c.bf16 %v1883_v8, %v1883_v8  ;;  %v1921_v25 = vadd.f32 %v1710_v30, %v749_v21 }
  0xb7   : > { %v714_v55 = vpop.f32.mrf.mxu2 }
  0xb8   : > { %v636_v31 = vpop.f32.mrf.mxu0  ;;  %v676_v32 = vpop.f32.mrf.mxu1  ;;  %v1862_v60 = vadd.f32 %v1710_v30, %v714_v55  ;;  %898 = vst.msk [vmem:[%s1721_s11 + $0xc4] sm:$0xf] %vm848_vm1, %v833_v12 }
  0xb9   : > { %v1806_v33 = vadd.f32 %v1710_v30, %v636_v31  ;;  %v1809_v35 = vadd.f32 %v1710_v30, %v676_v32  ;;  %v834_v32 = vpack.c.bf16 %v1921_v25, %v1921_v25 }
  0xba   : > { %v820_v0 = vpack.c.bf16 %v1862_v60, %v1862_v60 }
  0xbb   : > { %v789_v37 = vpack.c.bf16 %v1806_v33, %v1806_v33  ;;  %v805_v38 = vpack.c.bf16 %v1809_v35, %v1809_v35  ;;  %899 = vst.msk [vmem:[%s1721_s11 + $0xc8] sm:$0xf] %vm848_vm1, %v834_v32 }
  0xbc   : > { %885 = vst.msk [vmem:[%s1721_s11 + $0x90] sm:$0xf] %vm848_vm1, %v820_v0  ;;  %v1052_v0 = vmul.f32 %v1806_v33, %v1806_v33 }
  0xbd   : > { %854 = vst.msk [vmem:[%s1721_s11 + $0x14] sm:$0xf] %vm848_vm1, %v789_v37 }
  0xbe   : > { %870 = vst.msk [vmem:[%s1721_s11 + $0x54] sm:$0xf] %vm848_vm1, %v805_v38 }
  0xbf   : > { %v716_v5 = vpop.f32.mrf.mxu2 }
  0xc0   : > { %v639_v40 = vpop.f32.mrf.mxu0  ;;  %v679_v41 = vpop.f32.mrf.mxu1  ;;  %v1880_v7 = vadd.f32 %v1710_v30, %v716_v5 }
  0xc1   : > { %v1825_v44 = vadd.f32 %v1710_v30, %v639_v40  ;;  %v1828_v45 = vadd.f32 %v1710_v30, %v679_v41  ;;  %v751_v40 = vpop.f32.mrf.mxu3 }
  0xc2   : > { %v821_v11 = vpack.c.bf16 %v1880_v7, %v1880_v7  ;;  %v1939_v42 = vadd.f32 %v1710_v30, %v751_v40 }
  0xc3   : > { %v790_v48 = vpack.c.bf16 %v1825_v44, %v1825_v44  ;;  %v806_v49 = vpack.c.bf16 %v1828_v45, %v1828_v45  ;;  %v925_v40 = vsel %vm913_vm2, %v1825_v44, 0.0 }
  0xc4   : > { %886 = vst.msk [vmem:[%s1721_s11 + $0x94] sm:$0xf] %vm848_vm1, %v821_v11  ;;  %v835_v50 = vpack.c.bf16 %v1939_v42, %v1939_v42 }
  0xc5   : > { %855 = vst.msk [vmem:[%s1721_s11 + $0x18] sm:$0xf] %vm848_vm1, %v790_v48 }
  0xc6   : > { %871 = vst.msk [vmem:[%s1721_s11 + $0x58] sm:$0xf] %vm848_vm1, %v806_v49 }
  0xc7   : > { %v719_v19 = vpop.f32.mrf.mxu2  ;;  %900 = vst.msk [vmem:[%s1721_s11 + $0xcc] sm:$0xf] %vm848_vm1, %v835_v50 }
  0xc8   : > { %v641_v51 = vpop.f32.mrf.mxu0  ;;  %v681_v52 = vpop.f32.mrf.mxu1  ;;  %v1918_v24 = vadd.f32 %v1710_v30, %v719_v19 }
  0xc9   : > { %v1848_v53 = vadd.f32 %v1710_v30, %v641_v51  ;;  %v1851_v54 = vadd.f32 %v1710_v30, %v681_v52 }
  0xca   : > { %v822_v31 = vpack.c.bf16 %v1918_v24, %v1918_v24 }
  0xcb   : > { %v791_v58 = vpack.c.bf16 %v1848_v53, %v1848_v53  ;;  %v807_v59 = vpack.c.bf16 %v1851_v54, %v1851_v54 }
  0xcc   : > { %887 = vst.msk [vmem:[%s1721_s11 + $0x98] sm:$0xf] %vm848_vm1, %v822_v31  ;;  %v1120_v31 = vsel %vm913_vm2, %v1052_v0, 0.0 }
  0xcd   : > { %856 = vst.msk [vmem:[%s1721_s11 + $0x1c] sm:$0xf] %vm848_vm1, %v791_v58 }
  0xce   : > { %872 = vst.msk [vmem:[%s1721_s11 + $0x5c] sm:$0xf] %vm848_vm1, %v807_v59  ;;  %v754_v59 = vpop.f32.mrf.mxu3 }
  0xcf   : > { %v721_v38 = vpop.f32.mrf.mxu2  ;;  %v1985_v11 = vadd.f32 %v1710_v30, %v754_v59 }
  0xd0   : > { %v644_v62 = vpop.f32.mrf.mxu0  ;;  %v684_v63 = vpop.f32.mrf.mxu1  ;;  %v1936_v41 = vadd.f32 %v1710_v30, %v721_v38  ;;  %v1054_v38 = vmul.f32 %v1848_v53, %v1848_v53 }
  0xd1   : > { %v1872_v2 = vadd.f32 %v1710_v30, %v644_v62  ;;  %v1875_v3 = vadd.f32 %v1710_v30, %v684_v63  ;;  %v836_v32 = vpack.c.bf16 %v1985_v11, %v1985_v11 }
  0xd2   : > { %v823_v49 = vpack.c.bf16 %v1936_v41, %v1936_v41 }
  0xd3   : > { %v792_v9 = vpack.c.bf16 %v1872_v2, %v1872_v2  ;;  %v808_v10 = vpack.c.bf16 %v1875_v3, %v1875_v3  ;;  %v1055_v50 = vmul.f32 %v1872_v2, %v1872_v2  ;;  %901 = vst.msk [vmem:[%s1721_s11 + $0xd0] sm:$0xf] %vm848_vm1, %v836_v32 }
  0xd4   : > { %888 = vst.msk [vmem:[%s1721_s11 + $0x9c] sm:$0xf] %vm848_vm1, %v823_v49  ;;  %v1121_v49 = vadd.f32 %v1120_v31, %v1799_v29 }
  0xd5   : > { %857 = vst.msk [vmem:[%s1721_s11 + $0x20] sm:$0xf] %vm848_vm1, %v792_v9 }
  0xd6   : > { %873 = vst.msk [vmem:[%s1721_s11 + $0x60] sm:$0xf] %vm848_vm1, %v808_v10 }
  0xd7   : > { %v724_v58 = vpop.f32.mrf.mxu2 }
  0xd8   : > { %v646_v14 = vpop.f32.mrf.mxu0  ;;  %v686_v15 = vpop.f32.mrf.mxu1  ;;  %v1982_v10 = vadd.f32 %v1710_v30, %v724_v58  ;;  %v927_v58 = vsel %vm913_vm2, %v1848_v53, 0.0  ;;  %v929_v53 = vsel %vm913_vm2, %v1872_v2, 0.0 }
  0xd9   : > { %v1904_v16 = vadd.f32 %v1710_v30, %v646_v14  ;;  %v1907_v17 = vadd.f32 %v1710_v30, %v686_v15  ;;  %v756_v14 = vpop.f32.mrf.mxu3  ;;  %v1053_v15 = vmul.f32 %v1825_v44, %v1825_v44 }
  0xdb   : > { %v793_v22 = vpack.c.bf16 %v1904_v16, %v1904_v16  ;;  %v809_v23 = vpack.c.bf16 %v1907_v17, %v1907_v17 }
  0xdd   : > { %858 = vst.msk [vmem:[%s1721_s11 + $0x24] sm:$0xf] %vm848_vm1, %v793_v22 }
  0xde   : > { %874 = vst.msk [vmem:[%s1721_s11 + $0x64] sm:$0xf] %vm848_vm1, %v809_v23  ;;  %v824_v23 = vpack.c.bf16 %v1982_v10, %v1982_v10 }
  0xdf   : > { %v726_v12 = vpop.f32.mrf.mxu2 }
  0xe0   : > { %v649_v27 = vpop.f32.mrf.mxu0  ;;  %v689_v28 = vpop.f32.mrf.mxu1  ;;  %v1994_v22 = vadd.f32 %v1710_v30, %v726_v12  ;;  %889 = vst.msk [vmem:[%s1721_s11 + $0xa0] sm:$0xf] %vm848_vm1, %v824_v23 }
  0xe1   : > { %v1928_v36 = vadd.f32 %v1710_v30, %v649_v27  ;;  %v1931_v37 = vadd.f32 %v1710_v30, %v689_v28  ;;  %v1999_v27 = vadd.f32 %v1710_v30, %v756_v14  ;;  %v923_v28 = vsel %vm913_vm2, %v1806_v33, 0.0 }
  0xe2   : > { %v825_v33 = vpack.c.bf16 %v1994_v22, %v1994_v22 }
  0xe3   : > { %v794_v46 = vpack.c.bf16 %v1928_v36, %v1928_v36  ;;  %v810_v48 = vpack.c.bf16 %v1931_v37, %v1931_v37  ;;  %v837_v44 = vpack.c.bf16 %v1999_v27, %v1999_v27 }
  0xe4   : > { %890 = vst.msk [vmem:[%s1721_s11 + $0xa4] sm:$0xf] %vm848_vm1, %v825_v33 }
  0xe5   : > { %859 = vst.msk [vmem:[%s1721_s11 + $0x28] sm:$0xf] %vm848_vm1, %v794_v46  ;;  %v1122_v46 = vsel %vm913_vm2, %v1053_v15, 0.0 }
  0xe6   : > { %875 = vst.msk [vmem:[%s1721_s11 + $0x68] sm:$0xf] %vm848_vm1, %v810_v48  ;;  %v924_v48 = vadd.f32 %v923_v28, %v1791_v26  ;;  %v1123_v0 = vadd.f32 %v1122_v46, %v1121_v49  ;;  %v931_v28 = vsel %vm913_vm2, %v1904_v16, 0.0 }
  0xe7   : > { %v729_v29 = vpop.f32.mrf.mxu2  ;;  %902 = vst.msk [vmem:[%s1721_s11 + $0xd4] sm:$0xf] %vm848_vm1, %v837_v44 }
  0xe8   : > { %v651_v51 = vpop.f32.mrf.mxu0  ;;  %v691_v52 = vpop.f32.mrf.mxu1  ;;  %v2068_v44 = vadd.f32 %v1710_v30, %v729_v29 }
  0xe9   : > { %v1960_v55 = vadd.f32 %v1710_v30, %v651_v51  ;;  %v1963_v57 = vadd.f32 %v1710_v30, %v691_v52 }
  0xeb   : > { %v795_v62 = vpack.c.bf16 %v1960_v55, %v1960_v55  ;;  %v811_v63 = vpack.c.bf16 %v1963_v57, %v1963_v57  ;;  %v1058_v31 = vmul.f32 %v1960_v55, %v1960_v55 }
  0xed   : > { %860 = vst.msk [vmem:[%s1721_s11 + $0x2c] sm:$0xf] %vm848_vm1, %v795_v62  ;;  %v759_v62 = vpop.f32.mrf.mxu3 }
  0xee   : > { %876 = vst.msk [vmem:[%s1721_s11 + $0x6c] sm:$0xf] %vm848_vm1, %v811_v63  ;;  %v926_v63 = vadd.f32 %v925_v40, %v924_v48  ;;  %v933_v40 = vsel %vm913_vm2, %v1928_v36, 0.0 }
  0xf0   : > { %v654_v1 = vpop.f32.mrf.mxu0  ;;  %v694_v5 = vpop.f32.mrf.mxu1  ;;  %v928_v15 = vadd.f32 %v927_v58, %v926_v63 }
  0xf1   : > { %v1976_v6 = vadd.f32 %v1710_v30, %v654_v1  ;;  %v1979_v9 = vadd.f32 %v1710_v30, %v694_v5  ;;  %v1124_v1 = vsel %vm913_vm2, %v1054_v38, 0.0  ;;  %v1056_v5 = vmul.f32 %v1904_v16, %v1904_v16  ;;  %v731_v58 = vpop.f32.mrf.mxu2 }
  0xf2   : > { %v1125_v23 = vadd.f32 %v1124_v1, %v1123_v0  ;;  %v930_v2 = vadd.f32 %v929_v53, %v928_v15  ;;  %v935_v16 = vsel %vm913_vm2, %v1960_v55, 0.0  ;;  %v1132_v1 = vsel %vm913_vm2, %v1058_v31, 0.0 }
  0xf3   : > { %v796_v19 = vpack.c.bf16 %v1976_v6, %v1976_v6  ;;  %v812_v21 = vpack.c.bf16 %v1979_v9, %v1979_v9  ;;  %v1128_v38 = vsel %vm913_vm2, %v1056_v5, 0.0  ;;  %v1059_v48 = vmul.f32 %v1976_v6, %v1976_v6 }
  0xf4   : > { %v932_v46 = vadd.f32 %v931_v28, %v930_v2  ;;  %v937_v53 = vsel %vm913_vm2, %v1976_v6, 0.0 }
  0xf5   : > { %861 = vst.msk [vmem:[%s1721_s11 + $0x30] sm:$0xf] %vm848_vm1, %v796_v19  ;;  %v1126_v19 = vsel %vm913_vm2, %v1055_v50, 0.0  ;;  %v761_v63 = vpop.f32.mrf.mxu3  ;;  %v1134_v6 = vsel %vm913_vm2, %v1059_v48, 0.0 }
  0xf6   : > { %877 = vst.msk [vmem:[%s1721_s11 + $0x70] sm:$0xf] %vm848_vm1, %v812_v21  ;;  %v1057_v21 = vmul.f32 %v1928_v36, %v1928_v36  ;;  %v1127_v32 = vadd.f32 %v1126_v19, %v1125_v23  ;;  %v2071_v36 = vadd.f32 %v1710_v30, %v759_v62  ;;  %v934_v0 = vadd.f32 %v933_v40, %v932_v46 }
  0xf7   : > { %v2079_v62 = vadd.f32 %v1710_v30, %v731_v58  ;;  %v826_v19 = vpack.c.bf16 %v2068_v44, %v2068_v44 }
  0xf8   : > { %v656_v51 = vpop.f32.mrf.mxu0  ;;  %v696_v52 = vpop.f32.mrf.mxu1  ;;  %v1130_v33 = vsel %vm913_vm2, %v1057_v21, 0.0  ;;  %v1129_v55 = vadd.f32 %v1128_v38, %v1127_v32  ;;  %v936_v15 = vadd.f32 %v935_v16, %v934_v0  ;;  %v2084_v21 = vadd.f32 %v1710_v30, %v761_v63 }
  0xf9   : > { %v657_v59 = vadd.f32 %v1710_v30, %v656_v51  ;;  %v2031_v26 = vadd.f32 %v1710_v30, %v696_v52  ;;  %v838_v2 = vpack.c.bf16 %v2071_v36, %v2071_v36  ;;  %891 = vst.msk [vmem:[%s1721_s11 + $0xa8] sm:$0xf] %vm848_vm1, %v826_v19  ;;  %v734_v63 = vpop.f32.mrf.mxu2  ;;  %v1063_v0 = vmul.f32 %v1714_v34, %v1714_v34 }
  0xfa   : > { %v938_v32 = vadd.f32 %v937_v53, %v936_v15  ;;  %v1064_v15 = vmul.f32 %v1735_v43, %v1735_v43 }
  0xfb   : > { %v797_v12 = vpack.c.bf16 %v657_v59, %v657_v59  ;;  %v813_v14 = vpack.c.bf16 %v2031_v26, %v2031_v26  ;;  %v1060_v5 = vmul.f32 %v657_v59, %v657_v59  ;;  %v939_v23 = vsel %vm913_vm2, %v657_v59, 0.0  ;;  %903 = vst.msk [vmem:[%s1721_s11 + $0xd8] sm:$0xf] %vm848_vm1, %v838_v2 }
  0xfc   : > { %v827_v59 = vpack.c.bf16 %v2079_v62, %v2079_v62 }
  0xfd   : > { %862 = vst.msk [vmem:[%s1721_s11 + $0x34] sm:$0xf] %vm848_vm1, %v797_v12  ;;  %v1136_v38 = vsel %vm913_vm2, %v1060_v5, 0.0 }
  0xfe   : > { %878 = vst.msk [vmem:[%s1721_s11 + $0x74] sm:$0xf] %vm848_vm1, %v813_v14  ;;  %v1131_v14 = vadd.f32 %v1130_v33, %v1129_v55  ;;  %v940_v33 = vadd.f32 %v939_v23, %v938_v32  ;;  %v764_v55 = vpop.f32.mrf.mxu3  ;;  %v945_v23 = vsel %vm913_vm2, %v1714_v34, 0.0  ;;  %v949_v34 = vsel %vm913_vm2, %v1749_v56, 0.0 }
  0xff   : > { %892 = vst.msk [vmem:[%s1721_s11 + $0xac] sm:$0xf] %vm848_vm1, %v827_v59  ;;  %v1144_v59 = vsel %vm913_vm2, %v1064_v15, 0.0 }
 0x100   : > { %v659_v49 = vpop.f32.mrf.mxu0  ;;  %v699_v50 = vpop.f32.mrf.mxu1  ;;  %v1133_v31 = vadd.f32 %v1132_v1, %v1131_v14 }
 0x101   : > { %v660_v51 = vadd.f32 %v1710_v30, %v659_v49  ;;  %v2065_v52 = vadd.f32 %v1710_v30, %v699_v50  ;;  %v839_v49 = vpack.c.bf16 %v2084_v21, %v2084_v21 }
 0x102   : > { %v1135_v46 = vadd.f32 %v1134_v6, %v1133_v31 }
 0x103   : > { %v798_v12 = vpack.c.bf16 %v660_v51, %v660_v51  ;;  %v814_v29 = vpack.c.bf16 %v2065_v52, %v2065_v52  ;;  %v1061_v28 = vmul.f32 %v660_v51, %v660_v51  ;;  %v941_v40 = vsel %vm913_vm2, %v660_v51, 0.0  ;;  %904 = vst.msk [vmem:[%s1721_s11 + $0xdc] sm:$0xf] %vm848_vm1, %v839_v49 }
 0x104   : > { %v1137_v1 = vadd.f32 %v1136_v38, %v1135_v46  ;;  %v942_v53 = vadd.f32 %v941_v40, %v940_v33  ;;  %v1142_v38 = vsel %vm913_vm2, %v1063_v0, 0.0  ;;  %v947_v40 = vsel %vm913_vm2, %v1735_v43, 0.0  ;;  %v736_v43 = vpop.f32.mrf.mxu2 }
 0x105   : > { %863 = vst.msk [vmem:[%s1721_s11 + $0x38] sm:$0xf] %vm848_vm1, %v798_v12  ;;  %v1138_v50 = vsel %vm913_vm2, %v1061_v28, 0.0  ;;  %v1065_v28 = vmul.f32 %v1749_v56, %v1749_v56  ;;  %v2139_v49 = vadd.f32 %v1710_v30, %v734_v63  ;;  %v2145_v56 = vadd.f32 %v1710_v30, %v736_v43 }
 0x106   : > { %879 = vst.msk [vmem:[%s1721_s11 + $0x78] sm:$0xf] %vm848_vm1, %v814_v29  ;;  %v1139_v19 = vadd.f32 %v1138_v50, %v1137_v1  ;;  %v2142_v50 = vadd.f32 %v1710_v30, %v764_v55  ;;  %v1067_v63 = vmul.f32 %v1780_v18, %v1780_v18 }
 0x107   : > { %v828_v55 = vpack.c.bf16 %v2139_v49, %v2139_v49 }
 0x108   : > { %v661_v16 = vpop.f32.mrf.mxu0  ;;  %v701_v48 = vpop.f32.mrf.mxu1 }
 0x109   : > { %v662_v58 = vadd.f32 %v1710_v30, %v661_v16  ;;  %v2107_v51 = vadd.f32 %v1710_v30, %v701_v48  ;;  %v1146_v16 = vsel %vm913_vm2, %v1065_v28, 0.0  ;;  %v1066_v48 = vmul.f32 %v1763_v4, %v1763_v4  ;;  %893 = vst.msk [vmem:[%s1721_s11 + $0xb0] sm:$0xf] %vm848_vm1, %v828_v55 }
 0x10a   : > { %v961_v55 = vsel %vm913_vm2, %v1875_v3, 0.0 }
 0x10b   : > { %v799_v5 = vpack.c.bf16 %v662_v58, %v662_v58  ;;  %v943_v12 = vsel %vm913_vm2, %v662_v58, 0.0  ;;  %v1062_v29 = vmul.f32 %v662_v58, %v662_v58  ;;  %v815_v14 = vpack.c.bf16 %v2107_v51, %v2107_v51  ;;  %v766_v58 = vpop.f32.mrf.mxu3 }
 0x10c   : > { %v944_v6 = vadd.f32 %v943_v12, %v942_v53  ;;  %v2148_v53 = vadd.f32 %v1710_v30, %v766_v58  ;;  %v840_v12 = vpack.c.bf16 %v2142_v50, %v2142_v50  ;;  %v1148_v15 = vsel %vm913_vm2, %v1066_v48, 0.0 }
 0x10d   : > { %864 = vst.msk [vmem:[%s1721_s11 + $0x3c] sm:$0xf] %vm848_vm1, %v799_v5  ;;  %v1140_v2 = vsel %vm913_vm2, %v1062_v29, 0.0  ;;  %v951_v5 = vsel %vm913_vm2, %v1763_v4, 0.0  ;;  %v1068_v4 = vmul.f32 %v1809_v35, %v1809_v35  ;;  %v959_v58 = vsel %vm913_vm2, %v1851_v54, 0.0 }
 0x10e   : > { %v946_v31 = vadd.f32 %v945_v23, %v944_v6  ;;  %v1141_v32 = vadd.f32 %v1140_v2, %v1139_v19  ;;  %880 = vst.msk [vmem:[%s1721_s11 + $0x7c] sm:$0xf] %vm848_vm1, %v815_v14  ;;  %v953_v19 = vsel %vm913_vm2, %v1780_v18, 0.0  ;;  %v829_v6 = vpack.c.bf16 %v2145_v56, %v2145_v56 }
 0x10f   : > { %905 = vst.msk [vmem:[%s1721_s11 + $0xe0] sm:$0xf] %vm848_vm1, %v840_v12  ;;  %v841_v2 = vpack.c.bf16 %v2148_v53, %v2148_v53  ;;  %v955_v18 = vsel %vm913_vm2, %v1809_v35, 0.0  ;;  %v1073_v12 = vmul.f32 %v1931_v37, %v1931_v37 }
 0x110   : > { %v948_v46 = vadd.f32 %v947_v40, %v946_v31  ;;  %v1143_v33 = vadd.f32 %v1142_v38, %v1141_v32  ;;  %v1150_v31 = vsel %vm913_vm2, %v1067_v63, 0.0  ;;  %v1069_v32 = vmul.f32 %v1828_v45, %v1828_v45  ;;  %894 = vst.msk [vmem:[%s1721_s11 + $0xb4] sm:$0xf] %vm848_vm1, %v829_v6 }
 0x111   : > { %906 = vst.msk [vmem:[%s1721_s11 + $0xe4] sm:$0xf] %vm848_vm1, %v841_v2 }
 0x112   : > { %v950_v0 = vadd.f32 %v949_v34, %v948_v46  ;;  %v1145_v1 = vadd.f32 %v1144_v59, %v1143_v33  ;;  %v1152_v59 = vsel %vm913_vm2, %v1068_v4, 0.0  ;;  %v957_v34 = vsel %vm913_vm2, %v1828_v45, 0.0  ;;  %v739_v33 = vpop.f32.mrf.mxu2 }
 0x113   : > { %v1070_v46 = vmul.f32 %v1851_v54, %v1851_v54  ;;  %v1154_v43 = vsel %vm913_vm2, %v1069_v32, 0.0  ;;  %v965_v4 = vsel %vm913_vm2, %v1931_v37, 0.0  ;;  %v2207_v2 = vadd.f32 %v1710_v30, %v739_v33 }
 0x114   : > { %v952_v29 = vadd.f32 %v951_v5, %v950_v0  ;;  %v1147_v14 = vadd.f32 %v1146_v16, %v1145_v1  ;;  %v769_v16 = vpop.f32.mrf.mxu3  ;;  %v1071_v0 = vmul.f32 %v1875_v3, %v1875_v3  ;;  %v1072_v1 = vmul.f32 %v1907_v17, %v1907_v17 }
 0x115   : > { %v1156_v63 = vsel %vm913_vm2, %v1070_v46, 0.0  ;;  %v1074_v3 = vmul.f32 %v1963_v57, %v1963_v57  ;;  %v830_v46 = vpack.c.bf16 %v2207_v2, %v2207_v2 }
 0x116   : > { %v954_v23 = vadd.f32 %v953_v19, %v952_v29  ;;  %v1149_v28 = vadd.f32 %v1148_v15, %v1147_v14  ;;  %v1158_v54 = vsel %vm913_vm2, %v1071_v0, 0.0  ;;  %v963_v15 = vsel %vm913_vm2, %v1907_v17, 0.0 }
 0x117   : > { %v1160_v19 = vsel %vm913_vm2, %v1072_v1, 0.0  ;;  %895 = vst.msk [vmem:[%s1721_s11 + $0xb8] sm:$0xf] %vm848_vm1, %v830_v46 }
 0x118   : > { %v956_v38 = vadd.f32 %v955_v18, %v954_v23  ;;  %v1151_v40 = vadd.f32 %v1150_v31, %v1149_v28  ;;  %v1162_v28 = vsel %vm913_vm2, %v1073_v12, 0.0  ;;  %v2210_v31 = vadd.f32 %v1710_v30, %v769_v16 }
 0x11a   : > { %v1153_v35 = vadd.f32 %v1152_v59, %v1151_v40  ;;  %v958_v48 = vadd.f32 %v957_v34, %v956_v38  ;;  %v741_v17 = vpop.f32.mrf.mxu2  ;;  %v967_v59 = vsel %vm913_vm2, %v1963_v57, 0.0  ;;  %v1075_v34 = vmul.f32 %v1979_v9, %v1979_v9 }
 0x11b   : > { %v2213_v37 = vadd.f32 %v1710_v30, %v741_v17  ;;  %v842_v33 = vpack.c.bf16 %v2210_v31, %v2210_v31  ;;  %v1076_v57 = vmul.f32 %v2031_v26, %v2031_v26  ;;  %v977_v17 = vsel %vm913_vm2, %v1774_v13, 0.0 }
 0x11c   : > { %v960_v5 = vadd.f32 %v959_v58, %v958_v48  ;;  %v1155_v45 = vadd.f32 %v1154_v43, %v1153_v35  ;;  %v771_v18 = vpop.f32.mrf.mxu3  ;;  %v1164_v48 = vsel %vm913_vm2, %v1074_v3, 0.0  ;;  %v969_v43 = vsel %vm913_vm2, %v1979_v9, 0.0 }
 0x11d   : > { %v2216_v40 = vadd.f32 %v1710_v30, %v771_v18  ;;  %v831_v58 = vpack.c.bf16 %v2213_v37, %v2213_v37  ;;  %907 = vst.msk [vmem:[%s1721_s11 + $0xe8] sm:$0xf] %vm848_vm1, %v842_v33  ;;  %v971_v9 = vsel %vm913_vm2, %v2031_v26, 0.0 }
 0x11e   : > { %v962_v29 = vadd.f32 %v961_v55, %v960_v5  ;;  %v1157_v14 = vadd.f32 %v1156_v63, %v1155_v45  ;;  %v1166_v45 = vsel %vm913_vm2, %v1075_v34, 0.0  ;;  %v1077_v63 = vmul.f32 %v2065_v52, %v2065_v52 }
 0x11f   : > { %v843_v5 = vpack.c.bf16 %v2216_v40, %v2216_v40  ;;  %896 = vst.msk [vmem:[%s1721_s11 + $0xbc] sm:$0xf] %vm848_vm1, %v831_v58  ;;  %v979_v34 = vsel %vm913_vm2, %v1785_v20, 0.0 }
 0x120   : > { %v964_v6 = vadd.f32 %v963_v15, %v962_v29  ;;  %v1159_v23 = vadd.f32 %v1158_v54, %v1157_v14  ;;  %v1168_v29 = vsel %vm913_vm2, %v1076_v57, 0.0  ;;  %v973_v14 = vsel %vm913_vm2, %v2065_v52, 0.0 }
 0x121   : > { %908 = vst.msk [vmem:[%s1721_s11 + $0xec] sm:$0xf] %vm848_vm1, %v843_v5  ;;  %v1078_v54 = vmul.f32 %v2107_v51, %v2107_v51  ;;  %v1080_v52 = vmul.f32 %v1785_v20, %v1785_v20 }
 0x122   : > { %v966_v32 = vadd.f32 %v965_v4, %v964_v6  ;;  %v1161_v38 = vadd.f32 %v1160_v19, %v1159_v23  ;;  %v1079_v4 = vmul.f32 %v1774_v13, %v1774_v13  ;;  %v1170_v6 = vsel %vm913_vm2, %v1077_v63, 0.0 }
 0x123   : > { %v975_v23 = vsel %vm913_vm2, %v2107_v51, 0.0  ;;  %v1172_v18 = vsel %vm913_vm2, %v1078_v54, 0.0  ;;  %v1081_v51 = vmul.f32 %v1820_v39, %v1820_v39  ;;  %v981_v13 = vsel %vm913_vm2, %v1820_v39, 0.0 }
 0x124   : > { %v968_v16 = vadd.f32 %v967_v59, %v966_v32  ;;  %v1163_v35 = vadd.f32 %v1162_v28, %v1161_v38  ;;  %v774_v15 = vpop.f32.mrf.mxu3  ;;  %v1174_v59 = vsel %vm913_vm2, %v1079_v4, 0.0  ;;  %v1083_v39 = vmul.f32 %v1862_v60, %v1862_v60 }
 0x126   : > { %v970_v0 = vadd.f32 %v969_v43, %v968_v16  ;;  %v1165_v1 = vadd.f32 %v1164_v48, %v1163_v35  ;;  %v1176_v16 = vsel %vm913_vm2, %v1080_v52, 0.0  ;;  %v1082_v35 = vmul.f32 %v1833_v47, %v1833_v47 }
 0x127   : > { %v2274_v48 = vadd.f32 %v1710_v30, %v774_v15  ;;  %v1182_v54 = vsel %vm913_vm2, %v1083_v39, 0.0  ;;  %v987_v15 = vsel %vm913_vm2, %v1880_v7, 0.0 }
 0x128   : > { %v1167_v55 = vadd.f32 %v1166_v45, %v1165_v1  ;;  %v972_v12 = vadd.f32 %v971_v9, %v970_v0  ;;  %v1178_v0 = vsel %vm913_vm2, %v1081_v51, 0.0  ;;  %v983_v1 = vsel %vm913_vm2, %v1833_v47, 0.0 }
 0x129   : > { %v844_v5 = vpack.c.bf16 %v2274_v48, %v2274_v48 }
 0x12a   : > { %v1169_v19 = vadd.f32 %v1168_v29, %v1167_v55  ;;  %v974_v26 = vadd.f32 %v973_v14, %v972_v12  ;;  %v1180_v55 = vsel %vm913_vm2, %v1082_v35, 0.0  ;;  %v985_v12 = vsel %vm913_vm2, %v1862_v60, 0.0 }
 0x12b   : > { %v1084_v29 = vmul.f32 %v1880_v7, %v1880_v7  ;;  %909 = vst.msk [vmem:[%s1721_s11 + $0xf0] sm:$0xf] %vm848_vm1, %v844_v5  ;;  %v991_v7 = vsel %vm913_vm2, %v1936_v41, 0.0 }
 0x12c   : > { %v1171_v28 = vadd.f32 %v1170_v6, %v1169_v19  ;;  %v976_v3 = vadd.f32 %v975_v23, %v974_v26  ;;  %v776_v43 = vpop.f32.mrf.mxu3  ;;  %v1085_v19 = vmul.f32 %v1918_v24, %v1918_v24  ;;  %v989_v6 = vsel %vm913_vm2, %v1918_v24, 0.0 }
 0x12d   : > { %v2277_v58 = vadd.f32 %v1710_v30, %v776_v43  ;;  %v1184_v60 = vsel %vm913_vm2, %v1084_v29, 0.0  ;;  %v1086_v23 = vmul.f32 %v1936_v41, %v1936_v41  ;;  %v993_v24 = vsel %vm913_vm2, %v1982_v10, 0.0 }
 0x12e   : > { %v978_v32 = vadd.f32 %v977_v17, %v976_v3  ;;  %v1173_v38 = vadd.f32 %v1172_v18, %v1171_v28  ;;  %v1186_v52 = vsel %vm913_vm2, %v1085_v19, 0.0  ;;  %v1087_v18 = vmul.f32 %v1982_v10, %v1982_v10 }
 0x12f   : > { %v845_v63 = vpack.c.bf16 %v2277_v58, %v2277_v58  ;;  %v995_v41 = vsel %vm913_vm2, %v1994_v22, 0.0  ;;  %v997_v10 = vsel %vm913_vm2, %v2068_v44, 0.0  ;;  %v1093_v19 = vmul.f32 %v2207_v2, %v2207_v2 }
 0x130   : > { %v980_v46 = vadd.f32 %v979_v34, %v978_v32  ;;  %v1175_v33 = vadd.f32 %v1174_v59, %v1173_v38  ;;  %v1188_v59 = vsel %vm913_vm2, %v1086_v23, 0.0  ;;  %v1088_v34 = vmul.f32 %v1994_v22, %v1994_v22 }
 0x131   : > { %910 = vst.msk [vmem:[%s1721_s11 + $0xf4] sm:$0xf] %vm848_vm1, %v845_v63 }
 0x132   : > { %v982_v57 = vadd.f32 %v981_v13, %v980_v46  ;;  %v1177_v20 = vadd.f32 %v1176_v16, %v1175_v33  ;;  %v1190_v33 = vsel %vm913_vm2, %v1087_v18, 0.0  ;;  %v1089_v16 = vmul.f32 %v2068_v44, %v2068_v44 }
 0x133   : > { %v1192_v43 = vsel %vm913_vm2, %v1088_v34, 0.0  ;;  %v1091_v44 = vmul.f32 %v2139_v49, %v2139_v49  ;;  %v1009_v18 = vsel %vm913_vm2, %v1865_v61, 0.0  ;;  %v1011_v34 = vsel %vm913_vm2, %v1883_v8, 0.0 }
 0x134   : > { %v984_v45 = vadd.f32 %v983_v1, %v982_v57  ;;  %v1179_v9 = vadd.f32 %v1178_v0, %v1177_v20  ;;  %v779_v28 = vpop.f32.mrf.mxu3  ;;  %v1090_v57 = vmul.f32 %v2079_v62, %v2079_v62  ;;  %v1194_v5 = vsel %vm913_vm2, %v1089_v16, 0.0 }
 0x135   : > { %v2328_v20 = vadd.f32 %v1710_v30, %v779_v28 }
 0x136   : > { %v986_v47 = vadd.f32 %v985_v12, %v984_v45  ;;  %v1181_v14 = vadd.f32 %v1180_v55, %v1179_v9  ;;  %v999_v45 = vsel %vm913_vm2, %v2079_v62, 0.0  ;;  %v1196_v29 = vsel %vm913_vm2, %v1090_v57, 0.0 }
 0x137   : > { %v846_v9 = vpack.c.bf16 %v2328_v20, %v2328_v20 }
 0x138   : > { %v1183_v26 = vadd.f32 %v1182_v54, %v1181_v14  ;;  %v988_v4 = vadd.f32 %v987_v15, %v986_v47  ;;  %v1092_v47 = vmul.f32 %v2145_v56, %v2145_v56  ;;  %v1198_v54 = vsel %vm913_vm2, %v1091_v44, 0.0 }
 0x139   : > { %911 = vst.msk [vmem:[%s1721_s11 + $0xf8] sm:$0xf] %vm848_vm1, %v846_v9  ;;  %v1003_v15 = vsel %vm913_vm2, %v2145_v56, 0.0  ;;  %v1202_v56 = vsel %vm913_vm2, %v1093_v19, 0.0  ;;  %v1101_v44 = vmul.f32 %v2071_v36, %v2071_v36  ;;  %v1104_v19 = vmul.f32 %v2148_v53, %v2148_v53 }
 0x13a   : > { %v990_v3 = vadd.f32 %v989_v6, %v988_v4  ;;  %v1185_v17 = vadd.f32 %v1184_v60, %v1183_v26  ;;  %v1005_v60 = vsel %vm913_vm2, %v2207_v2, 0.0  ;;  %v1094_v6 = vmul.f32 %v2213_v37, %v2213_v37 }
 0x13b   : > { %v1096_v2 = vmul.f32 %v1883_v8, %v1883_v8  ;;  %v1015_v8 = vsel %vm913_vm2, %v1939_v42, 0.0 }
 0x13c   : > { %v992_v32 = vadd.f32 %v991_v7, %v990_v3  ;;  %v1187_v38 = vadd.f32 %v1186_v52, %v1185_v17  ;;  %v781_v0 = vpop.f32.mrf.mxu3  ;;  %v1095_v3 = vmul.f32 %v1865_v61, %v1865_v61  ;;  %v1007_v17 = vsel %vm913_vm2, %v2213_v37, 0.0 }
 0x13d   : > { %v2331_v39 = vadd.f32 %v1710_v30, %v781_v0  ;;  %v1001_v30 = vsel %vm913_vm2, %v2139_v49, 0.0  ;;  %v1200_v49 = vsel %vm913_vm2, %v1092_v47, 0.0  ;;  %v1097_v37 = vmul.f32 %v1921_v25, %v1921_v25 }
 0x13e   : > { %v994_v51 = vadd.f32 %v993_v24, %v992_v32  ;;  %v1189_v46 = vadd.f32 %v1188_v59, %v1187_v38  ;;  %v1204_v32 = vsel %vm913_vm2, %v1094_v6, 0.0  ;;  %v1206_v24 = vsel %vm913_vm2, %v1095_v3, 0.0 }
 0x13f   : > { %v847_v12 = vpack.c.bf16 %v2331_v39, %v2331_v39  ;;  %v1013_v61 = vsel %vm913_vm2, %v1921_v25, 0.0  ;;  %v1017_v25 = vsel %vm913_vm2, %v1985_v11, 0.0  ;;  %v1218_v47 = vsel %vm913_vm2, %v1101_v44, 0.0 }
 0x140   : > { %v996_v13 = vadd.f32 %v995_v41, %v994_v51  ;;  %v1191_v35 = vadd.f32 %v1190_v33, %v1189_v46  ;;  %v1208_v33 = vsel %vm913_vm2, %v1096_v2, 0.0  ;;  %v1098_v41 = vmul.f32 %v1939_v42, %v1939_v42 }
 0x141   : > { %912 = vst.msk [vmem:[%s1721_s11 + $0xfc] sm:$0xf] %vm848_vm1, %v847_v12  ;;  %v1019_v42 = vsel %vm913_vm2, %v1999_v27, 0.0  ;;  %v1102_v12 = vmul.f32 %v2084_v21, %v2084_v21  ;;  %v1106_v3 = vmul.f32 %v2216_v40, %v2216_v40 }
 0x142   : > { %v998_v1 = vadd.f32 %v997_v10, %v996_v13  ;;  %v1193_v22 = vadd.f32 %v1192_v43, %v1191_v35  ;;  %v1210_v35 = vsel %vm913_vm2, %v1097_v37, 0.0  ;;  %v1099_v43 = vmul.f32 %v1985_v11, %v1985_v11 }
 0x143   : > { %v1212_v0 = vsel %vm913_vm2, %v1098_v41, 0.0  ;;  %v1021_v11 = vsel %vm913_vm2, %v2071_v36, 0.0  ;;  %v1025_v36 = vsel %vm913_vm2, %v2142_v50, 0.0  ;;  %v1109_v37 = vmul.f32 %v2328_v20, %v2328_v20 }
 0x144   : > { %v1000_v63 = vadd.f32 %v999_v45, %v998_v1  ;;  %v1195_v55 = vadd.f32 %v1194_v5, %v1193_v22  ;;  %v1100_v1 = vmul.f32 %v1999_v27, %v1999_v27  ;;  %v1214_v45 = vsel %vm913_vm2, %v1099_v43, 0.0 }
 0x145   : > { %v1023_v27 = vsel %vm913_vm2, %v2084_v21, 0.0  ;;  %v1027_v21 = vsel %vm913_vm2, %v2148_v53, 0.0  ;;  %v1031_v53 = vsel %vm913_vm2, %v2216_v40, 0.0  ;;  %v1035_v40 = vsel %vm913_vm2, %v2277_v58, 0.0 }
 0x146   : > { %v1197_v62 = vadd.f32 %v1196_v29, %v1195_v55  ;;  %v1002_v14 = vadd.f32 %v1001_v30, %v1000_v63  ;;  %v1216_v55 = vsel %vm913_vm2, %v1100_v1, 0.0 }
 0x148   : > { %v1199_v26 = vadd.f32 %v1198_v54, %v1197_v62  ;;  %v1004_v4 = vadd.f32 %v1003_v15, %v1002_v14  ;;  %v1103_v62 = vmul.f32 %v2142_v50, %v2142_v50  ;;  %v1220_v15 = vsel %vm913_vm2, %v1102_v12, 0.0 }
 0x149   : > { %v1029_v50 = vsel %vm913_vm2, %v2210_v31, 0.0 }
 0x14a   : > { %v1201_v23 = vadd.f32 %v1200_v49, %v1199_v26  ;;  %v1006_v28 = vadd.f32 %v1005_v60, %v1004_v4  ;;  %v1222_v49 = vsel %vm913_vm2, %v1103_v62, 0.0  ;;  %v1105_v60 = vmul.f32 %v2210_v31, %v2210_v31 }
 0x14b   : > { %v1033_v31 = vsel %vm913_vm2, %v2274_v48, 0.0 }
 0x14c   : > { %v1203_v52 = vadd.f32 %v1202_v56, %v1201_v23  ;;  %v1008_v7 = vadd.f32 %v1007_v17, %v1006_v28  ;;  %v1224_v28 = vsel %vm913_vm2, %v1104_v19, 0.0 }
 0x14e   : > { %v1010_v38 = vadd.f32 %v1009_v18, %v1008_v7  ;;  %v1205_v59 = vadd.f32 %v1204_v32, %v1203_v52  ;;  %v1226_v52 = vsel %vm913_vm2, %v1105_v60, 0.0  ;;  %v1107_v7 = vmul.f32 %v2274_v48, %v2274_v48 }
 0x14f   : > { %v1228_v32 = vsel %vm913_vm2, %v1106_v3, 0.0  ;;  %v1037_v48 = vsel %vm913_vm2, %v2328_v20, 0.0 }
 0x150   : > { %v1012_v51 = vadd.f32 %v1011_v34, %v1010_v38  ;;  %v1207_v46 = vadd.f32 %v1206_v24, %v1205_v59  ;;  %v1108_v38 = vmul.f32 %v2277_v58, %v2277_v58  ;;  %v1230_v34 = vsel %vm913_vm2, %v1107_v7, 0.0 }
 0x151   : > { %v1039_v58 = vsel %vm913_vm2, %v2331_v39, 0.0 }
 0x152   : > { %v1014_v16 = vadd.f32 %v1013_v61, %v1012_v51  ;;  %v1209_v13 = vadd.f32 %v1208_v33, %v1207_v46  ;;  %v1232_v33 = vsel %vm913_vm2, %v1108_v38, 0.0  ;;  %v1110_v61 = vmul.f32 %v2331_v39, %v2331_v39 }
 0x154   : > { %v1016_v10 = vadd.f32 %v1015_v8, %v1014_v16  ;;  %v1211_v57 = vadd.f32 %v1210_v35, %v1209_v13  ;;  %v1234_v13 = vsel %vm913_vm2, %v1109_v37, 0.0  ;;  %v1236_v43 = vsel %vm913_vm2, %v1110_v61, 0.0 }
 0x156   : > { %v1018_v22 = vadd.f32 %v1017_v25, %v1016_v10  ;;  %v1213_v5 = vadd.f32 %v1212_v0, %v1211_v57 }
 0x158   : > { %v1215_v9 = vadd.f32 %v1214_v45, %v1213_v5  ;;  %v1020_v63 = vadd.f32 %v1019_v42, %v1018_v22 }
 0x15a   : > { %v1022_v29 = vadd.f32 %v1021_v11, %v1020_v63  ;;  %v1217_v30 = vadd.f32 %v1216_v55, %v1215_v9 }
 0x15c   : > { %v1024_v14 = vadd.f32 %v1023_v27, %v1022_v29  ;;  %v1219_v54 = vadd.f32 %v1218_v47, %v1217_v30 }
 0x15e   : > { %v1026_v26 = vadd.f32 %v1025_v36, %v1024_v14  ;;  %v1221_v4 = vadd.f32 %v1220_v15, %v1219_v54 }
 0x160   : > { %v1028_v6 = vadd.f32 %v1027_v21, %v1026_v26  ;;  %v1223_v23 = vadd.f32 %v1222_v49, %v1221_v4 }
 0x162   : > { %v1030_v56 = vadd.f32 %v1029_v50, %v1028_v6  ;;  %v1225_v17 = vadd.f32 %v1224_v28, %v1223_v23 }
 0x164   : > { %v1032_v18 = vadd.f32 %v1031_v53, %v1030_v56  ;;  %v1227_v2 = vadd.f32 %v1226_v52, %v1225_v17 }
 0x166   : > { %v1229_v59 = vadd.f32 %v1228_v32, %v1227_v2  ;;  %v1034_v24 = vadd.f32 %v1033_v31, %v1032_v18 }
 0x168   : > { %v1231_v51 = vadd.f32 %v1230_v34, %v1229_v59  ;;  %v1036_v46 = vadd.f32 %v1035_v40, %v1034_v24 }
 0x16a   : > { %v1233_v41 = vadd.f32 %v1232_v33, %v1231_v51  ;;  %v1038_v16 = vadd.f32 %v1037_v48, %v1036_v46 }
 0x16c   : > { %v1235_v35 = vadd.f32 %v1234_v13, %v1233_v41  ;;  %v1040_v8 = vadd.f32 %v1039_v58, %v1038_v16 }
 0x16e   : > { %v1041_v10 = vrot.slane %v1040_v8, 4  ;;  %v1237_v57 = vadd.f32 %v1236_v43, %v1235_v35 }
 0x170   : > { %v1042_v0 = vadd.f32 %v1041_v10, %v1040_v8  ;;  %v1238_v20 = vrot.slane %v1237_v57, 4 }
 0x172   : > { %v1043_v25 = vrot.slane %v1042_v0, 2  ;;  %v1239_v1 = vadd.f32 %v1238_v20, %v1237_v57 }
 0x174   : > { %v1044_v22 = vadd.f32 %v1043_v25, %v1042_v0  ;;  %v1240_v5 = vrot.slane %v1239_v1, 2 }
 0x176   : > { %v1045_v45 = vrot.slane %v1044_v22, 1  ;;  %v1241_v42 = vadd.f32 %v1240_v5, %v1239_v1 }
 0x178   : > { %v1046_v39 = vadd.f32 %v1045_v45, %v1044_v22  ;;  %v1242_v44 = vrot.slane %v1241_v42, 1 }
 0x17a   : > { %v1243_v9 = vadd.f32 %v1242_v44, %v1241_v42  ;;  %1245 = vst.msk [vmem:[%s269_s14] sm:$0x1] %vm1244_vm3, %v1046_v39 }
 0x17c   : > { %1246 = vst.msk [vmem:[%s272_s17] sm:$0x1] %vm1244_vm3, %v1243_v9 }
 0x17d PF: > { %s18_s21 = sadd.s32 1, %s1587_s21  }
 0x17e   : > { %p15_p5 = scmp.ge.s32.totalorder %s18_s21, 4  }
 0x180   :  { %17 = sbr.rel (!%p15_p5) target bundleno = 1 (0x1), region = 90 }

// kernel: unet3d_forward.10
= control target key start
LH: loop header
LB: loop body
LE: loop exit
PB: predicated region body
PF: predicated region fallthrough
CT: control target
= control target key end

     0   :  { %s726_s21 = smov 0   ;;  %s818_s0 = inlined_call_operand.vmem [shape: bf16[128,128], index: 0, kind: input, shape index: {}]   ;;  %s819_s1 = inlined_call_operand.vmem [shape: bf16[128,8], index: 1, kind: input, shape index: {}]   ;;  %s820_s2 = inlined_call_operand.vmem [shape: f32[1,8], index: 2, kind: input, shape index: {}]   ;;  %s821_s3 = inlined_call_operand.<no memory space> [shape: f32[1], index: 3, kind: input, shape index: {}]   ;;  %s822_s4 = inlined_call_operand.vmem [shape: bf16[128,8], index: 4, kind: output, shape index: {0}]   ;;  %s823_s5 = inlined_call_operand.vmem [shape: f32[2,1,8], index: 5, kind: output, shape index: {1}]   ;;  %s824_s6 = inlined_call_operand.vmem [shape: f32[2,1,8], index: 6, kind: output, shape index: {2}]  }
   0x1 LB: > { %s732_s3 = sadd.s32 4294967295, %s689_s21   ;;  %p583_p0 = scmp.ge.s32.totalorder %s689_s21, 1  ;;  %s689_s21 = sphi %s726_s21, %s18_s21  }
   0x2   : > { %p219_p1 = scmp.lt.s32.totalorder %s689_s21, 3 }
   0x4   : > { %p220_p2 = pnand %p583_p0, %p219_p1 }
   0x5   : > { %s584_s30 = sshll.u32 (!%p220_p2), %s732_s3, 3  ;;  %p267_p4 = scmp.lt.s32.totalorder (!%p220_p2), %s732_s3, 1 }
   0x6   : > { %223 = sbr.rel (%p220_p2) target bundleno = 209 (0xd1), region = 36  ;;  %p256_p3 = scmp.lt.s32.totalorder (!%p220_p2), %s584_s30, 15 }
   0xb   : > { %v649_v0 = vld [vmem:[%s819_s1 + $0x38] sm:$0xff]  ;;  %v648_v1 = vld [vmem:[%s819_s1 + $0x30] sm:$0xff]  ;;  %v647_v2 = vld [vmem:[%s819_s1 + $0x28] sm:$0xff]  ;;  %s826_s30 = smov (!%p256_p3, %s584_s30), 15  ;;  %vm410_vm0 = vcmask 60416   ;;  %vm419_vm1 = vcmask 64512  }
   0xc   : > { %373 = vmatpush.bf16.msra.mxu0 %v649_v0  ;;  %650 = vmatpush.bf16.msra.mxu1 %v649_v0  ;;  %v646_v3 = vld [vmem:[%s819_s1 + $0x20] sm:$0xff]  ;;  %v645_v4 = vld [vmem:[%s819_s1 + $0x18] sm:$0xff]  ;;  %v644_v5 = vld [vmem:[%s819_s1 + $0x10] sm:$0xff]  ;;  %s585_s13 = sshll.u32 %s826_s30, 2  ;;  %s828_s3 = smov (!%p267_p4, %s732_s3), 1  ;;  %vm470_vm2 = vcmask 57344  }
   0xd   : > { %651 = vmatpush.bf16.msra.mxu2 %v649_v0  ;;  %652 = vmatpush.bf16.msra.mxu3 %v649_v0  ;;  %v643_v6 = vld [vmem:[%s819_s1 + $0x8] sm:$0xff]  ;;  %v642_v7 = vld [vmem:[%s819_s1] sm:$0xff]  ;;  %s259_s18 = scalar_lea.vmem %s818_s0, %s585_s13  ;;  %s773_s24 = scalar_lea.vmem %s822_s4, %s585_s13 }
   0xe   : > { %v638_v8 = vld [vmem:[%s259_s18] sm:$0xff]  ;;  %v639_v9 = vld [vmem:[%s259_s18 + $0x8] sm:$0xff]  ;;  %v640_v10 = vld [vmem:[%s259_s18 + $0x10] sm:$0xff]  ;;  %s269_s27 = scalar_lea.vmem %s823_s5, %s828_s3  ;;  %s272_s30 = scalar_lea.vmem %s824_s6, %s828_s3 }
   0xf   : > { %v641_v11 = vld [vmem:[%s259_s18 + $0x18] sm:$0xff]  ;;  %v682_v12 = vld [vmem:[%s820_s2] ss:$0 sm:$0xff] }
  0x10   : > { %374 = vmatpush.bf16.msra.mxu0 %v648_v1  ;;  %653 = vmatpush.bf16.msra.mxu1 %v648_v1 }
  0x11   : > { %654 = vmatpush.bf16.msra.mxu2 %v648_v1  ;;  %655 = vmatpush.bf16.msra.mxu3 %v648_v1 }
  0x14   : > { %375 = vmatpush.bf16.msra.mxu0 %v647_v2  ;;  %656 = vmatpush.bf16.msra.mxu1 %v647_v2 }
  0x15   : > { %657 = vmatpush.bf16.msra.mxu2 %v647_v2  ;;  %658 = vmatpush.bf16.msra.mxu3 %v647_v2 }
  0x18   : > { %376 = vmatpush.bf16.msra.mxu0 %v646_v3  ;;  %659 = vmatpush.bf16.msra.mxu1 %v646_v3 }
  0x19   : > { %660 = vmatpush.bf16.msra.mxu2 %v646_v3  ;;  %661 = vmatpush.bf16.msra.mxu3 %v646_v3 }
  0x1c   : > { %377 = vmatpush.bf16.msra.mxu0 %v645_v4  ;;  %662 = vmatpush.bf16.msra.mxu1 %v645_v4 }
  0x1d   : > { %663 = vmatpush.bf16.msra.mxu2 %v645_v4  ;;  %664 = vmatpush.bf16.msra.mxu3 %v645_v4 }
  0x20   : > { %378 = vmatpush.bf16.msra.mxu0 %v644_v5  ;;  %665 = vmatpush.bf16.msra.mxu1 %v644_v5 }
  0x21   : > { %666 = vmatpush.bf16.msra.mxu2 %v644_v5  ;;  %667 = vmatpush.bf16.msra.mxu3 %v644_v5 }
  0x24   : > { %379 = vmatpush.bf16.msra.mxu0 %v643_v6  ;;  %668 = vmatpush.bf16.msra.mxu1 %v643_v6 }
  0x25   : > { %669 = vmatpush.bf16.msra.mxu2 %v643_v6  ;;  %670 = vmatpush.bf16.msra.mxu3 %v643_v6 }
  0x28   : > { %380 = vmatpush.bf16.msra.mxu0 %v642_v7  ;;  %671 = vmatpush.bf16.msra.mxu1 %v642_v7 }
  0x29   : > { %672 = vmatpush.bf16.msra.mxu2 %v642_v7  ;;  %673 = vmatpush.bf16.msra.mxu3 %v642_v7 }
  0x2b   : > { %381 = vmatmul.bf16.vlgmr.msra.gmra.mxu0 %v638_v8  ;;  %386 = vmatmul.bf16.vlgmr.msra.gmra.mxu1 %v639_v9 }
  0x2c   : > { %391 = vmatmul.bf16.vlgmr.msra.gmra.mxu2 %v640_v10  ;;  %396 = vmatmul.bf16.vlgmr.msra.gmra.mxu3 %v641_v11 }
  0xa8   : > { %v382_v13 = vpop.f32.mrf.mxu0  ;;  %v387_v14 = vpop.f32.mrf.mxu1 }
  0xa9   : > { %v383_v15 = vadd.f32 %v682_v12, %v382_v13  ;;  %v388_v16 = vadd.f32 %v682_v12, %v387_v14 }
  0xab   : > { %v402_v17 = vpack.c.bf16 %v383_v15, %v383_v15  ;;  %v404_v18 = vpack.c.bf16 %v388_v16, %v388_v16  ;;  %v441_v27 = vmul.f32 %v383_v15, %v383_v15  ;;  %v420_v30 = vsel %vm419_vm1, %v383_v15, 0.0 }
  0xac   : > { %v443_v31 = vmul.f32 %v388_v16, %v388_v16  ;;  %v423_v37 = vsel %vm419_vm1, %v388_v16, 0.0 }
  0xad   : > { %411 = vst.msk [vmem:[%s773_s24] sm:$0xf] %vm410_vm0, %v402_v17  ;;  %v449_v38 = vsel %vm419_vm1, %v441_v27, 0.0 }
  0xae   : > { %413 = vst.msk [vmem:[%s773_s24 + $0x8] sm:$0xf] %vm410_vm0, %v404_v18  ;;  %v452_v42 = vsel %vm419_vm1, %v443_v31, 0.0 }
  0xaf   : > { %v392_v19 = vpop.f32.mrf.mxu2  ;;  %v397_v20 = vpop.f32.mrf.mxu3 }
  0xb0   : > { %v393_v21 = vadd.f32 %v682_v12, %v392_v19  ;;  %v398_v22 = vadd.f32 %v682_v12, %v397_v20  ;;  %v384_v23 = vpop.f32.mrf.mxu0  ;;  %v389_v24 = vpop.f32.mrf.mxu1 }
  0xb1   : > { %v385_v25 = vadd.f32 %v682_v12, %v384_v23  ;;  %v390_v26 = vadd.f32 %v682_v12, %v389_v24 }
  0xb2   : > { %v406_v28 = vpack.c.bf16 %v393_v21, %v393_v21  ;;  %v408_v29 = vpack.c.bf16 %v398_v22, %v398_v22  ;;  %v445_v47 = vmul.f32 %v393_v21, %v393_v21  ;;  %v427_v51 = vsel %vm419_vm1, %v393_v21, 0.0 }
  0xb3   : > { %v403_v32 = vpack.c.bf16 %v385_v25, %v385_v25  ;;  %v421_v33 = vsel %vm419_vm1, %v385_v25, 0.0  ;;  %v442_v35 = vmul.f32 %v385_v25, %v385_v25  ;;  %v405_v36 = vpack.c.bf16 %v390_v26, %v390_v26 }
  0xb4   : > { %415 = vst.msk [vmem:[%s773_s24 + $0x10] sm:$0xf] %vm410_vm0, %v406_v28  ;;  %v422_v34 = vadd.f32 %v421_v33, %v420_v30  ;;  %v444_v41 = vmul.f32 %v390_v26, %v390_v26  ;;  %v425_v44 = vsel %vm419_vm1, %v390_v26, 0.0  ;;  %v456_v60 = vsel %vm419_vm1, %v445_v47, 0.0 }
  0xb5   : > { %417 = vst.msk [vmem:[%s773_s24 + $0x18] sm:$0xf] %vm410_vm0, %v408_v29  ;;  %v450_v39 = vsel %vm419_vm1, %v442_v35, 0.0  ;;  %v447_v61 = vmul.f32 %v398_v22, %v398_v22  ;;  %v431_v63 = vsel %vm419_vm1, %v398_v22, 0.0 }
  0xb6   : > { %412 = vst.msk [vmem:[%s773_s24 + $0x4] sm:$0xf] %vm410_vm0, %v403_v32  ;;  %v424_v40 = vadd.f32 %v423_v37, %v422_v34  ;;  %v451_v43 = vadd.f32 %v450_v39, %v449_v38  ;;  %v454_v53 = vsel %vm419_vm1, %v444_v41, 0.0 }
  0xb7   : > { %414 = vst.msk [vmem:[%s773_s24 + $0xc] sm:$0xf] %vm410_vm0, %v405_v36  ;;  %v394_v45 = vpop.f32.mrf.mxu2  ;;  %v399_v46 = vpop.f32.mrf.mxu3  ;;  %v460_v6 = vsel %vm419_vm1, %v447_v61, 0.0 }
  0xb8   : > { %v426_v48 = vadd.f32 %v425_v44, %v424_v40  ;;  %v395_v49 = vadd.f32 %v682_v12, %v394_v45  ;;  %v400_v50 = vadd.f32 %v682_v12, %v399_v46  ;;  %v453_v52 = vadd.f32 %v452_v42, %v451_v43 }
  0xba   : > { %v407_v54 = vpack.c.bf16 %v395_v49, %v395_v49  ;;  %v428_v55 = vadd.f32 %v427_v51, %v426_v48  ;;  %v446_v56 = vmul.f32 %v395_v49, %v395_v49  ;;  %v455_v57 = vadd.f32 %v454_v53, %v453_v52 }
  0xbb   : > { %v429_v58 = vsel %vm419_vm1, %v395_v49, 0.0  ;;  %v409_v59 = vpack.c.bf16 %v400_v50, %v400_v50  ;;  %v448_v3 = vmul.f32 %v400_v50, %v400_v50  ;;  %v433_v5 = vsel %vm419_vm1, %v400_v50, 0.0 }
  0xbc   : > { %416 = vst.msk [vmem:[%s773_s24 + $0x14] sm:$0xf] %vm410_vm0, %v407_v54  ;;  %v430_v62 = vadd.f32 %v429_v58, %v428_v55  ;;  %v457_v0 = vadd.f32 %v456_v60, %v455_v57  ;;  %v458_v1 = vsel %vm419_vm1, %v446_v56, 0.0 }
  0xbd   : > { %418 = vst.msk [vmem:[%s773_s24 + $0x1c] sm:$0xf] %vm410_vm0, %v409_v59  ;;  %v462_v10 = vsel %vm419_vm1, %v448_v3, 0.0 }
  0xbe   : > { %v432_v2 = vadd.f32 %v431_v63, %v430_v62  ;;  %v459_v4 = vadd.f32 %v458_v1, %v457_v0 }
  0xc0   : > { %v434_v7 = vadd.f32 %v433_v5, %v432_v2  ;;  %v461_v8 = vadd.f32 %v460_v6, %v459_v4 }
  0xc2   : > { %v435_v9 = vrot.slane %v434_v7, 4  ;;  %v463_v11 = vadd.f32 %v462_v10, %v461_v8 }
  0xc4   : > { %v436_v12 = vadd.f32 %v435_v9, %v434_v7  ;;  %v464_v13 = vrot.slane %v463_v11, 4 }
  0xc6   : > { %v437_v14 = vrot.slane %v436_v12, 2  ;;  %v465_v15 = vadd.f32 %v464_v13, %v463_v11 }
  0xc8   : > { %v438_v16 = vadd.f32 %v437_v14, %v436_v12  ;;  %v466_v17 = vrot.slane %v465_v15, 2 }
  0xca   : > { %v439_v18 = vrot.slane %v438_v16, 1  ;;  %v467_v19 = vadd.f32 %v466_v17, %v465_v15 }
  0xcc   : > { %v440_v20 = vadd.f32 %v439_v18, %v438_v16  ;;  %v468_v21 = vrot.slane %v467_v19, 1 }
  0xce   : > { %471 = vst.msk [vmem:[%s269_s27] sm:$0x1] %vm470_vm2, %v440_v20  ;;  %v469_v22 = vadd.f32 %v468_v21, %v467_v19 }
  0xd0   : > { %472 = vst.msk [vmem:[%s272_s30] sm:$0x1] %vm470_vm2, %v469_v22 }
  0xd1 PF: > { %s18_s21 = sadd.s32 1, %s689_s21  }
  0xd2   : > { %p15_p5 = scmp.ge.s32.totalorder %s18_s21, 4  }
  0xd4   :  { %17 = sbr.rel (!%p15_p5) target bundleno = 1 (0x1), region = 90 }

// kernel: unet3d_forward.11
= control target key start
LH: loop header
LB: loop body
LE: loop exit
PB: predicated region body
PF: predicated region fallthrough
CT: control target
= control target key end

     0   :  { %s465_s15 = smov 0   ;;  %s488_s0 = inlined_call_operand.vmem [shape: bf16[128,16], index: 0, kind: input, shape index: {}]   ;;  %s489_s1 = inlined_call_operand.vmem [shape: bf16[16,128], index: 1, kind: input, shape index: {}]   ;;  %s490_s2 = inlined_call_operand.vmem [shape: f32[1,128], index: 2, kind: input, shape index: {}]   ;;  %s491_s3 = inlined_call_operand.<no memory space> [shape: f32[1], index: 3, kind: input, shape index: {}]   ;;  %s492_s4 = inlined_call_operand.vmem [shape: bf16[128,128], index: 4, kind: output, shape index: {}]  }
   0x1 LB: > { %s357_s16 = sadd.s32 4294967295, %s438_s15   ;;  %p361_p0 = scmp.ge.s32.totalorder %s438_s15, 1  ;;  %s438_s15 = sphi %s465_s15, %s15_s15  }
   0x2   : > { %p164_p1 = scmp.lt.s32.totalorder %s438_s15, 3 }
   0x4   : > { %p165_p2 = pnand %p361_p0, %p164_p1 }
   0x5   : > { %s362_s18 = sshll.u32 (!%p165_p2), %s357_s16, 3 }
   0x6   : > { %168 = sbr.rel (%p165_p2) target bundleno = 162 (0xa2), region = 36  ;;  %p191_p3 = scmp.lt.s32.totalorder (!%p165_p2), %s362_s18, 15 }
   0xb   : > { %v396_v0 = vld [vmem:[%s489_s1] sm:$0xff]  ;;  %s494_s18 = smov (!%p191_p3, %s362_s18), 15  ;;  %vm243_vm0 = vcmask 130048  }
   0xc   : > { %263 = vmatpush.bf16.msra.mxu0 %v396_v0  ;;  %420 = vmatpush.bf16.msra.mxu1 %v396_v0  ;;  %s363_s19 = sshll.u32 %s494_s18, 2  ;;  %v431_v7 = vld [vmem:[%s490_s2] ss:$0 sm:$0xff] }
   0xd   : > { %421 = vmatpush.bf16.msra.mxu2 %v396_v0  ;;  %422 = vmatpush.bf16.msra.mxu3 %v396_v0  ;;  %s194_s22 = scalar_lea.vmem %s488_s0, %s363_s19  ;;  %s200_s27 = scalar_lea.vmem %s492_s4, %s363_s19 }
   0xe   : > { %v392_v1 = vld [vmem:[%s194_s22] sm:$0xff]  ;;  %v393_v2 = vld [vmem:[%s194_s22 + $0x8] sm:$0xff]  ;;  %v394_v3 = vld [vmem:[%s194_s22 + $0x10] sm:$0xff] }
   0xf   : > { %v395_v4 = vld [vmem:[%s194_s22 + $0x18] sm:$0xff]  ;;  %386 = vmatmul.msk.bf16.vlgmr.msra.gmra.mxu0 %vm243_vm0, %v392_v1  ;;  %387 = vmatmul.msk.bf16.vlgmr.msra.gmra.mxu1 %vm243_vm0, %v393_v2 }
  0x10   : > { %388 = vmatmul.msk.bf16.vlgmr.msra.gmra.mxu2 %vm243_vm0, %v394_v3  ;;  %389 = vmatmul.msk.bf16.vlgmr.msra.gmra.mxu3 %vm243_vm0, %v395_v4 }
  0x8c   : > { %v265_v5 = vpop.f32.mrf.mxu0  ;;  %v270_v6 = vpop.f32.mrf.mxu1 }
  0x8d   : > { %v266_v12 = vadd.f32 %v431_v7, %v265_v5  ;;  %v271_v13 = vadd.f32 %v431_v7, %v270_v6 }
  0x93   : > { %v275_v8 = vpop.f32.mrf.mxu2  ;;  %v280_v9 = vpop.f32.mrf.mxu3 }
  0x94   : > { %v267_v10 = vpop.f32.mrf.mxu0  ;;  %v272_v11 = vpop.f32.mrf.mxu1  ;;  %v276_v20 = vadd.f32 %v431_v7, %v275_v8  ;;  %v281_v21 = vadd.f32 %v431_v7, %v280_v9 }
  0x95   : > { %v268_v14 = vadd.f32 %v431_v7, %v267_v10  ;;  %v273_v15 = vadd.f32 %v431_v7, %v272_v11 }
  0x97   : > { %v400_v16 = vpack.c.bf16 %v268_v14, %v266_v12  ;;  %v405_v17 = vpack.c.bf16 %v273_v15, %v271_v13 }
  0x99   : > { %401 = vst [vmem:[%s200_s27] sm:$0xff] %v400_v16  }
  0x9a   : > { %417 = vst [vmem:[%s200_s27 + $0x8] sm:$0xff] %v405_v17  }
  0x9b   : > { %v277_v18 = vpop.f32.mrf.mxu2  ;;  %v282_v19 = vpop.f32.mrf.mxu3 }
  0x9c   : > { %v278_v22 = vadd.f32 %v431_v7, %v277_v18  ;;  %v283_v23 = vadd.f32 %v431_v7, %v282_v19 }
  0x9e   : > { %v410_v24 = vpack.c.bf16 %v278_v22, %v276_v20  ;;  %v415_v25 = vpack.c.bf16 %v283_v23, %v281_v21 }
  0xa0   : > { %418 = vst [vmem:[%s200_s27 + $0x10] sm:$0xff] %v410_v24  }
  0xa1   : > { %419 = vst [vmem:[%s200_s27 + $0x18] sm:$0xff] %v415_v25  }
  0xa2 PF: > { %s15_s15 = sadd.s32 1, %s438_s15  }
  0xa3   : > { %p12_p4 = scmp.ge.s32.totalorder %s15_s15, 4  }
  0xa5   :  { %14 = sbr.rel (!%p12_p4) target bundleno = 1 (0x1), region = 66 }

// kernel: unet3d_forward.12
= control target key start
LH: loop header
LB: loop body
LE: loop exit
PB: predicated region body
PF: predicated region fallthrough
CT: control target
= control target key end

     0   :  { %s1870_s23 = smov 0   ;;  %s2805_s0 = inlined_call_operand.vmem [shape: bf16[1024,80], index: 0, kind: input, shape index: {}]   ;;  %s2806_s1 = inlined_call_operand.vmem [shape: bf16[80,8], index: 1, kind: input, shape index: {}]   ;;  %s2807_s2 = inlined_call_operand.vmem [shape: f32[1,8], index: 2, kind: input, shape index: {}]   ;;  %s2808_s3 = inlined_call_operand.<no memory space> [shape: f32[1], index: 3, kind: input, shape index: {}]   ;;  %s2809_s4 = inlined_call_operand.vmem [shape: bf16[1024,8], index: 4, kind: output, shape index: {0}]   ;;  %s2810_s5 = inlined_call_operand.vmem [shape: f32[2,1,8], index: 5, kind: output, shape index: {1}]   ;;  %s2811_s6 = inlined_call_operand.vmem [shape: f32[2,1,8], index: 6, kind: output, shape index: {2}]  }
   0x1   :  { %12 = sst [smem:[#allocation2]] %s2808_s3 }
   0x2 LB: > { %s1876_s24 = sadd.s32 4294967295, %s1830_s23   ;;  %p1575_p0 = scmp.ge.s32.totalorder %s1830_s23, 1  ;;  %s1830_s23 = sphi %s1870_s23, %s18_s23  }
   0x3   : > { %p219_p1 = scmp.lt.s32.totalorder %s1830_s23, 3 }
   0x5   : > { %p220_p2 = pnand %p1575_p0, %p219_p1 }
   0x6   : > { %s1576_s3 = sshll.u32 (!%p220_p2), %s1876_s24, 6  ;;  %s808_s15 = sld [smem:[#allocation2]] (!%p220_p2) }
   0x7   : > { %223 = sbr.rel (%p220_p2) target bundleno = 397 (0x18d), region = 36  ;;  %p256_p3 = scmp.lt.s32.totalorder (!%p220_p2), %s1576_s3, 127 }
   0x8   : > { %p267_p4 = scmp.lt.s32.totalorder (!%p220_p2), %s1876_s24, 1 }
   0xc   : > { %v1798_v0 = vld [vmem:[%s2806_s1 + $0x20] sm:$0xff]  ;;  %v1797_v1 = vld [vmem:[%s2806_s1 + $0x18] sm:$0xff]  ;;  %v1796_v2 = vld [vmem:[%s2806_s1 + $0x10] sm:$0xff]  ;;  %s2813_s3 = smov (!%p256_p3, %s1576_s3), 127  ;;  %vm542_vm0 = vcmask 654336   ;;  %v1967_v35 = vstv %s808_s15  ;;  %vm1066_vm3 = vcmask 60416  }
   0xd   : > { %642 = vmatpush.bf16.msra.mxu0 %v1798_v0  ;;  %1799 = vmatpush.bf16.msra.mxu1 %v1798_v0  ;;  %v1795_v3 = vld [vmem:[%s2806_s1 + $0x8] sm:$0xff]  ;;  %s1577_s9 = sshll.u32 %s2813_s3, 2  ;;  %v1794_v4 = vld [vmem:[%s2806_s1] sm:$0xff]  ;;  %vm1131_vm4 = vcmask 64512   ;;  %s2815_s24 = smov (!%p267_p4, %s1876_s24), 1 }
   0xe   : > { %1800 = vmatpush.bf16.msra.mxu2 %v1798_v0  ;;  %1801 = vmatpush.bf16.msra.mxu3 %v1798_v0  ;;  %s1904_s14 = scalar_lea.vmem %s2805_s0, %s1577_s9  ;;  %v1965_v33 = vld [vmem:[%s2807_s2] ss:$0 sm:$0xff]  ;;  %s1982_s20 = scalar_lea.vmem %s2809_s4, %s1577_s9 }
   0xf   : > { %v1762_v5 = vld [vmem:[%s1904_s14] sm:$0xff]  ;;  %v1763_v7 = vld [vmem:[%s1904_s14 + $0x8] sm:$0xff]  ;;  %v1764_v10 = vld [vmem:[%s1904_s14 + $0x10] sm:$0xff]  ;;  %s269_s3 = scalar_lea.vmem %s2810_s5, %s2815_s24  ;;  %s272_s29 = scalar_lea.vmem %s2811_s6, %s2815_s24 }
  0x10   : > { %v1770_v6 = vld [vmem:[%s1904_s14 + $0x40] sm:$0xff]  ;;  %v1771_v8 = vld [vmem:[%s1904_s14 + $0x48] sm:$0xff]  ;;  %v1772_v11 = vld [vmem:[%s1904_s14 + $0x50] sm:$0xff] }
  0x11   : > { %643 = vmatpush.bf16.msra.mxu0 %v1797_v1  ;;  %1802 = vmatpush.bf16.msra.mxu1 %v1797_v1  ;;  %v1778_v9 = vld [vmem:[%s1904_s14 + $0x80] sm:$0xff]  ;;  %v1779_v12 = vld [vmem:[%s1904_s14 + $0x88] sm:$0xff]  ;;  %v1765_v13 = vld [vmem:[%s1904_s14 + $0x18] sm:$0xff] }
  0x12   : > { %1803 = vmatpush.bf16.msra.mxu2 %v1797_v1  ;;  %1804 = vmatpush.bf16.msra.mxu3 %v1797_v1  ;;  %v1773_v14 = vld [vmem:[%s1904_s14 + $0x58] sm:$0xff]  ;;  %v1780_v15 = vld [vmem:[%s1904_s14 + $0x90] sm:$0xff]  ;;  %v1786_v16 = vld [vmem:[%s1904_s14 + $0xc0] sm:$0xff] }
  0x13   : > { %v1766_v17 = vld [vmem:[%s1904_s14 + $0x20] sm:$0xff]  ;;  %v1781_v19 = vld [vmem:[%s1904_s14 + $0x98] sm:$0xff]  ;;  %v1787_v20 = vld [vmem:[%s1904_s14 + $0xc8] sm:$0xff] }
  0x14   : > { %v1774_v18 = vld [vmem:[%s1904_s14 + $0x60] sm:$0xff]  ;;  %v1767_v21 = vld [vmem:[%s1904_s14 + $0x28] sm:$0xff]  ;;  %v1788_v24 = vld [vmem:[%s1904_s14 + $0xd0] sm:$0xff] }
  0x15   : > { %644 = vmatpush.bf16.msra.mxu0 %v1796_v2  ;;  %1805 = vmatpush.bf16.msra.mxu1 %v1796_v2  ;;  %v1775_v22 = vld [vmem:[%s1904_s14 + $0x68] sm:$0xff]  ;;  %v1782_v23 = vld [vmem:[%s1904_s14 + $0xa0] sm:$0xff]  ;;  %v1768_v25 = vld [vmem:[%s1904_s14 + $0x30] sm:$0xff] }
  0x16   : > { %1806 = vmatpush.bf16.msra.mxu2 %v1796_v2  ;;  %1807 = vmatpush.bf16.msra.mxu3 %v1796_v2  ;;  %v1776_v26 = vld [vmem:[%s1904_s14 + $0x70] sm:$0xff]  ;;  %v1783_v27 = vld [vmem:[%s1904_s14 + $0xa8] sm:$0xff]  ;;  %v1789_v28 = vld [vmem:[%s1904_s14 + $0xd8] sm:$0xff] }
  0x17   : > { %v1769_v29 = vld [vmem:[%s1904_s14 + $0x38] sm:$0xff]  ;;  %v1784_v31 = vld [vmem:[%s1904_s14 + $0xb0] sm:$0xff]  ;;  %v1790_v32 = vld [vmem:[%s1904_s14 + $0xe0] sm:$0xff] }
  0x18   : > { %v1777_v30 = vld [vmem:[%s1904_s14 + $0x78] sm:$0xff]  ;;  %v1791_v40 = vld [vmem:[%s1904_s14 + $0xe8] sm:$0xff] }
  0x19   : > { %645 = vmatpush.bf16.msra.mxu0 %v1795_v3  ;;  %1808 = vmatpush.bf16.msra.mxu1 %v1795_v3  ;;  %v1785_v39 = vld [vmem:[%s1904_s14 + $0xb8] sm:$0xff] }
  0x1a   : > { %1809 = vmatpush.bf16.msra.mxu2 %v1795_v3  ;;  %1810 = vmatpush.bf16.msra.mxu3 %v1795_v3 }
  0x1d   : > { %646 = vmatpush.bf16.msra.mxu0 %v1794_v4  ;;  %1811 = vmatpush.bf16.msra.mxu1 %v1794_v4 }
  0x1e   : > { %1812 = vmatpush.bf16.msra.mxu2 %v1794_v4  ;;  %1813 = vmatpush.bf16.msra.mxu3 %v1794_v4 }
  0x20   : > { %1728 = vmatmul.msk.bf16.vlgmr.msra.gmra.mxu0 %vm542_vm0, %v1762_v5  ;;  %1736 = vmatmul.msk.bf16.vlgmr.msra.gmra.mxu1 %vm542_vm0, %v1770_v6  ;;  %v1792_v5 = vld [vmem:[%s1904_s14 + $0xf0] sm:$0xff] }
  0x21   : > { %1744 = vmatmul.msk.bf16.vlgmr.msra.gmra.mxu2 %vm542_vm0, %v1778_v9  ;;  %1752 = vmatmul.msk.bf16.vlgmr.msra.gmra.mxu3 %vm542_vm0, %v1786_v16 }
  0x30   : > { %1729 = vmatmul.msk.bf16.gmra.mxu0 %vm542_vm0, %v1763_v7  ;;  %1737 = vmatmul.msk.bf16.gmra.mxu1 %vm542_vm0, %v1771_v8 }
  0x31   : > { %1745 = vmatmul.msk.bf16.gmra.mxu2 %vm542_vm0, %v1779_v12  ;;  %1753 = vmatmul.msk.bf16.gmra.mxu3 %vm542_vm0, %v1787_v20 }
  0x40   : > { %1730 = vmatmul.msk.bf16.gmra.mxu0 %vm542_vm0, %v1764_v10  ;;  %1738 = vmatmul.msk.bf16.gmra.mxu1 %vm542_vm0, %v1772_v11 }
  0x41   : > { %1746 = vmatmul.msk.bf16.gmra.mxu2 %vm542_vm0, %v1780_v15  ;;  %1754 = vmatmul.msk.bf16.gmra.mxu3 %vm542_vm0, %v1788_v24 }
  0x50   : > { %1731 = vmatmul.msk.bf16.gmra.mxu0 %vm542_vm0, %v1765_v13  ;;  %1739 = vmatmul.msk.bf16.gmra.mxu1 %vm542_vm0, %v1773_v14 }
  0x51   : > { %1747 = vmatmul.msk.bf16.gmra.mxu2 %vm542_vm0, %v1781_v19  ;;  %1755 = vmatmul.msk.bf16.gmra.mxu3 %vm542_vm0, %v1789_v28 }
  0x60   : > { %1732 = vmatmul.msk.bf16.gmra.mxu0 %vm542_vm0, %v1766_v17  ;;  %1740 = vmatmul.msk.bf16.gmra.mxu1 %vm542_vm0, %v1774_v18 }
  0x61   : > { %1748 = vmatmul.msk.bf16.gmra.mxu2 %vm542_vm0, %v1782_v23  ;;  %1756 = vmatmul.msk.bf16.gmra.mxu3 %vm542_vm0, %v1790_v32 }
  0x70   : > { %1733 = vmatmul.msk.bf16.gmra.mxu0 %vm542_vm0, %v1767_v21  ;;  %1741 = vmatmul.msk.bf16.gmra.mxu1 %vm542_vm0, %v1775_v22 }
  0x71   : > { %1749 = vmatmul.msk.bf16.gmra.mxu2 %vm542_vm0, %v1783_v27  ;;  %1757 = vmatmul.msk.bf16.gmra.mxu3 %vm542_vm0, %v1791_v40 }
  0x80   : > { %1734 = vmatmul.msk.bf16.gmra.mxu0 %vm542_vm0, %v1768_v25  ;;  %1742 = vmatmul.msk.bf16.gmra.mxu1 %vm542_vm0, %v1776_v26 }
  0x81   : > { %1750 = vmatmul.msk.bf16.gmra.mxu2 %vm542_vm0, %v1784_v31  ;;  %1758 = vmatmul.msk.bf16.gmra.mxu3 %vm542_vm0, %v1792_v5 }
  0x90   : > { %1735 = vmatmul.msk.bf16.gmra.mxu0 %vm542_vm0, %v1769_v29  ;;  %1743 = vmatmul.msk.bf16.gmra.mxu1 %vm542_vm0, %v1777_v30 }
  0x91   : > { %1751 = vmatmul.msk.bf16.gmra.mxu2 %vm542_vm0, %v1785_v39 }
  0x9d   : > { %v648_v34 = vpop.f32.mrf.mxu0  ;;  %v688_v36 = vpop.f32.mrf.mxu1 }
  0x9e   : > { %v649_v37 = vadd.f32 %v1965_v33, %v648_v34  ;;  %v689_v38 = vadd.f32 %v1965_v33, %v688_v36 }
  0xa0   : > { %vm809_vm1 = vcmp.gt.f32.partialorder %v649_v37, 0.0  ;;  %v874_v41 = vmul.f32 %v1967_v35, %v649_v37  ;;  %vm825_vm2 = vcmp.gt.f32.partialorder %v689_v38, 0.0  ;;  %v890_v42 = vmul.f32 %v1967_v35, %v689_v38 }
  0xa2   : > { %v938_v43 = vsel %vm809_vm1, %v649_v37, %v874_v41  ;;  %v1984_v44 = vsel %vm825_vm2, %v689_v38, %v890_v42 }
  0xa3   : > { %v1002_v45 = vpack.c.bf16 %v938_v43, %v938_v43  ;;  %v1018_v46 = vpack.c.bf16 %v1984_v44, %v1984_v44  ;;  %v1265_v53 = vmul.f32 %v938_v43, %v938_v43  ;;  %v1132_v54 = vsel %vm1131_vm4, %v938_v43, 0.0 }
  0xa4   : > { %v728_v15 = vpop.f32.mrf.mxu2 }
  0xa5   : > { %1067 = vst.msk [vmem:[%s1982_s20] sm:$0xf] %vm1066_vm3, %v1002_v45  ;;  %v650_v47 = vpop.f32.mrf.mxu0  ;;  %v690_v48 = vpop.f32.mrf.mxu1  ;;  %v1329_v62 = vsel %vm1131_vm4, %v1265_v53, 0.0  ;;  %v729_v22 = vadd.f32 %v1965_v33, %v728_v15  ;;  %v1793_v45 = vld [vmem:[%s1904_s14 + $0xf8] sm:$0xff] }
  0xa6   : > { %v651_v49 = vadd.f32 %v1965_v33, %v650_v47  ;;  %1083 = vst.msk [vmem:[%s1982_s20 + $0x40] sm:$0xf] %vm1066_vm3, %v1018_v46  ;;  %v691_v50 = vadd.f32 %v1965_v33, %v690_v48  ;;  %1759 = vmatmul.msk.bf16.gmra.mxu3 %vm542_vm0, %v1793_v45 }
  0xa7   : > { %vm841_vm11 = vcmp.gt.f32.partialorder %v729_v22, 0.0  ;;  %v906_v25 = vmul.f32 %v1967_v35, %v729_v22 }
  0xa8   : > { %vm810_vm5 = vcmp.gt.f32.partialorder %v651_v49, 0.0  ;;  %v875_v51 = vmul.f32 %v1967_v35, %v651_v49  ;;  %vm826_vm6 = vcmp.gt.f32.partialorder %v691_v50, 0.0  ;;  %v891_v52 = vmul.f32 %v1967_v35, %v691_v50 }
  0xa9   : > { %v2035_v34 = vsel %vm841_vm11, %v729_v22, %v906_v25 }
  0xaa   : > { %v939_v55 = vsel %vm810_vm5, %v651_v49, %v875_v51  ;;  %v1997_v56 = vsel %vm826_vm6, %v691_v50, %v891_v52  ;;  %v1034_v40 = vpack.c.bf16 %v2035_v34, %v2035_v34 }
  0xab   : > { %v1003_v57 = vpack.c.bf16 %v939_v55, %v939_v55  ;;  %v1133_v58 = vsel %vm1131_vm4, %v939_v55, 0.0  ;;  %v1266_v59 = vmul.f32 %v939_v55, %v939_v55  ;;  %v1019_v60 = vpack.c.bf16 %v1997_v56, %v1997_v56 }
  0xac   : > { %v1134_v61 = vadd.f32 %v1133_v58, %v1132_v54  ;;  %v730_v36 = vpop.f32.mrf.mxu2  ;;  %1099 = vst.msk [vmem:[%s1982_s20 + $0x80] sm:$0xf] %vm1066_vm3, %v1034_v40 }
  0xad   : > { %1068 = vst.msk [vmem:[%s1982_s20 + $0x4] sm:$0xf] %vm1066_vm3, %v1003_v57  ;;  %v1330_v63 = vsel %vm1131_vm4, %v1266_v59, 0.0  ;;  %v653_v0 = vpop.f32.mrf.mxu0  ;;  %v693_v1 = vpop.f32.mrf.mxu1  ;;  %v731_v46 = vadd.f32 %v1965_v33, %v730_v36 }
  0xae   : > { %v1331_v2 = vadd.f32 %v1330_v63, %v1329_v62  ;;  %v654_v3 = vadd.f32 %v1965_v33, %v653_v0  ;;  %1084 = vst.msk [vmem:[%s1982_s20 + $0x44] sm:$0xf] %vm1066_vm3, %v1019_v60  ;;  %v694_v4 = vadd.f32 %v1965_v33, %v693_v1 }
  0xaf   : > { %vm842_vm14 = vcmp.gt.f32.partialorder %v731_v46, 0.0  ;;  %v907_v49 = vmul.f32 %v1967_v35, %v731_v46 }
  0xb0   : > { %vm811_vm7 = vcmp.gt.f32.partialorder %v654_v3, 0.0  ;;  %v876_v6 = vmul.f32 %v1967_v35, %v654_v3  ;;  %vm827_vm8 = vcmp.gt.f32.partialorder %v694_v4, 0.0  ;;  %v892_v7 = vmul.f32 %v1967_v35, %v694_v4 }
  0xb1   : > { %v2061_v58 = vsel %vm842_vm14, %v731_v46, %v907_v49 }
  0xb2   : > { %v940_v8 = vsel %vm811_vm7, %v654_v3, %v876_v6  ;;  %v2014_v9 = vsel %vm827_vm8, %v694_v4, %v892_v7  ;;  %v1035_v63 = vpack.c.bf16 %v2061_v58, %v2061_v58 }
  0xb3   : > { %v1004_v10 = vpack.c.bf16 %v940_v8, %v940_v8  ;;  %v1135_v11 = vsel %vm1131_vm4, %v940_v8, 0.0  ;;  %v1267_v12 = vmul.f32 %v940_v8, %v940_v8  ;;  %v1020_v13 = vpack.c.bf16 %v2014_v9, %v2014_v9 }
  0xb4   : > { %v1136_v14 = vadd.f32 %v1135_v11, %v1134_v61  ;;  %v733_v59 = vpop.f32.mrf.mxu2  ;;  %1100 = vst.msk [vmem:[%s1982_s20 + $0x84] sm:$0xf] %vm1066_vm3, %v1035_v63 }
  0xb5   : > { %1069 = vst.msk [vmem:[%s1982_s20 + $0x8] sm:$0xf] %vm1066_vm3, %v1004_v10  ;;  %v1332_v16 = vsel %vm1131_vm4, %v1267_v12, 0.0  ;;  %v655_v17 = vpop.f32.mrf.mxu0  ;;  %v695_v18 = vpop.f32.mrf.mxu1  ;;  %v734_v3 = vadd.f32 %v1965_v33, %v733_v59 }
  0xb6   : > { %v1333_v19 = vadd.f32 %v1332_v16, %v1331_v2  ;;  %v656_v20 = vadd.f32 %v1965_v33, %v655_v17  ;;  %1085 = vst.msk [vmem:[%s1982_s20 + $0x48] sm:$0xf] %vm1066_vm3, %v1020_v13  ;;  %v696_v21 = vadd.f32 %v1965_v33, %v695_v18 }
  0xb7   : > { %vm843_vm1 = vcmp.gt.f32.partialorder %v734_v3, 0.0  ;;  %v908_v6 = vmul.f32 %v1967_v35, %v734_v3 }
  0xb8   : > { %vm812_vm9 = vcmp.gt.f32.partialorder %v656_v20, 0.0  ;;  %v877_v23 = vmul.f32 %v1967_v35, %v656_v20  ;;  %vm828_vm10 = vcmp.gt.f32.partialorder %v696_v21, 0.0  ;;  %v893_v24 = vmul.f32 %v1967_v35, %v696_v21 }
  0xb9   : > { %v2088_v12 = vsel %vm843_vm1, %v734_v3, %v908_v6 }
  0xba   : > { %v941_v26 = vsel %vm812_vm9, %v656_v20, %v877_v23  ;;  %v2030_v27 = vsel %vm828_vm10, %v696_v21, %v893_v24  ;;  %v1036_v16 = vpack.c.bf16 %v2088_v12, %v2088_v12 }
  0xbb   : > { %v1005_v28 = vpack.c.bf16 %v941_v26, %v941_v26  ;;  %v1137_v29 = vsel %vm1131_vm4, %v941_v26, 0.0  ;;  %v1268_v30 = vmul.f32 %v941_v26, %v941_v26  ;;  %v1021_v31 = vpack.c.bf16 %v2030_v27, %v2030_v27 }
  0xbc   : > { %v1138_v32 = vadd.f32 %v1137_v29, %v1136_v14  ;;  %v735_v13 = vpop.f32.mrf.mxu2  ;;  %1101 = vst.msk [vmem:[%s1982_s20 + $0x88] sm:$0xf] %vm1066_vm3, %v1036_v16 }
  0xbd   : > { %1070 = vst.msk [vmem:[%s1982_s20 + $0xc] sm:$0xf] %vm1066_vm3, %v1005_v28  ;;  %v1334_v37 = vsel %vm1131_vm4, %v1268_v30, 0.0  ;;  %v658_v38 = vpop.f32.mrf.mxu0  ;;  %v698_v39 = vpop.f32.mrf.mxu1 }
  0xbe   : > { %v1335_v41 = vadd.f32 %v1334_v37, %v1333_v19  ;;  %v659_v42 = vadd.f32 %v1965_v33, %v658_v38  ;;  %1086 = vst.msk [vmem:[%s1982_s20 + $0x4c] sm:$0xf] %vm1066_vm3, %v1021_v31  ;;  %v699_v43 = vadd.f32 %v1965_v33, %v698_v39  ;;  %v736_v19 = vadd.f32 %v1965_v33, %v735_v13  ;;  %v768_v30 = vpop.f32.mrf.mxu3 }
  0xbf   : > { %v769_v40 = vadd.f32 %v1965_v33, %v768_v30 }
  0xc0   : > { %vm813_vm12 = vcmp.gt.f32.partialorder %v659_v42, 0.0  ;;  %v878_v47 = vmul.f32 %v1967_v35, %v659_v42  ;;  %vm829_vm13 = vcmp.gt.f32.partialorder %v699_v43, 0.0  ;;  %v894_v48 = vmul.f32 %v1967_v35, %v699_v43 }
  0xc1   : > { %vm844_vm6 = vcmp.gt.f32.partialorder %v736_v19, 0.0  ;;  %v909_v22 = vmul.f32 %v1967_v35, %v736_v19  ;;  %v922_v49 = vmul.f32 %v1967_v35, %v769_v40  ;;  %vm857_vm10 = vcmp.gt.f32.partialorder %v769_v40, 0.0 }
  0xc2   : > { %v942_v50 = vsel %vm813_vm12, %v659_v42, %v878_v47  ;;  %v2054_v51 = vsel %vm829_vm13, %v699_v43, %v894_v48 }
  0xc3   : > { %v1006_v52 = vpack.c.bf16 %v942_v50, %v942_v50  ;;  %v1139_v53 = vsel %vm1131_vm4, %v942_v50, 0.0  ;;  %v1269_v54 = vmul.f32 %v942_v50, %v942_v50  ;;  %v1022_v55 = vpack.c.bf16 %v2054_v51, %v2054_v51 }
  0xc4   : > { %v2059_v57 = vadd.f32 %v1139_v53, %v1138_v32  ;;  %v2112_v28 = vsel %vm844_vm6, %v736_v19, %v909_v22  ;;  %v738_v29 = vpop.f32.mrf.mxu2 }
  0xc5   : > { %1071 = vst.msk [vmem:[%s1982_s20 + $0x10] sm:$0xf] %vm1066_vm3, %v1006_v52  ;;  %v1336_v60 = vsel %vm1131_vm4, %v1269_v54, 0.0  ;;  %v660_v61 = vpop.f32.mrf.mxu0  ;;  %v700_v62 = vpop.f32.mrf.mxu1  ;;  %v1037_v36 = vpack.c.bf16 %v2112_v28, %v2112_v28  ;;  %v739_v39 = vadd.f32 %v1965_v33, %v738_v29 }
  0xc6   : > { %v2068_v0 = vadd.f32 %v1336_v60, %v1335_v41  ;;  %v661_v1 = vadd.f32 %v1965_v33, %v660_v61  ;;  %1087 = vst.msk [vmem:[%s1982_s20 + $0x50] sm:$0xf] %vm1066_vm3, %v1022_v55  ;;  %v701_v2 = vadd.f32 %v1965_v33, %v700_v62  ;;  %v770_v53 = vpop.f32.mrf.mxu3  ;;  %v2150_v62 = vsel %vm857_vm10, %v769_v40, %v922_v49 }
  0xc7   : > { %1102 = vst.msk [vmem:[%s1982_s20 + $0x8c] sm:$0xf] %vm1066_vm3, %v1037_v36  ;;  %vm845_vm9 = vcmp.gt.f32.partialorder %v739_v39, 0.0  ;;  %v910_v43 = vmul.f32 %v1967_v35, %v739_v39 }
  0xc8   : > { %vm814_vm15 = vcmp.gt.f32.partialorder %v661_v1, 0.0  ;;  %v879_v4 = vmul.f32 %v1967_v35, %v661_v1  ;;  %vm830_vm0 = vcmp.gt.f32.partialorder %v701_v2, 0.0  ;;  %v895_v5 = vmul.f32 %v1967_v35, %v701_v2 }
  0xc9   : > { %v2138_v50 = vsel %vm845_vm9, %v739_v39, %v910_v43 }
  0xca   : > { %v2080_v7 = vsel %vm814_vm15, %v661_v1, %v879_v4  ;;  %v2082_v8 = vsel %vm830_vm0, %v701_v2, %v895_v5  ;;  %v1038_v59 = vpack.c.bf16 %v2138_v50, %v2138_v50  ;;  %v771_v1 = vadd.f32 %v1965_v33, %v770_v53 }
  0xcb   : > { %v1007_v10 = vpack.c.bf16 %v2080_v7, %v2080_v7  ;;  %v1023_v11 = vpack.c.bf16 %v2082_v8, %v2082_v8  ;;  %v1050_v4 = vpack.c.bf16 %v2150_v62, %v2150_v62 }
  0xcc   : > { %v740_v52 = vpop.f32.mrf.mxu2  ;;  %1103 = vst.msk [vmem:[%s1982_s20 + $0x90] sm:$0xf] %vm1066_vm3, %v1038_v59  ;;  %vm858_vm14 = vcmp.gt.f32.partialorder %v771_v1, 0.0  ;;  %v923_v19 = vmul.f32 %v1967_v35, %v771_v1 }
  0xcd   : > { %1072 = vst.msk [vmem:[%s1982_s20 + $0x14] sm:$0xf] %vm1066_vm3, %v1007_v10  ;;  %v663_v14 = vpop.f32.mrf.mxu0  ;;  %v703_v15 = vpop.f32.mrf.mxu1  ;;  %v741_v63 = vadd.f32 %v1965_v33, %v740_v52 }
  0xce   : > { %v664_v17 = vadd.f32 %v1965_v33, %v663_v14  ;;  %1088 = vst.msk [vmem:[%s1982_s20 + $0x54] sm:$0xf] %vm1066_vm3, %v1023_v11  ;;  %v704_v18 = vadd.f32 %v1965_v33, %v703_v15  ;;  %v773_v15 = vpop.f32.mrf.mxu3 }
  0xcf   : > { %vm846_vm13 = vcmp.gt.f32.partialorder %v741_v63, 0.0  ;;  %v911_v10 = vmul.f32 %v1967_v35, %v741_v63  ;;  %1115 = vst.msk [vmem:[%s1982_s20 + $0xc0] sm:$0xf] %vm1066_vm3, %v1050_v4 }
  0xd0   : > { %vm815_vm2 = vcmp.gt.f32.partialorder %v664_v17, 0.0  ;;  %v880_v20 = vmul.f32 %v1967_v35, %v664_v17  ;;  %vm831_vm5 = vcmp.gt.f32.partialorder %v704_v18, 0.0  ;;  %v896_v21 = vmul.f32 %v1967_v35, %v704_v18 }
  0xd2   : > { %v2104_v23 = vsel %vm815_vm2, %v664_v17, %v880_v20  ;;  %v2106_v24 = vsel %vm831_vm5, %v704_v18, %v896_v21  ;;  %v2171_v18 = vsel %vm846_vm13, %v741_v63, %v911_v10 }
  0xd3   : > { %v1008_v25 = vpack.c.bf16 %v2104_v23, %v2104_v23  ;;  %v1024_v26 = vpack.c.bf16 %v2106_v24, %v2106_v24  ;;  %v1039_v22 = vpack.c.bf16 %v2171_v18, %v2171_v18 }
  0xd4   : > { %v743_v14 = vpop.f32.mrf.mxu2 }
  0xd5   : > { %1073 = vst.msk [vmem:[%s1982_s20 + $0x18] sm:$0xf] %vm1066_vm3, %v1008_v25  ;;  %v665_v31 = vpop.f32.mrf.mxu0  ;;  %v705_v32 = vpop.f32.mrf.mxu1  ;;  %v2180_v25 = vsel %vm858_vm14, %v771_v1, %v923_v19  ;;  %v744_v36 = vadd.f32 %v1965_v33, %v743_v14 }
  0xd6   : > { %v666_v37 = vadd.f32 %v1965_v33, %v665_v31  ;;  %1089 = vst.msk [vmem:[%s1982_s20 + $0x58] sm:$0xf] %vm1066_vm3, %v1024_v26  ;;  %v706_v38 = vadd.f32 %v1965_v33, %v705_v32  ;;  %v1051_v30 = vpack.c.bf16 %v2180_v25, %v2180_v25 }
  0xd7   : > { %1104 = vst.msk [vmem:[%s1982_s20 + $0x94] sm:$0xf] %vm1066_vm3, %v1039_v22  ;;  %vm847_vm1 = vcmp.gt.f32.partialorder %v744_v36, 0.0 }
  0xd8   : > { %vm816_vm7 = vcmp.gt.f32.partialorder %v666_v37, 0.0  ;;  %v881_v41 = vmul.f32 %v1967_v35, %v666_v37  ;;  %vm832_vm8 = vcmp.gt.f32.partialorder %v706_v38, 0.0  ;;  %v897_v42 = vmul.f32 %v1967_v35, %v706_v38  ;;  %1116 = vst.msk [vmem:[%s1982_s20 + $0xc4] sm:$0xf] %vm1066_vm3, %v1051_v30 }
  0xda   : > { %v2129_v45 = vsel %vm816_vm7, %v666_v37, %v881_v41  ;;  %v2131_v46 = vsel %vm832_vm8, %v706_v38, %v897_v42  ;;  %v774_v37 = vadd.f32 %v1965_v33, %v773_v15  ;;  %v775_v41 = vpop.f32.mrf.mxu3 }
  0xdb   : > { %v1009_v47 = vpack.c.bf16 %v2129_v45, %v2129_v45  ;;  %v1025_v48 = vpack.c.bf16 %v2131_v46, %v2131_v46  ;;  %v776_v10 = vadd.f32 %v1965_v33, %v775_v41 }
  0xdc   : > { %v745_v40 = vpop.f32.mrf.mxu2  ;;  %vm859_vm2 = vcmp.gt.f32.partialorder %v774_v37, 0.0  ;;  %v924_v53 = vmul.f32 %v1967_v35, %v774_v37 }
  0xdd   : > { %1074 = vst.msk [vmem:[%s1982_s20 + $0x1c] sm:$0xf] %vm1066_vm3, %v1009_v47  ;;  %v668_v54 = vpop.f32.mrf.mxu0  ;;  %v708_v55 = vpop.f32.mrf.mxu1  ;;  %v912_v47 = vmul.f32 %v1967_v35, %v744_v36  ;;  %vm860_vm8 = vcmp.gt.f32.partialorder %v776_v10, 0.0 }
  0xde   : > { %v669_v60 = vadd.f32 %v1965_v33, %v668_v54  ;;  %1090 = vst.msk [vmem:[%s1982_s20 + $0x5c] sm:$0xf] %vm1066_vm3, %v1025_v48  ;;  %v709_v61 = vadd.f32 %v1965_v33, %v708_v55 }
  0xdf   : > { %v2207_v52 = vsel %vm847_vm1, %v744_v36, %v912_v47  ;;  %v1141_v36 = vsel %vm1131_vm4, %v2080_v7, 0.0 }
  0xe0   : > { %vm817_vm11 = vcmp.gt.f32.partialorder %v669_v60, 0.0  ;;  %v882_v2 = vmul.f32 %v1967_v35, %v669_v60  ;;  %vm833_vm12 = vcmp.gt.f32.partialorder %v709_v61, 0.0  ;;  %v898_v3 = vmul.f32 %v1967_v35, %v709_v61 }
  0xe1   : > { %v1040_v59 = vpack.c.bf16 %v2207_v52, %v2207_v52 }
  0xe2   : > { %v2158_v5 = vsel %vm817_vm11, %v669_v60, %v882_v2  ;;  %v2160_v6 = vsel %vm833_vm12, %v709_v61, %v898_v3  ;;  %v2214_v60 = vsel %vm859_vm2, %v774_v37, %v924_v53  ;;  %v746_v61 = vadd.f32 %v1965_v33, %v745_v40 }
  0xe3   : > { %v1010_v11 = vpack.c.bf16 %v2158_v5, %v2158_v5  ;;  %v1026_v13 = vpack.c.bf16 %v2160_v6, %v2160_v6  ;;  %v1052_v2 = vpack.c.bf16 %v2214_v60, %v2214_v60  ;;  %1105 = vst.msk [vmem:[%s1982_s20 + $0x98] sm:$0xf] %vm1066_vm3, %v1040_v59  ;;  %v1282_v59 = vmul.f32 %v1997_v56, %v1997_v56 }
  0xe4   : > { %vm848_vm7 = vcmp.gt.f32.partialorder %v746_v61, 0.0 }
  0xe5   : > { %1075 = vst.msk [vmem:[%s1982_s20 + $0x20] sm:$0xf] %vm1066_vm3, %v1010_v11  ;;  %v670_v16 = vpop.f32.mrf.mxu0  ;;  %v710_v17 = vpop.f32.mrf.mxu1 }
  0xe6   : > { %v671_v20 = vadd.f32 %v1965_v33, %v670_v16  ;;  %1091 = vst.msk [vmem:[%s1982_s20 + $0x60] sm:$0xf] %vm1066_vm3, %v1026_v13  ;;  %v711_v21 = vadd.f32 %v1965_v33, %v710_v17  ;;  %v748_v11 = vpop.f32.mrf.mxu2  ;;  %v778_v13 = vpop.f32.mrf.mxu3  ;;  %v913_v16 = vmul.f32 %v1967_v35, %v746_v61  ;;  %v1270_v17 = vmul.f32 %v2080_v7, %v2080_v7 }
  0xe7   : > { %1117 = vst.msk [vmem:[%s1982_s20 + $0xc8] sm:$0xf] %vm1066_vm3, %v1052_v2  ;;  %v1271_v7 = vmul.f32 %v2104_v23, %v2104_v23 }
  0xe8   : > { %vm818_vm15 = vcmp.gt.f32.partialorder %v671_v20, 0.0  ;;  %v883_v26 = vmul.f32 %v1967_v35, %v671_v20  ;;  %vm834_vm0 = vcmp.gt.f32.partialorder %v711_v21, 0.0  ;;  %v899_v29 = vmul.f32 %v1967_v35, %v711_v21 }
  0xe9   : > { %v2243_v22 = vsel %vm848_vm7, %v746_v61, %v913_v16  ;;  %v1272_v61 = vmul.f32 %v2129_v45, %v2129_v45  ;;  %v1340_v16 = vsel %vm1131_vm4, %v1271_v7, 0.0  ;;  %v2324_v7 = vsel %vm1131_vm4, %v1282_v59, 0.0 }
  0xea   : > { %v2188_v31 = vsel %vm818_vm15, %v671_v20, %v883_v26  ;;  %v2190_v32 = vsel %vm834_vm0, %v711_v21, %v899_v29  ;;  %v1281_v21 = vmul.f32 %v1984_v44, %v1984_v44  ;;  %v925_v26 = vmul.f32 %v1967_v35, %v776_v10 }
  0xeb   : > { %v1011_v38 = vpack.c.bf16 %v2188_v31, %v2188_v31  ;;  %v1027_v39 = vpack.c.bf16 %v2190_v32, %v2190_v32  ;;  %v1041_v37 = vpack.c.bf16 %v2243_v22, %v2243_v22 }
  0xec   : > { %v2276_v53 = vsel %vm1131_vm4, %v1281_v21, 0.0 }
  0xed   : > { %1076 = vst.msk [vmem:[%s1982_s20 + $0x24] sm:$0xf] %vm1066_vm3, %v1011_v38  ;;  %v673_v42 = vpop.f32.mrf.mxu0  ;;  %v713_v43 = vpop.f32.mrf.mxu1  ;;  %v2252_v38 = vsel %vm860_vm8, %v776_v10, %v925_v26 }
  0xee   : > { %v674_v48 = vadd.f32 %v1965_v33, %v673_v42  ;;  %1092 = vst.msk [vmem:[%s1982_s20 + $0x64] sm:$0xf] %vm1066_vm3, %v1027_v39  ;;  %v714_v49 = vadd.f32 %v1965_v33, %v713_v43  ;;  %v1338_v39 = vsel %vm1131_vm4, %v1270_v17, 0.0  ;;  %v1053_v42 = vpack.c.bf16 %v2252_v38, %v2252_v38 }
  0xef   : > { %v1143_v43 = vsel %vm1131_vm4, %v2104_v23, 0.0  ;;  %1106 = vst.msk [vmem:[%s1982_s20 + $0x9c] sm:$0xf] %vm1066_vm3, %v1041_v37  ;;  %v750_v23 = vpop.f32.mrf.mxu2  ;;  %v1145_v17 = vsel %vm1131_vm4, %v2129_v45, 0.0  ;;  %v1273_v37 = vmul.f32 %v2158_v5, %v2158_v5 }
  0xf0   : > { %vm819_vm5 = vcmp.gt.f32.partialorder %v674_v48, 0.0  ;;  %v884_v54 = vmul.f32 %v1967_v35, %v674_v48  ;;  %vm835_vm6 = vcmp.gt.f32.partialorder %v714_v49, 0.0  ;;  %v900_v55 = vmul.f32 %v1967_v35, %v714_v49  ;;  %1118 = vst.msk [vmem:[%s1982_s20 + $0xcc] sm:$0xf] %vm1066_vm3, %v1053_v42 }
  0xf1   : > { %v751_v26 = vadd.f32 %v1965_v33, %v750_v23  ;;  %v1274_v23 = vmul.f32 %v2188_v31, %v2188_v31 }
  0xf2   : > { %v2217_v63 = vsel %vm819_vm5, %v674_v48, %v884_v54  ;;  %v2219_v1 = vsel %vm835_vm6, %v714_v49, %v900_v55  ;;  %v2273_v49 = vsel %vm1131_vm4, %v1984_v44, 0.0  ;;  %v1142_v54 = vadd.f32 %v1141_v36, %v2059_v57  ;;  %v780_v55 = vpop.f32.mrf.mxu3 }
  0xf3   : > { %v1012_v3 = vpack.c.bf16 %v2217_v63, %v2217_v63  ;;  %v1028_v4 = vpack.c.bf16 %v2219_v1, %v2219_v1  ;;  %v1339_v57 = vadd.f32 %v1338_v39, %v2068_v0  ;;  %v1147_v36 = vsel %vm1131_vm4, %v2158_v5, 0.0 }
  0xf4   : > { %v1144_v10 = vadd.f32 %v1143_v43, %v1142_v54  ;;  %v2321_v43 = vsel %vm1131_vm4, %v1997_v56, 0.0  ;;  %vm850_vm15 = vcmp.gt.f32.partialorder %v751_v26, 0.0  ;;  %v915_v59 = vmul.f32 %v1967_v35, %v751_v26 }
  0xf5   : > { %1077 = vst.msk [vmem:[%s1982_s20 + $0x28] sm:$0xf] %vm1066_vm3, %v1012_v3  ;;  %v675_v14 = vpop.f32.mrf.mxu0  ;;  %v715_v15 = vpop.f32.mrf.mxu1  ;;  %v749_v3 = vadd.f32 %v1965_v33, %v748_v11 }
  0xf6   : > { %v676_v19 = vadd.f32 %v1965_v33, %v675_v14  ;;  %1093 = vst.msk [vmem:[%s1982_s20 + $0x68] sm:$0xf] %vm1066_vm3, %v1028_v4  ;;  %v716_v20 = vadd.f32 %v1965_v33, %v715_v15  ;;  %v779_v4 = vadd.f32 %v1965_v33, %v778_v13  ;;  %v1342_v13 = vsel %vm1131_vm4, %v1272_v61, 0.0 }
  0xf7   : > { %vm849_vm11 = vcmp.gt.f32.partialorder %v749_v3, 0.0  ;;  %v753_v54 = vpop.f32.mrf.mxu2 }
  0xf8   : > { %vm820_vm9 = vcmp.gt.f32.partialorder %v676_v19, 0.0  ;;  %v885_v29 = vmul.f32 %v1967_v35, %v676_v19  ;;  %vm836_vm10 = vcmp.gt.f32.partialorder %v716_v20, 0.0  ;;  %v901_v30 = vmul.f32 %v1967_v35, %v716_v20 }
  0xf9   : > { %v926_v21 = vmul.f32 %v1967_v35, %v779_v4  ;;  %vm861_vm14 = vcmp.gt.f32.partialorder %v779_v4, 0.0 }
  0xfa   : > { %v2255_v40 = vsel %vm820_vm9, %v676_v19, %v885_v29  ;;  %v2257_v41 = vsel %vm836_vm10, %v716_v20, %v901_v30  ;;  %v914_v19 = vmul.f32 %v1967_v35, %v749_v3  ;;  %v783_v5 = vpop.f32.mrf.mxu3 }
  0xfb   : > { %v1013_v47 = vpack.c.bf16 %v2255_v40, %v2255_v40  ;;  %v1029_v48 = vpack.c.bf16 %v2257_v41, %v2257_v41 }
  0xfc   : > { %v2301_v20 = vsel %vm849_vm11, %v749_v3, %v914_v19 }
  0xfd   : > { %1078 = vst.msk [vmem:[%s1982_s20 + $0x2c] sm:$0xf] %vm1066_vm3, %v1013_v47  ;;  %v678_v44 = vpop.f32.mrf.mxu0  ;;  %v718_v2 = vpop.f32.mrf.mxu1  ;;  %v1042_v30 = vpack.c.bf16 %v2301_v20, %v2301_v20  ;;  %v1341_v47 = vadd.f32 %v1340_v16, %v1339_v57 }
  0xfe   : > { %v679_v14 = vadd.f32 %v1965_v33, %v678_v44  ;;  %1094 = vst.msk [vmem:[%s1982_s20 + $0x6c] sm:$0xf] %vm1066_vm3, %v1029_v48  ;;  %v719_v15 = vadd.f32 %v1965_v33, %v718_v2  ;;  %v1146_v48 = vadd.f32 %v1145_v17, %v1144_v10  ;;  %v2332_v44 = vsel %vm861_vm14, %v779_v4, %v926_v21 }
  0xff   : > { %1107 = vst.msk [vmem:[%s1982_s20 + $0xa0] sm:$0xf] %vm1066_vm3, %v1042_v30  ;;  %v1343_v2 = vadd.f32 %v1342_v13, %v1341_v47  ;;  %v781_v10 = vadd.f32 %v1965_v33, %v780_v55  ;;  %v1054_v4 = vpack.c.bf16 %v2332_v44, %v2332_v44  ;;  %v1149_v17 = vsel %vm1131_vm4, %v2188_v31, 0.0 }
 0x100   : > { %vm821_vm12 = vcmp.gt.f32.partialorder %v679_v14, 0.0  ;;  %v886_v11 = vmul.f32 %v1967_v35, %v679_v14  ;;  %vm837_vm13 = vcmp.gt.f32.partialorder %v719_v15, 0.0  ;;  %v902_v0 = vmul.f32 %v1967_v35, %v719_v15 }
 0x101   : > { %v1148_v3 = vadd.f32 %v1147_v36, %v1146_v48  ;;  %v1346_v55 = vsel %vm1131_vm4, %v1274_v23, 0.0  ;;  %1119 = vst.msk [vmem:[%s1982_s20 + $0xd0] sm:$0xf] %vm1066_vm3, %v1054_v4  ;;  %vm862_vm2 = vcmp.gt.f32.partialorder %v781_v10, 0.0  ;;  %v927_v31 = vmul.f32 %v1967_v35, %v781_v10 }
 0x102   : > { %v2305_v29 = vsel %vm821_vm12, %v679_v14, %v886_v11  ;;  %v2307_v45 = vsel %vm837_vm13, %v719_v15, %v902_v0  ;;  %v1344_v14 = vsel %vm1131_vm4, %v1273_v37, 0.0  ;;  %v1275_v15 = vmul.f32 %v2217_v63, %v2217_v63 }
 0x103   : > { %v1014_v39 = vpack.c.bf16 %v2305_v29, %v2305_v29  ;;  %v1030_v42 = vpack.c.bf16 %v2307_v45, %v2307_v45  ;;  %v2348_v11 = vsel %vm850_vm15, %v751_v26, %v915_v59  ;;  %v1345_v21 = vadd.f32 %v1344_v14, %v1343_v2 }
 0x104   : > { %v1043_v13 = vpack.c.bf16 %v2348_v11, %v2348_v11  ;;  %v1151_v26 = vsel %vm1131_vm4, %v2217_v63, 0.0  ;;  %v1348_v36 = vsel %vm1131_vm4, %v1275_v15, 0.0  ;;  %v1150_v47 = vadd.f32 %v1149_v17, %v1148_v3 }
 0x105   : > { %1079 = vst.msk [vmem:[%s1982_s20 + $0x30] sm:$0xf] %vm1066_vm3, %v1014_v39  ;;  %v680_v61 = vpop.f32.mrf.mxu0  ;;  %v720_v56 = vpop.f32.mrf.mxu1  ;;  %v1347_v48 = vadd.f32 %v1346_v55, %v1345_v21  ;;  %v2374_v63 = vmul.f32 %v2014_v9, %v2014_v9  ;;  %v1276_v59 = vmul.f32 %v2255_v40, %v2255_v40  ;;  %v2381_v3 = vsel %vm862_vm2, %v781_v10, %v927_v31 }
 0x106   : > { %v681_v57 = vadd.f32 %v1965_v33, %v680_v61  ;;  %1095 = vst.msk [vmem:[%s1982_s20 + $0x70] sm:$0xf] %vm1066_vm3, %v1030_v42  ;;  %v721_v16 = vadd.f32 %v1965_v33, %v720_v56  ;;  %v2366_v42 = vsel %vm1131_vm4, %v2014_v9, 0.0  ;;  %v755_v61 = vpop.f32.mrf.mxu2  ;;  %v2370_v56 = vpop.f32.mrf.mxu3  ;;  %v754_v14 = vadd.f32 %v1965_v33, %v753_v54 }
 0x107   : > { %1108 = vst.msk [vmem:[%s1982_s20 + $0xa4] sm:$0xf] %vm1066_vm3, %v1043_v13  ;;  %v1152_v15 = vadd.f32 %v1151_v26, %v1150_v47  ;;  %v1349_v4 = vadd.f32 %v1348_v36, %v1347_v48  ;;  %v1055_v9 = vpack.c.bf16 %v2381_v3, %v2381_v3  ;;  %v1153_v17 = vsel %vm1131_vm4, %v2255_v40, 0.0 }
 0x108   : > { %vm822_vm0 = vcmp.gt.f32.partialorder %v681_v57, 0.0  ;;  %v887_v19 = vmul.f32 %v1967_v35, %v681_v57  ;;  %vm838_vm1 = vcmp.gt.f32.partialorder %v721_v16, 0.0  ;;  %v903_v0 = vmul.f32 %v1967_v35, %v721_v16 }
 0x109   : > { %vm851_vm5 = vcmp.gt.f32.partialorder %v754_v14, 0.0  ;;  %1120 = vst.msk [vmem:[%s1982_s20 + $0xd4] sm:$0xf] %vm1066_vm3, %v1055_v9  ;;  %v916_v55 = vmul.f32 %v1967_v35, %v754_v14  ;;  %v1350_v13 = vsel %vm1131_vm4, %v1276_v59, 0.0  ;;  %v1155_v40 = vsel %vm1131_vm4, %v2305_v29, 0.0 }
 0x10a   : > { %v951_v30 = vsel %vm822_vm0, %v681_v57, %v887_v19  ;;  %v2360_v39 = vsel %vm838_vm1, %v721_v16, %v903_v0  ;;  %v1277_v19 = vmul.f32 %v2305_v29, %v2305_v29  ;;  %v784_v0 = vadd.f32 %v1965_v33, %v783_v5 }
 0x10b   : > { %v1015_v37 = vpack.c.bf16 %v951_v30, %v951_v30  ;;  %v1031_v23 = vpack.c.bf16 %v2360_v39, %v2360_v39  ;;  %v1278_v31 = vmul.f32 %v951_v30, %v951_v30  ;;  %v2403_v36 = vsel %vm851_vm5, %v754_v14, %v916_v55 }
 0x10c   : > { %v1154_v47 = vadd.f32 %v1153_v17, %v1152_v15  ;;  %vm863_vm8 = vcmp.gt.f32.partialorder %v784_v0, 0.0  ;;  %v1352_v5 = vsel %vm1131_vm4, %v1277_v19, 0.0  ;;  %v1157_v29 = vsel %vm1131_vm4, %v951_v30, 0.0 }
 0x10d   : > { %1080 = vst.msk [vmem:[%s1982_s20 + $0x34] sm:$0xf] %vm1066_vm3, %v1015_v37  ;;  %v683_v2 = vpop.f32.mrf.mxu0  ;;  %v723_v57 = vpop.f32.mrf.mxu1  ;;  %v928_v37 = vmul.f32 %v1967_v35, %v784_v0  ;;  %v1044_v19 = vpack.c.bf16 %v2403_v36, %v2403_v36  ;;  %v1354_v30 = vsel %vm1131_vm4, %v1278_v31, 0.0  ;;  %v1284_v55 = vmul.f32 %v2030_v27, %v2030_v27 }
 0x10e   : > { %v684_v16 = vadd.f32 %v1965_v33, %v683_v2  ;;  %1096 = vst.msk [vmem:[%s1982_s20 + $0x74] sm:$0xf] %vm1066_vm3, %v1031_v23  ;;  %v724_v10 = vadd.f32 %v1965_v33, %v723_v57  ;;  %v756_v2 = vadd.f32 %v1965_v33, %v755_v61  ;;  %v758_v57 = vpop.f32.mrf.mxu2  ;;  %v788_v14 = vpop.f32.mrf.mxu3  ;;  %v1156_v9 = vadd.f32 %v1155_v40, %v1154_v47 }
 0x10f   : > { %1109 = vst.msk [vmem:[%s1982_s20 + $0xa8] sm:$0xf] %vm1066_vm3, %v1044_v19 }
 0x110   : > { %vm823_vm6 = vcmp.gt.f32.partialorder %v684_v16, 0.0  ;;  %v888_v54 = vmul.f32 %v1967_v35, %v684_v16  ;;  %vm839_vm7 = vcmp.gt.f32.partialorder %v724_v10, 0.0  ;;  %v904_v21 = vmul.f32 %v1967_v35, %v724_v10 }
 0x111   : > { %v1158_v40 = vadd.f32 %v1157_v29, %v1156_v9  ;;  %vm852_vm10 = vcmp.gt.f32.partialorder %v756_v2, 0.0 }
 0x112   : > { %v952_v26 = vsel %vm823_vm6, %v684_v16, %v888_v54  ;;  %v2406_v23 = vsel %vm839_vm7, %v724_v10, %v904_v21  ;;  %v1351_v16 = vadd.f32 %v1350_v13, %v1349_v4  ;;  %v2423_v4 = vsel %vm863_vm8, %v784_v0, %v928_v37 }
 0x113   : > { %v1016_v48 = vpack.c.bf16 %v952_v26, %v952_v26  ;;  %v1032_v59 = vpack.c.bf16 %v2406_v23, %v2406_v23  ;;  %v1279_v15 = vmul.f32 %v952_v26, %v952_v26  ;;  %v1159_v54 = vsel %vm1131_vm4, %v952_v26, 0.0 }
 0x114   : > { %v1353_v13 = vadd.f32 %v1352_v5, %v1351_v16  ;;  %v1056_v21 = vpack.c.bf16 %v2423_v4, %v2423_v4  ;;  %v917_v37 = vmul.f32 %v1967_v35, %v756_v2 }
 0x115   : > { %1081 = vst.msk [vmem:[%s1982_s20 + $0x38] sm:$0xf] %vm1066_vm3, %v1016_v48  ;;  %v685_v17 = vpop.f32.mrf.mxu0  ;;  %v725_v10 = vpop.f32.mrf.mxu1  ;;  %v1160_v48 = vadd.f32 %v1159_v54, %v1158_v40  ;;  %v1356_v0 = vsel %vm1131_vm4, %v1279_v15, 0.0  ;;  %v1169_v40 = vsel %vm1131_vm4, %v2030_v27, 0.0 }
 0x116   : > { %v686_v61 = vadd.f32 %v1965_v33, %v685_v17  ;;  %1097 = vst.msk [vmem:[%s1982_s20 + $0x78] sm:$0xf] %vm1066_vm3, %v1032_v59  ;;  %v726_v26 = vadd.f32 %v1965_v33, %v725_v10  ;;  %v1355_v47 = vadd.f32 %v1354_v30, %v1353_v13  ;;  %v786_v59 = vadd.f32 %v1965_v33, %v2370_v56  ;;  %v790_v13 = vpop.f32.mrf.mxu3 }
 0x117   : > { %1121 = vst.msk [vmem:[%s1982_s20 + $0xd8] sm:$0xf] %vm1066_vm3, %v1056_v21  ;;  %v2441_v19 = vsel %vm852_vm10, %v756_v2, %v917_v37  ;;  %v1364_v56 = vsel %vm1131_vm4, %v2374_v63, 0.0  ;;  %v1285_v63 = vmul.f32 %v2054_v51, %v2054_v51 }
 0x118   : > { %vm824_vm9 = vcmp.gt.f32.partialorder %v686_v61, 0.0  ;;  %v889_v31 = vmul.f32 %v1967_v35, %v686_v61  ;;  %vm840_vm11 = vcmp.gt.f32.partialorder %v726_v26, 0.0  ;;  %v905_v29 = vmul.f32 %v1967_v35, %v726_v26 }
 0x119   : > { %v1357_v15 = vadd.f32 %v1356_v0, %v1355_v47  ;;  %v1045_v54 = vpack.c.bf16 %v2441_v19, %v2441_v19  ;;  %vm864_vm12 = vcmp.gt.f32.partialorder %v786_v59, 0.0  ;;  %v929_v27 = vmul.f32 %v1967_v35, %v786_v59 }
 0x11a   : > { %v953_v5 = vsel %vm824_vm9, %v686_v61, %v889_v31  ;;  %v2443_v30 = vsel %vm840_vm11, %v726_v26, %v905_v29  ;;  %v760_v61 = vpop.f32.mrf.mxu2  ;;  %v1366_v31 = vsel %vm1131_vm4, %v1284_v55, 0.0  ;;  %v789_v0 = vadd.f32 %v1965_v33, %v788_v14 }
 0x11b   : > { %v1017_v16 = vpack.c.bf16 %v953_v5, %v953_v5  ;;  %v1161_v9 = vsel %vm1131_vm4, %v953_v5, 0.0  ;;  %v1280_v17 = vmul.f32 %v953_v5, %v953_v5  ;;  %v1033_v21 = vpack.c.bf16 %v2443_v30, %v2443_v30  ;;  %1110 = vst.msk [vmem:[%s1982_s20 + $0xac] sm:$0xf] %vm1066_vm3, %v1045_v54 }
 0x11c   : > { %v1162_v10 = vadd.f32 %v1161_v9, %v1160_v48  ;;  %v759_v48 = vadd.f32 %v1965_v33, %v758_v57  ;;  %v1171_v55 = vsel %vm1131_vm4, %v2054_v51, 0.0  ;;  %v761_v5 = vadd.f32 %v1965_v33, %v760_v61 }
 0x11d   : > { %1082 = vst.msk [vmem:[%s1982_s20 + $0x3c] sm:$0xf] %vm1066_vm3, %v1017_v16  ;;  %v1358_v2 = vsel %vm1131_vm4, %v1280_v17, 0.0  ;;  %v1286_v29 = vmul.f32 %v2082_v8, %v2082_v8  ;;  %v2474_v16 = vsel %vm864_vm12, %v786_v59, %v929_v27  ;;  %vm865_vm14 = vcmp.gt.f32.partialorder %v789_v0, 0.0 }
 0x11e   : > { %v1164_v26 = vadd.f32 %v2273_v49, %v1162_v10  ;;  %v1359_v47 = vadd.f32 %v1358_v2, %v1357_v15  ;;  %1098 = vst.msk [vmem:[%s1982_s20 + $0x7c] sm:$0xf] %vm1066_vm3, %v1033_v21  ;;  %vm853_vm13 = vcmp.gt.f32.partialorder %v759_v48, 0.0  ;;  %v918_v57 = vmul.f32 %v1967_v35, %v759_v48  ;;  %v793_v54 = vpop.f32.mrf.mxu3 }
 0x11f   : > { %v1057_v51 = vpack.c.bf16 %v2474_v16, %v2474_v16  ;;  %v930_v59 = vmul.f32 %v1967_v35, %v789_v0  ;;  %vm854_vm15 = vcmp.gt.f32.partialorder %v761_v5, 0.0  ;;  %v1370_v61 = vsel %vm1131_vm4, %v1286_v29, 0.0 }
 0x120   : > { %v1166_v49 = vadd.f32 %v2321_v43, %v1164_v26  ;;  %v1361_v37 = vadd.f32 %v2276_v53, %v1359_v47  ;;  %v1368_v53 = vsel %vm1131_vm4, %v1285_v63, 0.0  ;;  %v1173_v43 = vsel %vm1131_vm4, %v2082_v8, 0.0 }
 0x121   : > { %v2484_v17 = vsel %vm853_vm13, %v759_v48, %v918_v57  ;;  %1122 = vst.msk [vmem:[%s1982_s20 + $0xdc] sm:$0xf] %vm1066_vm3, %v1057_v51  ;;  %v1287_v8 = vmul.f32 %v2106_v24, %v2106_v24  ;;  %v2494_v2 = vsel %vm865_vm14, %v789_v0, %v930_v59  ;;  %v919_v21 = vmul.f32 %v1967_v35, %v761_v5 }
 0x122   : > { %v1168_v14 = vadd.f32 %v2366_v42, %v1166_v49  ;;  %v1363_v9 = vadd.f32 %v2324_v7, %v1361_v37  ;;  %v1046_v7 = vpack.c.bf16 %v2484_v17, %v2484_v17  ;;  %v763_v42 = vpop.f32.mrf.mxu2  ;;  %v1058_v47 = vpack.c.bf16 %v2494_v2, %v2494_v2 }
 0x123   : > { %v1175_v63 = vsel %vm1131_vm4, %v2106_v24, 0.0  ;;  %v1289_v27 = vmul.f32 %v2160_v6, %v2160_v6  ;;  %v2507_v48 = vsel %vm854_vm15, %v761_v5, %v919_v21  ;;  %v791_v0 = vadd.f32 %v1965_v33, %v790_v13 }
 0x124   : > { %v1170_v15 = vadd.f32 %v1169_v40, %v1168_v14  ;;  %v1365_v10 = vadd.f32 %v1364_v56, %v1363_v9  ;;  %v1288_v56 = vmul.f32 %v2131_v46, %v2131_v46  ;;  %1111 = vst.msk [vmem:[%s1982_s20 + $0xb0] sm:$0xf] %vm1066_vm3, %v1046_v7  ;;  %v1047_v37 = vpack.c.bf16 %v2507_v48, %v2507_v48 }
 0x125   : > { %1123 = vst.msk [vmem:[%s1982_s20 + $0xe0] sm:$0xf] %vm1066_vm3, %v1058_v47  ;;  %v1372_v24 = vsel %vm1131_vm4, %v1287_v8, 0.0  ;;  %v1177_v29 = vsel %vm1131_vm4, %v2131_v46, 0.0  ;;  %vm866_vm0 = vcmp.gt.f32.partialorder %v791_v0, 0.0  ;;  %v931_v5 = vmul.f32 %v1967_v35, %v791_v0 }
 0x126   : > { %v1172_v40 = vadd.f32 %v1171_v55, %v1170_v15  ;;  %v1367_v26 = vadd.f32 %v1366_v31, %v1365_v10  ;;  %v1290_v55 = vmul.f32 %v2190_v32, %v2190_v32  ;;  %v1374_v33 = vsel %vm1131_vm4, %v1288_v56, 0.0  ;;  %1112 = vst.msk [vmem:[%s1982_s20 + $0xb4] sm:$0xf] %vm1066_vm3, %v1047_v37  ;;  %v2540_v8 = vld [vmem:[%s2807_s2] ss:$0 sm:$0xff] }
 0x127   : > { %v1291_v13 = vmul.f32 %v2219_v1, %v2219_v1  ;;  %v1179_v9 = vsel %vm1131_vm4, %v2160_v6, 0.0  ;;  %v1376_v51 = vsel %vm1131_vm4, %v1289_v27, 0.0  ;;  %v1181_v46 = vsel %vm1131_vm4, %v2190_v32, 0.0 }
 0x128   : > { %v1174_v31 = vadd.f32 %v1173_v43, %v1172_v40  ;;  %v1369_v49 = vadd.f32 %v1368_v53, %v1367_v26  ;;  %v2530_v53 = vsel %vm866_vm0, %v791_v0, %v931_v5  ;;  %v1378_v43 = vsel %vm1131_vm4, %v1290_v55, 0.0 }
 0x129   : > { %v1059_v10 = vpack.c.bf16 %v2530_v53, %v2530_v53  ;;  %v1183_v6 = vsel %vm1131_vm4, %v2219_v1, 0.0  ;;  %v764_v32 = vadd.f32 %v2540_v8, %v763_v42  ;;  %v794_v21 = vadd.f32 %v2540_v8, %v793_v54 }
 0x12a   : > { %v1371_v57 = vadd.f32 %v1370_v61, %v1369_v49  ;;  %v1176_v14 = vadd.f32 %v1175_v63, %v1174_v31  ;;  %v765_v7 = vpop.f32.mrf.mxu2  ;;  %v795_v61 = vpop.f32.mrf.mxu3  ;;  %v1380_v40 = vsel %vm1131_vm4, %v1291_v13, 0.0  ;;  %v1292_v1 = vmul.f32 %v2257_v41, %v2257_v41 }
 0x12b   : > { %v766_v56 = vadd.f32 %v2540_v8, %v765_v7  ;;  %1124 = vst.msk [vmem:[%s1982_s20 + $0xe4] sm:$0xf] %vm1066_vm3, %v1059_v10  ;;  %v796_v63 = vadd.f32 %v2540_v8, %v795_v61  ;;  %vm855_vm1 = vcmp.gt.f32.partialorder %v764_v32, 0.0  ;;  %v920_v27 = vmul.f32 %v1967_v35, %v764_v32 }
 0x12c   : > { %v1178_v59 = vadd.f32 %v1177_v29, %v1176_v14  ;;  %v1373_v15 = vadd.f32 %v1372_v24, %v1371_v57  ;;  %vm867_vm2 = vcmp.gt.f32.partialorder %v794_v21, 0.0  ;;  %v932_v54 = vmul.f32 %v1967_v35, %v794_v21 }
 0x12d   : > { %vm856_vm5 = vcmp.gt.f32.partialorder %v766_v56, 0.0  ;;  %v2553_v55 = vsel %vm855_vm1, %v764_v32, %v920_v27  ;;  %v921_v31 = vmul.f32 %v1967_v35, %v766_v56  ;;  %vm868_vm6 = vcmp.gt.f32.partialorder %v796_v63, 0.0 }
 0x12e   : > { %v1180_v26 = vadd.f32 %v1179_v9, %v1178_v59  ;;  %v1375_v47 = vadd.f32 %v1374_v33, %v1373_v15  ;;  %v933_v49 = vmul.f32 %v1967_v35, %v796_v63  ;;  %v1185_v37 = vsel %vm1131_vm4, %v2257_v41, 0.0 }
 0x12f   : > { %v1048_v5 = vpack.c.bf16 %v2553_v55, %v2553_v55  ;;  %v1293_v33 = vmul.f32 %v2307_v45, %v2307_v45  ;;  %v2563_v13 = vsel %vm867_vm2, %v794_v21, %v932_v54  ;;  %v2565_v57 = vsel %vm856_vm5, %v766_v56, %v921_v31 }
 0x130   : > { %v1182_v42 = vadd.f32 %v1181_v46, %v1180_v26  ;;  %v1377_v0 = vadd.f32 %v1376_v51, %v1375_v47  ;;  %v2567_v14 = vsel %vm868_vm6, %v796_v63, %v933_v49  ;;  %v1060_v41 = vpack.c.bf16 %v2563_v13, %v2563_v13 }
 0x131   : > { %1113 = vst.msk [vmem:[%s1982_s20 + $0xb8] sm:$0xf] %vm1066_vm3, %v1048_v5  ;;  %v1187_v59 = vsel %vm1131_vm4, %v2307_v45, 0.0  ;;  %v1294_v15 = vmul.f32 %v2360_v39, %v2360_v39  ;;  %v1049_v10 = vpack.c.bf16 %v2565_v57, %v2565_v57  ;;  %v1384_v32 = vsel %vm1131_vm4, %v1293_v33, 0.0 }
 0x132   : > { %v1184_v24 = vadd.f32 %v1183_v6, %v1182_v42  ;;  %v1379_v29 = vadd.f32 %v1378_v43, %v1377_v0  ;;  %v798_v46 = vpop.f32.mrf.mxu3  ;;  %v1382_v43 = vsel %vm1131_vm4, %v1292_v1, 0.0  ;;  %1125 = vst.msk [vmem:[%s1982_s20 + $0xe8] sm:$0xf] %vm1066_vm3, %v1060_v41  ;;  %v1061_v6 = vpack.c.bf16 %v2567_v14, %v2567_v14 }
 0x133   : > { %v1189_v21 = vsel %vm1131_vm4, %v2360_v39, 0.0  ;;  %v1295_v45 = vmul.f32 %v2406_v23, %v2406_v23  ;;  %1114 = vst.msk [vmem:[%s1982_s20 + $0xbc] sm:$0xf] %vm1066_vm3, %v1049_v10  ;;  %v1297_v26 = vmul.f32 %v2035_v34, %v2035_v34  ;;  %v1386_v47 = vsel %vm1131_vm4, %v1294_v15, 0.0 }
 0x134   : > { %v1186_v9 = vadd.f32 %v1185_v37, %v1184_v24  ;;  %v1381_v51 = vadd.f32 %v1380_v40, %v1379_v29  ;;  %1126 = vst.msk [vmem:[%s1982_s20 + $0xec] sm:$0xf] %vm1066_vm3, %v1061_v6  ;;  %v1191_v63 = vsel %vm1131_vm4, %v2406_v23, 0.0  ;;  %v1296_v39 = vmul.f32 %v2443_v30, %v2443_v30 }
 0x135   : > { %v1388_v42 = vsel %vm1131_vm4, %v1295_v45, 0.0  ;;  %v1193_v0 = vsel %vm1131_vm4, %v2443_v30, 0.0  ;;  %v1298_v54 = vmul.f32 %v2061_v58, %v2061_v58  ;;  %v799_v37 = vadd.f32 %v2540_v8, %v798_v46 }
 0x136   : > { %v1188_v7 = vadd.f32 %v1187_v59, %v1186_v9  ;;  %v1383_v61 = vadd.f32 %v1382_v43, %v1381_v51  ;;  %v1195_v23 = vsel %vm1131_vm4, %v2035_v34, 0.0  ;;  %v1392_v29 = vsel %vm1131_vm4, %v1297_v26, 0.0 }
 0x137   : > { %v1390_v5 = vsel %vm1131_vm4, %v1296_v39, 0.0  ;;  %v1197_v30 = vsel %vm1131_vm4, %v2061_v58, 0.0  ;;  %v934_v41 = vmul.f32 %v1967_v35, %v799_v37  ;;  %v1299_v46 = vmul.f32 %v2088_v12, %v2088_v12 }
 0x138   : > { %v1190_v56 = vadd.f32 %v1189_v21, %v1188_v7  ;;  %v1385_v40 = vadd.f32 %v1384_v32, %v1383_v61  ;;  %vm869_vm7 = vcmp.gt.f32.partialorder %v799_v37, 0.0  ;;  %v1394_v43 = vsel %vm1131_vm4, %v1298_v54, 0.0 }
 0x139   : > { %v2618_v10 = vsel %vm869_vm7, %v799_v37, %v934_v41  ;;  %v1199_v58 = vsel %vm1131_vm4, %v2088_v12, 0.0  ;;  %v1300_v7 = vmul.f32 %v2112_v28, %v2112_v28  ;;  %v1301_v12 = vmul.f32 %v2138_v50, %v2138_v50 }
 0x13a   : > { %v1387_v1 = vadd.f32 %v1386_v47, %v1385_v40  ;;  %v1192_v27 = vadd.f32 %v1191_v63, %v1190_v56  ;;  %v800_v24 = vpop.f32.mrf.mxu3  ;;  %v1062_v61 = vpack.c.bf16 %v2618_v10, %v2618_v10  ;;  %v1396_v56 = vsel %vm1131_vm4, %v1299_v46, 0.0 }
 0x13b   : > { %v801_v33 = vadd.f32 %v2540_v8, %v800_v24  ;;  %v1201_v40 = vsel %vm1131_vm4, %v2112_v28, 0.0  ;;  %v1398_v39 = vsel %vm1131_vm4, %v1300_v7, 0.0  ;;  %v1205_v54 = vsel %vm1131_vm4, %v2171_v18, 0.0 }
 0x13c   : > { %v1389_v31 = vadd.f32 %v1388_v42, %v1387_v1  ;;  %v1194_v49 = vadd.f32 %v1193_v0, %v1192_v27  ;;  %1127 = vst.msk [vmem:[%s1982_s20 + $0xf0] sm:$0xf] %vm1066_vm3, %v1062_v61  ;;  %v1203_v1 = vsel %vm1131_vm4, %v2138_v50, 0.0  ;;  %v1302_v27 = vmul.f32 %v2171_v18, %v2171_v18 }
 0x13d   : > { %vm870_vm8 = vcmp.gt.f32.partialorder %v801_v33, 0.0  ;;  %v935_v34 = vmul.f32 %v1967_v35, %v801_v33  ;;  %v1400_v0 = vsel %vm1131_vm4, %v1301_v12, 0.0  ;;  %v1207_v50 = vsel %vm1131_vm4, %v2207_v52, 0.0 }
 0x13e   : > { %v1196_v9 = vadd.f32 %v1195_v23, %v1194_v49  ;;  %v1391_v51 = vadd.f32 %v1390_v5, %v1389_v31  ;;  %v1303_v31 = vmul.f32 %v2207_v52, %v2207_v52  ;;  %v1402_v24 = vsel %vm1131_vm4, %v1302_v27, 0.0 }
 0x13f   : > { %v2626_v6 = vsel %vm870_vm8, %v801_v33, %v935_v34  ;;  %v1304_v23 = vmul.f32 %v2243_v22, %v2243_v22 }
 0x140   : > { %v1198_v59 = vadd.f32 %v1197_v30, %v1196_v9  ;;  %v1393_v15 = vadd.f32 %v1392_v29, %v1391_v51  ;;  %v1063_v45 = vpack.c.bf16 %v2626_v6, %v2626_v6  ;;  %v1305_v29 = vmul.f32 %v2301_v20, %v2301_v20 }
 0x141   : > { %v1404_v18 = vsel %vm1131_vm4, %v1303_v31, 0.0  ;;  %v1209_v30 = vsel %vm1131_vm4, %v2243_v22, 0.0  ;;  %v1306_v9 = vmul.f32 %v2348_v11, %v2348_v11  ;;  %v1406_v34 = vsel %vm1131_vm4, %v1304_v23, 0.0 }
 0x142   : > { %v1200_v32 = vadd.f32 %v1199_v58, %v1198_v59  ;;  %v1395_v21 = vadd.f32 %v1394_v43, %v1393_v15  ;;  %1128 = vst.msk [vmem:[%s1982_s20 + $0xf4] sm:$0xf] %vm1066_vm3, %v1063_v45  ;;  %v803_v63 = vpop.f32.mrf.mxu3  ;;  %v1211_v43 = vsel %vm1131_vm4, %v2301_v20, 0.0  ;;  %v1408_v59 = vsel %vm1131_vm4, %v1305_v29, 0.0 }
 0x143   : > { %v804_v52 = vadd.f32 %v2540_v8, %v803_v63  ;;  %v1213_v22 = vsel %vm1131_vm4, %v2348_v11, 0.0  ;;  %v1410_v20 = vsel %vm1131_vm4, %v1306_v9, 0.0  ;;  %v1215_v11 = vsel %vm1131_vm4, %v2403_v36, 0.0 }
 0x144   : > { %v1202_v26 = vadd.f32 %v1201_v40, %v1200_v32  ;;  %v1397_v47 = vadd.f32 %v1396_v56, %v1395_v21  ;;  %v1307_v32 = vmul.f32 %v2403_v36, %v2403_v36  ;;  %v1308_v40 = vmul.f32 %v2441_v19, %v2441_v19 }
 0x145   : > { %v936_v61 = vmul.f32 %v1967_v35, %v804_v52  ;;  %vm871_vm9 = vcmp.gt.f32.partialorder %v804_v52, 0.0  ;;  %v1309_v36 = vmul.f32 %v2484_v17, %v2484_v17  ;;  %v1225_v9 = vsel %vm1131_vm4, %v2565_v57, 0.0 }
 0x146   : > { %v1204_v42 = vadd.f32 %v1203_v1, %v1202_v26  ;;  %v1399_v28 = vadd.f32 %v1398_v39, %v1397_v47  ;;  %v1412_v39 = vsel %vm1131_vm4, %v1307_v32, 0.0  ;;  %v1217_v1 = vsel %vm1131_vm4, %v2441_v19, 0.0 }
 0x147   : > { %v2674_v56 = vsel %vm871_vm9, %v804_v52, %v936_v61  ;;  %v1416_v19 = vsel %vm1131_vm4, %v1309_v36, 0.0  ;;  %v1227_v52 = vsel %vm1131_vm4, %v2150_v62, 0.0  ;;  %v1316_v61 = vmul.f32 %v2252_v38, %v2252_v38 }
 0x148   : > { %v1401_v49 = vadd.f32 %v1400_v0, %v1399_v28  ;;  %v1206_v37 = vadd.f32 %v1205_v54, %v1204_v42  ;;  %v1064_v12 = vpack.c.bf16 %v2674_v56, %v2674_v56  ;;  %v1414_v28 = vsel %vm1131_vm4, %v1308_v40, 0.0 }
 0x149   : > { %v1219_v0 = vsel %vm1131_vm4, %v2484_v17, 0.0  ;;  %v1310_v54 = vmul.f32 %v2507_v48, %v2507_v48  ;;  %v1223_v17 = vsel %vm1131_vm4, %v2553_v55, 0.0  ;;  %v1430_v40 = vsel %vm1131_vm4, %v1316_v61, 0.0 }
 0x14a   : > { %v1208_v5 = vadd.f32 %v1207_v50, %v1206_v37  ;;  %v1403_v33 = vadd.f32 %v1402_v24, %v1401_v49  ;;  %v805_v46 = vpop.f32.mrf.mxu3  ;;  %1129 = vst.msk [vmem:[%s1982_s20 + $0xf8] sm:$0xf] %vm1066_vm3, %v1064_v12  ;;  %v1221_v37 = vsel %vm1131_vm4, %v2507_v48, 0.0  ;;  %v1311_v24 = vmul.f32 %v2553_v55, %v2553_v55 }
 0x14b   : > { %v806_v15 = vadd.f32 %v2540_v8, %v805_v46  ;;  %v1418_v29 = vsel %vm1131_vm4, %v1310_v54, 0.0  ;;  %v1314_v55 = vmul.f32 %v2180_v25, %v2180_v25  ;;  %v1318_v12 = vmul.f32 %v2381_v3, %v2381_v3 }
 0x14c   : > { %v1210_v51 = vadd.f32 %v1209_v30, %v1208_v5  ;;  %v1405_v41 = vadd.f32 %v1404_v18, %v1403_v33  ;;  %v1312_v5 = vmul.f32 %v2565_v57, %v2565_v57  ;;  %v1313_v30 = vmul.f32 %v2150_v62, %v2150_v62 }
 0x14d   : > { %vm872_vm10 = vcmp.gt.f32.partialorder %v806_v15, 0.0  ;;  %v937_v21 = vmul.f32 %v1967_v35, %v806_v15  ;;  %v1420_v48 = vsel %vm1131_vm4, %v1311_v24, 0.0  ;;  %v1315_v57 = vmul.f32 %v2214_v60, %v2214_v60 }
 0x14e   : > { %v1212_v58 = vadd.f32 %v1211_v43, %v1210_v51  ;;  %v1407_v7 = vadd.f32 %v1406_v34, %v1405_v41  ;;  %v1422_v46 = vsel %vm1131_vm4, %v1312_v5, 0.0  ;;  %v1231_v62 = vsel %vm1131_vm4, %v2214_v60, 0.0 }
 0x14f   : > { %v2682_v26 = vsel %vm872_vm10, %v806_v15, %v937_v21  ;;  %v1229_v15 = vsel %vm1131_vm4, %v2180_v25, 0.0  ;;  %v1233_v25 = vsel %vm1131_vm4, %v2252_v38, 0.0  ;;  %v1235_v60 = vsel %vm1131_vm4, %v2332_v44, 0.0 }
 0x150   : > { %v1214_v45 = vadd.f32 %v1213_v22, %v1212_v58  ;;  %v1409_v8 = vadd.f32 %v1408_v59, %v1407_v7  ;;  %v1065_v63 = vpack.c.bf16 %v2682_v26, %v2682_v26  ;;  %v1424_v59 = vsel %vm1131_vm4, %v1313_v30, 0.0 }
 0x151   : > { %v1426_v7 = vsel %vm1131_vm4, %v1314_v55, 0.0  ;;  %v1237_v38 = vsel %vm1131_vm4, %v2381_v3, 0.0  ;;  %v1241_v3 = vsel %vm1131_vm4, %v2474_v16, 0.0  ;;  %v1322_v24 = vmul.f32 %v2530_v53, %v2530_v53 }
 0x152   : > { %v1216_v47 = vadd.f32 %v1215_v11, %v1214_v45  ;;  %v1411_v35 = vadd.f32 %v1410_v20, %v1409_v8  ;;  %1130 = vst.msk [vmem:[%s1982_s20 + $0xfc] sm:$0xf] %vm1066_vm3, %v1065_v63  ;;  %v1428_v20 = vsel %vm1131_vm4, %v1315_v57, 0.0  ;;  %v1317_v45 = vmul.f32 %v2332_v44, %v2332_v44 }
 0x153   : > { %v1239_v44 = vsel %vm1131_vm4, %v2423_v4, 0.0  ;;  %v1324_v30 = vmul.f32 %v2567_v14, %v2567_v14  ;;  %v1327_v57 = vmul.f32 %v2674_v56, %v2674_v56  ;;  %vm1462_vm3 = vcmask 57344  }
 0x154   : > { %v1218_v27 = vadd.f32 %v1217_v1, %v1216_v47  ;;  %v1413_v42 = vadd.f32 %v1412_v39, %v1411_v35  ;;  %v1432_v63 = vsel %vm1131_vm4, %v1317_v45, 0.0  ;;  %v1319_v39 = vmul.f32 %v2423_v4, %v2423_v4 }
 0x155   : > { %v1243_v4 = vsel %vm1131_vm4, %v2494_v2, 0.0 }
 0x156   : > { %v1415_v31 = vadd.f32 %v1414_v28, %v1413_v42  ;;  %v1220_v49 = vadd.f32 %v1219_v0, %v1218_v27  ;;  %v1434_v27 = vsel %vm1131_vm4, %v1318_v12, 0.0  ;;  %v1320_v42 = vmul.f32 %v2474_v16, %v2474_v16 }
 0x157   : > { %v1436_v54 = vsel %vm1131_vm4, %v1319_v39, 0.0  ;;  %v1245_v16 = vsel %vm1131_vm4, %v2530_v53, 0.0  ;;  %v1249_v53 = vsel %vm1131_vm4, %v2567_v14, 0.0  ;;  %v1253_v14 = vsel %vm1131_vm4, %v2626_v6, 0.0 }
 0x158   : > { %v1417_v50 = vadd.f32 %v1416_v19, %v1415_v31  ;;  %v1222_v23 = vadd.f32 %v1221_v37, %v1220_v49  ;;  %v1321_v31 = vmul.f32 %v2494_v2, %v2494_v2  ;;  %v1438_v37 = vsel %vm1131_vm4, %v1320_v42, 0.0 }
 0x159   : > { %v1247_v2 = vsel %vm1131_vm4, %v2563_v13, 0.0 }
 0x15a   : > { %v1419_v33 = vadd.f32 %v1418_v29, %v1417_v50  ;;  %v1224_v18 = vadd.f32 %v1223_v17, %v1222_v23  ;;  %v1440_v29 = vsel %vm1131_vm4, %v1321_v31, 0.0  ;;  %v1323_v17 = vmul.f32 %v2563_v13, %v2563_v13 }
 0x15b   : > { %v1251_v13 = vsel %vm1131_vm4, %v2618_v10, 0.0 }
 0x15c   : > { %v1421_v51 = vadd.f32 %v1420_v48, %v1419_v33  ;;  %v1226_v41 = vadd.f32 %v1225_v9, %v1224_v18  ;;  %v1442_v18 = vsel %vm1131_vm4, %v1322_v24, 0.0 }
 0x15e   : > { %v1228_v34 = vadd.f32 %v1227_v52, %v1226_v41  ;;  %v1423_v43 = vadd.f32 %v1422_v46, %v1421_v51  ;;  %v1444_v51 = vsel %vm1131_vm4, %v1323_v17, 0.0  ;;  %v1325_v41 = vmul.f32 %v2618_v10, %v2618_v10 }
 0x15f   : > { %v1446_v46 = vsel %vm1131_vm4, %v1324_v30, 0.0  ;;  %v1255_v10 = vsel %vm1131_vm4, %v2674_v56, 0.0 }
 0x160   : > { %v1230_v22 = vadd.f32 %v1229_v15, %v1228_v34  ;;  %v1425_v58 = vadd.f32 %v1424_v59, %v1423_v43  ;;  %v1326_v34 = vmul.f32 %v2626_v6, %v2626_v6  ;;  %v1448_v15 = vsel %vm1131_vm4, %v1325_v41, 0.0 }
 0x161   : > { %v1257_v6 = vsel %vm1131_vm4, %v2682_v26, 0.0 }
 0x162   : > { %v1232_v32 = vadd.f32 %v1231_v62, %v1230_v22  ;;  %v1427_v21 = vadd.f32 %v1426_v7, %v1425_v58  ;;  %v1450_v7 = vsel %vm1131_vm4, %v1326_v34, 0.0  ;;  %v1328_v62 = vmul.f32 %v2682_v26, %v2682_v26 }
 0x164   : > { %v1234_v8 = vadd.f32 %v1233_v25, %v1232_v32  ;;  %v1429_v11 = vadd.f32 %v1428_v20, %v1427_v21  ;;  %v1452_v21 = vsel %vm1131_vm4, %v1327_v57, 0.0  ;;  %v1454_v45 = vsel %vm1131_vm4, %v1328_v62, 0.0 }
 0x166   : > { %v1236_v47 = vadd.f32 %v1235_v60, %v1234_v8  ;;  %v1431_v35 = vadd.f32 %v1430_v40, %v1429_v11 }
 0x168   : > { %v1433_v1 = vadd.f32 %v1432_v63, %v1431_v35  ;;  %v1238_v36 = vadd.f32 %v1237_v38, %v1236_v47 }
 0x16a   : > { %v1240_v28 = vadd.f32 %v1239_v44, %v1238_v36  ;;  %v1435_v0 = vadd.f32 %v1434_v27, %v1433_v1 }
 0x16c   : > { %v1242_v49 = vadd.f32 %v1241_v3, %v1240_v28  ;;  %v1437_v19 = vadd.f32 %v1436_v54, %v1435_v0 }
 0x16e   : > { %v1244_v50 = vadd.f32 %v1243_v4, %v1242_v49  ;;  %v1439_v23 = vadd.f32 %v1438_v37, %v1437_v19 }
 0x170   : > { %v1246_v5 = vadd.f32 %v1245_v16, %v1244_v50  ;;  %v1441_v33 = vadd.f32 %v1440_v29, %v1439_v23 }
 0x172   : > { %v1248_v48 = vadd.f32 %v1247_v2, %v1246_v5  ;;  %v1443_v9 = vadd.f32 %v1442_v18, %v1441_v33 }
 0x174   : > { %v1250_v52 = vadd.f32 %v1249_v53, %v1248_v48  ;;  %v1445_v55 = vadd.f32 %v1444_v51, %v1443_v9 }
 0x176   : > { %v1447_v43 = vadd.f32 %v1446_v46, %v1445_v55  ;;  %v1252_v59 = vadd.f32 %v1251_v13, %v1250_v52 }
 0x178   : > { %v1449_v22 = vadd.f32 %v1448_v15, %v1447_v43  ;;  %v1254_v58 = vadd.f32 %v1253_v14, %v1252_v59 }
 0x17a   : > { %v1451_v61 = vadd.f32 %v1450_v7, %v1449_v22  ;;  %v1256_v32 = vadd.f32 %v1255_v10, %v1254_v58 }
 0x17c   : > { %v1453_v20 = vadd.f32 %v1452_v21, %v1451_v61  ;;  %v1258_v25 = vadd.f32 %v1257_v6, %v1256_v32 }
 0x17e   : > { %v1259_v8 = vrot.slane %v1258_v25, 4  ;;  %v1455_v11 = vadd.f32 %v1454_v45, %v1453_v20 }
 0x180   : > { %v1260_v40 = vadd.f32 %v1259_v8, %v1258_v25  ;;  %v1456_v56 = vrot.slane %v1455_v11, 4 }
 0x182   : > { %v1261_v60 = vrot.slane %v1260_v40, 2  ;;  %v1457_v12 = vadd.f32 %v1456_v56, %v1455_v11 }
 0x184   : > { %v1262_v47 = vadd.f32 %v1261_v60, %v1260_v40  ;;  %v1458_v35 = vrot.slane %v1457_v12, 2 }
 0x186   : > { %v1263_v63 = vrot.slane %v1262_v47, 1  ;;  %v1459_v38 = vadd.f32 %v1458_v35, %v1457_v12 }
 0x188   : > { %v1264_v26 = vadd.f32 %v1263_v63, %v1262_v47  ;;  %v1460_v39 = vrot.slane %v1459_v38, 1 }
 0x18a   : > { %v1461_v1 = vadd.f32 %v1460_v39, %v1459_v38  ;;  %1463 = vst.msk [vmem:[%s269_s3] sm:$0x1] %vm1462_vm3, %v1264_v26 }
 0x18c   : > { %1464 = vst.msk [vmem:[%s272_s29] sm:$0x1] %vm1462_vm3, %v1461_v1 }
 0x18d PF: > { %s18_s23 = sadd.s32 1, %s1830_s23  }
 0x18e   : > { %p15_p5 = scmp.ge.s32.totalorder %s18_s23, 4  }
 0x190   :  { %17 = sbr.rel (!%p15_p5) target bundleno = 2 (0x2), region = 90 }

// kernel: unet3d_forward.14
= control target key start
LH: loop header
LB: loop body
LE: loop exit
PB: predicated region body
PF: predicated region fallthrough
CT: control target
= control target key end

     0   :  { %s1333_s15 = smov 0   ;;  %s1529_s0 = inlined_call_operand.vmem [shape: bf16[1024,16], index: 0, kind: input, shape index: {}]   ;;  %s1530_s1 = inlined_call_operand.vmem [shape: bf16[16,128], index: 1, kind: input, shape index: {}]   ;;  %s1531_s2 = inlined_call_operand.vmem [shape: f32[1,128], index: 2, kind: input, shape index: {}]   ;;  %s1532_s3 = inlined_call_operand.<no memory space> [shape: f32[1], index: 3, kind: input, shape index: {}]   ;;  %s1533_s4 = inlined_call_operand.vmem [shape: bf16[1024,128], index: 4, kind: output, shape index: {}]  }
   0x1 LB: > { %s889_s16 = sadd.s32 4294967295, %s1306_s15   ;;  %p893_p0 = scmp.ge.s32.totalorder %s1306_s15, 1  ;;  %s1306_s15 = sphi %s1333_s15, %s15_s15  }
   0x2   : > { %p164_p1 = scmp.lt.s32.totalorder %s1306_s15, 3 }
   0x4   : > { %p165_p2 = pnand %p893_p0, %p164_p1 }
   0x5   : > { %s894_s18 = sshll.u32 (!%p165_p2), %s889_s16, 6 }
   0x6   : > { %168 = sbr.rel (%p165_p2) target bundleno = 275 (0x113), region = 36  ;;  %p191_p3 = scmp.lt.s32.totalorder (!%p165_p2), %s894_s18, 127 }
   0xb   : > { %v1096_v0 = vld [vmem:[%s1530_s1] sm:$0xff]  ;;  %s1535_s18 = smov (!%p191_p3, %s894_s18), 127  ;;  %vm439_vm0 = vcmask 130048  }
   0xc   : > { %543 = vmatpush.bf16.msra.mxu0 %v1096_v0  ;;  %1288 = vmatpush.bf16.msra.mxu1 %v1096_v0  ;;  %s895_s19 = sshll.u32 %s1535_s18, 2  ;;  %v1421_v35 = vld [vmem:[%s1531_s2] ss:$0 sm:$0xff] }
   0xd   : > { %1289 = vmatpush.bf16.msra.mxu2 %v1096_v0  ;;  %1290 = vmatpush.bf16.msra.mxu3 %v1096_v0  ;;  %s1352_s22 = scalar_lea.vmem %s1529_s0, %s895_s19  ;;  %s1432_s27 = scalar_lea.vmem %s1533_s4, %s895_s19 }
   0xe   : > { %v1064_v1 = vld [vmem:[%s1352_s22] sm:$0xff]  ;;  %v1065_v5 = vld [vmem:[%s1352_s22 + $0x8] sm:$0xff]  ;;  %v1066_v9 = vld [vmem:[%s1352_s22 + $0x10] sm:$0xff] }
   0xf   : > { %v1072_v2 = vld [vmem:[%s1352_s22 + $0x40] sm:$0xff]  ;;  %1030 = vmatmul.msk.bf16.vlgmr.msra.gmra.mxu0 %vm439_vm0, %v1064_v1  ;;  %v1073_v6 = vld [vmem:[%s1352_s22 + $0x48] sm:$0xff]  ;;  %v1074_v10 = vld [vmem:[%s1352_s22 + $0x50] sm:$0xff] }
  0x10   : > { %v1080_v3 = vld [vmem:[%s1352_s22 + $0x80] sm:$0xff]  ;;  %1038 = vmatmul.msk.bf16.vlgmr.msra.gmra.mxu1 %vm439_vm0, %v1072_v2  ;;  %v1081_v7 = vld [vmem:[%s1352_s22 + $0x88] sm:$0xff]  ;;  %v1082_v11 = vld [vmem:[%s1352_s22 + $0x90] sm:$0xff] }
  0x11   : > { %v1088_v4 = vld [vmem:[%s1352_s22 + $0xc0] sm:$0xff]  ;;  %1046 = vmatmul.msk.bf16.vlgmr.msra.gmra.mxu2 %vm439_vm0, %v1080_v3  ;;  %v1089_v8 = vld [vmem:[%s1352_s22 + $0xc8] sm:$0xff]  ;;  %v1090_v12 = vld [vmem:[%s1352_s22 + $0xd0] sm:$0xff] }
  0x12   : > { %1054 = vmatmul.msk.bf16.vlgmr.msra.gmra.mxu3 %vm439_vm0, %v1088_v4  ;;  %v1067_v13 = vld [vmem:[%s1352_s22 + $0x18] sm:$0xff]  ;;  %v1068_v17 = vld [vmem:[%s1352_s22 + $0x20] sm:$0xff]  ;;  %v1069_v21 = vld [vmem:[%s1352_s22 + $0x28] sm:$0xff] }
  0x13   : > { %v1075_v14 = vld [vmem:[%s1352_s22 + $0x58] sm:$0xff]  ;;  %v1076_v18 = vld [vmem:[%s1352_s22 + $0x60] sm:$0xff]  ;;  %v1077_v22 = vld [vmem:[%s1352_s22 + $0x68] sm:$0xff] }
  0x14   : > { %v1083_v15 = vld [vmem:[%s1352_s22 + $0x98] sm:$0xff]  ;;  %v1084_v19 = vld [vmem:[%s1352_s22 + $0xa0] sm:$0xff]  ;;  %v1085_v23 = vld [vmem:[%s1352_s22 + $0xa8] sm:$0xff] }
  0x15   : > { %v1091_v16 = vld [vmem:[%s1352_s22 + $0xd8] sm:$0xff]  ;;  %v1092_v20 = vld [vmem:[%s1352_s22 + $0xe0] sm:$0xff]  ;;  %v1093_v24 = vld [vmem:[%s1352_s22 + $0xe8] sm:$0xff] }
  0x16   : > { %v1070_v25 = vld [vmem:[%s1352_s22 + $0x30] sm:$0xff]  ;;  %v1071_v29 = vld [vmem:[%s1352_s22 + $0x38] sm:$0xff] }
  0x17   : > { %v1078_v26 = vld [vmem:[%s1352_s22 + $0x70] sm:$0xff]  ;;  %v1079_v30 = vld [vmem:[%s1352_s22 + $0x78] sm:$0xff] }
  0x18   : > { %v1086_v27 = vld [vmem:[%s1352_s22 + $0xb0] sm:$0xff]  ;;  %v1087_v31 = vld [vmem:[%s1352_s22 + $0xb8] sm:$0xff] }
  0x19   : > { %v1094_v28 = vld [vmem:[%s1352_s22 + $0xf0] sm:$0xff]  ;;  %v1095_v32 = vld [vmem:[%s1352_s22 + $0xf8] sm:$0xff] }
  0x1f   : > { %1031 = vmatmul.msk.bf16.gmra.mxu0 %vm439_vm0, %v1065_v5 }
  0x20   : > { %1039 = vmatmul.msk.bf16.gmra.mxu1 %vm439_vm0, %v1073_v6 }
  0x21   : > { %1047 = vmatmul.msk.bf16.gmra.mxu2 %vm439_vm0, %v1081_v7 }
  0x22   : > { %1055 = vmatmul.msk.bf16.gmra.mxu3 %vm439_vm0, %v1089_v8 }
  0x2f   : > { %1032 = vmatmul.msk.bf16.gmra.mxu0 %vm439_vm0, %v1066_v9 }
  0x30   : > { %1040 = vmatmul.msk.bf16.gmra.mxu1 %vm439_vm0, %v1074_v10 }
  0x31   : > { %1048 = vmatmul.msk.bf16.gmra.mxu2 %vm439_vm0, %v1082_v11 }
  0x32   : > { %1056 = vmatmul.msk.bf16.gmra.mxu3 %vm439_vm0, %v1090_v12 }
  0x3f   : > { %1033 = vmatmul.msk.bf16.gmra.mxu0 %vm439_vm0, %v1067_v13 }
  0x40   : > { %1041 = vmatmul.msk.bf16.gmra.mxu1 %vm439_vm0, %v1075_v14 }
  0x41   : > { %1049 = vmatmul.msk.bf16.gmra.mxu2 %vm439_vm0, %v1083_v15 }
  0x42   : > { %1057 = vmatmul.msk.bf16.gmra.mxu3 %vm439_vm0, %v1091_v16 }
  0x4f   : > { %1034 = vmatmul.msk.bf16.gmra.mxu0 %vm439_vm0, %v1068_v17 }
  0x50   : > { %1042 = vmatmul.msk.bf16.gmra.mxu1 %vm439_vm0, %v1076_v18 }
  0x51   : > { %1050 = vmatmul.msk.bf16.gmra.mxu2 %vm439_vm0, %v1084_v19 }
  0x52   : > { %1058 = vmatmul.msk.bf16.gmra.mxu3 %vm439_vm0, %v1092_v20 }
  0x5f   : > { %1035 = vmatmul.msk.bf16.gmra.mxu0 %vm439_vm0, %v1069_v21 }
  0x60   : > { %1043 = vmatmul.msk.bf16.gmra.mxu1 %vm439_vm0, %v1077_v22 }
  0x61   : > { %1051 = vmatmul.msk.bf16.gmra.mxu2 %vm439_vm0, %v1085_v23 }
  0x62   : > { %1059 = vmatmul.msk.bf16.gmra.mxu3 %vm439_vm0, %v1093_v24 }
  0x6f   : > { %1036 = vmatmul.msk.bf16.gmra.mxu0 %vm439_vm0, %v1070_v25 }
  0x70   : > { %1044 = vmatmul.msk.bf16.gmra.mxu1 %vm439_vm0, %v1078_v26 }
  0x71   : > { %1052 = vmatmul.msk.bf16.gmra.mxu2 %vm439_vm0, %v1086_v27 }
  0x72   : > { %1060 = vmatmul.msk.bf16.gmra.mxu3 %vm439_vm0, %v1094_v28 }
  0x7f   : > { %1037 = vmatmul.msk.bf16.gmra.mxu0 %vm439_vm0, %v1071_v29 }
  0x80   : > { %1045 = vmatmul.msk.bf16.gmra.mxu1 %vm439_vm0, %v1079_v30 }
  0x81   : > { %1053 = vmatmul.msk.bf16.gmra.mxu2 %vm439_vm0, %v1087_v31 }
  0x82   : > { %1061 = vmatmul.msk.bf16.gmra.mxu3 %vm439_vm0, %v1095_v32 }
  0x8c   : > { %v545_v33 = vpop.f32.mrf.mxu0 }
  0x8d   : > { %v585_v34 = vpop.f32.mrf.mxu1  ;;  %v546_v40 = vadd.f32 %v1421_v35, %v545_v33 }
  0x8e   : > { %v586_v41 = vadd.f32 %v1421_v35, %v585_v34 }
  0x94   : > { %v625_v36 = vpop.f32.mrf.mxu2  ;;  %v547_v38 = vpop.f32.mrf.mxu0 }
  0x95   : > { %v665_v37 = vpop.f32.mrf.mxu3  ;;  %v587_v39 = vpop.f32.mrf.mxu1  ;;  %v548_v42 = vadd.f32 %v1421_v35, %v547_v38  ;;  %v626_v48 = vadd.f32 %v1421_v35, %v625_v36 }
  0x96   : > { %v588_v43 = vadd.f32 %v1421_v35, %v587_v39  ;;  %v666_v49 = vadd.f32 %v1421_v35, %v665_v37 }
  0x97   : > { %v1100_v44 = vpack.c.bf16 %v548_v42, %v546_v40 }
  0x98   : > { %v1140_v45 = vpack.c.bf16 %v588_v43, %v586_v41 }
  0x99   : > { %1101 = vst [vmem:[%s1432_s27] sm:$0xff] %v1100_v44  }
  0x9a   : > { %1264 = vst [vmem:[%s1432_s27 + $0x40] sm:$0xff] %v1140_v45  }
  0x9c   : > { %v627_v46 = vpop.f32.mrf.mxu2  ;;  %v550_v52 = vpop.f32.mrf.mxu0 }
  0x9d   : > { %v667_v47 = vpop.f32.mrf.mxu3  ;;  %v628_v50 = vadd.f32 %v1421_v35, %v627_v46  ;;  %v590_v53 = vpop.f32.mrf.mxu1  ;;  %v551_v60 = vadd.f32 %v1421_v35, %v550_v52 }
  0x9e   : > { %v668_v51 = vadd.f32 %v1421_v35, %v667_v47  ;;  %v591_v61 = vadd.f32 %v1421_v35, %v590_v53 }
  0x9f   : > { %v1180_v54 = vpack.c.bf16 %v628_v50, %v626_v48 }
  0xa0   : > { %v1220_v55 = vpack.c.bf16 %v668_v51, %v666_v49 }
  0xa1   : > { %1272 = vst [vmem:[%s1432_s27 + $0x80] sm:$0xff] %v1180_v54  }
  0xa2   : > { %1280 = vst [vmem:[%s1432_s27 + $0xc0] sm:$0xff] %v1220_v55  }
  0xa4   : > { %v630_v56 = vpop.f32.mrf.mxu2  ;;  %v552_v58 = vpop.f32.mrf.mxu0 }
  0xa5   : > { %v670_v57 = vpop.f32.mrf.mxu3  ;;  %v592_v59 = vpop.f32.mrf.mxu1  ;;  %v553_v62 = vadd.f32 %v1421_v35, %v552_v58  ;;  %v631_v4 = vadd.f32 %v1421_v35, %v630_v56 }
  0xa6   : > { %v593_v63 = vadd.f32 %v1421_v35, %v592_v59  ;;  %v671_v5 = vadd.f32 %v1421_v35, %v670_v57 }
  0xa7   : > { %v1105_v0 = vpack.c.bf16 %v553_v62, %v551_v60 }
  0xa8   : > { %v1145_v1 = vpack.c.bf16 %v593_v63, %v591_v61 }
  0xa9   : > { %1257 = vst [vmem:[%s1432_s27 + $0x8] sm:$0xff] %v1105_v0  }
  0xaa   : > { %1265 = vst [vmem:[%s1432_s27 + $0x48] sm:$0xff] %v1145_v1  }
  0xac   : > { %v632_v2 = vpop.f32.mrf.mxu2  ;;  %v555_v8 = vpop.f32.mrf.mxu0 }
  0xad   : > { %v672_v3 = vpop.f32.mrf.mxu3  ;;  %v633_v6 = vadd.f32 %v1421_v35, %v632_v2  ;;  %v595_v9 = vpop.f32.mrf.mxu1  ;;  %v556_v16 = vadd.f32 %v1421_v35, %v555_v8 }
  0xae   : > { %v673_v7 = vadd.f32 %v1421_v35, %v672_v3  ;;  %v596_v17 = vadd.f32 %v1421_v35, %v595_v9 }
  0xaf   : > { %v1185_v10 = vpack.c.bf16 %v633_v6, %v631_v4 }
  0xb0   : > { %v1225_v11 = vpack.c.bf16 %v673_v7, %v671_v5 }
  0xb1   : > { %1273 = vst [vmem:[%s1432_s27 + $0x88] sm:$0xff] %v1185_v10  }
  0xb2   : > { %1281 = vst [vmem:[%s1432_s27 + $0xc8] sm:$0xff] %v1225_v11  }
  0xb4   : > { %v635_v12 = vpop.f32.mrf.mxu2  ;;  %v557_v14 = vpop.f32.mrf.mxu0 }
  0xb5   : > { %v675_v13 = vpop.f32.mrf.mxu3  ;;  %v597_v15 = vpop.f32.mrf.mxu1  ;;  %v558_v18 = vadd.f32 %v1421_v35, %v557_v14  ;;  %v636_v24 = vadd.f32 %v1421_v35, %v635_v12 }
  0xb6   : > { %v598_v19 = vadd.f32 %v1421_v35, %v597_v15  ;;  %v676_v25 = vadd.f32 %v1421_v35, %v675_v13 }
  0xb7   : > { %v1110_v20 = vpack.c.bf16 %v558_v18, %v556_v16 }
  0xb8   : > { %v1150_v21 = vpack.c.bf16 %v598_v19, %v596_v17 }
  0xb9   : > { %1258 = vst [vmem:[%s1432_s27 + $0x10] sm:$0xff] %v1110_v20  }
  0xba   : > { %1266 = vst [vmem:[%s1432_s27 + $0x50] sm:$0xff] %v1150_v21  }
  0xbc   : > { %v637_v22 = vpop.f32.mrf.mxu2  ;;  %v560_v28 = vpop.f32.mrf.mxu0 }
  0xbd   : > { %v677_v23 = vpop.f32.mrf.mxu3  ;;  %v638_v26 = vadd.f32 %v1421_v35, %v637_v22  ;;  %v600_v29 = vpop.f32.mrf.mxu1  ;;  %v561_v37 = vadd.f32 %v1421_v35, %v560_v28 }
  0xbe   : > { %v678_v27 = vadd.f32 %v1421_v35, %v677_v23  ;;  %v601_v38 = vadd.f32 %v1421_v35, %v600_v29 }
  0xbf   : > { %v1190_v30 = vpack.c.bf16 %v638_v26, %v636_v24 }
  0xc0   : > { %v1230_v31 = vpack.c.bf16 %v678_v27, %v676_v25 }
  0xc1   : > { %1274 = vst [vmem:[%s1432_s27 + $0x90] sm:$0xff] %v1190_v30  }
  0xc2   : > { %1282 = vst [vmem:[%s1432_s27 + $0xd0] sm:$0xff] %v1230_v31  }
  0xc4   : > { %v640_v32 = vpop.f32.mrf.mxu2  ;;  %v562_v34 = vpop.f32.mrf.mxu0 }
  0xc5   : > { %v680_v33 = vpop.f32.mrf.mxu3  ;;  %v602_v36 = vpop.f32.mrf.mxu1  ;;  %v563_v39 = vadd.f32 %v1421_v35, %v562_v34  ;;  %v641_v45 = vadd.f32 %v1421_v35, %v640_v32 }
  0xc6   : > { %v603_v40 = vadd.f32 %v1421_v35, %v602_v36  ;;  %v681_v46 = vadd.f32 %v1421_v35, %v680_v33 }
  0xc7   : > { %v1115_v41 = vpack.c.bf16 %v563_v39, %v561_v37 }
  0xc8   : > { %v1155_v42 = vpack.c.bf16 %v603_v40, %v601_v38 }
  0xc9   : > { %1259 = vst [vmem:[%s1432_s27 + $0x18] sm:$0xff] %v1115_v41  }
  0xca   : > { %1267 = vst [vmem:[%s1432_s27 + $0x58] sm:$0xff] %v1155_v42  }
  0xcc   : > { %v642_v43 = vpop.f32.mrf.mxu2  ;;  %v565_v49 = vpop.f32.mrf.mxu0 }
  0xcd   : > { %v682_v44 = vpop.f32.mrf.mxu3  ;;  %v643_v47 = vadd.f32 %v1421_v35, %v642_v43  ;;  %v605_v50 = vpop.f32.mrf.mxu1  ;;  %v566_v57 = vadd.f32 %v1421_v35, %v565_v49 }
  0xce   : > { %v683_v48 = vadd.f32 %v1421_v35, %v682_v44  ;;  %v606_v58 = vadd.f32 %v1421_v35, %v605_v50 }
  0xcf   : > { %v1195_v51 = vpack.c.bf16 %v643_v47, %v641_v45 }
  0xd0   : > { %v1235_v52 = vpack.c.bf16 %v683_v48, %v681_v46 }
  0xd1   : > { %1275 = vst [vmem:[%s1432_s27 + $0x98] sm:$0xff] %v1195_v51  }
  0xd2   : > { %1283 = vst [vmem:[%s1432_s27 + $0xd8] sm:$0xff] %v1235_v52  }
  0xd4   : > { %v645_v53 = vpop.f32.mrf.mxu2  ;;  %v567_v55 = vpop.f32.mrf.mxu0 }
  0xd5   : > { %v685_v54 = vpop.f32.mrf.mxu3  ;;  %v607_v56 = vpop.f32.mrf.mxu1  ;;  %v568_v59 = vadd.f32 %v1421_v35, %v567_v55  ;;  %v646_v1 = vadd.f32 %v1421_v35, %v645_v53 }
  0xd6   : > { %v608_v60 = vadd.f32 %v1421_v35, %v607_v56  ;;  %v686_v2 = vadd.f32 %v1421_v35, %v685_v54 }
  0xd7   : > { %v1120_v61 = vpack.c.bf16 %v568_v59, %v566_v57 }
  0xd8   : > { %v1160_v62 = vpack.c.bf16 %v608_v60, %v606_v58 }
  0xd9   : > { %1260 = vst [vmem:[%s1432_s27 + $0x20] sm:$0xff] %v1120_v61  }
  0xda   : > { %1268 = vst [vmem:[%s1432_s27 + $0x60] sm:$0xff] %v1160_v62  }
  0xdc   : > { %v647_v63 = vpop.f32.mrf.mxu2  ;;  %v570_v5 = vpop.f32.mrf.mxu0 }
  0xdd   : > { %v687_v0 = vpop.f32.mrf.mxu3  ;;  %v648_v3 = vadd.f32 %v1421_v35, %v647_v63  ;;  %v610_v6 = vpop.f32.mrf.mxu1  ;;  %v571_v13 = vadd.f32 %v1421_v35, %v570_v5 }
  0xde   : > { %v688_v4 = vadd.f32 %v1421_v35, %v687_v0  ;;  %v611_v14 = vadd.f32 %v1421_v35, %v610_v6 }
  0xdf   : > { %v1200_v7 = vpack.c.bf16 %v648_v3, %v646_v1 }
  0xe0   : > { %v1240_v8 = vpack.c.bf16 %v688_v4, %v686_v2 }
  0xe1   : > { %1276 = vst [vmem:[%s1432_s27 + $0xa0] sm:$0xff] %v1200_v7  }
  0xe2   : > { %1284 = vst [vmem:[%s1432_s27 + $0xe0] sm:$0xff] %v1240_v8  }
  0xe4   : > { %v650_v9 = vpop.f32.mrf.mxu2  ;;  %v572_v11 = vpop.f32.mrf.mxu0 }
  0xe5   : > { %v690_v10 = vpop.f32.mrf.mxu3  ;;  %v612_v12 = vpop.f32.mrf.mxu1  ;;  %v573_v15 = vadd.f32 %v1421_v35, %v572_v11  ;;  %v651_v21 = vadd.f32 %v1421_v35, %v650_v9 }
  0xe6   : > { %v613_v16 = vadd.f32 %v1421_v35, %v612_v12  ;;  %v691_v22 = vadd.f32 %v1421_v35, %v690_v10 }
  0xe7   : > { %v1125_v17 = vpack.c.bf16 %v573_v15, %v571_v13 }
  0xe8   : > { %v1165_v18 = vpack.c.bf16 %v613_v16, %v611_v14 }
  0xe9   : > { %1261 = vst [vmem:[%s1432_s27 + $0x28] sm:$0xff] %v1125_v17  }
  0xea   : > { %1269 = vst [vmem:[%s1432_s27 + $0x68] sm:$0xff] %v1165_v18  }
  0xec   : > { %v652_v19 = vpop.f32.mrf.mxu2  ;;  %v575_v25 = vpop.f32.mrf.mxu0 }
  0xed   : > { %v692_v20 = vpop.f32.mrf.mxu3  ;;  %v653_v23 = vadd.f32 %v1421_v35, %v652_v19  ;;  %v615_v26 = vpop.f32.mrf.mxu1  ;;  %v576_v33 = vadd.f32 %v1421_v35, %v575_v25 }
  0xee   : > { %v693_v24 = vadd.f32 %v1421_v35, %v692_v20  ;;  %v616_v34 = vadd.f32 %v1421_v35, %v615_v26 }
  0xef   : > { %v1205_v27 = vpack.c.bf16 %v653_v23, %v651_v21 }
  0xf0   : > { %v1245_v28 = vpack.c.bf16 %v693_v24, %v691_v22 }
  0xf1   : > { %1277 = vst [vmem:[%s1432_s27 + $0xa8] sm:$0xff] %v1205_v27  }
  0xf2   : > { %1285 = vst [vmem:[%s1432_s27 + $0xe8] sm:$0xff] %v1245_v28  }
  0xf4   : > { %v655_v29 = vpop.f32.mrf.mxu2  ;;  %v577_v31 = vpop.f32.mrf.mxu0 }
  0xf5   : > { %v695_v30 = vpop.f32.mrf.mxu3  ;;  %v617_v32 = vpop.f32.mrf.mxu1  ;;  %v578_v36 = vadd.f32 %v1421_v35, %v577_v31  ;;  %v656_v42 = vadd.f32 %v1421_v35, %v655_v29 }
  0xf6   : > { %v618_v37 = vadd.f32 %v1421_v35, %v617_v32  ;;  %v696_v43 = vadd.f32 %v1421_v35, %v695_v30 }
  0xf7   : > { %v1130_v38 = vpack.c.bf16 %v578_v36, %v576_v33 }
  0xf8   : > { %v1170_v39 = vpack.c.bf16 %v618_v37, %v616_v34 }
  0xf9   : > { %1262 = vst [vmem:[%s1432_s27 + $0x30] sm:$0xff] %v1130_v38  }
  0xfa   : > { %1270 = vst [vmem:[%s1432_s27 + $0x70] sm:$0xff] %v1170_v39  }
  0xfc   : > { %v657_v40 = vpop.f32.mrf.mxu2  ;;  %v580_v46 = vpop.f32.mrf.mxu0 }
  0xfd   : > { %v697_v41 = vpop.f32.mrf.mxu3  ;;  %v658_v44 = vadd.f32 %v1421_v35, %v657_v40  ;;  %v620_v47 = vpop.f32.mrf.mxu1  ;;  %v581_v54 = vadd.f32 %v1421_v35, %v580_v46 }
  0xfe   : > { %v698_v45 = vadd.f32 %v1421_v35, %v697_v41  ;;  %v621_v55 = vadd.f32 %v1421_v35, %v620_v47 }
  0xff   : > { %v1210_v48 = vpack.c.bf16 %v658_v44, %v656_v42 }
 0x100   : > { %v1250_v49 = vpack.c.bf16 %v698_v45, %v696_v43 }
 0x101   : > { %1278 = vst [vmem:[%s1432_s27 + $0xb0] sm:$0xff] %v1210_v48  }
 0x102   : > { %1286 = vst [vmem:[%s1432_s27 + $0xf0] sm:$0xff] %v1250_v49  }
 0x104   : > { %v660_v50 = vpop.f32.mrf.mxu2  ;;  %v582_v52 = vpop.f32.mrf.mxu0 }
 0x105   : > { %v700_v51 = vpop.f32.mrf.mxu3  ;;  %v622_v53 = vpop.f32.mrf.mxu1  ;;  %v583_v56 = vadd.f32 %v1421_v35, %v582_v52  ;;  %v661_v62 = vadd.f32 %v1421_v35, %v660_v50 }
 0x106   : > { %v623_v57 = vadd.f32 %v1421_v35, %v622_v53  ;;  %v701_v63 = vadd.f32 %v1421_v35, %v700_v51 }
 0x107   : > { %v1135_v58 = vpack.c.bf16 %v583_v56, %v581_v54 }
 0x108   : > { %v1175_v59 = vpack.c.bf16 %v623_v57, %v621_v55 }
 0x109   : > { %1263 = vst [vmem:[%s1432_s27 + $0x38] sm:$0xff] %v1135_v58  }
 0x10a   : > { %1271 = vst [vmem:[%s1432_s27 + $0x78] sm:$0xff] %v1175_v59  }
 0x10c   : > { %v662_v60 = vpop.f32.mrf.mxu2 }
 0x10d   : > { %v702_v61 = vpop.f32.mrf.mxu3  ;;  %v663_v0 = vadd.f32 %v1421_v35, %v662_v60 }
 0x10e   : > { %v703_v1 = vadd.f32 %v1421_v35, %v702_v61 }
 0x10f   : > { %v1215_v2 = vpack.c.bf16 %v663_v0, %v661_v62 }
 0x110   : > { %v1255_v3 = vpack.c.bf16 %v703_v1, %v701_v63 }
 0x111   : > { %1279 = vst [vmem:[%s1432_s27 + $0xb8] sm:$0xff] %v1215_v2  }
 0x112   : > { %1287 = vst [vmem:[%s1432_s27 + $0xf8] sm:$0xff] %v1255_v3  }
 0x113 PF: > { %s15_s15 = sadd.s32 1, %s1306_s15  }
 0x114   : > { %p12_p4 = scmp.ge.s32.totalorder %s15_s15, 4  }
 0x116   :  { %14 = sbr.rel (!%p12_p4) target bundleno = 1 (0x1), region = 66 }

// kernel: unet3d_forward.15
= control target key start
LH: loop header
LB: loop body
LE: loop exit
PB: predicated region body
PF: predicated region fallthrough
CT: control target
= control target key end

     0   :  { %s5779_s23 = smov 0   ;;  %s9522_s0 = inlined_call_operand.vmem [shape: bf16[8192,48], index: 0, kind: input, shape index: {}]   ;;  %s9523_s1 = inlined_call_operand.vmem [shape: bf16[48,4], index: 1, kind: input, shape index: {}]   ;;  %s9524_s2 = inlined_call_operand.vmem [shape: f32[1,4], index: 2, kind: input, shape index: {}]   ;;  %s9525_s3 = inlined_call_operand.<no memory space> [shape: f32[1], index: 3, kind: input, shape index: {}]   ;;  %s9526_s4 = inlined_call_operand.vmem [shape: bf16[8192,4], index: 4, kind: output, shape index: {0}]   ;;  %s9527_s5 = inlined_call_operand.vmem [shape: f32[4,1,4], index: 5, kind: output, shape index: {1}]   ;;  %s9528_s6 = inlined_call_operand.vmem [shape: f32[4,1,4], index: 6, kind: output, shape index: {2}]  }
   0x1   :  { %12 = sst [smem:[#allocation2]] %s9525_s3 }
   0x2 LB: > { %s5785_s24 = sadd.s32 4294967295, %s5739_s23   ;;  %p4919_p0 = scmp.ge.s32.totalorder %s5739_s23, 1  ;;  %s5739_s23 = sphi %s5779_s23, %s18_s23  }
   0x3   : > { %p219_p1 = scmp.lt.s32.totalorder %s5739_s23, 5 }
   0x5   : > { %p220_p2 = pnand %p4919_p0, %p219_p1 }
   0x7   : > { %223 = sbr.rel (%p220_p2) target bundleno = 1061 (0x425), region = 36 }
   0xc   : > { %v5708_v0 = vld [vmem:[%s9523_s1 + $0x10] sm:$0xff]  ;;  %s4920_s3 = sshll.u32 %s5785_s24, 8  ;;  %v5707_v1 = vld [vmem:[%s9523_s1 + $0x8] sm:$0xff]  ;;  %v5706_v2 = vld [vmem:[%s9523_s1] sm:$0xff]  ;;  %vm1198_vm0 = vcmask 392192   ;;  %s2232_s11 = sld [smem:[#allocation2]] }
   0xd   : > { %p256_p3 = scmp.lt.s32.totalorder %s4920_s3, 1023  ;;  %1588 = vmatpush.bf16.msra.mxu0 %v5708_v0  ;;  %5709 = vmatpush.bf16.msra.mxu1 %v5708_v0  ;;  %v5834_v14 = vld [vmem:[%s9524_s2] ss:$0 sm:$0xff]  ;;  %vm3258_vm2 = vcmask 27648   ;;  %vm3515_vm3 = vcmask 31744   ;;  %p267_p4 = scmp.lt.s32.totalorder %s5785_s24, 3 }
   0xe   : > { %5710 = vmatpush.bf16.msra.mxu2 %v5708_v0  ;;  %5711 = vmatpush.bf16.msra.mxu3 %v5708_v0 }
   0xf   : > { %s9912_s3 = smov (!%p256_p3, %s4920_s3), 1023  ;;  %s9914_s24 = smov (!%p267_p4, %s5785_s24), 3 }
  0x10   : > { %s4921_s29 = sshll.u32 %s9912_s3, 2  ;;  %s269_s8 = scalar_lea.vmem %s9527_s5, %s9914_s24 }
  0x11   : > { %1589 = vmatpush.bf16.msra.mxu0 %v5707_v1  ;;  %s5807_s10 = scalar_lea.vmem %s9522_s0, %s4921_s29  ;;  %5712 = vmatpush.bf16.msra.mxu1 %v5707_v1  ;;  %s5847_s16 = scalar_lea.vmem %s9526_s4, %s4921_s29 }
  0x12   : > { %5713 = vmatpush.bf16.msra.mxu2 %v5707_v1  ;;  %5714 = vmatpush.bf16.msra.mxu3 %v5707_v1  ;;  %v5578_v3 = vld [vmem:[%s5807_s10] sm:$0xff]  ;;  %v5579_v4 = vld [vmem:[%s5807_s10 + $0x8] sm:$0xff]  ;;  %v5580_v5 = vld [vmem:[%s5807_s10 + $0x10] sm:$0xff]  ;;  %v5837_v17 = vstv %s2232_s11  ;;  %s272_s11 = scalar_lea.vmem %s9528_s6, %s9914_s24 }
  0x13   : > { %v5581_v6 = vld [vmem:[%s5807_s10 + $0x18] sm:$0xff]  ;;  %v5582_v7 = vld [vmem:[%s5807_s10 + $0x20] sm:$0xff]  ;;  %v5583_v8 = vld [vmem:[%s5807_s10 + $0x28] sm:$0xff] }
  0x14   : > { %v5610_v9 = vld [vmem:[%s5807_s10 + $0x100] sm:$0xff]  ;;  %v5584_v10 = vld [vmem:[%s5807_s10 + $0x30] sm:$0xff]  ;;  %v5611_v11 = vld [vmem:[%s5807_s10 + $0x108] sm:$0xff] }
  0x15   : > { %1590 = vmatpush.bf16.msra.mxu0 %v5706_v2  ;;  %5715 = vmatpush.bf16.msra.mxu1 %v5706_v2  ;;  %v5585_v12 = vld [vmem:[%s5807_s10 + $0x38] sm:$0xff]  ;;  %v5612_v13 = vld [vmem:[%s5807_s10 + $0x110] sm:$0xff]  ;;  %v5586_v15 = vld [vmem:[%s5807_s10 + $0x40] sm:$0xff] }
  0x16   : > { %5716 = vmatpush.bf16.msra.mxu2 %v5706_v2  ;;  %5717 = vmatpush.bf16.msra.mxu3 %v5706_v2  ;;  %v5613_v22 = vld [vmem:[%s5807_s10 + $0x118] sm:$0xff]  ;;  %v5587_v33 = vld [vmem:[%s5807_s10 + $0x48] sm:$0xff]  ;;  %v5614_v45 = vld [vmem:[%s5807_s10 + $0x120] sm:$0xff] }
  0x17   : > { %v5588_v56 = vld [vmem:[%s5807_s10 + $0x50] sm:$0xff] }
  0x18   : > { %5448 = vmatmul.msk.bf16.vlgmr.msra.gmra.mxu0 %vm1198_vm0, %v5578_v3  ;;  %5480 = vmatmul.msk.bf16.vlgmr.msra.gmra.mxu1 %vm1198_vm0, %v5610_v9  ;;  %v5615_v3 = vld [vmem:[%s5807_s10 + $0x128] sm:$0xff] }
  0x28   : > { %5449 = vmatmul.msk.bf16.gmra.mxu0 %vm1198_vm0, %v5579_v4  ;;  %5481 = vmatmul.msk.bf16.gmra.mxu1 %vm1198_vm0, %v5611_v11 }
  0x38   : > { %5450 = vmatmul.msk.bf16.gmra.mxu0 %vm1198_vm0, %v5580_v5  ;;  %5482 = vmatmul.msk.bf16.gmra.mxu1 %vm1198_vm0, %v5612_v13 }
  0x48   : > { %5451 = vmatmul.msk.bf16.gmra.mxu0 %vm1198_vm0, %v5581_v6  ;;  %5483 = vmatmul.msk.bf16.gmra.mxu1 %vm1198_vm0, %v5613_v22 }
  0x58   : > { %5452 = vmatmul.msk.bf16.gmra.mxu0 %vm1198_vm0, %v5582_v7  ;;  %5484 = vmatmul.msk.bf16.gmra.mxu1 %vm1198_vm0, %v5614_v45 }
  0x68   : > { %5453 = vmatmul.msk.bf16.gmra.mxu0 %vm1198_vm0, %v5583_v8  ;;  %5485 = vmatmul.msk.bf16.gmra.mxu1 %vm1198_vm0, %v5615_v3 }
  0x78   : > { %5454 = vmatmul.msk.bf16.gmra.mxu0 %vm1198_vm0, %v5584_v10 }
  0x88   : > { %5455 = vmatmul.msk.bf16.gmra.mxu0 %vm1198_vm0, %v5585_v12 }
  0x95   : > { %v1592_v16 = vpop.f32.mrf.mxu0 }
  0x96   : > { %v1593_v18 = vadd.f32 %v5834_v14, %v1592_v16 }
  0x98   : > { %vm2233_vm1 = vcmp.gt.f32.partialorder %v1593_v18, 0.0  ;;  %v2490_v19 = vmul.f32 %v5837_v17, %v1593_v18  ;;  %5456 = vmatmul.msk.bf16.gmra.mxu0 %vm1198_vm0, %v5586_v15  ;;  %v5589_v15 = vld [vmem:[%s5807_s10 + $0x58] sm:$0xff] }
  0x9a   : > { %v2746_v20 = vsel %vm2233_vm1, %v1593_v18, %v2490_v19 }
  0x9b   : > { %v3002_v21 = vpack.c.bf16 %v2746_v20, %v2746_v20  ;;  %v4033_v26 = vmul.f32 %v2746_v20, %v2746_v20  ;;  %v3516_v28 = vsel %vm3515_vm3, %v2746_v20, 0.0 }
  0x9d   : > { %3259 = vst.msk [vmem:[%s5847_s16] sm:$0xf] %vm3258_vm2, %v3002_v21  ;;  %v1594_v23 = vpop.f32.mrf.mxu0  ;;  %v4289_v34 = vsel %vm3515_vm3, %v4033_v26, 0.0 }
  0x9e   : > { %v1595_v24 = vadd.f32 %v5834_v14, %v1594_v23 }
  0xa0   : > { %vm2234_vm4 = vcmp.gt.f32.partialorder %v1595_v24, 0.0  ;;  %v2491_v25 = vmul.f32 %v5837_v17, %v1595_v24 }
  0xa2   : > { %v2747_v27 = vsel %vm2234_vm4, %v1595_v24, %v2491_v25 }
  0xa3   : > { %v3003_v29 = vpack.c.bf16 %v2747_v27, %v2747_v27  ;;  %v3517_v30 = vsel %vm3515_vm3, %v2747_v27, 0.0  ;;  %v4034_v31 = vmul.f32 %v2747_v27, %v2747_v27  ;;  %v5616_v27 = vld [vmem:[%s5807_s10 + $0x130] sm:$0xff] }
  0xa4   : > { %v3518_v32 = vadd.f32 %v3517_v30, %v3516_v28  ;;  %5486 = vmatmul.msk.bf16.gmra.mxu1 %vm1198_vm0, %v5616_v27  ;;  %v5592_v27 = vld [vmem:[%s5807_s10 + $0x70] sm:$0xff] }
  0xa5   : > { %3260 = vst.msk [vmem:[%s5847_s16 + $0x4] sm:$0xf] %vm3258_vm2, %v3003_v29  ;;  %v4290_v35 = vsel %vm3515_vm3, %v4034_v31, 0.0  ;;  %v1597_v36 = vpop.f32.mrf.mxu0 }
  0xa6   : > { %v4291_v37 = vadd.f32 %v4290_v35, %v4289_v34  ;;  %v1598_v38 = vadd.f32 %v5834_v14, %v1597_v36 }
  0xa8   : > { %vm2235_vm5 = vcmp.gt.f32.partialorder %v1598_v38, 0.0  ;;  %v2492_v39 = vmul.f32 %v5837_v17, %v1598_v38  ;;  %5457 = vmatmul.msk.bf16.gmra.mxu0 %vm1198_vm0, %v5587_v33 }
  0xaa   : > { %v2748_v40 = vsel %vm2235_vm5, %v1598_v38, %v2492_v39  ;;  %v5590_v38 = vld [vmem:[%s5807_s10 + $0x60] sm:$0xff] }
  0xab   : > { %v3004_v41 = vpack.c.bf16 %v2748_v40, %v2748_v40  ;;  %v3519_v42 = vsel %vm3515_vm3, %v2748_v40, 0.0  ;;  %v4035_v43 = vmul.f32 %v2748_v40, %v2748_v40 }
  0xac   : > { %v3520_v44 = vadd.f32 %v3519_v42, %v3518_v32 }
  0xad   : > { %3261 = vst.msk [vmem:[%s5847_s16 + $0x8] sm:$0xf] %vm3258_vm2, %v3004_v41  ;;  %v4292_v46 = vsel %vm3515_vm3, %v4035_v43, 0.0  ;;  %v1599_v47 = vpop.f32.mrf.mxu0 }
  0xae   : > { %v4293_v48 = vadd.f32 %v4292_v46, %v4291_v37  ;;  %v1600_v49 = vadd.f32 %v5834_v14, %v1599_v47 }
  0xb0   : > { %vm2236_vm6 = vcmp.gt.f32.partialorder %v1600_v49, 0.0  ;;  %v2493_v50 = vmul.f32 %v5837_v17, %v1600_v49 }
  0xb2   : > { %v2749_v51 = vsel %vm2236_vm6, %v1600_v49, %v2493_v50  ;;  %v5617_v49 = vld [vmem:[%s5807_s10 + $0x138] sm:$0xff] }
  0xb3   : > { %v3005_v52 = vpack.c.bf16 %v2749_v51, %v2749_v51  ;;  %v3521_v53 = vsel %vm3515_vm3, %v2749_v51, 0.0  ;;  %v4036_v54 = vmul.f32 %v2749_v51, %v2749_v51 }
  0xb4   : > { %v3522_v55 = vadd.f32 %v3521_v53, %v3520_v44  ;;  %5487 = vmatmul.msk.bf16.gmra.mxu1 %vm1198_vm0, %v5617_v49 }
  0xb5   : > { %3262 = vst.msk [vmem:[%s5847_s16 + $0xc] sm:$0xf] %vm3258_vm2, %v3005_v52  ;;  %v4294_v57 = vsel %vm3515_vm3, %v4036_v54, 0.0  ;;  %v1602_v58 = vpop.f32.mrf.mxu0 }
  0xb6   : > { %v4295_v59 = vadd.f32 %v4294_v57, %v4293_v48  ;;  %v1603_v60 = vadd.f32 %v5834_v14, %v1602_v58 }
  0xb8   : > { %vm2237_vm7 = vcmp.gt.f32.partialorder %v1603_v60, 0.0  ;;  %v2494_v61 = vmul.f32 %v5837_v17, %v1603_v60  ;;  %5458 = vmatmul.msk.bf16.gmra.mxu0 %vm1198_vm0, %v5588_v56 }
  0xba   : > { %v2750_v62 = vsel %vm2237_vm7, %v1603_v60, %v2494_v61  ;;  %v5591_v60 = vld [vmem:[%s5807_s10 + $0x68] sm:$0xff] }
  0xbb   : > { %v3006_v63 = vpack.c.bf16 %v2750_v62, %v2750_v62  ;;  %v3523_v0 = vsel %vm3515_vm3, %v2750_v62, 0.0  ;;  %v4037_v1 = vmul.f32 %v2750_v62, %v2750_v62 }
  0xbc   : > { %v3524_v2 = vadd.f32 %v3523_v0, %v3522_v55 }
  0xbd   : > { %3263 = vst.msk [vmem:[%s5847_s16 + $0x10] sm:$0xf] %vm3258_vm2, %v3006_v63  ;;  %v4296_v4 = vsel %vm3515_vm3, %v4037_v1, 0.0  ;;  %v1604_v5 = vpop.f32.mrf.mxu0  ;;  %v5642_v1 = vld [vmem:[%s5807_s10 + $0x200] sm:$0xff] }
  0xbe   : > { %v4297_v6 = vadd.f32 %v4296_v4, %v4295_v59  ;;  %v1605_v7 = vadd.f32 %v5834_v14, %v1604_v5  ;;  %5512 = vmatmul.msk.bf16.vlgmr.msra.gmra.mxu2 %vm1198_vm0, %v5642_v1 }
  0xc0   : > { %vm2238_vm8 = vcmp.gt.f32.partialorder %v1605_v7, 0.0  ;;  %v2495_v8 = vmul.f32 %v5837_v17, %v1605_v7 }
  0xc2   : > { %v2751_v9 = vsel %vm2238_vm8, %v1605_v7, %v2495_v8  ;;  %v1752_v7 = vpop.f32.mrf.mxu1 }
  0xc3   : > { %v3007_v10 = vpack.c.bf16 %v2751_v9, %v2751_v9  ;;  %v3525_v11 = vsel %vm3515_vm3, %v2751_v9, 0.0  ;;  %v4038_v12 = vmul.f32 %v2751_v9, %v2751_v9  ;;  %v5618_v9 = vld [vmem:[%s5807_s10 + $0x140] sm:$0xff] }
  0xc4   : > { %v3526_v13 = vadd.f32 %v3525_v11, %v3524_v2  ;;  %5488 = vmatmul.msk.bf16.gmra.mxu1 %vm1198_vm0, %v5618_v9 }
  0xc5   : > { %3264 = vst.msk [vmem:[%s5847_s16 + $0x14] sm:$0xf] %vm3258_vm2, %v3007_v10  ;;  %v4298_v16 = vsel %vm3515_vm3, %v4038_v12, 0.0  ;;  %v1607_v18 = vpop.f32.mrf.mxu0 }
  0xc6   : > { %v4299_v19 = vadd.f32 %v4298_v16, %v4297_v6  ;;  %v1608_v20 = vadd.f32 %v5834_v14, %v1607_v18 }
  0xc8   : > { %vm2239_vm9 = vcmp.gt.f32.partialorder %v1608_v20, 0.0  ;;  %v2496_v21 = vmul.f32 %v5837_v17, %v1608_v20  ;;  %5459 = vmatmul.msk.bf16.gmra.mxu0 %vm1198_vm0, %v5589_v15  ;;  %v1753_v15 = vadd.f32 %v5834_v14, %v1752_v7 }
  0xca   : > { %v2752_v22 = vsel %vm2239_vm9, %v1608_v20, %v2496_v21  ;;  %vm2297_vm15 = vcmp.gt.f32.partialorder %v1753_v15, 0.0  ;;  %v2554_v18 = vmul.f32 %v5837_v17, %v1753_v15 }
  0xcb   : > { %v3008_v23 = vpack.c.bf16 %v2752_v22, %v2752_v22  ;;  %v3527_v24 = vsel %vm3515_vm3, %v2752_v22, 0.0  ;;  %v4039_v25 = vmul.f32 %v2752_v22, %v2752_v22 }
  0xcc   : > { %v3528_v26 = vadd.f32 %v3527_v24, %v3526_v13  ;;  %v5941_v20 = vsel %vm2297_vm15, %v1753_v15, %v2554_v18 }
  0xcd   : > { %3265 = vst.msk [vmem:[%s5847_s16 + $0x18] sm:$0xf] %vm3258_vm2, %v3008_v23  ;;  %v4300_v28 = vsel %vm3515_vm3, %v4039_v25, 0.0  ;;  %v1609_v29 = vpop.f32.mrf.mxu0  ;;  %v3066_v24 = vpack.c.bf16 %v5941_v20, %v5941_v20  ;;  %v1754_v25 = vpop.f32.mrf.mxu1 }
  0xce   : > { %v4301_v30 = vadd.f32 %v4300_v28, %v4299_v19  ;;  %v1610_v31 = vadd.f32 %v5834_v14, %v1609_v29  ;;  %v1755_v28 = vadd.f32 %v5834_v14, %v1754_v25 }
  0xcf   : > { %3323 = vst.msk [vmem:[%s5847_s16 + $0x100] sm:$0xf] %vm3258_vm2, %v3066_v24 }
  0xd0   : > { %vm2240_vm10 = vcmp.gt.f32.partialorder %v1610_v31, 0.0  ;;  %v2497_v32 = vmul.f32 %v5837_v17, %v1610_v31  ;;  %vm2298_vm1 = vcmp.gt.f32.partialorder %v1755_v28, 0.0 }
  0xd2   : > { %v2753_v33 = vsel %vm2240_vm10, %v1610_v31, %v2497_v32 }
  0xd3   : > { %v3009_v34 = vpack.c.bf16 %v2753_v33, %v2753_v33  ;;  %v3529_v35 = vsel %vm3515_vm3, %v2753_v33, 0.0  ;;  %v4040_v36 = vmul.f32 %v2753_v33, %v2753_v33  ;;  %v5643_v33 = vld [vmem:[%s5807_s10 + $0x208] sm:$0xff] }
  0xd4   : > { %v3530_v37 = vadd.f32 %v3529_v35, %v3528_v26  ;;  %5513 = vmatmul.msk.bf16.gmra.mxu2 %vm1198_vm0, %v5643_v33 }
  0xd5   : > { %3266 = vst.msk [vmem:[%s5847_s16 + $0x1c] sm:$0xf] %vm3258_vm2, %v3009_v34  ;;  %v4302_v39 = vsel %vm3515_vm3, %v4040_v36, 0.0  ;;  %v1612_v40 = vpop.f32.mrf.mxu0  ;;  %v2555_v34 = vmul.f32 %v5837_v17, %v1755_v28 }
  0xd6   : > { %v4303_v41 = vadd.f32 %v4302_v39, %v4301_v30  ;;  %v1613_v42 = vadd.f32 %v5834_v14, %v1612_v40 }
  0xd7   : > { %v5959_v36 = vsel %vm2298_vm1, %v1755_v28, %v2555_v34 }
  0xd8   : > { %vm2241_vm11 = vcmp.gt.f32.partialorder %v1613_v42, 0.0  ;;  %v2498_v43 = vmul.f32 %v5837_v17, %v1613_v42  ;;  %5460 = vmatmul.msk.bf16.gmra.mxu0 %vm1198_vm0, %v5590_v38  ;;  %v3067_v38 = vpack.c.bf16 %v5959_v36, %v5959_v36 }
  0xda   : > { %v2754_v44 = vsel %vm2241_vm11, %v1613_v42, %v2498_v43  ;;  %v1757_v42 = vpop.f32.mrf.mxu1  ;;  %3324 = vst.msk [vmem:[%s5847_s16 + $0x104] sm:$0xf] %vm3258_vm2, %v3067_v38 }
  0xdb   : > { %v3010_v45 = vpack.c.bf16 %v2754_v44, %v2754_v44  ;;  %v3531_v46 = vsel %vm3515_vm3, %v2754_v44, 0.0  ;;  %v4041_v47 = vmul.f32 %v2754_v44, %v2754_v44  ;;  %v5619_v44 = vld [vmem:[%s5807_s10 + $0x148] sm:$0xff]  ;;  %v1758_v49 = vadd.f32 %v5834_v14, %v1757_v42 }
  0xdc   : > { %v3532_v48 = vadd.f32 %v3531_v46, %v3530_v37  ;;  %5489 = vmatmul.msk.bf16.gmra.mxu1 %vm1198_vm0, %v5619_v44 }
  0xdd   : > { %3267 = vst.msk [vmem:[%s5847_s16 + $0x20] sm:$0xf] %vm3258_vm2, %v3010_v45  ;;  %v4304_v50 = vsel %vm3515_vm3, %v4041_v47, 0.0  ;;  %v1614_v51 = vpop.f32.mrf.mxu0  ;;  %vm2299_vm6 = vcmp.gt.f32.partialorder %v1758_v49, 0.0 }
  0xde   : > { %v4305_v52 = vadd.f32 %v4304_v50, %v4303_v41  ;;  %v1615_v53 = vadd.f32 %v5834_v14, %v1614_v51  ;;  %v2556_v51 = vmul.f32 %v5837_v17, %v1758_v49 }
  0xe0   : > { %vm2242_vm12 = vcmp.gt.f32.partialorder %v1615_v53, 0.0  ;;  %v2499_v54 = vmul.f32 %v5837_v17, %v1615_v53 }
  0xe2   : > { %v2755_v55 = vsel %vm2242_vm12, %v1615_v53, %v2499_v54  ;;  %v5975_v53 = vsel %vm2299_vm6, %v1758_v49, %v2556_v51 }
  0xe3   : > { %v3011_v56 = vpack.c.bf16 %v2755_v55, %v2755_v55  ;;  %v3533_v57 = vsel %vm3515_vm3, %v2755_v55, 0.0  ;;  %v4042_v58 = vmul.f32 %v2755_v55, %v2755_v55 }
  0xe4   : > { %v3534_v59 = vadd.f32 %v3533_v57, %v3532_v48  ;;  %v3068_v57 = vpack.c.bf16 %v5975_v53, %v5975_v53 }
  0xe5   : > { %3268 = vst.msk [vmem:[%s5847_s16 + $0x24] sm:$0xf] %vm3258_vm2, %v3011_v56  ;;  %v4306_v61 = vsel %vm3515_vm3, %v4042_v58, 0.0  ;;  %v1617_v62 = vpop.f32.mrf.mxu0  ;;  %v1759_v58 = vpop.f32.mrf.mxu1 }
  0xe6   : > { %v4307_v63 = vadd.f32 %v4306_v61, %v4305_v52  ;;  %v1618_v0 = vadd.f32 %v5834_v14, %v1617_v62  ;;  %v1760_v61 = vadd.f32 %v5834_v14, %v1759_v58  ;;  %3325 = vst.msk [vmem:[%s5847_s16 + $0x108] sm:$0xf] %vm3258_vm2, %v3068_v57 }
  0xe8   : > { %vm2243_vm13 = vcmp.gt.f32.partialorder %v1618_v0, 0.0  ;;  %v2500_v2 = vmul.f32 %v5837_v17, %v1618_v0  ;;  %5461 = vmatmul.msk.bf16.gmra.mxu0 %vm1198_vm0, %v5591_v60  ;;  %v5593_v60 = vld [vmem:[%s5807_s10 + $0x78] sm:$0xff]  ;;  %vm2300_vm7 = vcmp.gt.f32.partialorder %v1760_v61, 0.0 }
  0xea   : > { %v2756_v3 = vsel %vm2243_vm13, %v1618_v0, %v2500_v2  ;;  %v5644_v2 = vld [vmem:[%s5807_s10 + $0x210] sm:$0xff] }
  0xeb   : > { %v3012_v4 = vpack.c.bf16 %v2756_v3, %v2756_v3  ;;  %v3535_v5 = vsel %vm3515_vm3, %v2756_v3, 0.0  ;;  %v4043_v6 = vmul.f32 %v2756_v3, %v2756_v3  ;;  %v2557_v3 = vmul.f32 %v5837_v17, %v1760_v61  ;;  %5514 = vmatmul.msk.bf16.gmra.mxu2 %vm1198_vm0, %v5644_v2 }
  0xec   : > { %v3536_v8 = vadd.f32 %v3535_v5, %v3534_v59 }
  0xed   : > { %3269 = vst.msk [vmem:[%s5847_s16 + $0x28] sm:$0xf] %vm3258_vm2, %v3012_v4  ;;  %v4308_v10 = vsel %vm3515_vm3, %v4043_v6, 0.0  ;;  %v1619_v11 = vpop.f32.mrf.mxu0  ;;  %v5993_v5 = vsel %vm2300_vm7, %v1760_v61, %v2557_v3  ;;  %v5595_v3 = vld [vmem:[%s5807_s10 + $0x88] sm:$0xff] }
  0xee   : > { %v4309_v12 = vadd.f32 %v4308_v10, %v4307_v63  ;;  %v1620_v13 = vadd.f32 %v5834_v14, %v1619_v11  ;;  %v3069_v7 = vpack.c.bf16 %v5993_v5, %v5993_v5  ;;  %v1762_v11 = vpop.f32.mrf.mxu1 }
  0xf0   : > { %vm2244_vm14 = vcmp.gt.f32.partialorder %v1620_v13, 0.0  ;;  %v2501_v16 = vmul.f32 %v5837_v17, %v1620_v13  ;;  %3326 = vst.msk [vmem:[%s5847_s16 + $0x10c] sm:$0xf] %vm3258_vm2, %v3069_v7 }
  0xf2   : > { %v2757_v19 = vsel %vm2244_vm14, %v1620_v13, %v2501_v16  ;;  %v5620_v13 = vld [vmem:[%s5807_s10 + $0x150] sm:$0xff] }
  0xf3   : > { %v3013_v21 = vpack.c.bf16 %v2757_v19, %v2757_v19  ;;  %v3537_v22 = vsel %vm3515_vm3, %v2757_v19, 0.0  ;;  %v4044_v23 = vmul.f32 %v2757_v19, %v2757_v19  ;;  %5490 = vmatmul.msk.bf16.gmra.mxu1 %vm1198_vm0, %v5620_v13 }
  0xf4   : > { %v3538_v26 = vadd.f32 %v3537_v22, %v3536_v8 }
  0xf5   : > { %3270 = vst.msk [vmem:[%s5847_s16 + $0x2c] sm:$0xf] %vm3258_vm2, %v3013_v21  ;;  %v4310_v29 = vsel %vm3515_vm3, %v4044_v23, 0.0  ;;  %v1622_v30 = vpop.f32.mrf.mxu0  ;;  %v1763_v21 = vadd.f32 %v5834_v14, %v1762_v11 }
  0xf6   : > { %v4311_v31 = vadd.f32 %v4310_v29, %v4309_v12  ;;  %v1623_v32 = vadd.f32 %v5834_v14, %v1622_v30  ;;  %v1764_v30 = vpop.f32.mrf.mxu1 }
  0xf7   : > { %vm2301_vm10 = vcmp.gt.f32.partialorder %v1763_v21, 0.0  ;;  %v2558_v23 = vmul.f32 %v5837_v17, %v1763_v21  ;;  %v1765_v33 = vadd.f32 %v5834_v14, %v1764_v30 }
  0xf8   : > { %vm2245_vm4 = vcmp.gt.f32.partialorder %v1623_v32, 0.0  ;;  %v2502_v35 = vmul.f32 %v5837_v17, %v1623_v32  ;;  %5462 = vmatmul.msk.bf16.gmra.mxu0 %vm1198_vm0, %v5592_v27 }
  0xf9   : > { %v6009_v25 = vsel %vm2301_vm10, %v1763_v21, %v2558_v23  ;;  %vm2302_vm11 = vcmp.gt.f32.partialorder %v1765_v33, 0.0 }
  0xfa   : > { %v2758_v37 = vsel %vm2245_vm4, %v1623_v32, %v2502_v35  ;;  %v3070_v29 = vpack.c.bf16 %v6009_v25, %v6009_v25  ;;  %v5594_v32 = vld [vmem:[%s5807_s10 + $0x80] sm:$0xff] }
  0xfb   : > { %v3014_v39 = vpack.c.bf16 %v2758_v37, %v2758_v37  ;;  %v3539_v40 = vsel %vm3515_vm3, %v2758_v37, 0.0  ;;  %v4045_v41 = vmul.f32 %v2758_v37, %v2758_v37 }
  0xfc   : > { %v3540_v43 = vadd.f32 %v3539_v40, %v3538_v26  ;;  %3327 = vst.msk [vmem:[%s5847_s16 + $0x110] sm:$0xf] %vm3258_vm2, %v3070_v29  ;;  %v2559_v40 = vmul.f32 %v5837_v17, %v1765_v33 }
  0xfd   : > { %3271 = vst.msk [vmem:[%s5847_s16 + $0x30] sm:$0xf] %vm3258_vm2, %v3014_v39  ;;  %v4312_v45 = vsel %vm3515_vm3, %v4045_v41, 0.0  ;;  %v1624_v46 = vpop.f32.mrf.mxu0  ;;  %v5645_v39 = vld [vmem:[%s5807_s10 + $0x218] sm:$0xff] }
  0xfe   : > { %v4313_v47 = vadd.f32 %v4312_v45, %v4311_v31  ;;  %v1625_v48 = vadd.f32 %v5834_v14, %v1624_v46  ;;  %5515 = vmatmul.msk.bf16.gmra.mxu2 %vm1198_vm0, %v5645_v39  ;;  %v6027_v42 = vsel %vm2302_vm11, %v1765_v33, %v2559_v40 }
  0xff   : > { %v3071_v44 = vpack.c.bf16 %v6027_v42, %v6027_v42 }
 0x100   : > { %vm2246_vm5 = vcmp.gt.f32.partialorder %v1625_v48, 0.0  ;;  %v2503_v50 = vmul.f32 %v5837_v17, %v1625_v48 }
 0x101   : > { %3328 = vst.msk [vmem:[%s5847_s16 + $0x114] sm:$0xf] %vm3258_vm2, %v3071_v44 }
 0x102   : > { %v2759_v52 = vsel %vm2246_vm5, %v1625_v48, %v2503_v50  ;;  %v1767_v48 = vpop.f32.mrf.mxu1  ;;  %v5621_v50 = vld [vmem:[%s5807_s10 + $0x158] sm:$0xff] }
 0x103   : > { %v3015_v54 = vpack.c.bf16 %v2759_v52, %v2759_v52  ;;  %v3541_v55 = vsel %vm3515_vm3, %v2759_v52, 0.0  ;;  %v4046_v56 = vmul.f32 %v2759_v52, %v2759_v52  ;;  %5491 = vmatmul.msk.bf16.gmra.mxu1 %vm1198_vm0, %v5621_v50 }
 0x104   : > { %v3542_v59 = vadd.f32 %v3541_v55, %v3540_v43 }
 0x105   : > { %3272 = vst.msk [vmem:[%s5847_s16 + $0x34] sm:$0xf] %vm3258_vm2, %v3015_v54  ;;  %v4314_v62 = vsel %vm3515_vm3, %v4046_v56, 0.0  ;;  %v1627_v63 = vpop.f32.mrf.mxu0  ;;  %v1768_v56 = vadd.f32 %v5834_v14, %v1767_v48 }
 0x106   : > { %v4315_v0 = vadd.f32 %v4314_v62, %v4313_v47  ;;  %v1628_v1 = vadd.f32 %v5834_v14, %v1627_v63 }
 0x107   : > { %vm2303_vm14 = vcmp.gt.f32.partialorder %v1768_v56, 0.0  ;;  %v2560_v58 = vmul.f32 %v5837_v17, %v1768_v56 }
 0x108   : > { %vm2247_vm8 = vcmp.gt.f32.partialorder %v1628_v1, 0.0  ;;  %v2504_v4 = vmul.f32 %v5837_v17, %v1628_v1  ;;  %5463 = vmatmul.msk.bf16.gmra.mxu0 %vm1198_vm0, %v5593_v60 }
 0x109   : > { %v6043_v60 = vsel %vm2303_vm14, %v1768_v56, %v2560_v58 }
 0x10a   : > { %v2760_v6 = vsel %vm2247_vm8, %v1628_v1, %v2504_v4  ;;  %v1769_v1 = vpop.f32.mrf.mxu1 }
 0x10b   : > { %v3016_v8 = vpack.c.bf16 %v2760_v6, %v2760_v6  ;;  %v3543_v9 = vsel %vm3515_vm3, %v2760_v6, 0.0  ;;  %v4047_v10 = vmul.f32 %v2760_v6, %v2760_v6  ;;  %v1770_v4 = vadd.f32 %v5834_v14, %v1769_v1 }
 0x10c   : > { %v3544_v12 = vadd.f32 %v3543_v9, %v3542_v59 }
 0x10d   : > { %3273 = vst.msk [vmem:[%s5847_s16 + $0x38] sm:$0xf] %vm3258_vm2, %v3016_v8  ;;  %v4316_v15 = vsel %vm3515_vm3, %v4047_v10, 0.0  ;;  %v1629_v16 = vpop.f32.mrf.mxu0  ;;  %vm2304_vm15 = vcmp.gt.f32.partialorder %v1770_v4, 0.0  ;;  %v5646_v10 = vld [vmem:[%s5807_s10 + $0x220] sm:$0xff]  ;;  %v2561_v11 = vmul.f32 %v5837_v17, %v1770_v4 }
 0x10e   : > { %v4317_v18 = vadd.f32 %v4316_v15, %v4315_v0  ;;  %v1630_v19 = vadd.f32 %v5834_v14, %v1629_v16  ;;  %v3072_v0 = vpack.c.bf16 %v6043_v60, %v6043_v60  ;;  %5516 = vmatmul.msk.bf16.gmra.mxu2 %vm1198_vm0, %v5646_v10 }
 0x10f   : > { %v6061_v13 = vsel %vm2304_vm15, %v1770_v4, %v2561_v11 }
 0x110   : > { %vm2248_vm9 = vcmp.gt.f32.partialorder %v1630_v19, 0.0  ;;  %v2505_v22 = vmul.f32 %v5837_v17, %v1630_v19  ;;  %3329 = vst.msk [vmem:[%s5847_s16 + $0x118] sm:$0xf] %vm3258_vm2, %v3072_v0  ;;  %v3073_v16 = vpack.c.bf16 %v6061_v13, %v6061_v13 }
 0x112   : > { %v2761_v24 = vsel %vm2248_vm9, %v1630_v19, %v2505_v22  ;;  %v1772_v22 = vpop.f32.mrf.mxu1  ;;  %3330 = vst.msk [vmem:[%s5847_s16 + $0x11c] sm:$0xf] %vm3258_vm2, %v3073_v16 }
 0x113   : > { %v3017_v26 = vpack.c.bf16 %v2761_v24, %v2761_v24  ;;  %v3545_v27 = vsel %vm3515_vm3, %v2761_v24, 0.0  ;;  %v4048_v28 = vmul.f32 %v2761_v24, %v2761_v24  ;;  %v5622_v24 = vld [vmem:[%s5807_s10 + $0x160] sm:$0xff]  ;;  %v1773_v30 = vadd.f32 %v5834_v14, %v1772_v22 }
 0x114   : > { %v3546_v31 = vadd.f32 %v3545_v27, %v3544_v12  ;;  %5492 = vmatmul.msk.bf16.gmra.mxu1 %vm1198_vm0, %v5622_v24 }
 0x115   : > { %3274 = vst.msk [vmem:[%s5847_s16 + $0x3c] sm:$0xf] %vm3258_vm2, %v3017_v26  ;;  %v4318_v34 = vsel %vm3515_vm3, %v4048_v28, 0.0  ;;  %v1632_v35 = vpop.f32.mrf.mxu0  ;;  %vm2305_vm5 = vcmp.gt.f32.partialorder %v1773_v30, 0.0 }
 0x116   : > { %v4319_v37 = vadd.f32 %v4318_v34, %v4317_v18  ;;  %v1633_v38 = vadd.f32 %v5834_v14, %v1632_v35 }
 0x118   : > { %vm2249_vm12 = vcmp.gt.f32.partialorder %v1633_v38, 0.0  ;;  %v2506_v41 = vmul.f32 %v5837_v17, %v1633_v38  ;;  %5464 = vmatmul.msk.bf16.gmra.mxu0 %vm1198_vm0, %v5594_v32  ;;  %v2562_v32 = vmul.f32 %v5837_v17, %v1773_v30 }
 0x11a   : > { %v2762_v43 = vsel %vm2249_vm12, %v1633_v38, %v2506_v41  ;;  %v6077_v34 = vsel %vm2305_vm5, %v1773_v30, %v2562_v32  ;;  %v1774_v40 = vpop.f32.mrf.mxu1 }
 0x11b   : > { %v3018_v45 = vpack.c.bf16 %v2762_v43, %v2762_v43  ;;  %v3547_v46 = vsel %vm3515_vm3, %v2762_v43, 0.0  ;;  %v4049_v47 = vmul.f32 %v2762_v43, %v2762_v43  ;;  %v3074_v39 = vpack.c.bf16 %v6077_v34, %v6077_v34  ;;  %v5596_v43 = vld [vmem:[%s5807_s10 + $0x90] sm:$0xff] }
 0x11c   : > { %v3548_v49 = vadd.f32 %v3547_v46, %v3546_v31  ;;  %v1775_v44 = vadd.f32 %v5834_v14, %v1774_v40 }
 0x11d   : > { %3275 = vst.msk [vmem:[%s5847_s16 + $0x40] sm:$0xf] %vm3258_vm2, %v3018_v45  ;;  %v4320_v51 = vsel %vm3515_vm3, %v4049_v47, 0.0  ;;  %v1634_v52 = vpop.f32.mrf.mxu0 }
 0x11e   : > { %v4321_v54 = vadd.f32 %v4320_v51, %v4319_v37  ;;  %v1635_v55 = vadd.f32 %v5834_v14, %v1634_v52  ;;  %3331 = vst.msk [vmem:[%s5847_s16 + $0x120] sm:$0xf] %vm3258_vm2, %v3074_v39  ;;  %vm2306_vm6 = vcmp.gt.f32.partialorder %v1775_v44, 0.0  ;;  %v2563_v50 = vmul.f32 %v5837_v17, %v1775_v44  ;;  %v5624_v39 = vld [vmem:[%s5807_s10 + $0x170] sm:$0xff] }
 0x120   : > { %vm2250_vm13 = vcmp.gt.f32.partialorder %v1635_v55, 0.0  ;;  %v2507_v57 = vmul.f32 %v5837_v17, %v1635_v55  ;;  %v6095_v52 = vsel %vm2306_vm6, %v1775_v44, %v2563_v50 }
 0x122   : > { %v2763_v59 = vsel %vm2250_vm13, %v1635_v55, %v2507_v57  ;;  %v3075_v55 = vpack.c.bf16 %v6095_v52, %v6095_v52 }
 0x123   : > { %v3019_v61 = vpack.c.bf16 %v2763_v59, %v2763_v59  ;;  %v3549_v62 = vsel %vm3515_vm3, %v2763_v59, 0.0  ;;  %v4050_v63 = vmul.f32 %v2763_v59, %v2763_v59  ;;  %v1777_v59 = vpop.f32.mrf.mxu1 }
 0x124   : > { %v3550_v2 = vadd.f32 %v3549_v62, %v3548_v49  ;;  %v5647_v49 = vld [vmem:[%s5807_s10 + $0x228] sm:$0xff]  ;;  %3332 = vst.msk [vmem:[%s5847_s16 + $0x124] sm:$0xf] %vm3258_vm2, %v3075_v55 }
 0x125   : > { %3276 = vst.msk [vmem:[%s5847_s16 + $0x44] sm:$0xf] %vm3258_vm2, %v3019_v61  ;;  %v4322_v6 = vsel %vm3515_vm3, %v4050_v63, 0.0  ;;  %v1637_v7 = vpop.f32.mrf.mxu0  ;;  %5517 = vmatmul.msk.bf16.gmra.mxu2 %vm1198_vm0, %v5647_v49  ;;  %v5623_v62 = vld [vmem:[%s5807_s10 + $0x168] sm:$0xff] }
 0x126   : > { %v4323_v8 = vadd.f32 %v4322_v6, %v4321_v54  ;;  %v1638_v9 = vadd.f32 %v5834_v14, %v1637_v7  ;;  %5493 = vmatmul.msk.bf16.gmra.mxu1 %vm1198_vm0, %v5623_v62 }
 0x128   : > { %vm2251_vm1 = vcmp.gt.f32.partialorder %v1638_v9, 0.0  ;;  %v2508_v12 = vmul.f32 %v5837_v17, %v1638_v9  ;;  %5465 = vmatmul.msk.bf16.gmra.mxu0 %vm1198_vm0, %v5595_v3  ;;  %v1778_v3 = vadd.f32 %v5834_v14, %v1777_v59 }
 0x12a   : > { %v2764_v15 = vsel %vm2251_vm1, %v1638_v9, %v2508_v12  ;;  %vm2307_vm9 = vcmp.gt.f32.partialorder %v1778_v3, 0.0  ;;  %v2564_v6 = vmul.f32 %v5837_v17, %v1778_v3 }
 0x12b   : > { %v3020_v18 = vpack.c.bf16 %v2764_v15, %v2764_v15  ;;  %v3551_v19 = vsel %vm3515_vm3, %v2764_v15, 0.0  ;;  %v4051_v21 = vmul.f32 %v2764_v15, %v2764_v15  ;;  %v1779_v15 = vpop.f32.mrf.mxu1 }
 0x12c   : > { %v3552_v23 = vadd.f32 %v3551_v19, %v3550_v2  ;;  %v1780_v19 = vadd.f32 %v5834_v14, %v1779_v15 }
 0x12d   : > { %3277 = vst.msk [vmem:[%s5847_s16 + $0x48] sm:$0xf] %vm3258_vm2, %v3020_v18  ;;  %v4324_v26 = vsel %vm3515_vm3, %v4051_v21, 0.0  ;;  %v1639_v27 = vpop.f32.mrf.mxu0  ;;  %v5597_v18 = vld [vmem:[%s5807_s10 + $0x98] sm:$0xff] }
 0x12e   : > { %v4325_v28 = vadd.f32 %v4324_v26, %v4323_v8  ;;  %v1640_v29 = vadd.f32 %v5834_v14, %v1639_v27  ;;  %v6111_v8 = vsel %vm2307_vm9, %v1778_v3, %v2564_v6  ;;  %vm2308_vm10 = vcmp.gt.f32.partialorder %v1780_v19, 0.0  ;;  %v5648_v26 = vld [vmem:[%s5807_s10 + $0x230] sm:$0xff] }
 0x12f   : > { %v3076_v12 = vpack.c.bf16 %v6111_v8, %v6111_v8  ;;  %v2565_v27 = vmul.f32 %v5837_v17, %v1780_v19 }
 0x130   : > { %vm2252_vm4 = vcmp.gt.f32.partialorder %v1640_v29, 0.0  ;;  %v2509_v31 = vmul.f32 %v5837_v17, %v1640_v29 }
 0x131   : > { %3333 = vst.msk [vmem:[%s5847_s16 + $0x128] sm:$0xf] %vm3258_vm2, %v3076_v12 }
 0x132   : > { %v2765_v33 = vsel %vm2252_vm4, %v1640_v29, %v2509_v31  ;;  %v6129_v29 = vsel %vm2308_vm10, %v1780_v19, %v2565_v27 }
 0x133   : > { %v3021_v35 = vpack.c.bf16 %v2765_v33, %v2765_v33  ;;  %v3553_v37 = vsel %vm3515_vm3, %v2765_v33, 0.0  ;;  %v4052_v38 = vmul.f32 %v2765_v33, %v2765_v33  ;;  %v3077_v31 = vpack.c.bf16 %v6129_v29, %v6129_v29 }
 0x134   : > { %v3554_v41 = vadd.f32 %v3553_v37, %v3552_v23  ;;  %v1782_v37 = vpop.f32.mrf.mxu1 }
 0x135   : > { %3278 = vst.msk [vmem:[%s5847_s16 + $0x4c] sm:$0xf] %vm3258_vm2, %v3021_v35  ;;  %v4326_v45 = vsel %vm3515_vm3, %v4052_v38, 0.0  ;;  %v1642_v46 = vpop.f32.mrf.mxu0  ;;  %5518 = vmatmul.msk.bf16.gmra.mxu2 %vm1198_vm0, %v5648_v26 }
 0x136   : > { %v4327_v47 = vadd.f32 %v4326_v45, %v4325_v28  ;;  %v1643_v48 = vadd.f32 %v5834_v14, %v1642_v46  ;;  %3334 = vst.msk [vmem:[%s5847_s16 + $0x12c] sm:$0xf] %vm3258_vm2, %v3077_v31  ;;  %v1783_v45 = vadd.f32 %v5834_v14, %v1782_v37  ;;  %5494 = vmatmul.msk.bf16.gmra.mxu1 %vm1198_vm0, %v5624_v39 }
 0x138   : > { %vm2253_vm7 = vcmp.gt.f32.partialorder %v1643_v48, 0.0  ;;  %v2510_v51 = vmul.f32 %v5837_v17, %v1643_v48  ;;  %5466 = vmatmul.msk.bf16.gmra.mxu0 %vm1198_vm0, %v5596_v43  ;;  %vm2309_vm13 = vcmp.gt.f32.partialorder %v1783_v45, 0.0 }
 0x13a   : > { %v2766_v54 = vsel %vm2253_vm7, %v1643_v48, %v2510_v51 }
 0x13b   : > { %v3022_v56 = vpack.c.bf16 %v2766_v54, %v2766_v54  ;;  %v3555_v57 = vsel %vm3515_vm3, %v2766_v54, 0.0  ;;  %v4053_v58 = vmul.f32 %v2766_v54, %v2766_v54 }
 0x13c   : > { %v3556_v61 = vadd.f32 %v3555_v57, %v3554_v41 }
 0x13d   : > { %3279 = vst.msk [vmem:[%s5847_s16 + $0x50] sm:$0xf] %vm3258_vm2, %v3022_v56  ;;  %v4328_v63 = vsel %vm3515_vm3, %v4053_v58, 0.0  ;;  %v1644_v0 = vpop.f32.mrf.mxu0  ;;  %v1784_v56 = vpop.f32.mrf.mxu1  ;;  %v5598_v58 = vld [vmem:[%s5807_s10 + $0xa0] sm:$0xff] }
 0x13e   : > { %v4329_v1 = vadd.f32 %v4328_v63, %v4327_v47  ;;  %v1645_v2 = vadd.f32 %v5834_v14, %v1644_v0  ;;  %v2566_v47 = vmul.f32 %v5837_v17, %v1783_v45  ;;  %v1785_v59 = vadd.f32 %v5834_v14, %v1784_v56 }
 0x140   : > { %vm2254_vm8 = vcmp.gt.f32.partialorder %v1645_v2, 0.0  ;;  %v2511_v4 = vmul.f32 %v5837_v17, %v1645_v2  ;;  %v6145_v49 = vsel %vm2309_vm13, %v1783_v45, %v2566_v47  ;;  %vm2310_vm14 = vcmp.gt.f32.partialorder %v1785_v59, 0.0  ;;  %v5650_v45 = vld [vmem:[%s5807_s10 + $0x240] sm:$0xff] }
 0x141   : > { %v3078_v55 = vpack.c.bf16 %v6145_v49, %v6145_v49  ;;  %v5674_v47 = vld [vmem:[%s5807_s10 + $0x300] sm:$0xff] }
 0x142   : > { %v2767_v7 = vsel %vm2254_vm8, %v1645_v2, %v2511_v4  ;;  %v2567_v2 = vmul.f32 %v5837_v17, %v1785_v59  ;;  %5544 = vmatmul.msk.bf16.vlgmr.msra.gmra.mxu3 %vm1198_vm0, %v5674_v47 }
 0x143   : > { %v3023_v9 = vpack.c.bf16 %v2767_v7, %v2767_v7  ;;  %v3557_v10 = vsel %vm3515_vm3, %v2767_v7, 0.0  ;;  %v4054_v11 = vmul.f32 %v2767_v7, %v2767_v7  ;;  %3335 = vst.msk [vmem:[%s5847_s16 + $0x130] sm:$0xf] %vm3258_vm2, %v3078_v55 }
 0x144   : > { %v3558_v16 = vadd.f32 %v3557_v10, %v3556_v61  ;;  %v6163_v4 = vsel %vm2310_vm14, %v1785_v59, %v2567_v2 }
 0x145   : > { %3280 = vst.msk [vmem:[%s5847_s16 + $0x54] sm:$0xf] %vm3258_vm2, %v3023_v9  ;;  %v4330_v21 = vsel %vm3515_vm3, %v4054_v11, 0.0  ;;  %v1647_v22 = vpop.f32.mrf.mxu0  ;;  %v3079_v7 = vpack.c.bf16 %v6163_v4, %v6163_v4  ;;  %v1787_v12 = vpop.f32.mrf.mxu1 }
 0x146   : > { %v4331_v23 = vadd.f32 %v4330_v21, %v4329_v1  ;;  %v1648_v24 = vadd.f32 %v5834_v14, %v1647_v22  ;;  %v5649_v1 = vld [vmem:[%s5807_s10 + $0x238] sm:$0xff] }
 0x147   : > { %5519 = vmatmul.msk.bf16.gmra.mxu2 %vm1198_vm0, %v5649_v1  ;;  %3336 = vst.msk [vmem:[%s5847_s16 + $0x134] sm:$0xf] %vm3258_vm2, %v3079_v7  ;;  %v6213_v1 = vld [vmem:[%s9524_s2] ss:$0 sm:$0xff] }
 0x148   : > { %vm2255_vm11 = vcmp.gt.f32.partialorder %v1648_v24, 0.0  ;;  %v2512_v28 = vmul.f32 %v5837_v17, %v1648_v24  ;;  %5467 = vmatmul.msk.bf16.gmra.mxu0 %vm1198_vm0, %v5597_v18 }
 0x14a   : > { %v2768_v30 = vsel %vm2255_vm11, %v1648_v24, %v2512_v28 }
 0x14b   : > { %v3024_v32 = vpack.c.bf16 %v2768_v30, %v2768_v30  ;;  %v3559_v33 = vsel %vm3515_vm3, %v2768_v30, 0.0  ;;  %v4055_v35 = vmul.f32 %v2768_v30, %v2768_v30 }
 0x14c   : > { %v3560_v38 = vadd.f32 %v3559_v33, %v3558_v16  ;;  %v5625_v16 = vld [vmem:[%s5807_s10 + $0x178] sm:$0xff] }
 0x14d   : > { %3281 = vst.msk [vmem:[%s5847_s16 + $0x58] sm:$0xf] %vm3258_vm2, %v3024_v32  ;;  %v4332_v40 = vsel %vm3515_vm3, %v4055_v35, 0.0  ;;  %v1649_v41 = vpop.f32.mrf.mxu0  ;;  %5495 = vmatmul.msk.bf16.gmra.mxu1 %vm1198_vm0, %v5625_v16  ;;  %v1789_v35 = vpop.f32.mrf.mxu1 }
 0x14e   : > { %v4333_v43 = vadd.f32 %v4332_v40, %v4331_v23  ;;  %v1650_v44 = vadd.f32 %v5834_v14, %v1649_v41  ;;  %v1788_v23 = vadd.f32 %v5834_v14, %v1787_v12  ;;  %v1790_v39 = vadd.f32 %v5834_v14, %v1789_v35 }
 0x150   : > { %vm2256_vm12 = vcmp.gt.f32.partialorder %v1650_v44, 0.0  ;;  %v2513_v46 = vmul.f32 %v5837_v17, %v1650_v44  ;;  %vm2311_vm4 = vcmp.gt.f32.partialorder %v1788_v23, 0.0  ;;  %v2568_v26 = vmul.f32 %v5837_v17, %v1788_v23 }
 0x151   : > { %vm2312_vm5 = vcmp.gt.f32.partialorder %v1790_v39, 0.0 }
 0x152   : > { %v2769_v48 = vsel %vm2256_vm12, %v1650_v44, %v2513_v46  ;;  %v6179_v28 = vsel %vm2311_vm4, %v1788_v23, %v2568_v26  ;;  %v2569_v46 = vmul.f32 %v5837_v17, %v1790_v39 }
 0x153   : > { %v3025_v50 = vpack.c.bf16 %v2769_v48, %v2769_v48  ;;  %v3561_v51 = vsel %vm3515_vm3, %v2769_v48, 0.0  ;;  %v4056_v54 = vmul.f32 %v2769_v48, %v2769_v48  ;;  %v3080_v33 = vpack.c.bf16 %v6179_v28, %v6179_v28 }
 0x154   : > { %v3562_v57 = vadd.f32 %v3561_v51, %v3560_v38  ;;  %v5599_v38 = vld [vmem:[%s5807_s10 + $0xa8] sm:$0xff] }
 0x155   : > { %3282 = vst.msk [vmem:[%s5847_s16 + $0x5c] sm:$0xf] %vm3258_vm2, %v3025_v50  ;;  %v4334_v61 = vsel %vm3515_vm3, %v4056_v54, 0.0  ;;  %v1652_v62 = vpop.f32.mrf.mxu0  ;;  %v6198_v50 = vsel %vm2312_vm5, %v1790_v39, %v2569_v46 }
 0x156   : > { %v4335_v63 = vadd.f32 %v4334_v61, %v4333_v43  ;;  %v1653_v0 = vadd.f32 %v5834_v14, %v1652_v62  ;;  %3337 = vst.msk [vmem:[%s5847_s16 + $0x138] sm:$0xf] %vm3258_vm2, %v3080_v33  ;;  %v3081_v51 = vpack.c.bf16 %v6198_v50, %v6198_v50  ;;  %v5626_v61 = vld [vmem:[%s5807_s10 + $0x180] sm:$0xff] }
 0x157   : > { %5520 = vmatmul.msk.bf16.gmra.mxu2 %vm1198_vm0, %v5650_v45 }
 0x158   : > { %vm2257_vm15 = vcmp.gt.f32.partialorder %v1653_v0, 0.0  ;;  %v2514_v3 = vmul.f32 %v5837_v17, %v1653_v0  ;;  %5468 = vmatmul.msk.bf16.gmra.mxu0 %vm1198_vm0, %v5598_v58  ;;  %v1912_v58 = vpop.f32.mrf.mxu2  ;;  %3338 = vst.msk [vmem:[%s5847_s16 + $0x13c] sm:$0xf] %vm3258_vm2, %v3081_v51 }
 0x15a   : > { %v2770_v6 = vsel %vm2257_vm15, %v1653_v0, %v2514_v3 }
 0x15b   : > { %v3026_v9 = vpack.c.bf16 %v2770_v6, %v2770_v6  ;;  %v3563_v10 = vsel %vm3515_vm3, %v2770_v6, 0.0  ;;  %v4057_v11 = vmul.f32 %v2770_v6, %v2770_v6  ;;  %v1913_v6 = vadd.f32 %v6213_v1, %v1912_v58 }
 0x15c   : > { %v3564_v15 = vadd.f32 %v3563_v10, %v3562_v57  ;;  %v1792_v57 = vpop.f32.mrf.mxu1 }
 0x15d   : > { %3283 = vst.msk [vmem:[%s5847_s16 + $0x60] sm:$0xf] %vm3258_vm2, %v3026_v9  ;;  %v4336_v18 = vsel %vm3515_vm3, %v4057_v11, 0.0  ;;  %v1654_v19 = vpop.f32.mrf.mxu0  ;;  %v1793_v3 = vadd.f32 %v6213_v1, %v1792_v57  ;;  %5496 = vmatmul.msk.bf16.gmra.mxu1 %vm1198_vm0, %v5626_v61  ;;  %vm2361_vm9 = vcmp.gt.f32.partialorder %v1913_v6, 0.0  ;;  %v2618_v10 = vmul.f32 %v5837_v17, %v1913_v6  ;;  %v5627_v57 = vld [vmem:[%s5807_s10 + $0x188] sm:$0xff] }
 0x15e   : > { %v4337_v21 = vadd.f32 %v4336_v18, %v4335_v63  ;;  %v1655_v22 = vadd.f32 %v5834_v14, %v1654_v19 }
 0x15f   : > { %vm2313_vm8 = vcmp.gt.f32.partialorder %v1793_v3, 0.0  ;;  %v2570_v9 = vmul.f32 %v5837_v17, %v1793_v3  ;;  %v6228_v26 = vsel %vm2361_vm9, %v1913_v6, %v2618_v10 }
 0x160   : > { %vm2258_vm1 = vcmp.gt.f32.partialorder %v1655_v22, 0.0  ;;  %v2515_v24 = vmul.f32 %v5837_v17, %v1655_v22 }
 0x161   : > { %v6222_v12 = vsel %vm2313_vm8, %v1793_v3, %v2570_v9 }
 0x162   : > { %v2771_v27 = vsel %vm2258_vm1, %v1655_v22, %v2515_v24  ;;  %v3082_v19 = vpack.c.bf16 %v6222_v12, %v6222_v12  ;;  %v1914_v22 = vpop.f32.mrf.mxu2  ;;  %v5600_v24 = vld [vmem:[%s5807_s10 + $0xb0] sm:$0xff] }
 0x163   : > { %v3027_v30 = vpack.c.bf16 %v2771_v27, %v2771_v27  ;;  %v3565_v31 = vsel %vm3515_vm3, %v2771_v27, 0.0  ;;  %v4058_v32 = vmul.f32 %v2771_v27, %v2771_v27  ;;  %v1915_v39 = vadd.f32 %v6213_v1, %v1914_v22 }
 0x164   : > { %v3566_v37 = vadd.f32 %v3565_v31, %v3564_v15  ;;  %v3130_v31 = vpack.c.bf16 %v6228_v26, %v6228_v26  ;;  %3339 = vst.msk [vmem:[%s5847_s16 + $0x140] sm:$0xf] %vm3258_vm2, %v3082_v19 }
 0x165   : > { %3284 = vst.msk [vmem:[%s5847_s16 + $0x64] sm:$0xf] %vm3258_vm2, %v3027_v30  ;;  %v4338_v40 = vsel %vm3515_vm3, %v4058_v32, 0.0  ;;  %v1657_v41 = vpop.f32.mrf.mxu0  ;;  %vm2362_vm12 = vcmp.gt.f32.partialorder %v1915_v39, 0.0 }
 0x166   : > { %v4339_v43 = vadd.f32 %v4338_v40, %v4337_v21  ;;  %v1658_v44 = vadd.f32 %v5834_v14, %v1657_v41  ;;  %v1794_v21 = vpop.f32.mrf.mxu1  ;;  %3387 = vst.msk [vmem:[%s5847_s16 + $0x200] sm:$0xf] %vm3258_vm2, %v3130_v31 }
 0x167   : > { %v1795_v35 = vadd.f32 %v6213_v1, %v1794_v21 }
 0x168   : > { %vm2259_vm6 = vcmp.gt.f32.partialorder %v1658_v44, 0.0  ;;  %v2516_v48 = vmul.f32 %v5837_v17, %v1658_v44  ;;  %5469 = vmatmul.msk.bf16.gmra.mxu0 %vm1198_vm0, %v5599_v38  ;;  %v5675_v38 = vld [vmem:[%s5807_s10 + $0x308] sm:$0xff] }
 0x169   : > { %vm2314_vm11 = vcmp.gt.f32.partialorder %v1795_v35, 0.0  ;;  %v2571_v41 = vmul.f32 %v5837_v17, %v1795_v35  ;;  %5545 = vmatmul.msk.bf16.gmra.mxu3 %vm1198_vm0, %v5675_v38  ;;  %v5676_v38 = vld [vmem:[%s5807_s10 + $0x310] sm:$0xff] }
 0x16a   : > { %v2772_v14 = vsel %vm2259_vm6, %v1658_v44, %v2516_v48 }
 0x16b   : > { %v3028_v54 = vpack.c.bf16 %v2772_v14, %v2772_v14  ;;  %v3567_v55 = vsel %vm3515_vm3, %v2772_v14, 0.0  ;;  %v4059_v56 = vmul.f32 %v2772_v14, %v2772_v14  ;;  %v6250_v45 = vsel %vm2314_vm11, %v1795_v35, %v2571_v41 }
 0x16c   : > { %v3568_v59 = vadd.f32 %v3567_v55, %v3566_v37  ;;  %v5651_v37 = vld [vmem:[%s5807_s10 + $0x248] sm:$0xff]  ;;  %v3083_v14 = vpack.c.bf16 %v6250_v45, %v6250_v45 }
 0x16d   : > { %3285 = vst.msk [vmem:[%s5847_s16 + $0x68] sm:$0xf] %vm3258_vm2, %v3028_v54  ;;  %v4340_v62 = vsel %vm3515_vm3, %v4059_v56, 0.0  ;;  %v1659_v63 = vpop.f32.mrf.mxu0  ;;  %5521 = vmatmul.msk.bf16.gmra.mxu2 %vm1198_vm0, %v5651_v37  ;;  %v1917_v54 = vpop.f32.mrf.mxu2  ;;  %5497 = vmatmul.msk.bf16.gmra.mxu1 %vm1198_vm0, %v5627_v57  ;;  %v5652_v37 = vld [vmem:[%s5807_s10 + $0x250] sm:$0xff] }
 0x16e   : > { %v4341_v0 = vadd.f32 %v4340_v62, %v4339_v43  ;;  %v1660_v2 = vadd.f32 %v6213_v1, %v1659_v63  ;;  %v2619_v43 = vmul.f32 %v5837_v17, %v1915_v39  ;;  %v1797_v51 = vpop.f32.mrf.mxu1  ;;  %3340 = vst.msk [vmem:[%s5847_s16 + $0x144] sm:$0xf] %vm3258_vm2, %v3083_v14 }
 0x170   : > { %vm2260_vm7 = vcmp.gt.f32.partialorder %v1660_v2, 0.0  ;;  %v2517_v7 = vmul.f32 %v5837_v17, %v1660_v2  ;;  %v6255_v56 = vsel %vm2362_vm12, %v1915_v39, %v2619_v43 }
 0x171   : > { %v3131_v61 = vpack.c.bf16 %v6255_v56, %v6255_v56 }
 0x172   : > { %v2773_v11 = vsel %vm2260_vm7, %v1660_v2, %v2517_v7  ;;  %v1918_v2 = vadd.f32 %v6213_v1, %v1917_v54 }
 0x173   : > { %v3029_v15 = vpack.c.bf16 %v2773_v11, %v2773_v11  ;;  %v3569_v16 = vsel %vm3515_vm3, %v2773_v11, 0.0  ;;  %v4060_v18 = vmul.f32 %v2773_v11, %v2773_v11  ;;  %3388 = vst.msk [vmem:[%s5847_s16 + $0x204] sm:$0xf] %vm3258_vm2, %v3131_v61 }
 0x174   : > { %v3570_v23 = vadd.f32 %v3569_v16, %v3568_v59  ;;  %vm2363_vm15 = vcmp.gt.f32.partialorder %v1918_v2, 0.0  ;;  %v2620_v7 = vmul.f32 %v5837_v17, %v1918_v2 }
 0x175   : > { %3286 = vst.msk [vmem:[%s5847_s16 + $0x6c] sm:$0xf] %vm3258_vm2, %v3029_v15  ;;  %v4342_v27 = vsel %vm3515_vm3, %v4060_v18, 0.0  ;;  %v1662_v30 = vpop.f32.mrf.mxu0  ;;  %v1919_v21 = vpop.f32.mrf.mxu2 }
 0x176   : > { %v4343_v32 = vadd.f32 %v4342_v27, %v4341_v0  ;;  %v1663_v33 = vadd.f32 %v6213_v1, %v1662_v30  ;;  %v1798_v0 = vadd.f32 %v6213_v1, %v1797_v51  ;;  %v1799_v19 = vpop.f32.mrf.mxu1  ;;  %v1920_v39 = vadd.f32 %v6213_v1, %v1919_v21 }
 0x177   : > { %v1800_v35 = vadd.f32 %v6213_v1, %v1799_v19 }
 0x178   : > { %vm2261_vm10 = vcmp.gt.f32.partialorder %v1663_v33, 0.0  ;;  %v2518_v40 = vmul.f32 %v5837_v17, %v1663_v33  ;;  %5470 = vmatmul.msk.bf16.gmra.mxu0 %vm1198_vm0, %v5600_v24  ;;  %vm2315_vm14 = vcmp.gt.f32.partialorder %v1798_v0, 0.0  ;;  %v2572_v6 = vmul.f32 %v5837_v17, %v1798_v0 }
 0x179   : > { %v6280_v24 = vsel %vm2363_vm15, %v1918_v2, %v2620_v7  ;;  %vm2316_vm4 = vcmp.gt.f32.partialorder %v1800_v35, 0.0  ;;  %v2573_v41 = vmul.f32 %v5837_v17, %v1800_v35  ;;  %vm2364_vm5 = vcmp.gt.f32.partialorder %v1920_v39, 0.0  ;;  %5546 = vmatmul.msk.bf16.gmra.mxu3 %vm1198_vm0, %v5676_v38 }
 0x17a   : > { %v2774_v44 = vsel %vm2261_vm10, %v1663_v33, %v2518_v40  ;;  %v6274_v10 = vsel %vm2315_vm14, %v1798_v0, %v2572_v6  ;;  %v3132_v31 = vpack.c.bf16 %v6280_v24, %v6280_v24  ;;  %v2621_v43 = vmul.f32 %v5837_v17, %v1920_v39 }
 0x17b   : > { %v3030_v46 = vpack.c.bf16 %v2774_v44, %v2774_v44  ;;  %v3571_v47 = vsel %vm3515_vm3, %v2774_v44, 0.0  ;;  %v4061_v48 = vmul.f32 %v2774_v44, %v2774_v44  ;;  %v3084_v18 = vpack.c.bf16 %v6274_v10, %v6274_v10 }
 0x17c   : > { %v3572_v55 = vadd.f32 %v3571_v47, %v3570_v23  ;;  %v5601_v23 = vld [vmem:[%s5807_s10 + $0xb8] sm:$0xff]  ;;  %3389 = vst.msk [vmem:[%s5847_s16 + $0x208] sm:$0xf] %vm3258_vm2, %v3132_v31  ;;  %v5602_v31 = vld [vmem:[%s5807_s10 + $0xc0] sm:$0xff] }
 0x17d   : > { %3287 = vst.msk [vmem:[%s5847_s16 + $0x70] sm:$0xf] %vm3258_vm2, %v3030_v46  ;;  %v4344_v58 = vsel %vm3515_vm3, %v4061_v48, 0.0  ;;  %v1664_v59 = vpop.f32.mrf.mxu0  ;;  %5522 = vmatmul.msk.bf16.gmra.mxu2 %vm1198_vm0, %v5652_v37  ;;  %v6302_v46 = vsel %vm2316_vm4, %v1800_v35, %v2573_v41  ;;  %v5653_v41 = vld [vmem:[%s5807_s10 + $0x258] sm:$0xff] }
 0x17e   : > { %v4345_v62 = vadd.f32 %v4344_v58, %v4343_v32  ;;  %v1665_v63 = vadd.f32 %v6213_v1, %v1664_v59  ;;  %3341 = vst.msk [vmem:[%s5847_s16 + $0x148] sm:$0xf] %vm3258_vm2, %v3084_v18  ;;  %v3085_v51 = vpack.c.bf16 %v6302_v46, %v6302_v46  ;;  %v1802_v54 = vpop.f32.mrf.mxu1  ;;  %v6307_v58 = vsel %vm2364_vm5, %v1920_v39, %v2621_v43  ;;  %v5628_v59 = vld [vmem:[%s5807_s10 + $0x190] sm:$0xff]  ;;  %v5677_v43 = vld [vmem:[%s5807_s10 + $0x318] sm:$0xff] }
 0x17f   : > { %9709 = vst [vmem:[#allocation3_spill] sm:$0xff] %v6307_v58  ;;  %5498 = vmatmul.msk.bf16.gmra.mxu1 %vm1198_vm0, %v5628_v59 }
 0x180   : > { %vm2262_vm13 = vcmp.gt.f32.partialorder %v1665_v63, 0.0  ;;  %v2519_v3 = vmul.f32 %v5837_v17, %v1665_v63  ;;  %3342 = vst.msk [vmem:[%s5847_s16 + $0x14c] sm:$0xf] %vm3258_vm2, %v3085_v51 }
 0x182   : > { %v2775_v9 = vsel %vm2262_vm13, %v1665_v63, %v2519_v3  ;;  %v3133_v63 = vpack.c.bf16 %v6307_v58, %v6307_v58  ;;  %v1803_v3 = vadd.f32 %v6213_v1, %v1802_v54 }
 0x183   : > { %v3031_v11 = vpack.c.bf16 %v2775_v9, %v2775_v9  ;;  %v3573_v15 = vsel %vm3515_vm3, %v2775_v9, 0.0  ;;  %v4062_v16 = vmul.f32 %v2775_v9, %v2775_v9 }
 0x184   : > { %v3574_v22 = vadd.f32 %v3573_v15, %v3572_v55  ;;  %v1922_v55 = vpop.f32.mrf.mxu2  ;;  %3390 = vst.msk [vmem:[%s5847_s16 + $0x20c] sm:$0xf] %vm3258_vm2, %v3133_v63  ;;  %vm2317_vm7 = vcmp.gt.f32.partialorder %v1803_v3, 0.0  ;;  %v2574_v9 = vmul.f32 %v5837_v17, %v1803_v3 }
 0x185   : > { %3288 = vst.msk [vmem:[%s5847_s16 + $0x74] sm:$0xf] %vm3258_vm2, %v3031_v11  ;;  %v4346_v27 = vsel %vm3515_vm3, %v4062_v16, 0.0  ;;  %v1667_v30 = vpop.f32.mrf.mxu0  ;;  %v1923_v6 = vadd.f32 %v6213_v1, %v1922_v55 }
 0x186   : > { %v4347_v32 = vadd.f32 %v4346_v27, %v4345_v62  ;;  %v1668_v33 = vadd.f32 %v6213_v1, %v1667_v30  ;;  %v6326_v16 = vsel %vm2317_vm7, %v1803_v3, %v2574_v9  ;;  %v5629_v3 = vld [vmem:[%s5807_s10 + $0x198] sm:$0xff] }
 0x187   : > { %vm2365_vm8 = vcmp.gt.f32.partialorder %v1923_v6, 0.0  ;;  %v2622_v11 = vmul.f32 %v5837_v17, %v1923_v6 }
 0x188   : > { %vm2263_vm1 = vcmp.gt.f32.partialorder %v1668_v33, 0.0  ;;  %v2520_v40 = vmul.f32 %v5837_v17, %v1668_v33  ;;  %5471 = vmatmul.msk.bf16.gmra.mxu0 %vm1198_vm0, %v5601_v23  ;;  %v1804_v23 = vpop.f32.mrf.mxu1 }
 0x189   : > { %5547 = vmatmul.msk.bf16.gmra.mxu3 %vm1198_vm0, %v5677_v43 }
 0x18a   : > { %v2776_v44 = vsel %vm2263_vm1, %v1668_v33, %v2520_v40  ;;  %v1805_v40 = vadd.f32 %v6213_v1, %v1804_v23 }
 0x18b   : > { %v3032_v47 = vpack.c.bf16 %v2776_v44, %v2776_v44  ;;  %v3575_v48 = vsel %vm3515_vm3, %v2776_v44, 0.0  ;;  %v4063_v14 = vmul.f32 %v2776_v44, %v2776_v44 }
 0x18c   : > { %v3576_v57 = vadd.f32 %v3575_v48, %v3574_v22  ;;  %v3086_v22 = vpack.c.bf16 %v6326_v16, %v6326_v16  ;;  %v1924_v27 = vpop.f32.mrf.mxu2  ;;  %vm2318_vm10 = vcmp.gt.f32.partialorder %v1805_v40, 0.0  ;;  %v2575_v48 = vmul.f32 %v5837_v17, %v1805_v40 }
 0x18d   : > { %3289 = vst.msk [vmem:[%s5847_s16 + $0x78] sm:$0xf] %vm3258_vm2, %v3032_v47  ;;  %v4348_v61 = vsel %vm3515_vm3, %v4063_v14, 0.0  ;;  %v1669_v62 = vpop.f32.mrf.mxu0  ;;  %v1925_v44 = vadd.f32 %v6213_v1, %v1924_v27  ;;  %5523 = vmatmul.msk.bf16.gmra.mxu2 %vm1198_vm0, %v5653_v41  ;;  %v5603_v41 = vld [vmem:[%s5807_s10 + $0xc8] sm:$0xff] }
 0x18e   : > { %v4349_v0 = vadd.f32 %v4348_v61, %v4347_v32  ;;  %v1670_v2 = vadd.f32 %v6213_v1, %v1669_v62  ;;  %v6332_v32 = vsel %vm2365_vm8, %v1923_v6, %v2622_v11  ;;  %3343 = vst.msk [vmem:[%s5847_s16 + $0x150] sm:$0xf] %vm3258_vm2, %v3086_v22  ;;  %v6354_v54 = vsel %vm2318_vm10, %v1805_v40, %v2575_v48 }
 0x18f   : > { %9710 = vst [vmem:[#allocation4_spill] sm:$0xff] %v6332_v32  ;;  %v3134_v37 = vpack.c.bf16 %v6332_v32, %v6332_v32  ;;  %vm2366_vm11 = vcmp.gt.f32.partialorder %v1925_v44, 0.0  ;;  %v2623_v14 = vmul.f32 %v5837_v17, %v1925_v44  ;;  %v3087_v61 = vpack.c.bf16 %v6354_v54, %v6354_v54  ;;  %5499 = vmatmul.msk.bf16.gmra.mxu1 %vm1198_vm0, %v5629_v3 }
 0x190   : > { %vm2264_vm6 = vcmp.gt.f32.partialorder %v1670_v2, 0.0  ;;  %v2521_v7 = vmul.f32 %v5837_v17, %v1670_v2  ;;  %v1807_v62 = vpop.f32.mrf.mxu1 }
 0x191   : > { %3391 = vst.msk [vmem:[%s5847_s16 + $0x210] sm:$0xf] %vm3258_vm2, %v3134_v37 }
 0x192   : > { %v2777_v15 = vsel %vm2264_vm6, %v1670_v2, %v2521_v7  ;;  %v6359_v2 = vsel %vm2366_vm11, %v1925_v44, %v2623_v14  ;;  %3344 = vst.msk [vmem:[%s5847_s16 + $0x154] sm:$0xf] %vm3258_vm2, %v3087_v61 }
 0x193   : > { %v3033_v18 = vpack.c.bf16 %v2777_v15, %v2777_v15  ;;  %v3577_v19 = vsel %vm3515_vm3, %v2777_v15, 0.0  ;;  %v4064_v21 = vmul.f32 %v2777_v15, %v2777_v15  ;;  %9711 = vst [vmem:[#allocation5_spill] sm:$0xff] %v6359_v2  ;;  %v3135_v9 = vpack.c.bf16 %v6359_v2, %v6359_v2 }
 0x194   : > { %v3578_v30 = vadd.f32 %v3577_v19, %v3576_v57  ;;  %v1927_v63 = vpop.f32.mrf.mxu2 }
 0x195   : > { %3290 = vst.msk [vmem:[%s5847_s16 + $0x7c] sm:$0xf] %vm3258_vm2, %v3033_v18  ;;  %v4350_v33 = vsel %vm3515_vm3, %v4064_v21, 0.0  ;;  %v1672_v35 = vpop.f32.mrf.mxu0  ;;  %v1808_v18 = vadd.f32 %v6213_v1, %v1807_v62  ;;  %v1928_v19 = vadd.f32 %v6213_v1, %v1927_v63 }
 0x196   : > { %v4351_v38 = vadd.f32 %v4350_v33, %v4349_v0  ;;  %v1673_v39 = vadd.f32 %v6213_v1, %v1672_v35  ;;  %3392 = vst.msk [vmem:[%s5847_s16 + $0x214] sm:$0xf] %vm3258_vm2, %v3135_v9 }
 0x197   : > { %vm2319_vm13 = vcmp.gt.f32.partialorder %v1808_v18, 0.0  ;;  %v2576_v22 = vmul.f32 %v5837_v17, %v1808_v18  ;;  %vm2367_vm14 = vcmp.gt.f32.partialorder %v1928_v19, 0.0  ;;  %v2624_v23 = vmul.f32 %v5837_v17, %v1928_v19 }
 0x198   : > { %vm2265_vm9 = vcmp.gt.f32.partialorder %v1673_v39, 0.0  ;;  %v2522_v47 = vmul.f32 %v5837_v17, %v1673_v39  ;;  %5472 = vmatmul.msk.bf16.gmra.mxu0 %vm1198_vm0, %v5602_v31 }
 0x199   : > { %v6384_v43 = vsel %vm2367_vm14, %v1928_v19, %v2624_v23  ;;  %v5630_v23 = vld [vmem:[%s5807_s10 + $0x1a0] sm:$0xff] }
 0x19a   : > { %v2778_v51 = vsel %vm2265_vm9, %v1673_v39, %v2522_v47  ;;  %9712 = vst [vmem:[#allocation6_spill] sm:$0xff] %v6384_v43  ;;  %v3136_v48 = vpack.c.bf16 %v6384_v43, %v6384_v43 }
 0x19b   : > { %v3034_v55 = vpack.c.bf16 %v2778_v51, %v2778_v51  ;;  %v3579_v57 = vsel %vm3515_vm3, %v2778_v51, 0.0  ;;  %v4065_v59 = vmul.f32 %v2778_v51, %v2778_v51 }
 0x19c   : > { %v3580_v0 = vadd.f32 %v3579_v57, %v3578_v30  ;;  %v6378_v30 = vsel %vm2319_vm13, %v1808_v18, %v2576_v22  ;;  %v1929_v39 = vpop.f32.mrf.mxu2  ;;  %v5654_v57 = vld [vmem:[%s5807_s10 + $0x260] sm:$0xff]  ;;  %3393 = vst.msk [vmem:[%s5847_s16 + $0x218] sm:$0xf] %vm3258_vm2, %v3136_v48 }
 0x19d   : > { %3291 = vst.msk [vmem:[%s5847_s16 + $0x80] sm:$0xf] %vm3258_vm2, %v3034_v55  ;;  %v4352_v6 = vsel %vm3515_vm3, %v4065_v59, 0.0  ;;  %v1674_v7 = vpop.f32.mrf.mxu0  ;;  %v3088_v37 = vpack.c.bf16 %v6378_v30, %v6378_v30  ;;  %v5678_v59 = vld [vmem:[%s5807_s10 + $0x320] sm:$0xff]  ;;  %v1930_v61 = vadd.f32 %v6213_v1, %v1929_v39  ;;  %5524 = vmatmul.msk.bf16.gmra.mxu2 %vm1198_vm0, %v5654_v57 }
 0x19e   : > { %v4353_v11 = vadd.f32 %v4352_v6, %v4351_v38  ;;  %v1675_v15 = vadd.f32 %v6213_v1, %v1674_v7  ;;  %v1809_v38 = vpop.f32.mrf.mxu1  ;;  %5548 = vmatmul.msk.bf16.gmra.mxu3 %vm1198_vm0, %v5678_v59 }
 0x19f   : > { %3345 = vst.msk [vmem:[%s5847_s16 + $0x158] sm:$0xf] %vm3258_vm2, %v3088_v37  ;;  %v1810_v55 = vadd.f32 %v6213_v1, %v1809_v38  ;;  %vm2368_vm4 = vcmp.gt.f32.partialorder %v1930_v61, 0.0  ;;  %5500 = vmatmul.msk.bf16.gmra.mxu1 %vm1198_vm0, %v5630_v23 }
 0x1a0   : > { %vm2266_vm12 = vcmp.gt.f32.partialorder %v1675_v15, 0.0  ;;  %v2523_v21 = vmul.f32 %v5837_v17, %v1675_v15 }
 0x1a1   : > { %vm2320_vm1 = vcmp.gt.f32.partialorder %v1810_v55, 0.0  ;;  %v2577_v63 = vmul.f32 %v5837_v17, %v1810_v55 }
 0x1a2   : > { %v2779_v27 = vsel %vm2266_vm12, %v1675_v15, %v2523_v21 }
 0x1a3   : > { %v3035_v31 = vpack.c.bf16 %v2779_v27, %v2779_v27  ;;  %v3581_v33 = vsel %vm3515_vm3, %v2779_v27, 0.0  ;;  %v4066_v35 = vmul.f32 %v2779_v27, %v2779_v27  ;;  %v6406_v6 = vsel %vm2320_vm1, %v1810_v55, %v2577_v63  ;;  %v5604_v63 = vld [vmem:[%s5807_s10 + $0xd0] sm:$0xff] }
 0x1a4   : > { %v3582_v40 = vadd.f32 %v3581_v33, %v3580_v0  ;;  %v2625_v0 = vmul.f32 %v5837_v17, %v1930_v61  ;;  %9713 = vst [vmem:[#allocation7_spill] sm:$0xff] %v6406_v6  ;;  %v3089_v15 = vpack.c.bf16 %v6406_v6, %v6406_v6  ;;  %v1932_v19 = vpop.f32.mrf.mxu2  ;;  %v7229_v6 = vsel %vm3515_vm3, %v6095_v52, 0.0 }
 0x1a5   : > { %3292 = vst.msk [vmem:[%s5847_s16 + $0x84] sm:$0xf] %vm3258_vm2, %v3035_v31  ;;  %v4354_v44 = vsel %vm3515_vm3, %v4066_v35, 0.0  ;;  %v1677_v47 = vpop.f32.mrf.mxu0  ;;  %v1933_v39 = vadd.f32 %v6213_v1, %v1932_v19  ;;  %v5655_v19 = vld [vmem:[%s5807_s10 + $0x268] sm:$0xff] }
 0x1a6   : > { %v4355_v14 = vadd.f32 %v4354_v44, %v4353_v11  ;;  %v1678_v51 = vadd.f32 %v6213_v1, %v1677_v47  ;;  %v1812_v18 = vpop.f32.mrf.mxu1  ;;  %v6411_v22 = vsel %vm2368_vm4, %v1930_v61, %v2625_v0  ;;  %3346 = vst.msk [vmem:[%s5847_s16 + $0x15c] sm:$0xf] %vm3258_vm2, %v3089_v15 }
 0x1a7   : > { %9714 = vst [vmem:[#allocation8_spill] sm:$0xff] %v6411_v22  ;;  %v3137_v33 = vpack.c.bf16 %v6411_v22, %v6411_v22  ;;  %v1813_v38 = vadd.f32 %v6213_v1, %v1812_v18  ;;  %vm2369_vm7 = vcmp.gt.f32.partialorder %v1933_v39, 0.0  ;;  %v2626_v44 = vmul.f32 %v5837_v17, %v1933_v39  ;;  %v5684_v22 = vld [vmem:[%s5807_s10 + $0x350] sm:$0xff] }
 0x1a8   : > { %vm2267_vm15 = vcmp.gt.f32.partialorder %v1678_v51, 0.0  ;;  %v2524_v62 = vmul.f32 %v5837_v17, %v1678_v51  ;;  %5473 = vmatmul.msk.bf16.gmra.mxu0 %vm1198_vm0, %v5603_v41 }
 0x1a9   : > { %3394 = vst.msk [vmem:[%s5847_s16 + $0x21c] sm:$0xf] %vm3258_vm2, %v3137_v33  ;;  %vm2321_vm6 = vcmp.gt.f32.partialorder %v1813_v38, 0.0  ;;  %v2578_v41 = vmul.f32 %v5837_v17, %v1813_v38  ;;  %v6436_v0 = vsel %vm2369_vm7, %v1933_v39, %v2626_v44 }
 0x1aa   : > { %v2780_v3 = vsel %vm2267_vm15, %v1678_v51, %v2524_v62  ;;  %9716 = vst [vmem:[#allocation10_spill] sm:$0xff] %v6436_v0 }
 0x1ab   : > { %v3036_v7 = vpack.c.bf16 %v2780_v3, %v2780_v3  ;;  %v3583_v9 = vsel %vm3515_vm3, %v2780_v3, 0.0  ;;  %v4067_v11 = vmul.f32 %v2780_v3, %v2780_v3  ;;  %v6430_v48 = vsel %vm2321_vm6, %v1813_v38, %v2578_v41 }
 0x1ac   : > { %v3584_v21 = vadd.f32 %v3583_v9, %v3582_v40  ;;  %9715 = vst [vmem:[#allocation9_spill] sm:$0xff] %v6430_v48  ;;  %v3090_v57 = vpack.c.bf16 %v6430_v48, %v6430_v48  ;;  %v1934_v61 = vpop.f32.mrf.mxu2  ;;  %v3138_v9 = vpack.c.bf16 %v6436_v0, %v6436_v0 }
 0x1ad   : > { %3293 = vst.msk [vmem:[%s5847_s16 + $0x88] sm:$0xf] %vm3258_vm2, %v3036_v7  ;;  %v4356_v27 = vsel %vm3515_vm3, %v4067_v11, 0.0  ;;  %v1679_v31 = vpop.f32.mrf.mxu0  ;;  %v1935_v23 = vadd.f32 %v6213_v1, %v1934_v61  ;;  %5525 = vmatmul.msk.bf16.gmra.mxu2 %vm1198_vm0, %v5655_v19 }
 0x1ae   : > { %v4357_v35 = vadd.f32 %v4356_v27, %v4355_v14  ;;  %v1680_v37 = vadd.f32 %v6213_v1, %v1679_v31  ;;  %v1814_v59 = vpop.f32.mrf.mxu1  ;;  %3347 = vst.msk [vmem:[%s5847_s16 + $0x160] sm:$0xf] %vm3258_vm2, %v3090_v57 }
 0x1af   : > { %v1815_v18 = vadd.f32 %v6213_v1, %v1814_v59  ;;  %3395 = vst.msk [vmem:[%s5847_s16 + $0x220] sm:$0xf] %vm3258_vm2, %v3138_v9  ;;  %vm2370_vm10 = vcmp.gt.f32.partialorder %v1935_v23, 0.0  ;;  %v2627_v33 = vmul.f32 %v5837_v17, %v1935_v23 }
 0x1b0   : > { %vm2268_vm5 = vcmp.gt.f32.partialorder %v1680_v37, 0.0  ;;  %v2525_v40 = vmul.f32 %v5837_v17, %v1680_v37 }
 0x1b1   : > { %vm2322_vm9 = vcmp.gt.f32.partialorder %v1815_v18, 0.0  ;;  %v2579_v31 = vmul.f32 %v5837_v17, %v1815_v18 }
 0x1b2   : > { %v2781_v47 = vsel %vm2268_vm5, %v1680_v37, %v2525_v40 }
 0x1b3   : > { %v3037_v14 = vpack.c.bf16 %v2781_v47, %v2781_v47  ;;  %v3585_v51 = vsel %vm3515_vm3, %v2781_v47, 0.0  ;;  %v4068_v55 = vmul.f32 %v2781_v47, %v2781_v47  ;;  %v6458_v37 = vsel %vm2322_vm9, %v1815_v18, %v2579_v31 }
 0x1b4   : > { %v3586_v62 = vadd.f32 %v3585_v51, %v3584_v21  ;;  %v5679_v21 = vld [vmem:[%s5807_s10 + $0x328] sm:$0xff]  ;;  %9717 = vst [vmem:[#allocation11_spill] sm:$0xff] %v6458_v37  ;;  %v3091_v41 = vpack.c.bf16 %v6458_v37, %v6458_v37  ;;  %v1937_v47 = vpop.f32.mrf.mxu2  ;;  %v6463_v51 = vsel %vm2370_vm10, %v1935_v23, %v2627_v33 }
 0x1b5   : > { %3294 = vst.msk [vmem:[%s5847_s16 + $0x8c] sm:$0xf] %vm3258_vm2, %v3037_v14  ;;  %v4358_v3 = vsel %vm3515_vm3, %v4068_v55, 0.0  ;;  %v1682_v7 = vpop.f32.mrf.mxu0  ;;  %5549 = vmatmul.msk.bf16.gmra.mxu3 %vm1198_vm0, %v5679_v21  ;;  %v5631_v55 = vld [vmem:[%s5807_s10 + $0x1a8] sm:$0xff]  ;;  %v3139_v61 = vpack.c.bf16 %v6463_v51, %v6463_v51 }
 0x1b6   : > { %v4359_v11 = vadd.f32 %v4358_v3, %v4357_v35  ;;  %v1683_v15 = vadd.f32 %v6213_v1, %v1682_v7  ;;  %v1817_v44 = vpop.f32.mrf.mxu1  ;;  %9718 = vst [vmem:[#allocation12_spill] sm:$0xff] %v6463_v51  ;;  %5501 = vmatmul.msk.bf16.gmra.mxu1 %vm1198_vm0, %v5631_v55 }
 0x1b7   : > { %3348 = vst.msk [vmem:[%s5847_s16 + $0x164] sm:$0xf] %vm3258_vm2, %v3091_v41  ;;  %v1818_v7 = vadd.f32 %v6213_v1, %v1817_v44 }
 0x1b8   : > { %vm2269_vm8 = vcmp.gt.f32.partialorder %v1683_v15, 0.0  ;;  %v2526_v27 = vmul.f32 %v5837_v17, %v1683_v15  ;;  %5474 = vmatmul.msk.bf16.gmra.mxu0 %vm1198_vm0, %v5604_v63  ;;  %3396 = vst.msk [vmem:[%s5847_s16 + $0x224] sm:$0xf] %vm3258_vm2, %v3139_v61  ;;  %v5656_v61 = vld [vmem:[%s5807_s10 + $0x270] sm:$0xff] }
 0x1b9   : > { %vm2323_vm12 = vcmp.gt.f32.partialorder %v1818_v7, 0.0 }
 0x1ba   : > { %v2782_v35 = vsel %vm2269_vm8, %v1683_v15, %v2526_v27 }
 0x1bb   : > { %v3038_v38 = vpack.c.bf16 %v2782_v35, %v2782_v35  ;;  %v3587_v39 = vsel %vm3515_vm3, %v2782_v35, 0.0  ;;  %v4069_v40 = vmul.f32 %v2782_v35, %v2782_v35 }
 0x1bc   : > { %v3588_v14 = vadd.f32 %v3587_v39, %v3586_v62  ;;  %v1938_v62 = vadd.f32 %v6213_v1, %v1937_v47  ;;  %v1939_v35 = vpop.f32.mrf.mxu2  ;;  %v5605_v39 = vld [vmem:[%s5807_s10 + $0xd8] sm:$0xff] }
 0x1bd   : > { %3295 = vst.msk [vmem:[%s5847_s16 + $0x90] sm:$0xf] %vm3258_vm2, %v3038_v38  ;;  %v4360_v57 = vsel %vm3515_vm3, %v4069_v40, 0.0  ;;  %v1684_v59 = vpop.f32.mrf.mxu0  ;;  %5526 = vmatmul.msk.bf16.gmra.mxu2 %vm1198_vm0, %v5656_v61 }
 0x1be   : > { %v4361_v63 = vadd.f32 %v4360_v57, %v4359_v11  ;;  %v1685_v3 = vadd.f32 %v6213_v1, %v1684_v59  ;;  %v2580_v11 = vmul.f32 %v5837_v17, %v1818_v7  ;;  %vm2371_vm13 = vcmp.gt.f32.partialorder %v1938_v62, 0.0  ;;  %v1819_v33 = vpop.f32.mrf.mxu1 }
 0x1bf   : > { %v2628_v15 = vmul.f32 %v5837_v17, %v1938_v62  ;;  %v1820_v59 = vadd.f32 %v6213_v1, %v1819_v33 }
 0x1c0   : > { %vm2270_vm11 = vcmp.gt.f32.partialorder %v1685_v3, 0.0  ;;  %v2527_v9 = vmul.f32 %v5837_v17, %v1685_v3  ;;  %v6482_v19 = vsel %vm2323_vm12, %v1818_v7, %v2580_v11 }
 0x1c1   : > { %9719 = vst [vmem:[#allocation13_spill] sm:$0xff] %v6482_v19  ;;  %v3092_v31 = vpack.c.bf16 %v6482_v19, %v6482_v19  ;;  %v6488_v40 = vsel %vm2371_vm13, %v1938_v62, %v2628_v15  ;;  %vm2324_vm15 = vcmp.gt.f32.partialorder %v1820_v59, 0.0 }
 0x1c2   : > { %v2783_v18 = vsel %vm2270_vm11, %v1685_v3, %v2527_v9  ;;  %9720 = vst [vmem:[#allocation14_spill] sm:$0xff] %v6488_v40  ;;  %v3140_v47 = vpack.c.bf16 %v6488_v40, %v6488_v40  ;;  %v1940_v3 = vadd.f32 %v6213_v1, %v1939_v35  ;;  %v5634_v40 = vld [vmem:[%s5807_s10 + $0x1c0] sm:$0xff] }
 0x1c3   : > { %v3039_v21 = vpack.c.bf16 %v2783_v18, %v2783_v18  ;;  %v3589_v23 = vsel %vm3515_vm3, %v2783_v18, 0.0  ;;  %v4070_v27 = vmul.f32 %v2783_v18, %v2783_v18  ;;  %3349 = vst.msk [vmem:[%s5847_s16 + $0x168] sm:$0xf] %vm3258_vm2, %v3092_v31 }
 0x1c4   : > { %v3590_v38 = vadd.f32 %v3589_v23, %v3588_v14  ;;  %v5680_v14 = vld [vmem:[%s5807_s10 + $0x330] sm:$0xff]  ;;  %3397 = vst.msk [vmem:[%s5847_s16 + $0x228] sm:$0xf] %vm3258_vm2, %v3140_v47  ;;  %vm2372_vm1 = vcmp.gt.f32.partialorder %v1940_v3, 0.0  ;;  %v2629_v62 = vmul.f32 %v5837_v17, %v1940_v3  ;;  %v1942_v31 = vpop.f32.mrf.mxu2 }
 0x1c5   : > { %3296 = vst.msk [vmem:[%s5847_s16 + $0x94] sm:$0xf] %vm3258_vm2, %v3039_v21  ;;  %v4362_v41 = vsel %vm3515_vm3, %v4070_v27, 0.0  ;;  %v1687_v44 = vpop.f32.mrf.mxu0  ;;  %5550 = vmatmul.msk.bf16.gmra.mxu3 %vm1198_vm0, %v5680_v14 }
 0x1c6   : > { %v4363_v55 = vadd.f32 %v4362_v41, %v4361_v63  ;;  %v1688_v57 = vadd.f32 %v6213_v1, %v1687_v44  ;;  %v2581_v63 = vmul.f32 %v5837_v17, %v1820_v59  ;;  %v1822_v27 = vpop.f32.mrf.mxu1  ;;  %v6515_v35 = vsel %vm2372_vm1, %v1940_v3, %v2629_v62 }
 0x1c7   : > { %9722 = vst [vmem:[#allocation16_spill] sm:$0xff] %v6515_v35  ;;  %v3141_v47 = vpack.c.bf16 %v6515_v35, %v6515_v35  ;;  %v1823_v61 = vadd.f32 %v6213_v1, %v1822_v27  ;;  %v5658_v35 = vld [vmem:[%s5807_s10 + $0x280] sm:$0xff] }
 0x1c8   : > { %vm2271_vm14 = vcmp.gt.f32.partialorder %v1688_v57, 0.0  ;;  %v2528_v7 = vmul.f32 %v5837_v17, %v1688_v57  ;;  %5475 = vmatmul.msk.bf16.gmra.mxu0 %vm1198_vm0, %v5605_v39  ;;  %v6510_v11 = vsel %vm2324_vm15, %v1820_v59, %v2581_v63  ;;  %v5632_v39 = vld [vmem:[%s5807_s10 + $0x1b0] sm:$0xff] }
 0x1c9   : > { %9721 = vst [vmem:[#allocation15_spill] sm:$0xff] %v6510_v11  ;;  %v3093_v23 = vpack.c.bf16 %v6510_v11, %v6510_v11  ;;  %5502 = vmatmul.msk.bf16.gmra.mxu1 %vm1198_vm0, %v5632_v39  ;;  %vm2325_vm5 = vcmp.gt.f32.partialorder %v1823_v61, 0.0  ;;  %v7172_v11 = vsel %vm3515_vm3, %v6043_v60, 0.0 }
 0x1ca   : > { %v2784_v9 = vsel %vm2271_vm14, %v1688_v57, %v2528_v7  ;;  %3398 = vst.msk [vmem:[%s5847_s16 + $0x22c] sm:$0xf] %vm3258_vm2, %v3141_v47 }
 0x1cb   : > { %v3040_v15 = vpack.c.bf16 %v2784_v9, %v2784_v9  ;;  %v3591_v18 = vsel %vm3515_vm3, %v2784_v9, 0.0  ;;  %v4071_v21 = vmul.f32 %v2784_v9, %v2784_v9  ;;  %3350 = vst.msk [vmem:[%s5847_s16 + $0x16c] sm:$0xf] %vm3258_vm2, %v3093_v23 }
 0x1cc   : > { %v3592_v33 = vadd.f32 %v3591_v18, %v3590_v38  ;;  %v1943_v38 = vadd.f32 %v6213_v1, %v1942_v31  ;;  %v1944_v23 = vpop.f32.mrf.mxu2  ;;  %v5606_v31 = vld [vmem:[%s5807_s10 + $0xe0] sm:$0xff] }
 0x1cd   : > { %3297 = vst.msk [vmem:[%s5847_s16 + $0x98] sm:$0xf] %vm3258_vm2, %v3040_v15  ;;  %v4364_v41 = vsel %vm3515_vm3, %v4071_v21, 0.0  ;;  %v1689_v44 = vpop.f32.mrf.mxu0 }
 0x1ce   : > { %v4365_v57 = vadd.f32 %v4364_v41, %v4363_v55  ;;  %v1690_v59 = vadd.f32 %v6213_v1, %v1689_v44  ;;  %v2582_v55 = vmul.f32 %v5837_v17, %v1823_v61  ;;  %vm2373_vm6 = vcmp.gt.f32.partialorder %v1943_v38, 0.0  ;;  %v1824_v21 = vpop.f32.mrf.mxu1 }
 0x1cf   : > { %v2630_v3 = vmul.f32 %v5837_v17, %v1943_v38 }
 0x1d0   : > { %vm2272_vm4 = vcmp.gt.f32.partialorder %v1690_v59, 0.0  ;;  %v2529_v14 = vmul.f32 %v5837_v17, %v1690_v59  ;;  %v6534_v63 = vsel %vm2325_vm5, %v1823_v61, %v2582_v55  ;;  %v5657_v55 = vld [vmem:[%s5807_s10 + $0x278] sm:$0xff] }
 0x1d1   : > { %9723 = vst [vmem:[#allocation17_spill] sm:$0xff] %v6534_v63  ;;  %v3094_v18 = vpack.c.bf16 %v6534_v63, %v6534_v63  ;;  %v6540_v39 = vsel %vm2373_vm6, %v1943_v38, %v2630_v3  ;;  %v1945_v38 = vadd.f32 %v6213_v1, %v1944_v23  ;;  %5527 = vmatmul.msk.bf16.gmra.mxu2 %vm1198_vm0, %v5657_v55  ;;  %v5633_v55 = vld [vmem:[%s5807_s10 + $0x1b8] sm:$0xff] }
 0x1d2   : > { %v2785_v7 = vsel %vm2272_vm4, %v1690_v59, %v2529_v14  ;;  %9724 = vst [vmem:[#allocation18_spill] sm:$0xff] %v6540_v39  ;;  %v3142_v47 = vpack.c.bf16 %v6540_v39, %v6540_v39  ;;  %v1825_v14 = vadd.f32 %v6213_v1, %v1824_v21 }
 0x1d3   : > { %v3041_v62 = vpack.c.bf16 %v2785_v7, %v2785_v7  ;;  %v3593_v9 = vsel %vm3515_vm3, %v2785_v7, 0.0  ;;  %v4072_v15 = vmul.f32 %v2785_v7, %v2785_v7  ;;  %3351 = vst.msk [vmem:[%s5847_s16 + $0x170] sm:$0xf] %vm3258_vm2, %v3094_v18  ;;  %vm2374_vm9 = vcmp.gt.f32.partialorder %v1945_v38, 0.0 }
 0x1d4   : > { %v3594_v27 = vadd.f32 %v3593_v9, %v3592_v33  ;;  %v5681_v33 = vld [vmem:[%s5807_s10 + $0x338] sm:$0xff]  ;;  %3399 = vst.msk [vmem:[%s5847_s16 + $0x230] sm:$0xf] %vm3258_vm2, %v3142_v47  ;;  %vm2326_vm8 = vcmp.gt.f32.partialorder %v1825_v14, 0.0  ;;  %v2631_v7 = vmul.f32 %v5837_v17, %v1945_v38 }
 0x1d5   : > { %3298 = vst.msk [vmem:[%s5847_s16 + $0x9c] sm:$0xf] %vm3258_vm2, %v3041_v62  ;;  %v4366_v41 = vsel %vm3515_vm3, %v4072_v15, 0.0  ;;  %v1692_v44 = vpop.f32.mrf.mxu0  ;;  %5551 = vmatmul.msk.bf16.gmra.mxu3 %vm1198_vm0, %v5681_v33 }
 0x1d6   : > { %v4367_v59 = vadd.f32 %v4366_v41, %v4365_v57  ;;  %v1693_v61 = vadd.f32 %v6213_v1, %v1692_v44  ;;  %v2583_v57 = vmul.f32 %v5837_v17, %v1825_v14  ;;  %v1947_v41 = vpop.f32.mrf.mxu2  ;;  %v6567_v47 = vsel %vm2374_vm9, %v1945_v38, %v2631_v7 }
 0x1d7   : > { %9726 = vst [vmem:[#allocation20_spill] sm:$0xff] %v6567_v47  ;;  %v3143_v33 = vpack.c.bf16 %v6567_v47, %v6567_v47 }
 0x1d8   : > { %vm2273_vm7 = vcmp.gt.f32.partialorder %v1693_v61, 0.0  ;;  %v2530_v3 = vmul.f32 %v5837_v17, %v1693_v61  ;;  %5476 = vmatmul.msk.bf16.gmra.mxu0 %vm1198_vm0, %v5606_v31  ;;  %v6562_v9 = vsel %vm2326_vm8, %v1825_v14, %v2583_v57  ;;  %v1827_v31 = vpop.f32.mrf.mxu1 }
 0x1d9   : > { %9725 = vst [vmem:[#allocation19_spill] sm:$0xff] %v6562_v9  ;;  %v3095_v23 = vpack.c.bf16 %v6562_v9, %v6562_v9  ;;  %5503 = vmatmul.msk.bf16.gmra.mxu1 %vm1198_vm0, %v5633_v55  ;;  %v7131_v9 = vsel %vm3515_vm3, %v6009_v25, 0.0 }
 0x1da   : > { %v2786_v62 = vsel %vm2273_vm7, %v1693_v61, %v2530_v3  ;;  %3400 = vst.msk [vmem:[%s5847_s16 + $0x234] sm:$0xf] %vm3258_vm2, %v3143_v33  ;;  %v5607_v33 = vld [vmem:[%s5807_s10 + $0xe8] sm:$0xff] }
 0x1db   : > { %v3042_v15 = vpack.c.bf16 %v2786_v62, %v2786_v62  ;;  %v3595_v18 = vsel %vm3515_vm3, %v2786_v62, 0.0  ;;  %v4073_v21 = vmul.f32 %v2786_v62, %v2786_v62  ;;  %3352 = vst.msk [vmem:[%s5847_s16 + $0x174] sm:$0xf] %vm3258_vm2, %v3095_v23  ;;  %v1828_v62 = vadd.f32 %v6213_v1, %v1827_v31 }
 0x1dc   : > { %v3596_v44 = vadd.f32 %v3595_v18, %v3594_v27  ;;  %v1948_v27 = vadd.f32 %v6213_v1, %v1947_v41 }
 0x1dd   : > { %3299 = vst.msk [vmem:[%s5847_s16 + $0xa0] sm:$0xf] %vm3258_vm2, %v3042_v15  ;;  %v4368_v61 = vsel %vm3515_vm3, %v4073_v21, 0.0  ;;  %v1694_v14 = vpop.f32.mrf.mxu0  ;;  %vm2327_vm11 = vcmp.gt.f32.partialorder %v1828_v62, 0.0 }
 0x1de   : > { %v4369_v3 = vadd.f32 %v4368_v61, %v4367_v59  ;;  %v1695_v57 = vadd.f32 %v6213_v1, %v1694_v14  ;;  %v2584_v59 = vmul.f32 %v5837_v17, %v1828_v62  ;;  %vm2375_vm12 = vcmp.gt.f32.partialorder %v1948_v27, 0.0  ;;  %v1949_v61 = vpop.f32.mrf.mxu2 }
 0x1df   : > { %v2632_v7 = vmul.f32 %v5837_v17, %v1948_v27 }
 0x1e0   : > { %vm2274_vm10 = vcmp.gt.f32.partialorder %v1695_v57, 0.0  ;;  %v2531_v38 = vmul.f32 %v5837_v17, %v1695_v57  ;;  %v6586_v18 = vsel %vm2327_vm11, %v1828_v62, %v2584_v59  ;;  %v1829_v55 = vpop.f32.mrf.mxu1 }
 0x1e1   : > { %9727 = vst [vmem:[#allocation21_spill] sm:$0xff] %v6586_v18  ;;  %v3096_v41 = vpack.c.bf16 %v6586_v18, %v6586_v18  ;;  %v6592_v47 = vsel %vm2375_vm12, %v1948_v27, %v2632_v7  ;;  %v1830_v39 = vadd.f32 %v6213_v1, %v1829_v55  ;;  %v1950_v27 = vadd.f32 %v6213_v1, %v1949_v61  ;;  %v5641_v18 = vld [vmem:[%s5807_s10 + $0x1f8] sm:$0xff] }
 0x1e2   : > { %v2787_v15 = vsel %vm2274_vm10, %v1695_v57, %v2531_v38  ;;  %9728 = vst [vmem:[#allocation22_spill] sm:$0xff] %v6592_v47  ;;  %v3144_v38 = vpack.c.bf16 %v6592_v47, %v6592_v47  ;;  %5528 = vmatmul.msk.bf16.gmra.mxu2 %vm1198_vm0, %v5658_v35  ;;  %v2072_v47 = vpop.f32.mrf.mxu3 }
 0x1e3   : > { %v3043_v21 = vpack.c.bf16 %v2787_v15, %v2787_v15  ;;  %v3597_v23 = vsel %vm3515_vm3, %v2787_v15, 0.0  ;;  %v4074_v31 = vmul.f32 %v2787_v15, %v2787_v15  ;;  %3353 = vst.msk [vmem:[%s5847_s16 + $0x178] sm:$0xf] %vm3258_vm2, %v3096_v41  ;;  %vm2328_vm14 = vcmp.gt.f32.partialorder %v1830_v39, 0.0 }
 0x1e4   : > { %v3598_v14 = vadd.f32 %v3597_v23, %v3596_v44  ;;  %v5682_v44 = vld [vmem:[%s5807_s10 + $0x340] sm:$0xff]  ;;  %3401 = vst.msk [vmem:[%s5847_s16 + $0x238] sm:$0xf] %vm3258_vm2, %v3144_v38  ;;  %vm2376_vm15 = vcmp.gt.f32.partialorder %v1950_v27, 0.0 }
 0x1e5   : > { %3300 = vst.msk [vmem:[%s5847_s16 + $0xa4] sm:$0xf] %vm3258_vm2, %v3043_v21  ;;  %v4370_v57 = vsel %vm3515_vm3, %v4074_v31, 0.0  ;;  %v1697_v62 = vpop.f32.mrf.mxu0  ;;  %v2633_v21 = vmul.f32 %v5837_v17, %v1950_v27  ;;  %5552 = vmatmul.msk.bf16.gmra.mxu3 %vm1198_vm0, %v5682_v44 }
 0x1e6   : > { %v4371_v59 = vadd.f32 %v4370_v57, %v4369_v3  ;;  %v1698_v15 = vadd.f32 %v6213_v1, %v1697_v62  ;;  %v2585_v3 = vmul.f32 %v5837_v17, %v1830_v39  ;;  %v1952_v35 = vpop.f32.mrf.mxu2 }
 0x1e7   : > { %v6619_v38 = vsel %vm2376_vm15, %v1950_v27, %v2633_v21  ;;  %v2073_v27 = vadd.f32 %v6213_v1, %v2072_v47 }
 0x1e8   : > { %vm2275_vm13 = vcmp.gt.f32.partialorder %v1698_v15, 0.0  ;;  %v2532_v7 = vmul.f32 %v5837_v17, %v1698_v15  ;;  %5477 = vmatmul.msk.bf16.gmra.mxu0 %vm1198_vm0, %v5607_v33  ;;  %v6614_v31 = vsel %vm2328_vm14, %v1830_v39, %v2585_v3  ;;  %v1832_v57 = vpop.f32.mrf.mxu1  ;;  %9730 = vst [vmem:[#allocation24_spill] sm:$0xff] %v6619_v38  ;;  %v3145_v44 = vpack.c.bf16 %v6619_v38, %v6619_v38 }
 0x1e9   : > { %9729 = vst [vmem:[#allocation23_spill] sm:$0xff] %v6614_v31  ;;  %v3097_v33 = vpack.c.bf16 %v6614_v31, %v6614_v31  ;;  %5504 = vmatmul.msk.bf16.gmra.mxu1 %vm1198_vm0, %v5634_v40  ;;  %vm2425_vm6 = vcmp.gt.f32.partialorder %v2073_v27, 0.0  ;;  %v2682_v40 = vmul.f32 %v5837_v17, %v2073_v27 }
 0x1ea   : > { %v2788_v23 = vsel %vm2275_vm13, %v1698_v15, %v2532_v7  ;;  %3402 = vst.msk [vmem:[%s5847_s16 + $0x23c] sm:$0xf] %vm3258_vm2, %v3145_v44 }
 0x1eb   : > { %v3044_v41 = vpack.c.bf16 %v2788_v23, %v2788_v23  ;;  %v3599_v55 = vsel %vm3515_vm3, %v2788_v23, 0.0  ;;  %v4075_v61 = vmul.f32 %v2788_v23, %v2788_v23  ;;  %3354 = vst.msk [vmem:[%s5847_s16 + $0x17c] sm:$0xf] %vm3258_vm2, %v3097_v33  ;;  %v1833_v23 = vadd.f32 %v6213_v1, %v1832_v57 }
 0x1ec   : > { %v3600_v62 = vadd.f32 %v3599_v55, %v3598_v14  ;;  %v1953_v14 = vadd.f32 %v6213_v1, %v1952_v35 }
 0x1ed   : > { %3301 = vst.msk [vmem:[%s5847_s16 + $0xa8] sm:$0xf] %vm3258_vm2, %v3044_v41  ;;  %v4372_v39 = vsel %vm3515_vm3, %v4075_v61, 0.0  ;;  %v1699_v15 = vpop.f32.mrf.mxu0  ;;  %vm2329_vm4 = vcmp.gt.f32.partialorder %v1833_v23, 0.0 }
 0x1ee   : > { %v4373_v7 = vadd.f32 %v4372_v39, %v4371_v59  ;;  %v1700_v3 = vadd.f32 %v6213_v1, %v1699_v15  ;;  %v2586_v59 = vmul.f32 %v5837_v17, %v1833_v23  ;;  %vm2377_vm5 = vcmp.gt.f32.partialorder %v1953_v14, 0.0  ;;  %v1954_v15 = vpop.f32.mrf.mxu2 }
 0x1ef   : > { %v2634_v41 = vmul.f32 %v5837_v17, %v1953_v14 }
 0x1f0   : > { %vm2276_vm1 = vcmp.gt.f32.partialorder %v1700_v3, 0.0  ;;  %v2533_v21 = vmul.f32 %v5837_v17, %v1700_v3  ;;  %v6639_v61 = vsel %vm2329_vm4, %v1833_v23, %v2586_v59  ;;  %v1834_v39 = vpop.f32.mrf.mxu1 }
 0x1f1   : > { %9731 = vst [vmem:[#allocation25_spill] sm:$0xff] %v6639_v61  ;;  %v3098_v35 = vpack.c.bf16 %v6639_v61, %v6639_v61  ;;  %v6646_v23 = vsel %vm2377_vm5, %v1953_v14, %v2634_v41  ;;  %v5659_v14 = vld [vmem:[%s5807_s10 + $0x288] sm:$0xff]  ;;  %v5689_v61 = vld [vmem:[%s5807_s10 + $0x378] sm:$0xff] }
 0x1f2   : > { %v2789_v55 = vsel %vm2276_vm1, %v1700_v3, %v2533_v21  ;;  %v5608_v3 = vld [vmem:[%s5807_s10 + $0xf0] sm:$0xff]  ;;  %9732 = vst [vmem:[#allocation26_spill] sm:$0xff] %v6646_v23  ;;  %v2074_v21 = vpop.f32.mrf.mxu3  ;;  %v5683_v41 = vld [vmem:[%s5807_s10 + $0x348] sm:$0xff]  ;;  %5529 = vmatmul.msk.bf16.gmra.mxu2 %vm1198_vm0, %v5659_v14 }
 0x1f3   : > { %v3045_v33 = vpack.c.bf16 %v2789_v55, %v2789_v55  ;;  %v3601_v47 = vsel %vm3515_vm3, %v2789_v55, 0.0  ;;  %v4076_v57 = vmul.f32 %v2789_v55, %v2789_v55  ;;  %v3146_v55 = vpack.c.bf16 %v6646_v23, %v6646_v23  ;;  %3355 = vst.msk [vmem:[%s5847_s16 + $0x180] sm:$0xf] %vm3258_vm2, %v3098_v35 }
 0x1f4   : > { %v3602_v44 = vadd.f32 %v3601_v47, %v3600_v62  ;;  %v6657_v62 = vsel %vm2425_vm6, %v2073_v27, %v2682_v40 }
 0x1f5   : > { %3302 = vst.msk [vmem:[%s5847_s16 + $0xac] sm:$0xf] %vm3258_vm2, %v3045_v33  ;;  %v4374_v59 = vsel %vm3515_vm3, %v4076_v57, 0.0  ;;  %v1702_v38 = vpop.f32.mrf.mxu0  ;;  %v3194_v33 = vpack.c.bf16 %v6657_v62, %v6657_v62  ;;  %5553 = vmatmul.msk.bf16.gmra.mxu3 %vm1198_vm0, %v5683_v41 }
 0x1f6   : > { %v4375_v51 = vadd.f32 %v4374_v59, %v4373_v7  ;;  %v1703_v0 = vadd.f32 %v6213_v1, %v1702_v38  ;;  %9733 = vst [vmem:[#allocation27_spill] sm:$0xff] %v6657_v62  ;;  %v6670_v1 = vld [vmem:[%s9524_s2] ss:$0 sm:$0xff] }
 0x1f7   : > { %3403 = vst.msk [vmem:[%s5847_s16 + $0x240] sm:$0xf] %vm3258_vm2, %v3146_v55  ;;  %v1835_v38 = vadd.f32 %v6670_v1, %v1834_v39  ;;  %v1955_v7 = vadd.f32 %v6670_v1, %v1954_v15  ;;  %v2075_v27 = vadd.f32 %v6670_v1, %v2074_v21  ;;  %v1957_v55 = vpop.f32.mrf.mxu2 }
 0x1f8   : > { %vm2277_vm7 = vcmp.gt.f32.partialorder %v1703_v0, 0.0  ;;  %v2534_v47 = vmul.f32 %v5837_v17, %v1703_v0  ;;  %5478 = vmatmul.msk.bf16.gmra.mxu0 %vm1198_vm0, %v5608_v3  ;;  %3451 = vst.msk [vmem:[%s5847_s16 + $0x300] sm:$0xf] %vm3258_vm2, %v3194_v33  ;;  %v1837_v59 = vpop.f32.mrf.mxu1  ;;  %v5635_v33 = vld [vmem:[%s5807_s10 + $0x1c8] sm:$0xff] }
 0x1f9   : > { %vm2330_vm8 = vcmp.gt.f32.partialorder %v1835_v38, 0.0  ;;  %v2587_v57 = vmul.f32 %v5837_v17, %v1835_v38  ;;  %vm2378_vm9 = vcmp.gt.f32.partialorder %v1955_v7, 0.0  ;;  %v2635_v15 = vmul.f32 %v5837_v17, %v1955_v7  ;;  %5505 = vmatmul.msk.bf16.gmra.mxu1 %vm1198_vm0, %v5635_v33 }
 0x1fa   : > { %v2790_v40 = vsel %vm2277_vm7, %v1703_v0, %v2534_v47  ;;  %vm2426_vm10 = vcmp.gt.f32.partialorder %v2075_v27, 0.0  ;;  %v2683_v0 = vmul.f32 %v5837_v17, %v2075_v27  ;;  %v2077_v41 = vpop.f32.mrf.mxu3 }
 0x1fb   : > { %v3046_v35 = vpack.c.bf16 %v2790_v40, %v2790_v40  ;;  %v3603_v39 = vsel %vm3515_vm3, %v2790_v40, 0.0  ;;  %v4077_v3 = vmul.f32 %v2790_v40, %v2790_v40  ;;  %v6682_v21 = vsel %vm2330_vm8, %v1835_v38, %v2587_v57 }
 0x1fc   : > { %v3604_v14 = vadd.f32 %v3603_v39, %v3602_v44  ;;  %9734 = vst [vmem:[#allocation28_spill] sm:$0xff] %v6682_v21  ;;  %v3099_v40 = vpack.c.bf16 %v6682_v21, %v6682_v21  ;;  %v6693_v38 = vsel %vm2378_vm9, %v1955_v7, %v2635_v15  ;;  %v6695_v57 = vsel %vm2426_vm10, %v2075_v27, %v2683_v0 }
 0x1fd   : > { %3303 = vst.msk [vmem:[%s5847_s16 + $0xb0] sm:$0xf] %vm3258_vm2, %v3046_v35  ;;  %v4376_v47 = vsel %vm3515_vm3, %v4077_v3, 0.0  ;;  %v1704_v62 = vpop.f32.mrf.mxu0  ;;  %v3147_v35 = vpack.c.bf16 %v6693_v38, %v6693_v38  ;;  %v1958_v7 = vadd.f32 %v6670_v1, %v1957_v55  ;;  %v2078_v3 = vadd.f32 %v6670_v1, %v2077_v41 }
 0x1fe   : > { %v4377_v23 = vadd.f32 %v4376_v47, %v4375_v51  ;;  %v1705_v44 = vadd.f32 %v6670_v1, %v1704_v62  ;;  %9735 = vst [vmem:[#allocation29_spill] sm:$0xff] %v6693_v38  ;;  %v3195_v51 = vpack.c.bf16 %v6695_v57, %v6695_v57  ;;  %v1838_v62 = vadd.f32 %v6670_v1, %v1837_v59  ;;  %v5660_v38 = vld [vmem:[%s5807_s10 + $0x290] sm:$0xff] }
 0x1ff   : > { %9736 = vst [vmem:[#allocation30_spill] sm:$0xff] %v6695_v57  ;;  %vm2379_vm13 = vcmp.gt.f32.partialorder %v1958_v7, 0.0  ;;  %vm2427_vm14 = vcmp.gt.f32.partialorder %v2078_v3, 0.0 }
 0x200   : > { %3356 = vst.msk [vmem:[%s5847_s16 + $0x184] sm:$0xf] %vm3258_vm2, %v3099_v40  ;;  %vm2278_vm11 = vcmp.gt.f32.partialorder %v1705_v44, 0.0  ;;  %v2535_v39 = vmul.f32 %v5837_v17, %v1705_v44  ;;  %v1839_v47 = vpop.f32.mrf.mxu1  ;;  %v1959_v40 = vpop.f32.mrf.mxu2  ;;  %vm2331_vm12 = vcmp.gt.f32.partialorder %v1838_v62, 0.0  ;;  %v2588_v59 = vmul.f32 %v5837_v17, %v1838_v62 }
 0x201   : > { %3404 = vst.msk [vmem:[%s5847_s16 + $0x244] sm:$0xf] %vm3258_vm2, %v3147_v35  ;;  %v5609_v35 = vld [vmem:[%s5807_s10 + $0xf8] sm:$0xff] }
 0x202   : > { %v2791_v27 = vsel %vm2278_vm11, %v1705_v44, %v2535_v39  ;;  %3452 = vst.msk [vmem:[%s5847_s16 + $0x304] sm:$0xf] %vm3258_vm2, %v3195_v51  ;;  %v2079_v55 = vpop.f32.mrf.mxu3  ;;  %v2636_v39 = vmul.f32 %v5837_v17, %v1958_v7  ;;  %v2684_v51 = vmul.f32 %v5837_v17, %v2078_v3  ;;  %5530 = vmatmul.msk.bf16.gmra.mxu2 %vm1198_vm0, %v5660_v38 }
 0x203   : > { %v3047_v15 = vpack.c.bf16 %v2791_v27, %v2791_v27  ;;  %v3605_v0 = vsel %vm3515_vm3, %v2791_v27, 0.0  ;;  %v4078_v33 = vmul.f32 %v2791_v27, %v2791_v27 }
 0x204   : > { %v3606_v57 = vadd.f32 %v3605_v0, %v3604_v14  ;;  %v6721_v0 = vsel %vm2331_vm12, %v1838_v62, %v2588_v59  ;;  %v6727_v43 = vsel %vm2379_vm13, %v1958_v7, %v2636_v39  ;;  %v6737_v62 = vsel %vm2427_vm14, %v2078_v3, %v2684_v51  ;;  %v5636_v51 = vld [vmem:[%s5807_s10 + $0x1d0] sm:$0xff] }
 0x205   : > { %3304 = vst.msk [vmem:[%s5847_s16 + $0xb4] sm:$0xf] %vm3258_vm2, %v3047_v15  ;;  %v4378_v44 = vsel %vm3515_vm3, %v4078_v33, 0.0  ;;  %v1707_v41 = vpop.f32.mrf.mxu0  ;;  %v3100_v15 = vpack.c.bf16 %v6721_v0, %v6721_v0  ;;  %v1840_v33 = vadd.f32 %v6670_v1, %v1839_v47  ;;  %5554 = vmatmul.msk.bf16.gmra.mxu3 %vm1198_vm0, %v5684_v22  ;;  %v3196_v47 = vpack.c.bf16 %v6737_v62, %v6737_v62 }
 0x206   : > { %v4379_v27 = vadd.f32 %v4378_v44, %v4377_v23  ;;  %v1708_v14 = vadd.f32 %v6670_v1, %v1707_v41  ;;  %9737 = vst [vmem:[#allocation31_spill] sm:$0xff] %v6721_v0  ;;  %v3148_v23 = vpack.c.bf16 %v6727_v43, %v6727_v43  ;;  %v1960_v22 = vadd.f32 %v6670_v1, %v1959_v40 }
 0x207   : > { %9738 = vst [vmem:[#allocation32_spill] sm:$0xff] %v6727_v43  ;;  %vm2332_vm1 = vcmp.gt.f32.partialorder %v1840_v33, 0.0  ;;  %v2589_v3 = vmul.f32 %v5837_v17, %v1840_v33 }
 0x208   : > { %vm2279_vm15 = vcmp.gt.f32.partialorder %v1708_v14, 0.0  ;;  %v2536_v2 = vmul.f32 %v5837_v17, %v1708_v14  ;;  %5479 = vmatmul.msk.bf16.gmra.mxu0 %vm1198_vm0, %v5609_v35  ;;  %3357 = vst.msk [vmem:[%s5847_s16 + $0x188] sm:$0xf] %vm3258_vm2, %v3100_v15  ;;  %v1842_v38 = vpop.f32.mrf.mxu1  ;;  %v1962_v41 = vpop.f32.mrf.mxu2  ;;  %vm2380_vm4 = vcmp.gt.f32.partialorder %v1960_v22, 0.0 }
 0x209   : > { %9739 = vst [vmem:[#allocation33_spill] sm:$0xff] %v6737_v62  ;;  %5506 = vmatmul.msk.bf16.gmra.mxu1 %vm1198_vm0, %v5636_v51 }
 0x20a   : > { %v2792_v7 = vsel %vm2279_vm15, %v1708_v14, %v2536_v2  ;;  %3405 = vst.msk [vmem:[%s5847_s16 + $0x248] sm:$0xf] %vm3258_vm2, %v3148_v23  ;;  %v2082_v2 = vpop.f32.mrf.mxu3  ;;  %v2080_v23 = vadd.f32 %v6670_v1, %v2079_v55 }
 0x20b   : > { %v3048_v35 = vpack.c.bf16 %v2792_v7, %v2792_v7  ;;  %v3607_v59 = vsel %vm3515_vm3, %v2792_v7, 0.0  ;;  %v4079_v44 = vmul.f32 %v2792_v7, %v2792_v7  ;;  %3453 = vst.msk [vmem:[%s5847_s16 + $0x308] sm:$0xf] %vm3258_vm2, %v3196_v47  ;;  %v2637_v47 = vmul.f32 %v5837_v17, %v1960_v22 }
 0x20c   : > { %v3608_v39 = vadd.f32 %v3607_v59, %v3606_v57  ;;  %v6755_v57 = vsel %vm2332_vm1, %v1840_v33, %v2589_v3  ;;  %vm2428_vm6 = vcmp.gt.f32.partialorder %v2080_v23, 0.0  ;;  %v2685_v55 = vmul.f32 %v5837_v17, %v2080_v23 }
 0x20d   : > { %3305 = vst.msk [vmem:[%s5847_s16 + $0xb8] sm:$0xf] %vm3258_vm2, %v3048_v35  ;;  %v4380_v14 = vsel %vm3515_vm3, %v4079_v44, 0.0  ;;  %v1709_v15 = vpop.f32.mrf.mxu0  ;;  %v3101_v40 = vpack.c.bf16 %v6755_v57, %v6755_v57  ;;  %v1843_v33 = vadd.f32 %v6670_v1, %v1842_v38  ;;  %v1963_v3 = vadd.f32 %v6670_v1, %v1962_v41 }
 0x20e   : > { %v4381_v7 = vadd.f32 %v4380_v14, %v4379_v27  ;;  %v1710_v62 = vadd.f32 %v6670_v1, %v1709_v15  ;;  %9740 = vst [vmem:[#allocation34_spill] sm:$0xff] %v6755_v57  ;;  %v6765_v27 = vsel %vm2380_vm4, %v1960_v22, %v2637_v47  ;;  %v6772_v43 = vsel %vm2428_vm6, %v2080_v23, %v2685_v55 }
 0x20f   : > { %3358 = vst.msk [vmem:[%s5847_s16 + $0x18c] sm:$0xf] %vm3258_vm2, %v3101_v40  ;;  %v3149_v44 = vpack.c.bf16 %v6765_v27, %v6765_v27  ;;  %vm2333_vm7 = vcmp.gt.f32.partialorder %v1843_v33, 0.0  ;;  %v2590_v23 = vmul.f32 %v5837_v17, %v1843_v33  ;;  %vm2381_vm8 = vcmp.gt.f32.partialorder %v1963_v3, 0.0 }
 0x210   : > { %vm2280_vm5 = vcmp.gt.f32.partialorder %v1710_v62, 0.0  ;;  %v2537_v35 = vmul.f32 %v5837_v17, %v1710_v62  ;;  %9741 = vst [vmem:[#allocation35_spill] sm:$0xff] %v6765_v27  ;;  %v1844_v32 = vpop.f32.mrf.mxu1  ;;  %v1964_v40 = vpop.f32.mrf.mxu2 }
 0x211   : > { %9742 = vst [vmem:[#allocation36_spill] sm:$0xff] %v6772_v43 }
 0x212   : > { %v2793_v59 = vsel %vm2280_vm5, %v1710_v62, %v2537_v35  ;;  %3406 = vst.msk [vmem:[%s5847_s16 + $0x24c] sm:$0xf] %vm3258_vm2, %v3149_v44  ;;  %v3197_v62 = vpack.c.bf16 %v6772_v43, %v6772_v43  ;;  %v2084_v38 = vpop.f32.mrf.mxu3  ;;  %v5685_v44 = vld [vmem:[%s5807_s10 + $0x358] sm:$0xff] }
 0x213   : > { %v3049_v51 = vpack.c.bf16 %v2793_v59, %v2793_v59  ;;  %v3609_v14 = vsel %vm3515_vm3, %v2793_v59, 0.0  ;;  %v4080_v15 = vmul.f32 %v2793_v59, %v2793_v59  ;;  %v5661_v59 = vld [vmem:[%s5807_s10 + $0x298] sm:$0xff] }
 0x214   : > { %v3610_v22 = vadd.f32 %v3609_v14, %v3608_v39  ;;  %3454 = vst.msk [vmem:[%s5847_s16 + $0x30c] sm:$0xf] %vm3258_vm2, %v3197_v62  ;;  %v2638_v39 = vmul.f32 %v5837_v17, %v1963_v3  ;;  %v6788_v14 = vsel %vm2333_vm7, %v1843_v33, %v2590_v23  ;;  %5531 = vmatmul.msk.bf16.gmra.mxu2 %vm1198_vm0, %v5661_v59 }
 0x215   : > { %3306 = vst.msk [vmem:[%s5847_s16 + $0xbc] sm:$0xf] %vm3258_vm2, %v3049_v51  ;;  %v4382_v41 = vsel %vm3515_vm3, %v4080_v15, 0.0  ;;  %v1712_v47 = vpop.f32.mrf.mxu0  ;;  %v2083_v51 = vadd.f32 %v6670_v1, %v2082_v2  ;;  %v1845_v33 = vadd.f32 %v6670_v1, %v1844_v32  ;;  %5555 = vmatmul.msk.bf16.gmra.mxu3 %vm1198_vm0, %v5685_v44  ;;  %v5637_v44 = vld [vmem:[%s5807_s10 + $0x1d8] sm:$0xff] }
 0x216   : > { %v4383_v35 = vadd.f32 %v4382_v41, %v4381_v7  ;;  %v1713_v55 = vadd.f32 %v6670_v1, %v1712_v47  ;;  %9743 = vst [vmem:[#allocation37_spill] sm:$0xff] %v6788_v14  ;;  %v3102_v7 = vpack.c.bf16 %v6788_v14, %v6788_v14  ;;  %v6795_v62 = vsel %vm2381_vm8, %v1963_v3, %v2638_v39 }
 0x217   : > { %9744 = vst [vmem:[#allocation38_spill] sm:$0xff] %v6795_v62  ;;  %vm2429_vm10 = vcmp.gt.f32.partialorder %v2083_v51, 0.0  ;;  %v2686_v41 = vmul.f32 %v5837_v17, %v2083_v51  ;;  %v3150_v47 = vpack.c.bf16 %v6795_v62, %v6795_v62  ;;  %vm2334_vm11 = vcmp.gt.f32.partialorder %v1845_v33, 0.0 }
 0x218   : > { %vm2281_vm9 = vcmp.gt.f32.partialorder %v1713_v55, 0.0  ;;  %v2538_v15 = vmul.f32 %v5837_v17, %v1713_v55  ;;  %3359 = vst.msk [vmem:[%s5847_s16 + $0x190] sm:$0xf] %vm3258_vm2, %v3102_v7  ;;  %v1847_v39 = vpop.f32.mrf.mxu1  ;;  %v1967_v43 = vpop.f32.mrf.mxu2 }
 0x219   : > { %3407 = vst.msk [vmem:[%s5847_s16 + $0x250] sm:$0xf] %vm3258_vm2, %v3150_v47  ;;  %v6807_v58 = vsel %vm2429_vm10, %v2083_v51, %v2686_v41  ;;  %v1965_v47 = vadd.f32 %v6670_v1, %v1964_v40  ;;  %5507 = vmatmul.msk.bf16.gmra.mxu1 %vm1198_vm0, %v5637_v44  ;;  %v2085_v51 = vadd.f32 %v6670_v1, %v2084_v38 }
 0x21a   : > { %v2794_v2 = vsel %vm2281_vm9, %v1713_v55, %v2538_v15  ;;  %9745 = vst [vmem:[#allocation39_spill] sm:$0xff] %v6807_v58  ;;  %v2087_v32 = vpop.f32.mrf.mxu3  ;;  %v3198_v7 = vpack.c.bf16 %v6807_v58, %v6807_v58  ;;  %v1848_v41 = vadd.f32 %v6670_v1, %v1847_v39  ;;  %v1968_v14 = vadd.f32 %v6670_v1, %v1967_v43 }
 0x21b   : > { %v3050_v23 = vpack.c.bf16 %v2794_v2, %v2794_v2  ;;  %v3611_v59 = vsel %vm3515_vm3, %v2794_v2, 0.0  ;;  %v4081_v3 = vmul.f32 %v2794_v2, %v2794_v2  ;;  %vm2382_vm13 = vcmp.gt.f32.partialorder %v1965_v47, 0.0 }
 0x21c   : > { %v3612_v27 = vadd.f32 %v3611_v59, %v3610_v22  ;;  %v2591_v22 = vmul.f32 %v5837_v17, %v1845_v33  ;;  %3455 = vst.msk [vmem:[%s5847_s16 + $0x310] sm:$0xf] %vm3258_vm2, %v3198_v7  ;;  %v2639_v40 = vmul.f32 %v5837_v17, %v1965_v47  ;;  %vm2430_vm14 = vcmp.gt.f32.partialorder %v2085_v51, 0.0 }
 0x21d   : > { %3307 = vst.msk [vmem:[%s5847_s16 + $0xc0] sm:$0xf] %vm3258_vm2, %v3050_v23  ;;  %v4384_v55 = vsel %vm3515_vm3, %v4081_v3, 0.0  ;;  %v1714_v15 = vpop.f32.mrf.mxu0  ;;  %v2687_v44 = vmul.f32 %v5837_v17, %v2085_v51  ;;  %vm2335_vm15 = vcmp.gt.f32.partialorder %v1848_v41, 0.0  ;;  %vm2383_vm4 = vcmp.gt.f32.partialorder %v1968_v14, 0.0 }
 0x21e   : > { %v4385_v2 = vadd.f32 %v4384_v55, %v4383_v35  ;;  %v1715_v62 = vadd.f32 %v6670_v1, %v1714_v15  ;;  %v6824_v59 = vsel %vm2334_vm11, %v1845_v33, %v2591_v22  ;;  %v6833_v22 = vsel %vm2382_vm13, %v1965_v47, %v2639_v40  ;;  %v5686_v40 = vld [vmem:[%s5807_s10 + $0x360] sm:$0xff] }
 0x21f   : > { %9746 = vst [vmem:[#allocation40_spill] sm:$0xff] %v6824_v59  ;;  %v3103_v35 = vpack.c.bf16 %v6824_v59, %v6824_v59  ;;  %v6835_v58 = vsel %vm2430_vm14, %v2085_v51, %v2687_v44  ;;  %v3151_v59 = vpack.c.bf16 %v6833_v22, %v6833_v22  ;;  %v5662_v51 = vld [vmem:[%s5807_s10 + $0x2a0] sm:$0xff] }
 0x220   : > { %vm2282_vm12 = vcmp.gt.f32.partialorder %v1715_v62, 0.0  ;;  %v2539_v23 = vmul.f32 %v5837_v17, %v1715_v62  ;;  %v1849_v33 = vpop.f32.mrf.mxu1  ;;  %v1969_v15 = vpop.f32.mrf.mxu2  ;;  %9747 = vst [vmem:[#allocation41_spill] sm:$0xff] %v6833_v22  ;;  %v3199_v47 = vpack.c.bf16 %v6835_v58, %v6835_v58 }
 0x221   : > { %3360 = vst.msk [vmem:[%s5847_s16 + $0x194] sm:$0xf] %vm3258_vm2, %v3103_v35 }
 0x222   : > { %v2795_v3 = vsel %vm2282_vm12, %v1715_v62, %v2539_v23  ;;  %9748 = vst [vmem:[#allocation42_spill] sm:$0xff] %v6835_v58  ;;  %v2592_v62 = vmul.f32 %v5837_v17, %v1848_v41  ;;  %v2089_v23 = vpop.f32.mrf.mxu3 }
 0x223   : > { %v3051_v55 = vpack.c.bf16 %v2795_v3, %v2795_v3  ;;  %v3613_v38 = vsel %vm3515_vm3, %v2795_v3, 0.0  ;;  %v4082_v39 = vmul.f32 %v2795_v3, %v2795_v3  ;;  %3408 = vst.msk [vmem:[%s5847_s16 + $0x254] sm:$0xf] %vm3258_vm2, %v3151_v59 }
 0x224   : > { %v3614_v7 = vadd.f32 %v3613_v38, %v3612_v27  ;;  %v6852_v44 = vsel %vm2335_vm15, %v1848_v41, %v2592_v62  ;;  %3456 = vst.msk [vmem:[%s5847_s16 + $0x314] sm:$0xf] %vm3258_vm2, %v3199_v47  ;;  %5532 = vmatmul.msk.bf16.gmra.mxu2 %vm1198_vm0, %v5662_v51  ;;  %v2088_v38 = vadd.f32 %v6670_v1, %v2087_v32 }
 0x225   : > { %3308 = vst.msk [vmem:[%s5847_s16 + $0xc4] sm:$0xf] %vm3258_vm2, %v3051_v55  ;;  %v4386_v3 = vsel %vm3515_vm3, %v4082_v39, 0.0  ;;  %v1717_v35 = vpop.f32.mrf.mxu0  ;;  %v3104_v43 = vpack.c.bf16 %v6852_v44, %v6852_v44  ;;  %5556 = vmatmul.msk.bf16.gmra.mxu3 %vm1198_vm0, %v5686_v40  ;;  %v5638_v40 = vld [vmem:[%s5807_s10 + $0x1e0] sm:$0xff] }
 0x226   : > { %v4387_v57 = vadd.f32 %v4386_v3, %v4385_v2  ;;  %v1718_v27 = vadd.f32 %v6670_v1, %v1717_v35  ;;  %9749 = vst [vmem:[#allocation43_spill] sm:$0xff] %v6852_v44  ;;  %v2640_v2 = vmul.f32 %v5837_v17, %v1968_v14  ;;  %v1850_v3 = vadd.f32 %v6670_v1, %v1849_v33 }
 0x227   : > { %3361 = vst.msk [vmem:[%s5847_s16 + $0x198] sm:$0xf] %vm3258_vm2, %v3104_v43  ;;  %vm2431_vm5 = vcmp.gt.f32.partialorder %v2088_v38, 0.0  ;;  %v2688_v32 = vmul.f32 %v5837_v17, %v2088_v38  ;;  %v1970_v43 = vadd.f32 %v6670_v1, %v1969_v15 }
 0x228   : > { %vm2283_vm1 = vcmp.gt.f32.partialorder %v1718_v27, 0.0  ;;  %v2540_v55 = vmul.f32 %v5837_v17, %v1718_v27  ;;  %v1852_v35 = vpop.f32.mrf.mxu1  ;;  %v1972_v47 = vpop.f32.mrf.mxu2  ;;  %v6867_v58 = vsel %vm2383_vm4, %v1968_v14, %v2640_v2  ;;  %vm2336_vm6 = vcmp.gt.f32.partialorder %v1850_v3, 0.0 }
 0x229   : > { %9750 = vst [vmem:[#allocation44_spill] sm:$0xff] %v6867_v58  ;;  %v3152_v33 = vpack.c.bf16 %v6867_v58, %v6867_v58  ;;  %v6878_v2 = vsel %vm2431_vm5, %v2088_v38, %v2688_v32  ;;  %5508 = vmatmul.msk.bf16.gmra.mxu1 %vm1198_vm0, %v5638_v40  ;;  %v2593_v15 = vmul.f32 %v5837_v17, %v1850_v3  ;;  %vm2384_vm8 = vcmp.gt.f32.partialorder %v1970_v43, 0.0 }
 0x22a   : > { %v2796_v41 = vsel %vm2283_vm1, %v1718_v27, %v2540_v55  ;;  %v2092_v22 = vpop.f32.mrf.mxu3  ;;  %9751 = vst [vmem:[#allocation45_spill] sm:$0xff] %v6878_v2 }
 0x22b   : > { %v3052_v59 = vpack.c.bf16 %v2796_v41, %v2796_v41  ;;  %v3615_v39 = vsel %vm3515_vm3, %v2796_v41, 0.0  ;;  %v4083_v62 = vmul.f32 %v2796_v41, %v2796_v41  ;;  %v2090_v41 = vadd.f32 %v6670_v1, %v2089_v23  ;;  %3409 = vst.msk [vmem:[%s5847_s16 + $0x258] sm:$0xf] %vm3258_vm2, %v3152_v33 }
 0x22c   : > { %v3616_v51 = vadd.f32 %v3615_v39, %v3614_v7  ;;  %v6891_v38 = vsel %vm2336_vm6, %v1850_v3, %v2593_v15  ;;  %v1853_v3 = vadd.f32 %v6670_v1, %v1852_v35  ;;  %v5663_v35 = vld [vmem:[%s5807_s10 + $0x2a8] sm:$0xff] }
 0x22d   : > { %3309 = vst.msk [vmem:[%s5847_s16 + $0xc8] sm:$0xf] %vm3258_vm2, %v3052_v59  ;;  %v4388_v27 = vsel %vm3515_vm3, %v4083_v62, 0.0  ;;  %v1719_v55 = vpop.f32.mrf.mxu0  ;;  %v3200_v59 = vpack.c.bf16 %v6878_v2, %v6878_v2  ;;  %vm2432_vm9 = vcmp.gt.f32.partialorder %v2090_v41, 0.0  ;;  %v2689_v62 = vmul.f32 %v5837_v17, %v2090_v41 }
 0x22e   : > { %v4389_v7 = vadd.f32 %v4388_v27, %v4387_v57  ;;  %v1720_v14 = vadd.f32 %v6670_v1, %v1719_v55  ;;  %v2641_v57 = vmul.f32 %v5837_v17, %v1970_v43  ;;  %9752 = vst [vmem:[#allocation46_spill] sm:$0xff] %v6891_v38  ;;  %v3105_v55 = vpack.c.bf16 %v6891_v38, %v6891_v38 }
 0x22f   : > { %3457 = vst.msk [vmem:[%s5847_s16 + $0x318] sm:$0xf] %vm3258_vm2, %v3200_v59  ;;  %v1973_v38 = vadd.f32 %v6670_v1, %v1972_v47  ;;  %vm2337_vm11 = vcmp.gt.f32.partialorder %v1853_v3, 0.0  ;;  %v2594_v47 = vmul.f32 %v5837_v17, %v1853_v3 }
 0x230   : > { %vm2284_vm7 = vcmp.gt.f32.partialorder %v1720_v14, 0.0  ;;  %v2541_v39 = vmul.f32 %v5837_v17, %v1720_v14  ;;  %v1854_v33 = vpop.f32.mrf.mxu1  ;;  %v1974_v59 = vpop.f32.mrf.mxu2  ;;  %3362 = vst.msk [vmem:[%s5847_s16 + $0x19c] sm:$0xf] %vm3258_vm2, %v3105_v55 }
 0x231   : > { %vm2385_vm12 = vcmp.gt.f32.partialorder %v1973_v38, 0.0 }
 0x232   : > { %v2797_v23 = vsel %vm2284_vm7, %v1720_v14, %v2541_v39  ;;  %v6897_v14 = vsel %vm2384_vm8, %v1970_v43, %v2641_v57  ;;  %v2094_v39 = vpop.f32.mrf.mxu3  ;;  %v5687_v43 = vld [vmem:[%s5807_s10 + $0x368] sm:$0xff] }
 0x233   : > { %v3053_v32 = vpack.c.bf16 %v2797_v23, %v2797_v23  ;;  %v3617_v40 = vsel %vm3515_vm3, %v2797_v23, 0.0  ;;  %v4084_v27 = vmul.f32 %v2797_v23, %v2797_v23  ;;  %9753 = vst [vmem:[#allocation47_spill] sm:$0xff] %v6897_v14  ;;  %v3153_v23 = vpack.c.bf16 %v6897_v14, %v6897_v14 }
 0x234   : > { %v3618_v2 = vadd.f32 %v3617_v40, %v3616_v51  ;;  %v6910_v51 = vsel %vm2432_vm9, %v2090_v41, %v2689_v62  ;;  %5533 = vmatmul.msk.bf16.gmra.mxu2 %vm1198_vm0, %v5663_v35  ;;  %v6925_v41 = vsel %vm2337_vm11, %v1853_v3, %v2594_v47  ;;  %v2093_v62 = vadd.f32 %v6670_v1, %v2092_v22 }
 0x235   : > { %3310 = vst.msk [vmem:[%s5847_s16 + $0xcc] sm:$0xf] %vm3258_vm2, %v3053_v32  ;;  %v4390_v15 = vsel %vm3515_vm3, %v4084_v27, 0.0  ;;  %v1722_v58 = vpop.f32.mrf.mxu0  ;;  %v3201_v57 = vpack.c.bf16 %v6910_v51, %v6910_v51  ;;  %5557 = vmatmul.msk.bf16.gmra.mxu3 %vm1198_vm0, %v5687_v43  ;;  %v1855_v40 = vadd.f32 %v6670_v1, %v1854_v33  ;;  %v5639_v43 = vld [vmem:[%s5807_s10 + $0x1e8] sm:$0xff]  ;;  %v1975_v47 = vadd.f32 %v6670_v1, %v1974_v59 }
 0x236   : > { %v4391_v44 = vadd.f32 %v4390_v15, %v4389_v7  ;;  %v1723_v0 = vadd.f32 %v6670_v1, %v1722_v58  ;;  %9754 = vst [vmem:[#allocation48_spill] sm:$0xff] %v6910_v51  ;;  %v2642_v58 = vmul.f32 %v5837_v17, %v1973_v38  ;;  %vm2433_vm13 = vcmp.gt.f32.partialorder %v2093_v62, 0.0 }
 0x237   : > { %3410 = vst.msk [vmem:[%s5847_s16 + $0x25c] sm:$0xf] %vm3258_vm2, %v3153_v23  ;;  %v3106_v23 = vpack.c.bf16 %v6925_v41, %v6925_v41  ;;  %vm2338_vm14 = vcmp.gt.f32.partialorder %v1855_v40, 0.0  ;;  %vm2386_vm1 = vcmp.gt.f32.partialorder %v1975_v47, 0.0 }
 0x238   : > { %vm2285_vm10 = vcmp.gt.f32.partialorder %v1723_v0, 0.0  ;;  %v2542_v32 = vmul.f32 %v5837_v17, %v1723_v0  ;;  %3458 = vst.msk [vmem:[%s5847_s16 + $0x31c] sm:$0xf] %vm3258_vm2, %v3201_v57  ;;  %v1857_v35 = vpop.f32.mrf.mxu1  ;;  %v1977_v57 = vpop.f32.mrf.mxu2 }
 0x239   : > { %9755 = vst [vmem:[#allocation49_spill] sm:$0xff] %v6925_v41  ;;  %5509 = vmatmul.msk.bf16.gmra.mxu1 %vm1198_vm0, %v5639_v43 }
 0x23a   : > { %v2798_v7 = vsel %vm2285_vm10, %v1723_v0, %v2542_v32  ;;  %v6934_v0 = vsel %vm2385_vm12, %v1973_v38, %v2642_v58  ;;  %v2097_v3 = vpop.f32.mrf.mxu3  ;;  %3363 = vst.msk [vmem:[%s5847_s16 + $0x1a0] sm:$0xf] %vm3258_vm2, %v3106_v23  ;;  %v2595_v38 = vmul.f32 %v5837_v17, %v1855_v40 }
 0x23b   : > { %v3054_v27 = vpack.c.bf16 %v2798_v7, %v2798_v7  ;;  %v3619_v55 = vsel %vm3515_vm3, %v2798_v7, 0.0  ;;  %v4085_v15 = vmul.f32 %v2798_v7, %v2798_v7  ;;  %9756 = vst [vmem:[#allocation50_spill] sm:$0xff] %v6934_v0  ;;  %v3154_v32 = vpack.c.bf16 %v6934_v0, %v6934_v0 }
 0x23c   : > { %v6932_v51 = vadd.f32 %v3619_v55, %v3618_v2  ;;  %v2690_v2 = vmul.f32 %v5837_v17, %v2093_v62  ;;  %v6956_v58 = vsel %vm2338_vm14, %v1855_v40, %v2595_v38  ;;  %v2095_v55 = vadd.f32 %v6670_v1, %v2094_v39 }
 0x23d   : > { %3311 = vst.msk [vmem:[%s5847_s16 + $0xd0] sm:$0xf] %vm3258_vm2, %v3054_v27  ;;  %v4392_v22 = vsel %vm3515_vm3, %v4085_v15, 0.0  ;;  %v1724_v33 = vpop.f32.mrf.mxu0  ;;  %v2643_v27 = vmul.f32 %v5837_v17, %v1975_v47 }
 0x23e   : > { %v6943_v7 = vadd.f32 %v4392_v22, %v4391_v44  ;;  %v1725_v14 = vadd.f32 %v6670_v1, %v1724_v33  ;;  %3411 = vst.msk [vmem:[%s5847_s16 + $0x260] sm:$0xf] %vm3258_vm2, %v3154_v32  ;;  %v6954_v59 = vsel %vm2433_vm13, %v2093_v62, %v2690_v2  ;;  %v3107_v62 = vpack.c.bf16 %v6956_v58, %v6956_v58 }
 0x23f   : > { %9757 = vst [vmem:[#allocation51_spill] sm:$0xff] %v6954_v59  ;;  %v3202_v23 = vpack.c.bf16 %v6954_v59, %v6954_v59  ;;  %v6972_v33 = vsel %vm2386_vm1, %v1975_v47, %v2643_v27  ;;  %vm2434_vm4 = vcmp.gt.f32.partialorder %v2095_v55, 0.0  ;;  %v2691_v32 = vmul.f32 %v5837_v17, %v2095_v55  ;;  %v5688_v59 = vld [vmem:[%s5807_s10 + $0x370] sm:$0xff] }
 0x240   : > { %vm2286_vm15 = vcmp.gt.f32.partialorder %v1725_v14, 0.0  ;;  %v2543_v44 = vmul.f32 %v5837_v17, %v1725_v14  ;;  %9758 = vst [vmem:[#allocation52_spill] sm:$0xff] %v6956_v58  ;;  %v1859_v40 = vpop.f32.mrf.mxu1  ;;  %v1979_v22 = vpop.f32.mrf.mxu2  ;;  %v1858_v2 = vadd.f32 %v6670_v1, %v1857_v35 }
 0x241   : > { %3459 = vst.msk [vmem:[%s5847_s16 + $0x320] sm:$0xf] %vm3258_vm2, %v3202_v23  ;;  %v5664_v23 = vld [vmem:[%s5807_s10 + $0x2b0] sm:$0xff]  ;;  %v6983_v0 = vsel %vm2434_vm4, %v2095_v55, %v2691_v32 }
 0x242   : > { %v6960_v15 = vsel %vm2286_vm15, %v1725_v14, %v2543_v44  ;;  %v2099_v14 = vpop.f32.mrf.mxu3  ;;  %9759 = vst [vmem:[#allocation53_spill] sm:$0xff] %v6972_v33  ;;  %v3155_v44 = vpack.c.bf16 %v6972_v33, %v6972_v33  ;;  %v3203_v35 = vpack.c.bf16 %v6983_v0, %v6983_v0  ;;  %vm2339_vm6 = vcmp.gt.f32.partialorder %v1858_v2, 0.0 }
 0x243   : > { %v3055_v43 = vpack.c.bf16 %v6960_v15, %v6960_v15  ;;  %3364 = vst.msk [vmem:[%s5847_s16 + $0x1a4] sm:$0xf] %vm3258_vm2, %v3107_v62  ;;  %v2596_v27 = vmul.f32 %v5837_v17, %v1858_v2 }
 0x244   : > { %9760 = vst [vmem:[#allocation54_spill] sm:$0xff] %v6983_v0  ;;  %5534 = vmatmul.msk.bf16.gmra.mxu2 %vm1198_vm0, %v5664_v23 }
 0x245   : > { %3312 = vst.msk [vmem:[%s5847_s16 + $0xd4] sm:$0xf] %vm3258_vm2, %v3055_v43  ;;  %v1727_v39 = vpop.f32.mrf.mxu0  ;;  %v1978_v43 = vadd.f32 %v6670_v1, %v1977_v57  ;;  %5558 = vmatmul.msk.bf16.gmra.mxu3 %vm1198_vm0, %v5688_v59  ;;  %v7003_v23 = vsel %vm2339_vm6, %v1858_v2, %v2596_v27  ;;  %v5640_v59 = vld [vmem:[%s5807_s10 + $0x1f0] sm:$0xff]  ;;  %v1980_v2 = vadd.f32 %v6670_v1, %v1979_v22 }
 0x246   : > { %v1728_v38 = vadd.f32 %v6670_v1, %v1727_v39  ;;  %3412 = vst.msk [vmem:[%s5847_s16 + $0x264] sm:$0xf] %vm3258_vm2, %v3155_v44  ;;  %v2098_v39 = vadd.f32 %v6670_v1, %v2097_v3  ;;  %v1860_v3 = vadd.f32 %v6670_v1, %v1859_v40  ;;  %v4097_v22 = vmul.f32 %v5941_v20, %v5941_v20 }
 0x247   : > { %3460 = vst.msk [vmem:[%s5847_s16 + $0x324] sm:$0xf] %vm3258_vm2, %v3203_v35  ;;  %vm2387_vm7 = vcmp.gt.f32.partialorder %v1978_v43, 0.0  ;;  %v2644_v57 = vmul.f32 %v5837_v17, %v1978_v43  ;;  %vm2388_vm11 = vcmp.gt.f32.partialorder %v1980_v2, 0.0 }
 0x248   : > { %vm2287_vm5 = vcmp.gt.f32.partialorder %v1728_v38, 0.0  ;;  %v2544_v47 = vmul.f32 %v5837_v17, %v1728_v38  ;;  %v1862_v32 = vpop.f32.mrf.mxu1  ;;  %v7001_v44 = vpop.f32.mrf.mxu2  ;;  %9761 = vst [vmem:[#allocation55_spill] sm:$0xff] %v7003_v23  ;;  %vm2435_vm8 = vcmp.gt.f32.partialorder %v2098_v39, 0.0  ;;  %vm2340_vm10 = vcmp.gt.f32.partialorder %v1860_v3, 0.0 }
 0x249   : > { %v7015_v33 = vsel %vm2387_vm7, %v1978_v43, %v2644_v57  ;;  %5510 = vmatmul.msk.bf16.gmra.mxu1 %vm1198_vm0, %v5640_v59  ;;  %v2597_v40 = vmul.f32 %v5837_v17, %v1860_v3  ;;  %v2645_v59 = vmul.f32 %v5837_v17, %v1980_v2  ;;  %v1863_v41 = vadd.f32 %v6670_v1, %v1862_v32 }
 0x24a   : > { %v6994_v55 = vsel %vm2287_vm5, %v1728_v38, %v2544_v47  ;;  %v7006_v0 = vpop.f32.mrf.mxu3  ;;  %v3108_v47 = vpack.c.bf16 %v7003_v23, %v7003_v23  ;;  %9762 = vst [vmem:[#allocation56_spill] sm:$0xff] %v7015_v33  ;;  %v3156_v27 = vpack.c.bf16 %v7015_v33, %v7015_v33  ;;  %v2692_v23 = vmul.f32 %v5837_v17, %v2098_v39 }
 0x24b   : > { %v3056_v62 = vpack.c.bf16 %v6994_v55, %v6994_v55  ;;  %v7041_v58 = vsel %vm2340_vm10, %v1860_v3, %v2597_v40  ;;  %v7055_v3 = vsel %vm3515_vm3, %v5941_v20, 0.0  ;;  %v7063_v21 = vsel %vm2388_vm11, %v1980_v2, %v2645_v59 }
 0x24c   : > { %3365 = vst.msk [vmem:[%s5847_s16 + $0x1a8] sm:$0xf] %vm3258_vm2, %v3108_v47  ;;  %v7032_v57 = vsel %vm2435_vm8, %v2098_v39, %v2692_v23  ;;  %v2100_v39 = vadd.f32 %v6670_v1, %v2099_v14  ;;  %v7058_v14 = vsel %vm3515_vm3, %v4097_v22, 0.0  ;;  %v4099_v20 = vmul.f32 %v5975_v53, %v5975_v53 }
 0x24d   : > { %3313 = vst.msk [vmem:[%s5847_s16 + $0xd8] sm:$0xf] %vm3258_vm2, %v3056_v62  ;;  %v1729_v38 = vpop.f32.mrf.mxu0  ;;  %v3204_v47 = vpack.c.bf16 %v7032_v57, %v7032_v57  ;;  %v4100_v32 = vmul.f32 %v5993_v5, %v5993_v5  ;;  %v3157_v22 = vpack.c.bf16 %v7063_v21, %v7063_v21  ;;  %vm2341_vm14 = vcmp.gt.f32.partialorder %v1863_v41, 0.0 }
 0x24e   : > { %v1730_v35 = vadd.f32 %v6670_v1, %v1729_v38  ;;  %3413 = vst.msk [vmem:[%s5847_s16 + $0x268] sm:$0xf] %vm3258_vm2, %v3156_v27  ;;  %vm2436_vm13 = vcmp.gt.f32.partialorder %v2100_v39, 0.0  ;;  %v2693_v59 = vmul.f32 %v5837_v17, %v2100_v39 }
 0x24f   : > { %9763 = vst [vmem:[#allocation57_spill] sm:$0xff] %v7032_v57  ;;  %v3109_v57 = vpack.c.bf16 %v7041_v58, %v7041_v58 }
 0x250   : > { %vm2288_vm9 = vcmp.gt.f32.partialorder %v1730_v35, 0.0  ;;  %v2545_v62 = vmul.f32 %v5837_v17, %v1730_v35  ;;  %v1864_v27 = vpop.f32.mrf.mxu1  ;;  %v7039_v33 = vpop.f32.mrf.mxu2  ;;  %9764 = vst [vmem:[#allocation58_spill] sm:$0xff] %v7041_v58  ;;  %v7069_v58 = vsel %vm3515_vm3, %v5959_v36, 0.0 }
 0x251   : > { %3461 = vst.msk [vmem:[%s5847_s16 + $0x328] sm:$0xf] %vm3258_vm2, %v3204_v47  ;;  %v4101_v47 = vmul.f32 %v6009_v25, %v6009_v25 }
 0x252   : > { %v7030_v43 = vsel %vm2288_vm9, %v1730_v35, %v2545_v62  ;;  %v7044_v23 = vpop.f32.mrf.mxu3  ;;  %v4098_v35 = vmul.f32 %v5959_v36, %v5959_v36  ;;  %9765 = vst [vmem:[#allocation59_spill] sm:$0xff] %v7063_v21 }
 0x253   : > { %v3057_v38 = vpack.c.bf16 %v7030_v43, %v7030_v43  ;;  %3366 = vst.msk [vmem:[%s5847_s16 + $0x1ac] sm:$0xf] %vm3258_vm2, %v3109_v57  ;;  %v2598_v57 = vmul.f32 %v5837_v17, %v1863_v41 }
 0x254   : > { %v7083_v36 = vsel %vm3515_vm3, %v4098_v35, 0.0  ;;  %3414 = vst.msk [vmem:[%s5847_s16 + $0x26c] sm:$0xf] %vm3258_vm2, %v3157_v22  ;;  %v1983_v35 = vadd.f32 %v6670_v1, %v7001_v44  ;;  %v7101_v22 = vsel %vm3515_vm3, %v5975_v53, 0.0  ;;  %v7114_v44 = vsel %vm3515_vm3, %v4099_v20, 0.0 }
 0x255   : > { %3314 = vst.msk [vmem:[%s5847_s16 + $0xdc] sm:$0xf] %vm3258_vm2, %v3057_v38  ;;  %v1732_v62 = vpop.f32.mrf.mxu0  ;;  %v5665_v38 = vld [vmem:[%s5807_s10 + $0x2b8] sm:$0xff]  ;;  %5559 = vmatmul.msk.bf16.gmra.mxu3 %vm1198_vm0, %v5689_v61  ;;  %v7118_v53 = vsel %vm3515_vm3, %v5993_v5, 0.0  ;;  %v7134_v20 = vsel %vm3515_vm3, %v4101_v47, 0.0  ;;  %v4104_v47 = vmul.f32 %v6061_v13, %v6061_v13 }
 0x256   : > { %v1733_v40 = vadd.f32 %v6670_v1, %v1732_v62  ;;  %5535 = vmatmul.msk.bf16.gmra.mxu2 %vm1198_vm0, %v5665_v38  ;;  %v4102_v62 = vmul.f32 %v6027_v42, %v6027_v42  ;;  %v7095_v38 = vsel %vm2436_vm13, %v2100_v39, %v2693_v59  ;;  %v7121_v59 = vsel %vm3515_vm3, %v4100_v32, 0.0 }
 0x257   : > { %9766 = vst [vmem:[#allocation60_spill] sm:$0xff] %v7095_v38  ;;  %v3205_v61 = vpack.c.bf16 %v7095_v38, %v7095_v38  ;;  %v7124_v38 = vsel %vm2341_vm14, %v1863_v41, %v2598_v57  ;;  %v1865_v41 = vadd.f32 %v6670_v1, %v1864_v27  ;;  %v7143_v57 = vsel %vm3515_vm3, %v6027_v42, 0.0 }
 0x258   : > { %vm2289_vm12 = vcmp.gt.f32.partialorder %v1733_v40, 0.0  ;;  %v2546_v2 = vmul.f32 %v5837_v17, %v1733_v40  ;;  %v7111_v39 = vpop.f32.mrf.mxu2  ;;  %9767 = vst [vmem:[#allocation61_spill] sm:$0xff] %v7124_v38  ;;  %v3110_v32 = vpack.c.bf16 %v7124_v38, %v7124_v38  ;;  %v7146_v63 = vsel %vm3515_vm3, %v4102_v62, 0.0 }
 0x259   : > { %3462 = vst.msk [vmem:[%s5847_s16 + $0x32c] sm:$0xf] %vm3258_vm2, %v3205_v61  ;;  %vm2389_vm15 = vcmp.gt.f32.partialorder %v1983_v35, 0.0  ;;  %5511 = vmatmul.msk.bf16.gmra.mxu1 %vm1198_vm0, %v5641_v18  ;;  %v2646_v27 = vmul.f32 %v5837_v17, %v1983_v35  ;;  %v4105_v62 = vmul.f32 %v6077_v34, %v6077_v34  ;;  %v1985_v38 = vadd.f32 %v6670_v1, %v7039_v33 }
 0x25a   : > { %v7093_v21 = vsel %vm2289_vm12, %v1733_v40, %v2546_v2  ;;  %v2103_v40 = vadd.f32 %v6670_v1, %v7006_v0  ;;  %v7109_v2 = vpop.f32.mrf.mxu1  ;;  %v7126_v0 = vpop.f32.mrf.mxu3  ;;  %3367 = vst.msk [vmem:[%s5847_s16 + $0x1b0] sm:$0xf] %vm3258_vm2, %v3110_v32  ;;  %v2599_v32 = vmul.f32 %v5837_v17, %v1865_v41  ;;  %vm2342_vm5 = vcmp.gt.f32.partialorder %v1865_v41, 0.0 }
 0x25b   : > { %v3058_v31 = vpack.c.bf16 %v7093_v21, %v7093_v21  ;;  %v7163_v18 = vsel %vm2389_vm15, %v1983_v35, %v2646_v27  ;;  %vm2390_vm6 = vcmp.gt.f32.partialorder %v1985_v38, 0.0 }
 0x25c   : > { %vm2437_vm1 = vcmp.gt.f32.partialorder %v2103_v40, 0.0  ;;  %v2694_v42 = vmul.f32 %v5837_v17, %v2103_v40  ;;  %9768 = vst [vmem:[#allocation62_spill] sm:$0xff] %v7163_v18  ;;  %v3158_v37 = vpack.c.bf16 %v7163_v18, %v7163_v18  ;;  %v7211_v48 = vsel %vm2342_vm5, %v1865_v41, %v2599_v32  ;;  %v5666_v32 = vld [vmem:[%s5807_s10 + $0x2c0] sm:$0xff] }
 0x25d   : > { %3315 = vst.msk [vmem:[%s5847_s16 + $0xe0] sm:$0xf] %vm3258_vm2, %v3058_v31  ;;  %v1734_v5 = vpop.f32.mrf.mxu0  ;;  %v4103_v31 = vmul.f32 %v6043_v60, %v6043_v60  ;;  %v3111_v41 = vpack.c.bf16 %v7211_v48, %v7211_v48 }
 0x25e   : > { %v1735_v25 = vadd.f32 %v6670_v1, %v1734_v5  ;;  %v7165_v5 = vsel %vm2437_vm1, %v2103_v40, %v2694_v42  ;;  %v4106_v40 = vmul.f32 %v6095_v52, %v6095_v52  ;;  %v7193_v42 = vsel %vm3515_vm3, %v6061_v13, 0.0  ;;  %3415 = vst.msk [vmem:[%s5847_s16 + $0x270] sm:$0xf] %vm3258_vm2, %v3158_v37 }
 0x25f   : > { %9769 = vst [vmem:[#allocation63_spill] sm:$0xff] %v7165_v5  ;;  %v7179_v35 = vsel %vm3515_vm3, %v4103_v31, 0.0  ;;  %v3206_v60 = vpack.c.bf16 %v7165_v5, %v7165_v5  ;;  %v7196_v31 = vsel %vm3515_vm3, %v4104_v47, 0.0  ;;  %v7203_v5 = vsel %vm3515_vm3, %v4105_v62, 0.0 }
 0x260   : > { %vm2290_vm4 = vcmp.gt.f32.partialorder %v1735_v25, 0.0  ;;  %v2547_v61 = vmul.f32 %v5837_v17, %v1735_v25  ;;  %9770 = vst [vmem:[#allocation64_spill] sm:$0xff] %v7196_v31  ;;  %v2647_v47 = vmul.f32 %v5837_v17, %v1985_v38  ;;  %v4107_v62 = vmul.f32 %v6111_v8, %v6111_v8 }
 0x261   : > { %9772 = vst [vmem:[#allocation66_spill] sm:$0xff] %v7203_v5  ;;  %v4108_v37 = vmul.f32 %v6129_v29, %v6129_v29  ;;  %v4109_v31 = vmul.f32 %v6145_v49, %v6145_v49 }
 0x262   : > { %v7174_v19 = vsel %vm2290_vm4, %v1735_v25, %v2547_v61  ;;  %v7187_v27 = vpop.f32.mrf.mxu1  ;;  %v7189_v25 = vpop.f32.mrf.mxu2  ;;  %v7200_v61 = vsel %vm3515_vm3, %v6077_v34, 0.0  ;;  %9773 = vst [vmem:[#allocation67_spill] sm:$0xff] %v7211_v48  ;;  %v2105_v34 = vadd.f32 %v6670_v1, %v7044_v23  ;;  %v7232_v23 = vsel %vm3515_vm3, %v4106_v40, 0.0 }
 0x263   : > { %v3059_v33 = vpack.c.bf16 %v7174_v19, %v7174_v19  ;;  %9771 = vst [vmem:[#allocation65_spill] sm:$0xff] %v7200_v61  ;;  %v7207_v18 = vpop.f32.mrf.mxu3  ;;  %v7236_v61 = vsel %vm2390_vm6, %v1985_v38, %v2647_v47  ;;  %v4086_v40 = vmul.f32 %v6960_v15, %v6960_v15  ;;  %v7255_v47 = vsel %vm3515_vm3, %v4107_v62, 0.0 }
 0x264   : > { %3463 = vst.msk [vmem:[%s5847_s16 + $0x330] sm:$0xf] %vm3258_vm2, %v3206_v60  ;;  %v7240_v60 = vsel %vm3515_vm3, %v6111_v8, 0.0  ;;  %v3159_v52 = vpack.c.bf16 %v7236_v61, %v7236_v61  ;;  %vm2438_vm8 = vcmp.gt.f32.partialorder %v2105_v34, 0.0  ;;  %v2695_v38 = vmul.f32 %v5837_v17, %v2105_v34 }
 0x265   : > { %3316 = vst.msk [vmem:[%s5847_s16 + $0xe4] sm:$0xf] %vm3258_vm2, %v3059_v33  ;;  %v1737_v13 = vpop.f32.mrf.mxu0  ;;  %v5690_v33 = vld [vmem:[%s5807_s10 + $0x380] sm:$0xff]  ;;  %v1868_v8 = vadd.f32 %v6670_v1, %v7109_v2  ;;  %v7270_v2 = vsel %vm3515_vm3, %v6145_v49, 0.0 }
 0x266   : > { %v1738_v5 = vadd.f32 %v6670_v1, %v1737_v13  ;;  %9774 = vst [vmem:[#allocation68_spill] sm:$0xff] %v7236_v61  ;;  %5536 = vmatmul.msk.bf16.gmra.mxu2 %vm1198_vm0, %v5666_v32  ;;  %5560 = vmatmul.msk.bf16.gmra.mxu3 %vm1198_vm0, %v5690_v33  ;;  %v7262_v32 = vsel %vm3515_vm3, %v4108_v37, 0.0  ;;  %v7273_v33 = vsel %vm3515_vm3, %v4109_v31, 0.0  ;;  %v7288_v49 = vsel %vm2438_vm8, %v2105_v34, %v2695_v38  ;;  %v7303_v34 = vld [vmem:[%s9524_s2] ss:$0 sm:$0xff] }
 0x267   : > { %3368 = vst.msk [vmem:[%s5847_s16 + $0x1b4] sm:$0xf] %vm3258_vm2, %v3111_v41  ;;  %v7259_v41 = vsel %vm3515_vm3, %v6129_v29, 0.0  ;;  %v1988_v29 = vadd.f32 %v6670_v1, %v7111_v39  ;;  %vm2343_vm9 = vcmp.gt.f32.partialorder %v1868_v8, 0.0  ;;  %v2600_v31 = vmul.f32 %v5837_v17, %v1868_v8 }
 0x268   : > { %vm2291_vm7 = vcmp.gt.f32.partialorder %v1738_v5, 0.0  ;;  %v2548_v13 = vmul.f32 %v5837_v17, %v1738_v5  ;;  %9775 = vst [vmem:[#allocation69_spill] sm:$0xff] %v7255_v47  ;;  %v3621_v1 = vsel %vm3515_vm3, %v6960_v15, 0.0  ;;  %v4394_v39 = vsel %vm3515_vm3, %v4086_v40, 0.0 }
 0x269   : > { %9776 = vst [vmem:[#allocation70_spill] sm:$0xff] %v7259_v41  ;;  %v2108_v38 = vadd.f32 %v7303_v34, %v7126_v0  ;;  %v4087_v15 = vmul.f32 %v6994_v55, %v6994_v55  ;;  %vm2391_vm10 = vcmp.gt.f32.partialorder %v1988_v29, 0.0 }
 0x26a   : > { %9777 = vst [vmem:[#allocation71_spill] sm:$0xff] %v7262_v32  ;;  %v7264_v61 = vsel %vm2291_vm7, %v1738_v5, %v2548_v13  ;;  %v7279_v37 = vpop.f32.mrf.mxu1  ;;  %v7281_v48 = vpop.f32.mrf.mxu2  ;;  %v7285_v5 = vsel %vm3515_vm3, %v6163_v4, 0.0  ;;  %v3623_v32 = vsel %vm3515_vm3, %v6994_v55, 0.0 }
 0x26b   : > { %3416 = vst.msk [vmem:[%s5847_s16 + $0x274] sm:$0xf] %vm3258_vm2, %v3159_v52  ;;  %v3060_v62 = vpack.c.bf16 %v7264_v61, %v7264_v61  ;;  %v7291_v13 = vpop.f32.mrf.mxu3  ;;  %vm2439_vm12 = vcmp.gt.f32.partialorder %v2108_v38, 0.0  ;;  %v2696_v55 = vmul.f32 %v5837_v17, %v2108_v38 }
 0x26c   : > { %9778 = vst [vmem:[#allocation72_spill] sm:$0xff] %v7270_v2 }
 0x26d   : > { %9779 = vst [vmem:[#allocation73_spill] sm:$0xff] %v7273_v33  ;;  %v1739_v52 = vpop.f32.mrf.mxu0  ;;  %v3207_v33 = vpack.c.bf16 %v7288_v49, %v7288_v49 }
 0x26e   : > { %9780 = vst [vmem:[#allocation74_spill] sm:$0xff] %v7285_v5  ;;  %v1740_v40 = vadd.f32 %v7303_v34, %v1739_v52  ;;  %v7310_v5 = vsel %vm2343_vm9, %v1868_v8, %v2600_v31  ;;  %v4088_v52 = vmul.f32 %v7030_v43, %v7030_v43  ;;  %v3622_v31 = vadd.f32 %v3621_v1, %v6932_v51 }
 0x26f   : > { %9781 = vst [vmem:[#allocation75_spill] sm:$0xff] %v7288_v49  ;;  %v4110_v49 = vmul.f32 %v6163_v4, %v6163_v4  ;;  %v3112_v0 = vpack.c.bf16 %v7310_v5, %v7310_v5  ;;  %v4395_v4 = vadd.f32 %v4394_v39, %v6943_v7 }
 0x270   : > { %3317 = vst.msk [vmem:[%s5847_s16 + $0xe8] sm:$0xf] %vm3258_vm2, %v3060_v62  ;;  %v1870_v62 = vadd.f32 %v7303_v34, %v7187_v27  ;;  %vm2292_vm11 = vcmp.gt.f32.partialorder %v1740_v40, 0.0  ;;  %v2549_v8 = vmul.f32 %v5837_v17, %v1740_v40  ;;  %v2648_v27 = vmul.f32 %v5837_v17, %v1988_v29 }
 0x271   : > { %9782 = vst [vmem:[#allocation76_spill] sm:$0xff] %v7310_v5  ;;  %v3624_v41 = vadd.f32 %v3623_v32, %v3622_v31  ;;  %v7348_v32 = vsel %vm2439_vm12, %v2108_v38, %v2696_v55  ;;  %v2110_v38 = vadd.f32 %v7303_v34, %v7207_v18  ;;  %v4111_v18 = vmul.f32 %v6179_v28, %v6179_v28 }
 0x272   : > { %3464 = vst.msk [vmem:[%s5847_s16 + $0x334] sm:$0xf] %vm3258_vm2, %v3207_v33  ;;  %v4396_v33 = vsel %vm3515_vm3, %v4087_v15, 0.0  ;;  %v7332_v5 = vsel %vm2292_vm11, %v1740_v40, %v2549_v8  ;;  %v7334_v2 = vsel %vm2391_vm10, %v1988_v29, %v2648_v27  ;;  %v2601_v47 = vmul.f32 %v5837_v17, %v1870_v62  ;;  %v7341_v1 = vpop.f32.mrf.mxu1  ;;  %v7343_v39 = vpop.f32.mrf.mxu2 }
 0x273   : > { %3369 = vst.msk [vmem:[%s5847_s16 + $0x1b8] sm:$0xf] %vm3258_vm2, %v3112_v0  ;;  %v3061_v51 = vpack.c.bf16 %v7332_v5, %v7332_v5  ;;  %v3160_v7 = vpack.c.bf16 %v7334_v2, %v7334_v2  ;;  %vm2344_vm13 = vcmp.gt.f32.partialorder %v1870_v62, 0.0  ;;  %v3625_v15 = vsel %vm3515_vm3, %v7030_v43, 0.0  ;;  %v7352_v0 = vpop.f32.mrf.mxu3 }
 0x274   : > { %9783 = vst [vmem:[#allocation77_spill] sm:$0xff] %v7334_v2  ;;  %v4398_v29 = vsel %vm3515_vm3, %v4088_v52, 0.0  ;;  %v1990_v40 = vadd.f32 %v7303_v34, %v7189_v25  ;;  %v4397_v8 = vadd.f32 %v4396_v33, %v4395_v4  ;;  %v4089_v27 = vmul.f32 %v7093_v21, %v7093_v21  ;;  %v5667_v33 = vld [vmem:[%s5807_s10 + $0x2c8] sm:$0xff] }
 0x275   : > { %9784 = vst [vmem:[#allocation78_spill] sm:$0xff] %v7348_v32  ;;  %v1742_v31 = vpop.f32.mrf.mxu0  ;;  %v3208_v43 = vpack.c.bf16 %v7348_v32, %v7348_v32  ;;  %v7363_v52 = vsel %vm3515_vm3, %v4110_v49, 0.0  ;;  %v7367_v25 = vsel %vm3515_vm3, %v6179_v28, 0.0  ;;  %v7373_v55 = vsel %vm2344_vm13, %v1870_v62, %v2601_v47 }
 0x276   : > { %3318 = vst.msk [vmem:[%s5847_s16 + $0xec] sm:$0xf] %vm3258_vm2, %v3061_v51  ;;  %v1743_v4 = vadd.f32 %v7303_v34, %v1742_v31  ;;  %v5691_v51 = vld [vmem:[%s5807_s10 + $0x388] sm:$0xff]  ;;  %v3626_v32 = vadd.f32 %v3625_v15, %v3624_v41  ;;  %v4399_v49 = vadd.f32 %v4398_v29, %v4397_v8  ;;  %v3113_v2 = vpack.c.bf16 %v7373_v55, %v7373_v55 }
 0x277   : > { %3417 = vst.msk [vmem:[%s5847_s16 + $0x278] sm:$0xf] %vm3258_vm2, %v3160_v7  ;;  %vm2392_vm15 = vcmp.gt.f32.partialorder %v1990_v40, 0.0  ;;  %v2649_v7 = vmul.f32 %v5837_v17, %v1990_v40  ;;  %5537 = vmatmul.msk.bf16.gmra.mxu2 %vm1198_vm0, %v5667_v33  ;;  %v3627_v47 = vsel %vm3515_vm3, %v7093_v21, 0.0  ;;  %v4400_v28 = vsel %vm3515_vm3, %v4089_v27, 0.0  ;;  %5561 = vmatmul.msk.bf16.gmra.mxu3 %vm1198_vm0, %v5691_v51 }
 0x278   : > { %9785 = vst [vmem:[#allocation79_spill] sm:$0xff] %v7373_v55  ;;  %vm2293_vm14 = vcmp.gt.f32.partialorder %v1743_v4, 0.0  ;;  %v2550_v31 = vmul.f32 %v5837_v17, %v1743_v4  ;;  %vm2440_vm1 = vcmp.gt.f32.partialorder %v2110_v38, 0.0  ;;  %v2697_v41 = vmul.f32 %v5837_v17, %v2110_v38 }
 0x279   : > { %3465 = vst.msk [vmem:[%s5847_s16 + $0x338] sm:$0xf] %vm3258_vm2, %v3208_v43  ;;  %v4090_v62 = vmul.f32 %v7174_v19, %v7174_v19  ;;  %v7397_v29 = vsel %vm2392_vm15, %v1990_v40, %v2649_v7  ;;  %v1873_v21 = vadd.f32 %v7303_v34, %v7279_v37  ;;  %v3629_v8 = vsel %vm3515_vm3, %v7174_v19, 0.0 }
 0x27a   : > { %3370 = vst.msk [vmem:[%s5847_s16 + $0x1bc] sm:$0xf] %vm3258_vm2, %v3113_v2  ;;  %v7395_v15 = vsel %vm2293_vm14, %v1743_v4, %v2550_v31  ;;  %v3161_v27 = vpack.c.bf16 %v7397_v29, %v7397_v29  ;;  %v1993_v43 = vadd.f32 %v7303_v34, %v7281_v48  ;;  %v7409_v4 = vpop.f32.mrf.mxu1  ;;  %v7411_v40 = vpop.f32.mrf.mxu2  ;;  %v7414_v33 = vsel %vm3515_vm3, %v4111_v18, 0.0 }
 0x27b   : > { %9786 = vst [vmem:[#allocation80_spill] sm:$0xff] %v7397_v29  ;;  %v3062_v2 = vpack.c.bf16 %v7395_v15, %v7395_v15  ;;  %v3628_v37 = vadd.f32 %v3627_v47, %v3626_v32  ;;  %v4091_v19 = vmul.f32 %v7264_v61, %v7264_v61  ;;  %v7419_v51 = vsel %vm2440_vm1, %v2110_v38, %v2697_v41  ;;  %v7421_v31 = vpop.f32.mrf.mxu3 }
 0x27c   : > { %9787 = vst [vmem:[#allocation81_spill] sm:$0xff] %v7414_v33  ;;  %v4112_v48 = vmul.f32 %v6198_v50, %v6198_v50  ;;  %v4401_v7 = vadd.f32 %v4400_v28, %v4399_v49  ;;  %v3209_v18 = vpack.c.bf16 %v7419_v51, %v7419_v51  ;;  %v2113_v32 = vadd.f32 %v7303_v34, %v7291_v13 }
 0x27d   : > { %9788 = vst [vmem:[#allocation82_spill] sm:$0xff] %v7419_v51  ;;  %v1744_v29 = vpop.f32.mrf.mxu0  ;;  %v3630_v47 = vadd.f32 %v3629_v8, %v3628_v37  ;;  %v4402_v55 = vsel %vm3515_vm3, %v4090_v62, 0.0  ;;  %vm2345_vm4 = vcmp.gt.f32.partialorder %v1873_v21, 0.0  ;;  %v3631_v49 = vsel %vm3515_vm3, %v7264_v61, 0.0 }
 0x27e   : > { %3319 = vst.msk [vmem:[%s5847_s16 + $0xf0] sm:$0xf] %vm3258_vm2, %v3062_v2  ;;  %v1745_v38 = vadd.f32 %v7303_v34, %v1744_v29  ;;  %v2602_v28 = vmul.f32 %v5837_v17, %v1873_v21  ;;  %vm2393_vm5 = vcmp.gt.f32.partialorder %v1993_v43, 0.0  ;;  %v2650_v41 = vmul.f32 %v5837_v17, %v1993_v43 }
 0x27f   : > { %3418 = vst.msk [vmem:[%s5847_s16 + $0x27c] sm:$0xf] %vm3258_vm2, %v3161_v27  ;;  %v4404_v13 = vsel %vm3515_vm3, %v4091_v19, 0.0  ;;  %v4092_v62 = vmul.f32 %v7332_v5, %v7332_v5  ;;  %v2698_v61 = vmul.f32 %v5837_v17, %v2113_v32  ;;  %v1875_v27 = vadd.f32 %v7303_v34, %v7341_v1 }
 0x280   : > { %3466 = vst.msk [vmem:[%s5847_s16 + $0x33c] sm:$0xf] %vm3258_vm2, %v3209_v18  ;;  %vm2294_vm6 = vcmp.gt.f32.partialorder %v1745_v38, 0.0  ;;  %v2551_v29 = vmul.f32 %v5837_v17, %v1745_v38  ;;  %v7445_v8 = vsel %vm2345_vm4, %v1873_v21, %v2602_v28  ;;  %v7447_v2 = vsel %vm2393_vm5, %v1993_v43, %v2650_v41 }
 0x281   : > { %9789 = vst [vmem:[#allocation83_spill] sm:$0xff] %v7445_v8  ;;  %v4403_v37 = vadd.f32 %v4402_v55, %v4401_v7  ;;  %v3114_v19 = vpack.c.bf16 %v7445_v8, %v7445_v8  ;;  %vm2441_vm7 = vcmp.gt.f32.partialorder %v2113_v32, 0.0  ;;  %v7456_v51 = vsel %vm3515_vm3, %v6198_v50, 0.0 }
 0x282   : > { %9790 = vst [vmem:[#allocation84_spill] sm:$0xff] %v7447_v2  ;;  %v2807_v18 = vsel %vm2294_vm6, %v1745_v38, %v2551_v29  ;;  %v3632_v21 = vadd.f32 %v3631_v49, %v3630_v47  ;;  %v3162_v28 = vpack.c.bf16 %v7447_v2, %v7447_v2  ;;  %v7460_v41 = vpop.f32.mrf.mxu1  ;;  %v7462_v33 = vpop.f32.mrf.mxu2  ;;  %v3633_v55 = vsel %vm3515_vm3, %v7332_v5, 0.0 }
 0x283   : > { %v3063_v43 = vpack.c.bf16 %v2807_v18, %v2807_v18  ;;  %v4405_v1 = vadd.f32 %v4404_v13, %v4403_v37  ;;  %v4406_v7 = vsel %vm3515_vm3, %v4092_v62, 0.0  ;;  %v4093_v50 = vmul.f32 %v7395_v15, %v7395_v15  ;;  %3371 = vst.msk [vmem:[%s5847_s16 + $0x1c0] sm:$0xf] %vm3258_vm2, %v3114_v19  ;;  %v7471_v47 = vpop.f32.mrf.mxu3  ;;  %v5692_v19 = vld [vmem:[%s5807_s10 + $0x390] sm:$0xff] }
 0x284   : > { %v7475_v49 = vsel %vm2441_vm7, %v2113_v32, %v2698_v61  ;;  %vm2346_vm8 = vcmp.gt.f32.partialorder %v1875_v27, 0.0  ;;  %v2603_v13 = vmul.f32 %v5837_v17, %v1875_v27  ;;  %v1995_v5 = vadd.f32 %v7303_v34, %v7343_v39  ;;  %3419 = vst.msk [vmem:[%s5847_s16 + $0x280] sm:$0xf] %vm3258_vm2, %v3162_v28  ;;  %v5668_v61 = vld [vmem:[%s5807_s10 + $0x2d0] sm:$0xff] }
 0x285   : > { %3320 = vst.msk [vmem:[%s5847_s16 + $0xf4] sm:$0xf] %vm3258_vm2, %v3063_v43  ;;  %v1747_v38 = vpop.f32.mrf.mxu0  ;;  %v7481_v62 = vsel %vm3515_vm3, %v4112_v48, 0.0  ;;  %v7485_v29 = vsel %vm3515_vm3, %v6222_v12, 0.0  ;;  %v3210_v32 = vpack.c.bf16 %v7475_v49, %v7475_v49  ;;  %v3634_v43 = vadd.f32 %v3633_v55, %v3632_v21 }
 0x286   : > { %9791 = vst [vmem:[#allocation85_spill] sm:$0xff] %v7475_v49  ;;  %v1748_v37 = vadd.f32 %v7303_v34, %v1747_v38  ;;  %v4407_v2 = vadd.f32 %v4406_v7, %v4405_v1  ;;  %v3635_v39 = vsel %vm3515_vm3, %v7395_v15, 0.0  ;;  %v7496_v48 = vsel %vm2346_vm8, %v1875_v27, %v2603_v13 }
 0x287   : > { %v4408_v8 = vsel %vm3515_vm3, %v4093_v50, 0.0  ;;  %3467 = vst.msk [vmem:[%s5847_s16 + $0x340] sm:$0xf] %vm3258_vm2, %v3210_v32  ;;  %v3115_v28 = vpack.c.bf16 %v7496_v48, %v7496_v48  ;;  %5538 = vmatmul.msk.bf16.gmra.mxu2 %vm1198_vm0, %v5668_v61  ;;  %v4094_v21 = vmul.f32 %v2807_v18, %v2807_v18  ;;  %vm2394_vm10 = vcmp.gt.f32.partialorder %v1995_v5, 0.0  ;;  %5562 = vmatmul.msk.bf16.gmra.mxu3 %vm1198_vm0, %v5692_v19 }
 0x288   : > { %vm2295_vm9 = vcmp.gt.f32.partialorder %v1748_v37, 0.0  ;;  %v2552_v38 = vmul.f32 %v5837_v17, %v1748_v37  ;;  %v2651_v1 = vmul.f32 %v5837_v17, %v1995_v5  ;;  %v2115_v15 = vadd.f32 %v7303_v34, %v7352_v0 }
 0x289   : > { %v4113_v27 = vmul.f32 %v6222_v12, %v6222_v12  ;;  %v7513_v55 = vsel %vm3515_vm3, %v6228_v26, 0.0  ;;  %v4161_v7 = vmul.f32 %v6228_v26, %v6228_v26  ;;  %3372 = vst.msk [vmem:[%s5847_s16 + $0x1c4] sm:$0xf] %vm3258_vm2, %v3115_v28  ;;  %v3636_v13 = vadd.f32 %v3635_v39, %v3634_v43 }
 0x28a   : > { %9792 = vst [vmem:[#allocation86_spill] sm:$0xff] %v7513_v55  ;;  %v2808_v50 = vsel %vm2295_vm9, %v1748_v37, %v2552_v38  ;;  %v4409_v32 = vadd.f32 %v4408_v8, %v4407_v2  ;;  %v1878_v0 = vadd.f32 %v7303_v34, %v7409_v4  ;;  %v7521_v19 = vpop.f32.mrf.mxu1  ;;  %v7523_v12 = vpop.f32.mrf.mxu2  ;;  %v3637_v49 = vsel %vm3515_vm3, %v2807_v18, 0.0 }
 0x28b   : > { %v3064_v61 = vpack.c.bf16 %v2808_v50, %v2808_v50  ;;  %v7527_v55 = vsel %vm2394_vm10, %v1995_v5, %v2651_v1  ;;  %vm2442_vm11 = vcmp.gt.f32.partialorder %v2115_v15, 0.0  ;;  %v2699_v26 = vmul.f32 %v5837_v17, %v2115_v15  ;;  %v7530_v37 = vpop.f32.mrf.mxu3 }
 0x28c   : > { %9793 = vst [vmem:[#allocation87_spill] sm:$0xff] %v7527_v55  ;;  %v4410_v8 = vsel %vm3515_vm3, %v4094_v21, 0.0  ;;  %v4095_v4 = vmul.f32 %v2808_v50, %v2808_v50  ;;  %v3163_v43 = vpack.c.bf16 %v7527_v55, %v7527_v55  ;;  %v1998_v18 = vadd.f32 %v7303_v34, %v7411_v40 }
 0x28d   : > { %3321 = vst.msk [vmem:[%s5847_s16 + $0xf8] sm:$0xf] %vm3258_vm2, %v3064_v61  ;;  %v1749_v2 = vpop.f32.mrf.mxu0  ;;  %v3639_v5 = vsel %vm3515_vm3, %v2808_v50, 0.0  ;;  %v7541_v38 = vsel %vm2442_vm11, %v2115_v15, %v2699_v26  ;;  %v2118_v28 = vadd.f32 %v7303_v34, %v7421_v31  ;;  %v4114_v21 = vmul.f32 %v6250_v45, %v6250_v45 }
 0x28e   : > { %v1750_v39 = vadd.f32 %v7303_v34, %v1749_v2  ;;  %9794 = vst [vmem:[#allocation88_spill] sm:$0xff] %v7541_v38  ;;  %v3638_v1 = vadd.f32 %v3637_v49, %v3636_v13  ;;  %v3211_v61 = vpack.c.bf16 %v7541_v38, %v7541_v38  ;;  %vm2347_vm12 = vcmp.gt.f32.partialorder %v1878_v0, 0.0 }
 0x28f   : > { %3420 = vst.msk [vmem:[%s5847_s16 + $0x284] sm:$0xf] %vm3258_vm2, %v3163_v43  ;;  %v4411_v40 = vadd.f32 %v4410_v8, %v4409_v32  ;;  %v2604_v15 = vmul.f32 %v5837_v17, %v1878_v0  ;;  %v4412_v2 = vsel %vm3515_vm3, %v4095_v4, 0.0  ;;  %vm2395_vm14 = vcmp.gt.f32.partialorder %v1998_v18, 0.0 }
 0x290   : > { %vm2296_vm13 = vcmp.gt.f32.partialorder %v1750_v39, 0.0  ;;  %v2553_v50 = vmul.f32 %v5837_v17, %v1750_v39  ;;  %v3640_v26 = vadd.f32 %v3639_v5, %v3638_v1  ;;  %3468 = vst.msk [vmem:[%s5847_s16 + $0x344] sm:$0xf] %vm3258_vm2, %v3211_v61  ;;  %v2652_v31 = vmul.f32 %v5837_v17, %v1998_v18 }
 0x291   : > { %v7557_v13 = vsel %vm2347_vm12, %v1878_v0, %v2604_v15  ;;  %vm2443_vm15 = vcmp.gt.f32.partialorder %v2118_v28, 0.0  ;;  %v2700_v32 = vmul.f32 %v5837_v17, %v2118_v28 }
 0x292   : > { %v2809_v49 = vsel %vm2296_vm13, %v1750_v39, %v2553_v50  ;;  %v3116_v5 = vpack.c.bf16 %v7557_v13, %v7557_v13  ;;  %v7563_v4 = vpop.f32.mrf.mxu1  ;;  %v7565_v1 = vpop.f32.mrf.mxu2  ;;  %v4413_v39 = vadd.f32 %v4412_v2, %v4411_v40  ;;  %v7567_v61 = vsel %vm2395_vm14, %v1998_v18, %v2652_v31  ;;  %v5669_v31 = vld [vmem:[%s5807_s10 + $0x2d8] sm:$0xff] }
 0x293   : > { %v3065_v8 = vpack.c.bf16 %v2809_v49, %v2809_v49  ;;  %v3641_v43 = vsel %vm3515_vm3, %v2809_v49, 0.0  ;;  %v4096_v38 = vmul.f32 %v2809_v49, %v2809_v49  ;;  %v1880_v50 = vadd.f32 %v7303_v34, %v7460_v41  ;;  %v7571_v15 = vpop.f32.mrf.mxu3 }
 0x294   : > { %v3642_v0 = vadd.f32 %v3641_v43, %v3640_v26  ;;  %v7574_v49 = vsel %vm3515_vm3, %v4113_v27, 0.0  ;;  %v3164_v40 = vpack.c.bf16 %v7567_v61, %v7567_v61  ;;  %v2000_v18 = vadd.f32 %v7303_v34, %v7462_v33  ;;  %3373 = vst.msk [vmem:[%s5847_s16 + $0x1c8] sm:$0xf] %vm3258_vm2, %v3116_v5 }
 0x295   : > { %3322 = vst.msk [vmem:[%s5847_s16 + $0xfc] sm:$0xf] %vm3258_vm2, %v3065_v8  ;;  %v4414_v55 = vsel %vm3515_vm3, %v4096_v38, 0.0  ;;  %v7584_v26 = vsel %vm3515_vm3, %v4161_v7, 0.0  ;;  %v7590_v27 = vsel %vm2443_vm15, %v2118_v28, %v2700_v32  ;;  %v5693_v38 = vld [vmem:[%s5807_s10 + $0x398] sm:$0xff]  ;;  %v7596_v8 = vsel %vm3515_vm3, %v6250_v45, 0.0 }
 0x296   : > { %v3644_v41 = vadd.f32 %v7055_v3, %v3642_v0  ;;  %v4415_v2 = vadd.f32 %v4414_v55, %v4413_v39  ;;  %9795 = vst [vmem:[#allocation89_spill] sm:$0xff] %v7590_v27  ;;  %v7599_v33 = vsel %vm3515_vm3, %v4114_v21, 0.0  ;;  %v7603_v7 = vmul.f32 %v6255_v56, %v6255_v56 }
 0x297   : > { %3421 = vst.msk [vmem:[%s5847_s16 + $0x288] sm:$0xf] %vm3258_vm2, %v3164_v40  ;;  %v3212_v3 = vpack.c.bf16 %v7590_v27, %v7590_v27  ;;  %vm2348_vm1 = vcmp.gt.f32.partialorder %v1880_v50, 0.0  ;;  %v2605_v45 = vmul.f32 %v5837_v17, %v1880_v50  ;;  %5539 = vmatmul.msk.bf16.gmra.mxu2 %vm1198_vm0, %v5669_v31  ;;  %v4115_v21 = vmul.f32 %v6274_v10, %v6274_v10 }
 0x298   : > { %v3646_v55 = vadd.f32 %v7069_v58, %v3644_v41  ;;  %v4417_v28 = vadd.f32 %v7058_v14, %v4415_v2  ;;  %vm2396_vm4 = vcmp.gt.f32.partialorder %v2000_v18, 0.0  ;;  %v2653_v32 = vmul.f32 %v5837_v17, %v2000_v18  ;;  %5563 = vmatmul.msk.bf16.gmra.mxu3 %vm1198_vm0, %v5693_v38 }
 0x299   : > { %3469 = vst.msk [vmem:[%s5847_s16 + $0x348] sm:$0xf] %vm3258_vm2, %v3212_v3  ;;  %v2120_v43 = vadd.f32 %v7303_v34, %v7471_v47  ;;  %v7623_v5 = vsel %vm2348_vm1, %v1880_v50, %v2605_v45  ;;  %v1883_v39 = vadd.f32 %v7303_v34, %v7521_v19  ;;  %v7629_v0 = vsel %vm3515_vm3, %v6274_v10, 0.0 }
 0x29a   : > { %v3648_v58 = vadd.f32 %v7101_v22, %v3646_v55  ;;  %v4419_v14 = vadd.f32 %v7083_v36, %v4417_v28  ;;  %v4116_v40 = vmul.f32 %v6302_v46, %v6302_v46  ;;  %v3117_v47 = vpack.c.bf16 %v7623_v5, %v7623_v5  ;;  %v7637_v36 = vpop.f32.mrf.mxu1  ;;  %v7639_v50 = vpop.f32.mrf.mxu2 }
 0x29b   : > { %v7635_v22 = vsel %vm2396_vm4, %v2000_v18, %v2653_v32  ;;  %v7643_v19 = vmul.f32 %v6280_v24, %v6280_v24  ;;  %v7649_v31 = vpop.f32.mrf.mxu3  ;;  %v7652_v18 = vsel %vm3515_vm3, %v4115_v21, 0.0  ;;  %v7656_v38 = vsel %vm3515_vm3, %v6302_v46, 0.0 }
 0x29c   : > { %9796 = vst [vmem:[#allocation90_spill] sm:$0xff] %v7635_v22  ;;  %v3650_v10 = vadd.f32 %v7118_v53, %v3648_v58  ;;  %v4421_v41 = vadd.f32 %v7114_v44, %v4419_v14  ;;  %v3165_v2 = vpack.c.bf16 %v7635_v22, %v7635_v22  ;;  %vm2444_vm5 = vcmp.gt.f32.partialorder %v2120_v43, 0.0 }
 0x29d   : > { %3374 = vst.msk [vmem:[%s5847_s16 + $0x1cc] sm:$0xf] %vm3258_vm2, %v3117_v47  ;;  %v2701_v3 = vmul.f32 %v5837_v17, %v2120_v43  ;;  %vm2349_vm6 = vcmp.gt.f32.partialorder %v1883_v39, 0.0  ;;  %v2606_v55 = vmul.f32 %v5837_v17, %v1883_v39  ;;  %v7667_v28 = vsel %vm3515_vm3, %v4116_v40, 0.0 }
 0x29e   : > { %v3652_v53 = vadd.f32 %v7131_v9, %v3650_v10  ;;  %v4423_v44 = vadd.f32 %v7121_v59, %v4421_v41  ;;  %3422 = vst.msk [vmem:[%s5847_s16 + $0x28c] sm:$0xf] %vm3258_vm2, %v3165_v2  ;;  %v4117_v46 = vmul.f32 %v6326_v16, %v6326_v16  ;;  %v2003_v21 = vadd.f32 %v7303_v34, %v7523_v12 }
 0x29f   : > { %v7671_v45 = vsel %vm2444_vm5, %v2120_v43, %v2701_v3  ;;  %v2123_v58 = vadd.f32 %v7303_v34, %v7530_v37  ;;  %v4118_v14 = vmul.f32 %v6354_v54, %v6354_v54  ;;  %v7683_v40 = vsel %vm2349_vm6, %v1883_v39, %v2606_v55 }
 0x2a0   : > { %9797 = vst [vmem:[#allocation91_spill] sm:$0xff] %v7671_v45  ;;  %v3654_v9 = vadd.f32 %v7143_v57, %v3652_v53  ;;  %v4425_v59 = vadd.f32 %v7134_v20, %v4423_v44  ;;  %v3213_v32 = vpack.c.bf16 %v7671_v45, %v7671_v45  ;;  %vm2397_vm7 = vcmp.gt.f32.partialorder %v2003_v21, 0.0  ;;  %v9811_v45 = vld [vmem:[#allocation13_spill] sm:$0xff] }
 0x2a1   : > { %v2654_v43 = vmul.f32 %v5837_v17, %v2003_v21  ;;  %v4119_v57 = vmul.f32 %v6378_v30, %v6378_v30  ;;  %v3118_v37 = vpack.c.bf16 %v7683_v40, %v7683_v40  ;;  %v7696_v39 = vsel %vm3515_vm3, %v6326_v16, 0.0 }
 0x2a2   : > { %v3656_v20 = vadd.f32 %v7172_v11, %v3654_v9  ;;  %v4427_v12 = vadd.f32 %v7146_v63, %v4425_v59  ;;  %3470 = vst.msk [vmem:[%s5847_s16 + $0x34c] sm:$0xf] %vm3258_vm2, %v3213_v32  ;;  %v7699_v47 = vsel %vm3515_vm3, %v4117_v46, 0.0  ;;  %v7703_v10 = vsel %vm3515_vm3, %v6354_v54, 0.0  ;;  %v7707_v11 = vpop.f32.mrf.mxu1  ;;  %v7709_v63 = vpop.f32.mrf.mxu2  ;;  %v9799_v46 = vld [vmem:[#allocation65_spill] sm:$0xff]  ;;  %v9800_v9 = vld [vmem:[#allocation64_spill] sm:$0xff] }
 0x2a3   : > { %v7705_v41 = vsel %vm2397_vm7, %v2003_v21, %v2654_v43  ;;  %3375 = vst.msk [vmem:[%s5847_s16 + $0x1d0] sm:$0xf] %vm3258_vm2, %v3118_v37  ;;  %vm2445_vm8 = vcmp.gt.f32.partialorder %v2123_v58, 0.0  ;;  %v7717_v54 = vpop.f32.mrf.mxu3  ;;  %v7720_v53 = vsel %vm3515_vm3, %v4118_v14, 0.0  ;;  %v7724_v44 = vsel %vm3515_vm3, %v6378_v30, 0.0  ;;  %v5670_v14 = vld [vmem:[%s5807_s10 + $0x2e0] sm:$0xff] }
 0x2a4   : > { %9798 = vst [vmem:[#allocation92_spill] sm:$0xff] %v7705_v41  ;;  %v3658_v2 = vadd.f32 %v7193_v42, %v3656_v20  ;;  %v4429_v16 = vadd.f32 %v7179_v35, %v4427_v12  ;;  %v3166_v3 = vpack.c.bf16 %v7705_v41, %v7705_v41  ;;  %v2702_v42 = vmul.f32 %v5837_v17, %v2123_v58  ;;  %v5694_v30 = vld [vmem:[%s5807_s10 + $0x3a0] sm:$0xff]  ;;  %v9803_v37 = vld [vmem:[#allocation66_spill] sm:$0xff]  ;;  %v9814_v41 = vld [vmem:[#allocation73_spill] sm:$0xff] }
 0x2a5   : > { %v1885_v35 = vadd.f32 %v7303_v34, %v7563_v4  ;;  %v7730_v55 = vsel %vm3515_vm3, %v4119_v57, 0.0  ;;  %v2005_v32 = vadd.f32 %v7303_v34, %v7565_v1  ;;  %v9801_v43 = vld [vmem:[#allocation7_spill] sm:$0xff]  ;;  %v2125_v1 = vadd.f32 %v7303_v34, %v7571_v15 }
 0x2a6   : > { %v3660_v21 = vadd.f32 %v9799_v46, %v3658_v2  ;;  %v4431_v59 = vadd.f32 %v9800_v9, %v4429_v16  ;;  %3423 = vst.msk [vmem:[%s5847_s16 + $0x290] sm:$0xf] %vm3258_vm2, %v3166_v3  ;;  %v4120_v20 = vmul.f32 %v9801_v43, %v9801_v43  ;;  %v7742_v12 = vsel %vm2445_vm8, %v2123_v58, %v2702_v42  ;;  %v9804_v3 = vld [vmem:[#allocation9_spill] sm:$0xff] }
 0x2a7   : > { %9802 = vst [vmem:[#allocation65_spill] sm:$0xff] %v7742_v12  ;;  %vm2350_vm9 = vcmp.gt.f32.partialorder %v1885_v35, 0.0  ;;  %v2607_v4 = vmul.f32 %v5837_v17, %v1885_v35  ;;  %v3214_v16 = vpack.c.bf16 %v7742_v12, %v7742_v12  ;;  %5540 = vmatmul.msk.bf16.gmra.mxu2 %vm1198_vm0, %v5670_v14  ;;  %v4121_v58 = vmul.f32 %v9804_v3, %v9804_v3 }
 0x2a8   : > { %v3662_v57 = vadd.f32 %v7229_v6, %v3660_v21  ;;  %v4433_v2 = vadd.f32 %v9803_v37, %v4431_v59  ;;  %vm2398_vm10 = vcmp.gt.f32.partialorder %v2005_v32, 0.0  ;;  %v2655_v46 = vmul.f32 %v5837_v17, %v2005_v32  ;;  %5564 = vmatmul.msk.bf16.gmra.mxu3 %vm1198_vm0, %v5694_v30  ;;  %v9805_v6 = vld [vmem:[#allocation11_spill] sm:$0xff]  ;;  %v9808_v37 = vld [vmem:[#allocation69_spill] sm:$0xff] }
 0x2a9   : > { %v7754_v42 = vsel %vm2350_vm9, %v1885_v35, %v2607_v4  ;;  %v4122_v21 = vmul.f32 %v9805_v6, %v9805_v6  ;;  %3471 = vst.msk [vmem:[%s5847_s16 + $0x350] sm:$0xf] %vm3258_vm2, %v3214_v16  ;;  %v7768_v35 = vsel %vm3515_vm3, %v9801_v43, 0.0  ;;  %v7771_v14 = vsel %vm3515_vm3, %v4120_v20, 0.0 }
 0x2aa   : > { %v3664_v9 = vadd.f32 %v7240_v60, %v3662_v57  ;;  %v4435_v15 = vadd.f32 %v7232_v23, %v4433_v2  ;;  %v3119_v59 = vpack.c.bf16 %v7754_v42, %v7754_v42  ;;  %v7775_v30 = vsel %vm3515_vm3, %v9804_v3, 0.0  ;;  %v7779_v23 = vpop.f32.mrf.mxu2  ;;  %v9807_v60 = vld [vmem:[#allocation70_spill] sm:$0xff]  ;;  %v7787_v20 = vpop.f32.mrf.mxu1 }
 0x2ab   : > { %v7777_v4 = vsel %vm2398_vm10, %v2005_v32, %v2655_v46  ;;  %vm2446_vm11 = vcmp.gt.f32.partialorder %v2125_v1, 0.0  ;;  %v7789_v16 = vpop.f32.mrf.mxu3  ;;  %v7792_v32 = vsel %vm3515_vm3, %v4121_v58, 0.0  ;;  %v7796_v3 = vsel %vm3515_vm3, %v9805_v6, 0.0 }
 0x2ac   : > { %9806 = vst [vmem:[#allocation64_spill] sm:$0xff] %v7777_v4  ;;  %v3666_v57 = vadd.f32 %v9807_v60, %v3664_v9  ;;  %v4437_v2 = vadd.f32 %v9808_v37, %v4435_v15  ;;  %v3167_v43 = vpack.c.bf16 %v7777_v4, %v7777_v4  ;;  %v2703_v46 = vmul.f32 %v5837_v17, %v2125_v1  ;;  %v9810_v37 = vld [vmem:[#allocation71_spill] sm:$0xff] }
 0x2ad   : > { %3376 = vst.msk [vmem:[%s5847_s16 + $0x1d4] sm:$0xf] %vm3258_vm2, %v3119_v59  ;;  %v1888_v9 = vadd.f32 %v7303_v34, %v7637_v36  ;;  %v7802_v15 = vsel %vm3515_vm3, %v4122_v21, 0.0  ;;  %v9809_v59 = vld [vmem:[#allocation72_spill] sm:$0xff]  ;;  %v2008_v58 = vadd.f32 %v7303_v34, %v7639_v50  ;;  %v4123_v6 = vmul.f32 %v9811_v45, %v9811_v45  ;;  %v9813_v21 = vld [vmem:[#allocation74_spill] sm:$0xff]  ;;  %v9815_v50 = vld [vmem:[#allocation15_spill] sm:$0xff] }
 0x2ae   : > { %v3668_v60 = vadd.f32 %v9809_v59, %v3666_v57  ;;  %v4439_v12 = vadd.f32 %v9810_v37, %v4437_v2  ;;  %3424 = vst.msk [vmem:[%s5847_s16 + $0x294] sm:$0xf] %vm3258_vm2, %v3167_v43  ;;  %v7812_v27 = vsel %vm2446_vm11, %v2125_v1, %v2703_v46  ;;  %v2128_v43 = vadd.f32 %v7303_v34, %v7649_v31  ;;  %v9816_v46 = vld [vmem:[#allocation17_spill] sm:$0xff] }
 0x2af   : > { %9812 = vst [vmem:[#allocation7_spill] sm:$0xff] %v7812_v27  ;;  %vm2351_vm12 = vcmp.gt.f32.partialorder %v1888_v9, 0.0  ;;  %v2608_v36 = vmul.f32 %v5837_v17, %v1888_v9  ;;  %v3215_v2 = vpack.c.bf16 %v7812_v27, %v7812_v27  ;;  %v4124_v59 = vmul.f32 %v9815_v50, %v9815_v50  ;;  %v5695_v27 = vld [vmem:[%s5807_s10 + $0x3a8] sm:$0xff] }
 0x2b0   : > { %v3670_v4 = vadd.f32 %v9813_v21, %v3668_v60  ;;  %v4441_v57 = vadd.f32 %v9814_v41, %v4439_v12  ;;  %vm2399_vm13 = vcmp.gt.f32.partialorder %v2008_v58, 0.0  ;;  %v2656_v1 = vmul.f32 %v5837_v17, %v2008_v58 }
 0x2b1   : > { %v7823_v37 = vsel %vm2351_vm12, %v1888_v9, %v2608_v36  ;;  %v4125_v60 = vmul.f32 %v9816_v46, %v9816_v46  ;;  %3472 = vst.msk [vmem:[%s5847_s16 + $0x354] sm:$0xf] %vm3258_vm2, %v3215_v2  ;;  %v7836_v21 = vsel %vm3515_vm3, %v9811_v45, 0.0  ;;  %v7839_v9 = vsel %vm3515_vm3, %v4123_v6, 0.0 }
 0x2b2   : > { %v3672_v41 = vadd.f32 %v7367_v25, %v3670_v4  ;;  %v4443_v12 = vadd.f32 %v7363_v52, %v4441_v57  ;;  %v3120_v31 = vpack.c.bf16 %v7823_v37, %v7823_v37  ;;  %v7843_v36 = vsel %vm3515_vm3, %v9815_v50, 0.0  ;;  %v7847_v52 = vpop.f32.mrf.mxu2  ;;  %v9818_v57 = vld [vmem:[#allocation81_spill] sm:$0xff] }
 0x2b3   : > { %v7845_v25 = vsel %vm2399_vm13, %v2008_v58, %v2656_v1  ;;  %vm2447_vm14 = vcmp.gt.f32.partialorder %v2128_v43, 0.0  ;;  %v7855_v6 = vpop.f32.mrf.mxu3  ;;  %v7858_v50 = vsel %vm3515_vm3, %v4124_v59, 0.0  ;;  %v7862_v58 = vsel %vm3515_vm3, %v9816_v46, 0.0  ;;  %v5671_v46 = vld [vmem:[%s5807_s10 + $0x2e8] sm:$0xff] }
 0x2b4   : > { %9817 = vst [vmem:[#allocation66_spill] sm:$0xff] %v7845_v25  ;;  %v3674_v4 = vadd.f32 %v7456_v51, %v3672_v41  ;;  %v4445_v2 = vadd.f32 %v9818_v57, %v4443_v12  ;;  %v3168_v45 = vpack.c.bf16 %v7845_v25, %v7845_v25  ;;  %v2704_v51 = vmul.f32 %v5837_v17, %v2128_v43  ;;  %v7876_v57 = vpop.f32.mrf.mxu1  ;;  %v9819_v25 = vld [vmem:[#allocation19_spill] sm:$0xff] }
 0x2b5   : > { %3377 = vst.msk [vmem:[%s5847_s16 + $0x1d8] sm:$0xf] %vm3258_vm2, %v3120_v31  ;;  %v1890_v1 = vadd.f32 %v7303_v34, %v7707_v11  ;;  %v7868_v41 = vsel %vm3515_vm3, %v4125_v60, 0.0  ;;  %v2010_v59 = vadd.f32 %v7303_v34, %v7709_v63  ;;  %v4126_v22 = vmul.f32 %v9819_v25, %v9819_v25 }
 0x2b6   : > { %v3676_v12 = vadd.f32 %v7485_v29, %v3674_v4  ;;  %v4447_v31 = vadd.f32 %v7481_v62, %v4445_v2  ;;  %3425 = vst.msk [vmem:[%s5847_s16 + $0x298] sm:$0xf] %vm3258_vm2, %v3168_v45  ;;  %v7882_v11 = vsel %vm2447_vm14, %v2128_v43, %v2704_v51  ;;  %v2130_v4 = vadd.f32 %v7303_v34, %v7717_v54  ;;  %v9821_v2 = vld [vmem:[#allocation21_spill] sm:$0xff] }
 0x2b7   : > { %9820 = vst [vmem:[#allocation9_spill] sm:$0xff] %v7882_v11  ;;  %vm2352_vm15 = vcmp.gt.f32.partialorder %v1890_v1, 0.0  ;;  %v2609_v29 = vmul.f32 %v5837_v17, %v1890_v1  ;;  %v3216_v63 = vpack.c.bf16 %v7882_v11, %v7882_v11  ;;  %5541 = vmatmul.msk.bf16.gmra.mxu2 %vm1198_vm0, %v5671_v46  ;;  %v4127_v43 = vmul.f32 %v9821_v2, %v9821_v2 }
 0x2b8   : > { %v3678_v62 = vadd.f32 %v7596_v8, %v3676_v12  ;;  %v4449_v60 = vadd.f32 %v7574_v49, %v4447_v31  ;;  %vm2400_vm1 = vcmp.gt.f32.partialorder %v2010_v59, 0.0  ;;  %v2657_v51 = vmul.f32 %v5837_v17, %v2010_v59  ;;  %5565 = vmatmul.msk.bf16.gmra.mxu3 %vm1198_vm0, %v5695_v27  ;;  %v9822_v49 = vld [vmem:[#allocation23_spill] sm:$0xff] }
 0x2b9   : > { %v7894_v45 = vsel %vm2352_vm15, %v1890_v1, %v2609_v29  ;;  %v4128_v8 = vmul.f32 %v9822_v49, %v9822_v49  ;;  %3473 = vst.msk [vmem:[%s5847_s16 + $0x358] sm:$0xf] %vm3258_vm2, %v3216_v63  ;;  %v7908_v1 = vsel %vm3515_vm3, %v9819_v25, 0.0  ;;  %v7911_v46 = vsel %vm3515_vm3, %v4126_v22, 0.0 }
 0x2ba   : > { %v3680_v12 = vadd.f32 %v7629_v0, %v3678_v62  ;;  %v4451_v54 = vadd.f32 %v7599_v33, %v4449_v60  ;;  %v3121_v31 = vpack.c.bf16 %v7894_v45, %v7894_v45  ;;  %v7915_v27 = vsel %vm3515_vm3, %v9821_v2, 0.0  ;;  %v7919_v33 = vpop.f32.mrf.mxu2 }
 0x2bb   : > { %v7917_v0 = vsel %vm2400_vm1, %v2010_v59, %v2657_v51  ;;  %vm2448_vm4 = vcmp.gt.f32.partialorder %v2130_v4, 0.0  ;;  %v7927_v22 = vpop.f32.mrf.mxu3  ;;  %v7930_v60 = vsel %vm3515_vm3, %v4127_v43, 0.0  ;;  %v7934_v59 = vsel %vm3515_vm3, %v9822_v49, 0.0 }
 0x2bc   : > { %v3682_v29 = vadd.f32 %v7656_v38, %v3680_v12  ;;  %v4453_v62 = vadd.f32 %v7652_v18, %v4451_v54  ;;  %3378 = vst.msk [vmem:[%s5847_s16 + $0x1dc] sm:$0xf] %vm3258_vm2, %v3121_v31  ;;  %v3169_v25 = vpack.c.bf16 %v7917_v0, %v7917_v0  ;;  %v2705_v63 = vmul.f32 %v5837_v17, %v2130_v4  ;;  %v9823_v12 = vld [vmem:[#allocation25_spill] sm:$0xff] }
 0x2bd   : > { %v1893_v18 = vadd.f32 %v7303_v34, %v7787_v20  ;;  %v7940_v38 = vsel %vm3515_vm3, %v4128_v8, 0.0  ;;  %v2013_v43 = vadd.f32 %v7303_v34, %v7779_v23  ;;  %v4129_v49 = vmul.f32 %v9823_v12, %v9823_v12  ;;  %v7959_v23 = vpop.f32.mrf.mxu1 }
 0x2be   : > { %v3684_v2 = vadd.f32 %v7696_v39, %v3682_v29  ;;  %v4455_v51 = vadd.f32 %v7667_v28, %v4453_v62  ;;  %3426 = vst.msk [vmem:[%s5847_s16 + $0x29c] sm:$0xf] %vm3258_vm2, %v3169_v25  ;;  %v7950_v54 = vsel %vm2448_vm4, %v2130_v4, %v2705_v63  ;;  %v2133_v31 = vadd.f32 %v7303_v34, %v7789_v16  ;;  %v9825_v29 = vld [vmem:[#allocation28_spill] sm:$0xff] }
 0x2bf   : > { %9824 = vst [vmem:[#allocation11_spill] sm:$0xff] %v7950_v54  ;;  %vm2353_vm5 = vcmp.gt.f32.partialorder %v1893_v18, 0.0  ;;  %v2610_v20 = vmul.f32 %v5837_v17, %v1893_v18  ;;  %v3217_v28 = vpack.c.bf16 %v7950_v54, %v7950_v54  ;;  %v4130_v62 = vmul.f32 %v9825_v29, %v9825_v29 }
 0x2c0   : > { %v3686_v8 = vadd.f32 %v7703_v10, %v3684_v2  ;;  %v4457_v39 = vadd.f32 %v7699_v47, %v4455_v51  ;;  %vm2401_vm6 = vcmp.gt.f32.partialorder %v2013_v43, 0.0  ;;  %v2658_v25 = vmul.f32 %v5837_v17, %v2013_v43  ;;  %v9826_v10 = vld [vmem:[#allocation31_spill] sm:$0xff] }
 0x2c1   : > { %v7963_v4 = vsel %vm2353_vm5, %v1893_v18, %v2610_v20  ;;  %v4131_v47 = vmul.f32 %v9826_v10, %v9826_v10  ;;  %3474 = vst.msk [vmem:[%s5847_s16 + $0x35c] sm:$0xf] %vm3258_vm2, %v3217_v28  ;;  %v7976_v51 = vsel %vm3515_vm3, %v9823_v12, 0.0  ;;  %v7979_v18 = vsel %vm3515_vm3, %v4129_v49, 0.0 }
 0x2c2   : > { %v3688_v63 = vadd.f32 %v7724_v44, %v3686_v8  ;;  %v4459_v2 = vadd.f32 %v7720_v53, %v4457_v39  ;;  %v3122_v16 = vpack.c.bf16 %v7963_v4, %v7963_v4  ;;  %v7983_v20 = vsel %vm3515_vm3, %v9825_v29, 0.0  ;;  %v7987_v53 = vpop.f32.mrf.mxu2 }
 0x2c3   : > { %v7985_v44 = vsel %vm2401_vm6, %v2013_v43, %v2658_v25  ;;  %vm2449_vm7 = vcmp.gt.f32.partialorder %v2133_v31, 0.0  ;;  %v7995_v49 = vpop.f32.mrf.mxu3  ;;  %v7998_v28 = vsel %vm3515_vm3, %v4130_v62, 0.0  ;;  %v8002_v43 = vsel %vm3515_vm3, %v9826_v10, 0.0  ;;  %v5696_v10 = vld [vmem:[%s5807_s10 + $0x3b0] sm:$0xff] }
 0x2c4   : > { %v3690_v8 = vadd.f32 %v7768_v35, %v3688_v63  ;;  %v4461_v39 = vadd.f32 %v7730_v55, %v4459_v2  ;;  %3379 = vst.msk [vmem:[%s5847_s16 + $0x1e0] sm:$0xf] %vm3258_vm2, %v3122_v16  ;;  %v3170_v12 = vpack.c.bf16 %v7985_v44, %v7985_v44  ;;  %v2706_v35 = vmul.f32 %v5837_v17, %v2133_v31  ;;  %v5672_v2 = vld [vmem:[%s5807_s10 + $0x2f0] sm:$0xff]  ;;  %v9827_v16 = vld [vmem:[#allocation34_spill] sm:$0xff] }
 0x2c5   : > { %v1895_v55 = vadd.f32 %v7303_v34, %v7876_v57  ;;  %v8008_v29 = vsel %vm3515_vm3, %v4131_v47, 0.0  ;;  %v2015_v62 = vadd.f32 %v7303_v34, %v7847_v52  ;;  %v4132_v54 = vmul.f32 %v9827_v16, %v9827_v16 }
 0x2c6   : > { %v3692_v25 = vadd.f32 %v7775_v30, %v3690_v8  ;;  %v4463_v63 = vadd.f32 %v7771_v14, %v4461_v39  ;;  %3427 = vst.msk [vmem:[%s5847_s16 + $0x2a0] sm:$0xf] %vm3258_vm2, %v3170_v12  ;;  %v8020_v11 = vsel %vm2449_vm7, %v2133_v31, %v2706_v35  ;;  %v2135_v52 = vadd.f32 %v7303_v34, %v7855_v6  ;;  %v9829_v8 = vld [vmem:[#allocation37_spill] sm:$0xff] }
 0x2c7   : > { %9828 = vst [vmem:[#allocation70_spill] sm:$0xff] %v8020_v11  ;;  %vm2354_vm8 = vcmp.gt.f32.partialorder %v1895_v55, 0.0  ;;  %v2611_v57 = vmul.f32 %v5837_v17, %v1895_v55  ;;  %v3218_v47 = vpack.c.bf16 %v8020_v11, %v8020_v11  ;;  %5542 = vmatmul.msk.bf16.gmra.mxu2 %vm1198_vm0, %v5672_v2  ;;  %v4133_v31 = vmul.f32 %v9829_v8, %v9829_v8 }
 0x2c8   : > { %v3694_v30 = vadd.f32 %v7796_v3, %v3692_v25  ;;  %v4465_v14 = vadd.f32 %v7792_v32, %v4463_v63  ;;  %vm2402_vm9 = vcmp.gt.f32.partialorder %v2015_v62, 0.0  ;;  %v2659_v12 = vmul.f32 %v5837_v17, %v2015_v62  ;;  %5566 = vmatmul.msk.bf16.gmra.mxu3 %vm1198_vm0, %v5696_v10  ;;  %v9830_v32 = vld [vmem:[#allocation40_spill] sm:$0xff] }
 0x2c9   : > { %v8032_v39 = vsel %vm2354_vm8, %v1895_v55, %v2611_v57  ;;  %v4134_v3 = vmul.f32 %v9830_v32, %v9830_v32  ;;  %3475 = vst.msk [vmem:[%s5847_s16 + $0x360] sm:$0xf] %vm3258_vm2, %v3218_v47  ;;  %v1899_v55 = vpop.f32.mrf.mxu1  ;;  %v8046_v63 = vsel %vm3515_vm3, %v9827_v16, 0.0  ;;  %v8049_v2 = vsel %vm3515_vm3, %v4132_v54, 0.0 }
 0x2ca   : > { %v3696_v35 = vadd.f32 %v7836_v21, %v3694_v30  ;;  %v4467_v6 = vadd.f32 %v7802_v15, %v4465_v14  ;;  %v3123_v25 = vpack.c.bf16 %v8032_v39, %v8032_v39  ;;  %v8053_v10 = vsel %vm3515_vm3, %v9829_v8, 0.0  ;;  %v8057_v15 = vpop.f32.mrf.mxu2 }
 0x2cb   : > { %v8055_v21 = vsel %vm2402_vm9, %v2015_v62, %v2659_v12  ;;  %vm2450_vm10 = vcmp.gt.f32.partialorder %v2135_v52, 0.0  ;;  %v8065_v54 = vpop.f32.mrf.mxu3  ;;  %v8068_v14 = vsel %vm3515_vm3, %v4133_v31, 0.0  ;;  %v8072_v62 = vsel %vm3515_vm3, %v9830_v32, 0.0 }
 0x2cc   : > { %v3698_v57 = vadd.f32 %v7843_v36, %v3696_v35  ;;  %v4469_v30 = vadd.f32 %v7839_v9, %v4467_v6  ;;  %3380 = vst.msk [vmem:[%s5847_s16 + $0x1e4] sm:$0xf] %vm3258_vm2, %v3123_v25  ;;  %v3171_v16 = vpack.c.bf16 %v8055_v21, %v8055_v21  ;;  %v2707_v47 = vmul.f32 %v5837_v17, %v2135_v52  ;;  %v9831_v35 = vld [vmem:[#allocation43_spill] sm:$0xff] }
 0x2cd   : > { %v1898_v9 = vadd.f32 %v7303_v34, %v7959_v23  ;;  %v8078_v36 = vsel %vm3515_vm3, %v4134_v3, 0.0  ;;  %v2018_v31 = vadd.f32 %v7303_v34, %v7919_v33  ;;  %v4135_v32 = vmul.f32 %v9831_v35, %v9831_v35  ;;  %v9833_v33 = vld [vmem:[#allocation46_spill] sm:$0xff] }
 0x2ce   : > { %v3700_v8 = vadd.f32 %v7862_v58, %v3698_v57  ;;  %v4471_v12 = vadd.f32 %v7858_v50, %v4469_v30  ;;  %3428 = vst.msk [vmem:[%s5847_s16 + $0x2a4] sm:$0xf] %vm3258_vm2, %v3171_v16  ;;  %v8088_v6 = vsel %vm2450_vm10, %v2135_v52, %v2707_v47  ;;  %v2138_v25 = vadd.f32 %v7303_v34, %v7927_v22  ;;  %v9834_v16 = vld [vmem:[#allocation49_spill] sm:$0xff] }
 0x2cf   : > { %9832 = vst [vmem:[#allocation69_spill] sm:$0xff] %v8088_v6  ;;  %vm2355_vm11 = vcmp.gt.f32.partialorder %v1898_v9, 0.0  ;;  %v2612_v23 = vmul.f32 %v5837_v17, %v1898_v9  ;;  %v3219_v50 = vpack.c.bf16 %v8088_v6, %v8088_v6  ;;  %v4136_v57 = vmul.f32 %v9833_v33, %v9833_v33 }
 0x2d0   : > { %v3702_v3 = vadd.f32 %v7908_v1, %v3700_v8  ;;  %v4473_v58 = vadd.f32 %v7868_v41, %v4471_v12  ;;  %vm2403_vm12 = vcmp.gt.f32.partialorder %v2018_v31, 0.0  ;;  %v2660_v52 = vmul.f32 %v5837_v17, %v2018_v31 }
 0x2d1   : > { %v8099_v30 = vsel %vm2355_vm11, %v1898_v9, %v2612_v23  ;;  %v4137_v1 = vmul.f32 %v9834_v16, %v9834_v16  ;;  %3476 = vst.msk [vmem:[%s5847_s16 + $0x364] sm:$0xf] %vm3258_vm2, %v3219_v50  ;;  %v8112_v22 = vsel %vm3515_vm3, %v9831_v35, 0.0  ;;  %v8115_v9 = vsel %vm3515_vm3, %v4135_v32, 0.0  ;;  %v1902_v32 = vpop.f32.mrf.mxu1 }
 0x2d2   : > { %v3704_v41 = vadd.f32 %v7915_v27, %v3702_v3  ;;  %v4475_v47 = vadd.f32 %v7911_v46, %v4473_v58  ;;  %v3124_v34 = vpack.c.bf16 %v8099_v30, %v8099_v30  ;;  %v8119_v8 = vsel %vm3515_vm3, %v9833_v33, 0.0  ;;  %v8123_v27 = vpop.f32.mrf.mxu2 }
 0x2d3   : > { %v8121_v12 = vsel %vm2403_vm12, %v2018_v31, %v2660_v52  ;;  %vm2451_vm13 = vcmp.gt.f32.partialorder %v2138_v25, 0.0  ;;  %v8131_v3 = vpop.f32.mrf.mxu3  ;;  %v8134_v31 = vsel %vm3515_vm3, %v4136_v57, 0.0  ;;  %v8138_v58 = vsel %vm3515_vm3, %v9834_v16, 0.0 }
 0x2d4   : > { %v3706_v46 = vadd.f32 %v7934_v59, %v3704_v41  ;;  %v4477_v23 = vadd.f32 %v7930_v60, %v4475_v47  ;;  %3381 = vst.msk [vmem:[%s5847_s16 + $0x1e8] sm:$0xf] %vm3258_vm2, %v3124_v34  ;;  %v3172_v35 = vpack.c.bf16 %v8121_v12, %v8121_v12  ;;  %v2708_v60 = vmul.f32 %v5837_v17, %v2138_v25  ;;  %v8144_v59 = vld [vmem:[%s9524_s2] ss:$0 sm:$0xff]  ;;  %v5673_v41 = vld [vmem:[%s5807_s10 + $0x2f8] sm:$0xff]  ;;  %v9835_v34 = vld [vmem:[#allocation52_spill] sm:$0xff] }
 0x2d5   : > { %v1900_v50 = vadd.f32 %v8144_v59, %v1899_v55  ;;  %v8148_v33 = vsel %vm3515_vm3, %v4137_v1, 0.0  ;;  %v2020_v16 = vadd.f32 %v8144_v59, %v7987_v53  ;;  %v5697_v47 = vld [vmem:[%s5807_s10 + $0x3b8] sm:$0xff]  ;;  %v4138_v6 = vmul.f32 %v9835_v34, %v9835_v34 }
 0x2d6   : > { %v3708_v52 = vadd.f32 %v7976_v51, %v3706_v46  ;;  %v4479_v57 = vadd.f32 %v7940_v38, %v4477_v23  ;;  %3429 = vst.msk [vmem:[%s5847_s16 + $0x2a8] sm:$0xf] %vm3258_vm2, %v3172_v35  ;;  %v8161_v11 = vsel %vm2451_vm13, %v2138_v25, %v2708_v60  ;;  %v2140_v53 = vadd.f32 %v8144_v59, %v7995_v49  ;;  %v9836_v46 = vld [vmem:[#allocation55_spill] sm:$0xff] }
 0x2d7   : > { %vm2356_vm14 = vcmp.gt.f32.partialorder %v1900_v50, 0.0  ;;  %v2613_v55 = vmul.f32 %v5837_v17, %v1900_v50  ;;  %v3220_v1 = vpack.c.bf16 %v8161_v11, %v8161_v11  ;;  %5543 = vmatmul.msk.bf16.gmra.mxu2 %vm1198_vm0, %v5673_v41  ;;  %v4139_v25 = vmul.f32 %v9836_v46, %v9836_v46 }
 0x2d8   : > { %v3710_v51 = vadd.f32 %v7983_v20, %v3708_v52  ;;  %v4481_v38 = vadd.f32 %v7979_v18, %v4479_v57  ;;  %vm2404_vm15 = vcmp.gt.f32.partialorder %v2020_v16, 0.0  ;;  %v2661_v35 = vmul.f32 %v5837_v17, %v2020_v16  ;;  %5567 = vmatmul.msk.bf16.gmra.mxu3 %vm1198_vm0, %v5697_v47  ;;  %v9837_v18 = vld [vmem:[#allocation58_spill] sm:$0xff] }
 0x2d9   : > { %v8173_v23 = vsel %vm2356_vm14, %v1900_v50, %v2613_v55  ;;  %v4140_v20 = vmul.f32 %v9837_v18, %v9837_v18  ;;  %3477 = vst.msk [vmem:[%s5847_s16 + $0x368] sm:$0xf] %vm3258_vm2, %v3220_v1  ;;  %v8187_v50 = vsel %vm3515_vm3, %v9835_v34, 0.0  ;;  %v8190_v57 = vsel %vm3515_vm3, %v4138_v6, 0.0 }
 0x2da   : > { %v3712_v60 = vadd.f32 %v8002_v43, %v3710_v51  ;;  %v4483_v49 = vadd.f32 %v7998_v28, %v4481_v38  ;;  %v3125_v52 = vpack.c.bf16 %v8173_v23, %v8173_v23  ;;  %v8194_v41 = vsel %vm3515_vm3, %v9836_v46, 0.0  ;;  %v8198_v28 = vpop.f32.mrf.mxu2 }
 0x2db   : > { %v8196_v43 = vsel %vm2404_vm15, %v2020_v16, %v2661_v35  ;;  %vm2452_vm1 = vcmp.gt.f32.partialorder %v2140_v53, 0.0  ;;  %v8206_v6 = vpop.f32.mrf.mxu3  ;;  %v8209_v51 = vsel %vm3515_vm3, %v4139_v25, 0.0  ;;  %v8213_v16 = vsel %vm3515_vm3, %v9837_v18, 0.0  ;;  %v1904_v35 = vpop.f32.mrf.mxu1 }
 0x2dc   : > { %v3714_v47 = vadd.f32 %v8046_v63, %v3712_v60  ;;  %v4485_v55 = vadd.f32 %v8008_v29, %v4483_v49  ;;  %3382 = vst.msk [vmem:[%s5847_s16 + $0x1ec] sm:$0xf] %vm3258_vm2, %v3125_v52  ;;  %v3173_v34 = vpack.c.bf16 %v8196_v43, %v8196_v43  ;;  %v2709_v38 = vmul.f32 %v5837_v17, %v2140_v53  ;;  %v9838_v60 = vld [vmem:[#allocation61_spill] sm:$0xff]  ;;  %v9839_v52 = vld [vmem:[#allocation67_spill] sm:$0xff] }
 0x2dd   : > { %v1903_v63 = vadd.f32 %v8144_v59, %v1902_v32  ;;  %v8218_v29 = vsel %vm3515_vm3, %v4140_v20, 0.0  ;;  %v2023_v25 = vadd.f32 %v8144_v59, %v8057_v15  ;;  %v4141_v18 = vmul.f32 %v9838_v60, %v9838_v60 }
 0x2de   : > { %v3716_v1 = vadd.f32 %v8053_v10, %v3714_v47  ;;  %v4487_v46 = vadd.f32 %v8049_v2, %v4485_v55  ;;  %3430 = vst.msk [vmem:[%s5847_s16 + $0x2ac] sm:$0xf] %vm3258_vm2, %v3173_v34  ;;  %v8228_v49 = vsel %vm2452_vm1, %v2140_v53, %v2709_v38  ;;  %v2143_v15 = vadd.f32 %v8144_v59, %v8065_v54  ;;  %v9840_v34 = vld [vmem:[#allocation76_spill] sm:$0xff] }
 0x2df   : > { %vm2357_vm4 = vcmp.gt.f32.partialorder %v1903_v63, 0.0  ;;  %v2614_v32 = vmul.f32 %v5837_v17, %v1903_v63  ;;  %v3221_v2 = vpack.c.bf16 %v8228_v49, %v8228_v49  ;;  %v4142_v47 = vmul.f32 %v9839_v52, %v9839_v52 }
 0x2e0   : > { %v3718_v20 = vadd.f32 %v8072_v62, %v3716_v1  ;;  %v4489_v10 = vadd.f32 %v8068_v14, %v4487_v46  ;;  %vm2405_vm5 = vcmp.gt.f32.partialorder %v2023_v25, 0.0  ;;  %v2662_v53 = vmul.f32 %v5837_v17, %v2023_v25 }
 0x2e1   : > { %v8239_v55 = vsel %vm2357_vm4, %v1903_v63, %v2614_v32  ;;  %v4143_v62 = vmul.f32 %v9840_v34, %v9840_v34  ;;  %3478 = vst.msk [vmem:[%s5847_s16 + $0x36c] sm:$0xf] %vm3258_vm2, %v3221_v2  ;;  %v3731_v1 = vsel %vm3515_vm3, %v9838_v60, 0.0  ;;  %v8253_v63 = vsel %vm3515_vm3, %v4141_v18, 0.0 }
 0x2e2   : > { %v3720_v14 = vadd.f32 %v8112_v22, %v3718_v20  ;;  %v4491_v38 = vadd.f32 %v8078_v36, %v4489_v10  ;;  %v3126_v54 = vpack.c.bf16 %v8239_v55, %v8239_v55  ;;  %v3733_v46 = vsel %vm3515_vm3, %v9839_v52, 0.0  ;;  %v8259_v22 = vpop.f32.mrf.mxu2 }
 0x2e3   : > { %v8257_v32 = vsel %vm2405_vm5, %v2023_v25, %v2662_v53  ;;  %vm2453_vm6 = vcmp.gt.f32.partialorder %v2143_v15, 0.0  ;;  %v8267_v18 = vpop.f32.mrf.mxu3  ;;  %v4506_v10 = vsel %vm3515_vm3, %v4142_v47, 0.0  ;;  %v3735_v25 = vsel %vm3515_vm3, %v9840_v34, 0.0  ;;  %v5698_v47 = vld [vmem:[%s5807_s10 + $0x3c0] sm:$0xff] }
 0x2e4   : > { %v3722_v36 = vadd.f32 %v8119_v8, %v3720_v14  ;;  %v4493_v20 = vadd.f32 %v8115_v9, %v4491_v38  ;;  %3383 = vst.msk [vmem:[%s5847_s16 + $0x1f0] sm:$0xf] %vm3258_vm2, %v3126_v54  ;;  %v3174_v60 = vpack.c.bf16 %v8257_v32, %v8257_v32  ;;  %v2710_v2 = vmul.f32 %v5837_v17, %v2143_v15  ;;  %v9841_v38 = vld [vmem:[#allocation79_spill] sm:$0xff] }
 0x2e5   : > { %v1905_v52 = vadd.f32 %v8144_v59, %v1904_v35  ;;  %v8275_v8 = vsel %vm3515_vm3, %v4143_v62, 0.0  ;;  %v2025_v14 = vadd.f32 %v8144_v59, %v8123_v27  ;;  %v4144_v34 = vmul.f32 %v9841_v38, %v9841_v38 }
 0x2e6   : > { %v3724_v9 = vadd.f32 %v8138_v58, %v3722_v36  ;;  %v4495_v53 = vadd.f32 %v8134_v31, %v4493_v20  ;;  %3431 = vst.msk [vmem:[%s5847_s16 + $0x2b0] sm:$0xf] %vm3258_vm2, %v3174_v60  ;;  %v8286_v54 = vsel %vm2453_vm6, %v2143_v15, %v2710_v2  ;;  %v2145_v27 = vadd.f32 %v8144_v59, %v8131_v3  ;;  %v1907_v36 = vpop.f32.mrf.mxu1  ;;  %v9842_v20 = vld [vmem:[#allocation83_spill] sm:$0xff] }
 0x2e7   : > { %vm2358_vm7 = vcmp.gt.f32.partialorder %v1905_v52, 0.0  ;;  %v2615_v35 = vmul.f32 %v5837_v17, %v1905_v52  ;;  %v3222_v31 = vpack.c.bf16 %v8286_v54, %v8286_v54  ;;  %v4145_v60 = vmul.f32 %v9842_v20, %v9842_v20 }
 0x2e8   : > { %v3726_v62 = vadd.f32 %v8187_v50, %v3724_v9  ;;  %v4497_v58 = vadd.f32 %v8148_v33, %v4495_v53  ;;  %vm2406_vm8 = vcmp.gt.f32.partialorder %v2025_v14, 0.0  ;;  %v2663_v2 = vmul.f32 %v5837_v17, %v2025_v14  ;;  %5568 = vmatmul.msk.bf16.gmra.mxu3 %vm1198_vm0, %v5698_v47 }
 0x2e9   : > { %v8297_v15 = vsel %vm2358_vm7, %v1905_v52, %v2615_v35  ;;  %v4146_v9 = vmul.f32 %v7496_v48, %v7496_v48  ;;  %3479 = vst.msk [vmem:[%s5847_s16 + $0x370] sm:$0xf] %vm3258_vm2, %v3222_v31  ;;  %v3737_v52 = vsel %vm3515_vm3, %v9841_v38, 0.0  ;;  %v4510_v53 = vsel %vm3515_vm3, %v4144_v34, 0.0 }
 0x2ea   : > { %v3728_v33 = vadd.f32 %v8194_v41, %v3726_v62  ;;  %v4499_v50 = vadd.f32 %v8190_v57, %v4497_v58  ;;  %v3127_v3 = vpack.c.bf16 %v8297_v15, %v8297_v15  ;;  %v3739_v47 = vsel %vm3515_vm3, %v9842_v20, 0.0  ;;  %v8316_v57 = vpop.f32.mrf.mxu2 }
 0x2eb   : > { %v8314_v41 = vsel %vm2406_vm8, %v2025_v14, %v2663_v2  ;;  %vm2454_vm9 = vcmp.gt.f32.partialorder %v2145_v27, 0.0  ;;  %v8324_v38 = vpop.f32.mrf.mxu3  ;;  %v4512_v34 = vsel %vm3515_vm3, %v4145_v60, 0.0  ;;  %v3741_v14 = vsel %vm3515_vm3, %v7496_v48, 0.0 }
 0x2ec   : > { %v3730_v35 = vadd.f32 %v8213_v16, %v3728_v33  ;;  %v4501_v62 = vadd.f32 %v8209_v51, %v4499_v50  ;;  %3384 = vst.msk [vmem:[%s5847_s16 + $0x1f4] sm:$0xf] %vm3258_vm2, %v3127_v3  ;;  %v3175_v58 = vpack.c.bf16 %v8314_v41, %v8314_v41  ;;  %v2711_v31 = vmul.f32 %v5837_v17, %v2145_v27 }
 0x2ed   : > { %v1908_v20 = vadd.f32 %v8144_v59, %v1907_v36  ;;  %v4514_v2 = vsel %vm3515_vm3, %v4146_v9, 0.0  ;;  %v2028_v33 = vadd.f32 %v8144_v59, %v8198_v28  ;;  %v4147_v60 = vmul.f32 %v7557_v13, %v7557_v13 }
 0x2ee   : > { %v3732_v16 = vadd.f32 %v3731_v1, %v3730_v35  ;;  %v4503_v51 = vadd.f32 %v8218_v29, %v4501_v62  ;;  %3432 = vst.msk [vmem:[%s5847_s16 + $0x2b4] sm:$0xf] %vm3258_vm2, %v3175_v58  ;;  %v8339_v50 = vsel %vm2454_vm9, %v2145_v27, %v2711_v31  ;;  %v2148_v9 = vadd.f32 %v8144_v59, %v8206_v6  ;;  %v1909_v6 = vpop.f32.mrf.mxu1 }
 0x2ef   : > { %vm2359_vm10 = vcmp.gt.f32.partialorder %v1908_v20, 0.0  ;;  %v2616_v48 = vmul.f32 %v5837_v17, %v1908_v20  ;;  %v3223_v29 = vpack.c.bf16 %v8339_v50, %v8339_v50  ;;  %v4148_v28 = vmul.f32 %v7623_v5, %v7623_v5 }
 0x2f0   : > { %v3734_v36 = vadd.f32 %v3733_v46, %v3732_v16  ;;  %v4505_v1 = vadd.f32 %v8253_v63, %v4503_v51  ;;  %vm2407_vm11 = vcmp.gt.f32.partialorder %v2028_v33, 0.0  ;;  %v2664_v27 = vmul.f32 %v5837_v17, %v2028_v33 }
 0x2f1   : > { %v8349_v3 = vsel %vm2359_vm10, %v1908_v20, %v2616_v48  ;;  %v4149_v63 = vmul.f32 %v7683_v40, %v7683_v40  ;;  %3480 = vst.msk [vmem:[%s5847_s16 + $0x374] sm:$0xf] %vm3258_vm2, %v3223_v29  ;;  %v3743_v58 = vsel %vm3515_vm3, %v7557_v13, 0.0  ;;  %v4516_v31 = vsel %vm3515_vm3, %v4147_v60, 0.0 }
 0x2f2   : > { %v3736_v35 = vadd.f32 %v3735_v25, %v3734_v36  ;;  %v4507_v62 = vadd.f32 %v4506_v10, %v4505_v1  ;;  %v3128_v46 = vpack.c.bf16 %v8349_v3, %v8349_v3  ;;  %v3745_v20 = vsel %vm3515_vm3, %v7623_v5, 0.0  ;;  %v2034_v10 = vpop.f32.mrf.mxu2 }
 0x2f3   : > { %v8363_v25 = vsel %vm2407_vm11, %v2028_v33, %v2664_v27  ;;  %vm2455_vm12 = vcmp.gt.f32.partialorder %v2148_v9, 0.0  ;;  %v8370_v13 = vpop.f32.mrf.mxu3  ;;  %v4518_v60 = vsel %vm3515_vm3, %v4148_v28, 0.0  ;;  %v3747_v5 = vsel %vm3515_vm3, %v7683_v40, 0.0  ;;  %v5699_v27 = vld [vmem:[%s5807_s10 + $0x3c8] sm:$0xff] }
 0x2f4   : > { %v3738_v16 = vadd.f32 %v3737_v52, %v3736_v35  ;;  %v4509_v51 = vadd.f32 %v8275_v8, %v4507_v62  ;;  %3385 = vst.msk [vmem:[%s5847_s16 + $0x1f8] sm:$0xf] %vm3258_vm2, %v3128_v46  ;;  %v3176_v48 = vpack.c.bf16 %v8363_v25, %v8363_v25  ;;  %v2712_v33 = vmul.f32 %v5837_v17, %v2148_v9 }
 0x2f5   : > { %v1910_v36 = vadd.f32 %v8144_v59, %v1909_v6  ;;  %v4520_v8 = vsel %vm3515_vm3, %v4149_v63, 0.0  ;;  %v2030_v29 = vadd.f32 %v8144_v59, %v8259_v22  ;;  %v4150_v28 = vmul.f32 %v7754_v42, %v7754_v42 }
 0x2f6   : > { %v3740_v52 = vadd.f32 %v3739_v47, %v3738_v16  ;;  %v4511_v1 = vadd.f32 %v4510_v53, %v4509_v51  ;;  %3433 = vst.msk [vmem:[%s5847_s16 + $0x2b8] sm:$0xf] %vm3258_vm2, %v3176_v48  ;;  %v8385_v35 = vsel %vm2455_vm12, %v2148_v9, %v2712_v33  ;;  %v2150_v63 = vadd.f32 %v8144_v59, %v8267_v18 }
 0x2f7   : > { %vm2360_vm13 = vcmp.gt.f32.partialorder %v1910_v36, 0.0  ;;  %v2617_v40 = vmul.f32 %v5837_v17, %v1910_v36  ;;  %v3224_v53 = vpack.c.bf16 %v8385_v35, %v8385_v35  ;;  %v4151_v22 = vmul.f32 %v7823_v37, %v7823_v37 }
 0x2f8   : > { %v4513_v62 = vadd.f32 %v4512_v34, %v4511_v1  ;;  %v3742_v47 = vadd.f32 %v3741_v14, %v3740_v52  ;;  %vm2408_vm14 = vcmp.gt.f32.partialorder %v2030_v29, 0.0  ;;  %v2665_v9 = vmul.f32 %v5837_v17, %v2030_v29  ;;  %5569 = vmatmul.msk.bf16.gmra.mxu3 %vm1198_vm0, %v5699_v27 }
 0x2f9   : > { %v8394_v46 = vsel %vm2360_vm13, %v1910_v36, %v2617_v40  ;;  %v4152_v14 = vmul.f32 %v7894_v45, %v7894_v45  ;;  %3481 = vst.msk [vmem:[%s5847_s16 + $0x378] sm:$0xf] %vm3258_vm2, %v3224_v53  ;;  %v3749_v16 = vsel %vm3515_vm3, %v7754_v42, 0.0  ;;  %v4522_v51 = vsel %vm3515_vm3, %v4150_v28, 0.0 }
 0x2fa   : > { %v4515_v6 = vadd.f32 %v4514_v2, %v4513_v62  ;;  %v3744_v34 = vadd.f32 %v3743_v58, %v3742_v47  ;;  %v3129_v18 = vpack.c.bf16 %v8394_v46, %v8394_v46  ;;  %v3751_v48 = vsel %vm3515_vm3, %v7823_v37, 0.0  ;;  %v2037_v2 = vpop.f32.mrf.mxu2 }
 0x2fb   : > { %v8409_v33 = vsel %vm2408_vm14, %v2030_v29, %v2665_v9  ;;  %vm2456_vm15 = vcmp.gt.f32.partialorder %v2150_v63, 0.0  ;;  %v2157_v1 = vpop.f32.mrf.mxu3  ;;  %v4524_v42 = vsel %vm3515_vm3, %v4151_v22, 0.0  ;;  %v3753_v27 = vsel %vm3515_vm3, %v7894_v45, 0.0 }
 0x2fc   : > { %v4517_v58 = vadd.f32 %v4516_v31, %v4515_v6  ;;  %v3746_v36 = vadd.f32 %v3745_v20, %v3744_v34  ;;  %3386 = vst.msk [vmem:[%s5847_s16 + $0x1fc] sm:$0xf] %vm3258_vm2, %v3129_v18  ;;  %v3177_v52 = vpack.c.bf16 %v8409_v33, %v8409_v33  ;;  %v2713_v37 = vmul.f32 %v5837_v17, %v2150_v63 }
 0x2fd   : > { %v2033_v29 = vadd.f32 %v8144_v59, %v8316_v57  ;;  %v4526_v20 = vsel %vm3515_vm3, %v4152_v14, 0.0  ;;  %v2153_v40 = vadd.f32 %v8144_v59, %v8324_v38  ;;  %v4153_v62 = vmul.f32 %v7963_v4, %v7963_v4 }
 0x2fe   : > { %v4519_v28 = vadd.f32 %v4518_v60, %v4517_v58  ;;  %v3748_v31 = vadd.f32 %v3747_v5, %v3746_v36  ;;  %3434 = vst.msk [vmem:[%s5847_s16 + $0x2bc] sm:$0xf] %vm3258_vm2, %v3177_v52  ;;  %v8428_v47 = vsel %vm2456_vm15, %v2150_v63, %v2713_v37  ;;  %v2035_v5 = vadd.f32 %v8144_v59, %v2034_v10 }
 0x2ff   : > { %vm2409_vm1 = vcmp.gt.f32.partialorder %v2033_v29, 0.0  ;;  %v2666_v45 = vmul.f32 %v5837_v17, %v2033_v29  ;;  %v3225_v60 = vpack.c.bf16 %v8428_v47, %v8428_v47  ;;  %v4154_v22 = vmul.f32 %v8032_v39, %v8032_v39 }
 0x300   : > { %v4521_v53 = vadd.f32 %v4520_v8, %v4519_v28  ;;  %v3750_v57 = vadd.f32 %v3749_v16, %v3748_v31  ;;  %vm2457_vm4 = vcmp.gt.f32.partialorder %v2153_v40, 0.0  ;;  %v2714_v63 = vmul.f32 %v5837_v17, %v2153_v40 }
 0x301   : > { %v8436_v38 = vsel %vm2409_vm1, %v2033_v29, %v2666_v45  ;;  %v4155_v8 = vmul.f32 %v8099_v30, %v8099_v30  ;;  %3482 = vst.msk [vmem:[%s5847_s16 + $0x37c] sm:$0xf] %vm3258_vm2, %v3225_v60  ;;  %v3755_v10 = vsel %vm3515_vm3, %v7963_v4, 0.0  ;;  %v4528_v14 = vsel %vm3515_vm3, %v4153_v62, 0.0 }
 0x302   : > { %v4523_v9 = vadd.f32 %v4522_v51, %v4521_v53  ;;  %v3752_v6 = vadd.f32 %v3751_v48, %v3750_v57  ;;  %v3178_v34 = vpack.c.bf16 %v8436_v38, %v8436_v38  ;;  %v3757_v18 = vsel %vm3515_vm3, %v8032_v39, 0.0  ;;  %v2039_v51 = vpop.f32.mrf.mxu2 }
 0x303   : > { %v8450_v16 = vsel %vm2457_vm4, %v2153_v40, %v2714_v63  ;;  %vm2410_vm5 = vcmp.gt.f32.partialorder %v2035_v5, 0.0  ;;  %v2159_v52 = vpop.f32.mrf.mxu3  ;;  %v4530_v4 = vsel %vm3515_vm3, %v4154_v22, 0.0  ;;  %v3759_v37 = vsel %vm3515_vm3, %v8099_v30, 0.0  ;;  %v5700_v40 = vld [vmem:[%s5807_s10 + $0x3d0] sm:$0xff] }
 0x304   : > { %v4525_v48 = vadd.f32 %v4524_v42, %v4523_v9  ;;  %v3754_v58 = vadd.f32 %v3753_v27, %v3752_v6  ;;  %3435 = vst.msk [vmem:[%s5847_s16 + $0x2c0] sm:$0xf] %vm3258_vm2, %v3178_v34  ;;  %v3226_v36 = vpack.c.bf16 %v8450_v16, %v8450_v16  ;;  %v2667_v39 = vmul.f32 %v5837_v17, %v2035_v5 }
 0x305   : > { %v2155_v29 = vadd.f32 %v8144_v59, %v8370_v13  ;;  %v4532_v27 = vsel %vm3515_vm3, %v4155_v8, 0.0  ;;  %v2038_v31 = vadd.f32 %v8144_v59, %v2037_v2  ;;  %v4156_v62 = vmul.f32 %v8173_v23, %v8173_v23 }
 0x306   : > { %v4527_v28 = vadd.f32 %v4526_v20, %v4525_v48  ;;  %v3756_v42 = vadd.f32 %v3755_v10, %v3754_v58  ;;  %3483 = vst.msk [vmem:[%s5847_s16 + $0x380] sm:$0xf] %vm3258_vm2, %v3226_v36  ;;  %v8469_v45 = vsel %vm2410_vm5, %v2035_v5, %v2667_v39  ;;  %v2158_v57 = vadd.f32 %v8144_v59, %v2157_v1 }
 0x307   : > { %vm2458_vm6 = vcmp.gt.f32.partialorder %v2155_v29, 0.0  ;;  %v2715_v30 = vmul.f32 %v5837_v17, %v2155_v29  ;;  %v3179_v20 = vpack.c.bf16 %v8469_v45, %v8469_v45  ;;  %v4157_v2 = vmul.f32 %v8239_v55, %v8239_v55 }
 0x308   : > { %v4529_v53 = vadd.f32 %v4528_v14, %v4527_v28  ;;  %v3758_v13 = vadd.f32 %v3757_v18, %v3756_v42  ;;  %vm2411_vm7 = vcmp.gt.f32.partialorder %v2038_v31, 0.0  ;;  %v2668_v5 = vmul.f32 %v5837_v17, %v2038_v31  ;;  %5570 = vmatmul.msk.bf16.gmra.mxu3 %vm1198_vm0, %v5700_v40 }
 0x309   : > { %v8477_v60 = vsel %vm2458_vm6, %v2155_v29, %v2715_v30  ;;  %v4158_v9 = vmul.f32 %v8297_v15, %v8297_v15  ;;  %3436 = vst.msk [vmem:[%s5847_s16 + $0x2c4] sm:$0xf] %vm3258_vm2, %v3179_v20  ;;  %v3761_v6 = vsel %vm3515_vm3, %v8173_v23, 0.0  ;;  %v4534_v8 = vsel %vm3515_vm3, %v4156_v62, 0.0 }
 0x30a   : > { %v4531_v22 = vadd.f32 %v4530_v4, %v4529_v53  ;;  %v3760_v63 = vadd.f32 %v3759_v37, %v3758_v13  ;;  %v3227_v1 = vpack.c.bf16 %v8477_v60, %v8477_v60  ;;  %v3763_v34 = vsel %vm3515_vm3, %v8239_v55, 0.0  ;;  %v2042_v14 = vpop.f32.mrf.mxu2 }
 0x30b   : > { %v8492_v10 = vsel %vm2411_vm7, %v2038_v31, %v2668_v5  ;;  %vm2459_vm8 = vcmp.gt.f32.partialorder %v2158_v57, 0.0  ;;  %v2162_v36 = vpop.f32.mrf.mxu3  ;;  %v4536_v23 = vsel %vm3515_vm3, %v4157_v2, 0.0  ;;  %v3765_v4 = vsel %vm3515_vm3, %v8297_v15, 0.0 }
 0x30c   : > { %v4533_v18 = vadd.f32 %v4532_v27, %v4531_v22  ;;  %v3762_v48 = vadd.f32 %v3761_v6, %v3760_v63  ;;  %3484 = vst.msk [vmem:[%s5847_s16 + $0x384] sm:$0xf] %vm3258_vm2, %v3227_v1  ;;  %v3180_v58 = vpack.c.bf16 %v8492_v10, %v8492_v10  ;;  %v2716_v55 = vmul.f32 %v5837_v17, %v2158_v57 }
 0x30d   : > { %v2040_v37 = vadd.f32 %v8144_v59, %v2039_v51  ;;  %v4538_v28 = vsel %vm3515_vm3, %v4158_v9, 0.0  ;;  %v2160_v42 = vadd.f32 %v8144_v59, %v2159_v52  ;;  %v4159_v27 = vmul.f32 %v8349_v3, %v8349_v3 }
 0x30e   : > { %v4535_v39 = vadd.f32 %v4534_v8, %v4533_v18  ;;  %v3764_v29 = vadd.f32 %v3763_v34, %v3762_v48  ;;  %3437 = vst.msk [vmem:[%s5847_s16 + $0x2c8] sm:$0xf] %vm3258_vm2, %v3180_v58  ;;  %v8509_v31 = vsel %vm2459_vm8, %v2158_v57, %v2716_v55  ;;  %v3767_v51 = vsel %vm3515_vm3, %v8349_v3, 0.0 }
 0x30f   : > { %vm2412_vm9 = vcmp.gt.f32.partialorder %v2040_v37, 0.0  ;;  %v2669_v15 = vmul.f32 %v5837_v17, %v2040_v37  ;;  %v3228_v30 = vpack.c.bf16 %v8509_v31, %v8509_v31  ;;  %v4160_v52 = vmul.f32 %v8394_v46, %v8394_v46 }
 0x310   : > { %v4537_v40 = vadd.f32 %v4536_v23, %v4535_v39  ;;  %v3766_v62 = vadd.f32 %v3765_v4, %v3764_v29  ;;  %vm2460_vm10 = vcmp.gt.f32.partialorder %v2160_v42, 0.0  ;;  %v2717_v13 = vmul.f32 %v5837_v17, %v2160_v42  ;;  %v9843_v23 = vld [vmem:[#allocation86_spill] sm:$0xff]  ;;  %v9844_v29 = vld [vmem:[#allocation3_spill] sm:$0xff] }
 0x311   : > { %v8518_v53 = vsel %vm2412_vm9, %v2040_v37, %v2669_v15  ;;  %v3773_v20 = vsel %vm3515_vm3, %v6255_v56, 0.0  ;;  %3485 = vst.msk [vmem:[%s5847_s16 + $0x388] sm:$0xf] %vm3258_vm2, %v3228_v30  ;;  %v4546_v5 = vsel %vm3515_vm3, %v7603_v7, 0.0  ;;  %v4540_v22 = vsel %vm3515_vm3, %v4159_v27, 0.0  ;;  %v5701_v39 = vld [vmem:[%s5807_s10 + $0x3d8] sm:$0xff] }
 0x312   : > { %v4539_v57 = vadd.f32 %v4538_v28, %v4537_v40  ;;  %v3768_v2 = vadd.f32 %v3767_v51, %v3766_v62  ;;  %v3181_v3 = vpack.c.bf16 %v8518_v53, %v8518_v53  ;;  %v3769_v63 = vsel %vm3515_vm3, %v8394_v46, 0.0  ;;  %v2044_v1 = vpop.f32.mrf.mxu2 }
 0x313   : > { %v8532_v9 = vsel %vm2460_vm10, %v2160_v42, %v2717_v13  ;;  %v3775_v56 = vsel %vm3515_vm3, %v6280_v24, 0.0  ;;  %v2164_v34 = vpop.f32.mrf.mxu3  ;;  %v4548_v18 = vsel %vm3515_vm3, %v7643_v19, 0.0  ;;  %v4542_v46 = vsel %vm3515_vm3, %v4160_v52, 0.0  ;;  %v9845_v52 = vld [vmem:[#allocation4_spill] sm:$0xff] }
 0x314   : > { %v4541_v6 = vadd.f32 %v4540_v22, %v4539_v57  ;;  %v3770_v8 = vadd.f32 %v3769_v63, %v3768_v2  ;;  %3438 = vst.msk [vmem:[%s5847_s16 + $0x2cc] sm:$0xf] %vm3258_vm2, %v3181_v3  ;;  %v3229_v7 = vpack.c.bf16 %v8532_v9, %v8532_v9  ;;  %v2043_v48 = vadd.f32 %v8144_v59, %v2042_v14 }
 0x315   : > { %v2163_v58 = vadd.f32 %v8144_v59, %v2162_v36  ;;  %v2045_v55 = vadd.f32 %v8144_v59, %v2044_v1  ;;  %v2165_v37 = vadd.f32 %v8144_v59, %v2164_v34  ;;  %v4164_v28 = vmul.f32 %v9844_v29, %v9844_v29 }
 0x316   : > { %v3772_v4 = vadd.f32 %v9843_v23, %v3770_v8  ;;  %v4543_v24 = vadd.f32 %v4542_v46, %v4541_v6  ;;  %3486 = vst.msk [vmem:[%s5847_s16 + $0x38c] sm:$0xf] %vm3258_vm2, %v3229_v7  ;;  %vm2413_vm11 = vcmp.gt.f32.partialorder %v2043_v48, 0.0  ;;  %v2670_v19 = vmul.f32 %v5837_v17, %v2043_v48  ;;  %v9846_v8 = vld [vmem:[#allocation5_spill] sm:$0xff] }
 0x317   : > { %vm2461_vm12 = vcmp.gt.f32.partialorder %v2163_v58, 0.0  ;;  %v2718_v42 = vmul.f32 %v5837_v17, %v2163_v58  ;;  %vm2414_vm13 = vcmp.gt.f32.partialorder %v2045_v55, 0.0  ;;  %v2671_v15 = vmul.f32 %v5837_v17, %v2045_v55 }
 0x318   : > { %v3774_v14 = vadd.f32 %v3773_v20, %v3772_v4  ;;  %v4545_v36 = vadd.f32 %v7584_v26, %v4543_v24  ;;  %v8556_v27 = vsel %vm2413_vm11, %v2043_v48, %v2670_v19  ;;  %vm2462_vm14 = vcmp.gt.f32.partialorder %v2165_v37, 0.0  ;;  %5571 = vmatmul.msk.bf16.gmra.mxu3 %vm1198_vm0, %v5701_v39  ;;  %v9849_v39 = vld [vmem:[#allocation10_spill] sm:$0xff] }
 0x319   : > { %v2719_v40 = vmul.f32 %v5837_v17, %v2165_v37  ;;  %v3777_v62 = vsel %vm3515_vm3, %v9844_v29, 0.0  ;;  %v3182_v26 = vpack.c.bf16 %v8556_v27, %v8556_v27  ;;  %v4165_v13 = vmul.f32 %v9845_v52, %v9845_v52 }
 0x31a   : > { %v3776_v51 = vadd.f32 %v3775_v56, %v3774_v14  ;;  %v4547_v30 = vadd.f32 %v4546_v5, %v4545_v36  ;;  %v8567_v20 = vsel %vm2461_vm12, %v2163_v58, %v2718_v42  ;;  %v8569_v57 = vsel %vm2414_vm13, %v2045_v55, %v2671_v15  ;;  %v2047_v3 = vpop.f32.mrf.mxu2  ;;  %v9848_v55 = vld [vmem:[#allocation8_spill] sm:$0xff] }
 0x31b   : > { %v8571_v2 = vsel %vm2462_vm14, %v2165_v37, %v2719_v40  ;;  %3439 = vst.msk [vmem:[%s5847_s16 + $0x2d0] sm:$0xf] %vm3258_vm2, %v3182_v26  ;;  %v3230_v5 = vpack.c.bf16 %v8567_v20, %v8567_v20  ;;  %v2167_v1 = vpop.f32.mrf.mxu3  ;;  %v4550_v56 = vsel %vm3515_vm3, %v4164_v28, 0.0  ;;  %v3779_v6 = vsel %vm3515_vm3, %v9845_v52, 0.0  ;;  %v9850_v42 = vld [vmem:[#allocation12_spill] sm:$0xff] }
 0x31c   : > { %v3778_v22 = vadd.f32 %v3777_v62, %v3776_v51  ;;  %v4549_v63 = vadd.f32 %v4548_v18, %v4547_v30  ;;  %v4166_v7 = vmul.f32 %v9846_v8, %v9846_v8  ;;  %v3183_v34 = vpack.c.bf16 %v8569_v57, %v8569_v57  ;;  %v9847_v18 = vld [vmem:[#allocation6_spill] sm:$0xff] }
 0x31d   : > { %v4167_v46 = vmul.f32 %v9847_v18, %v9847_v18  ;;  %3487 = vst.msk [vmem:[%s5847_s16 + $0x390] sm:$0xf] %vm3258_vm2, %v3230_v5  ;;  %v3231_v23 = vpack.c.bf16 %v8571_v2, %v8571_v2  ;;  %v4552_v4 = vsel %vm3515_vm3, %v4165_v13, 0.0  ;;  %v3781_v24 = vsel %vm3515_vm3, %v9846_v8, 0.0 }
 0x31e   : > { %v3780_v48 = vadd.f32 %v3779_v6, %v3778_v22  ;;  %v4551_v58 = vadd.f32 %v4550_v56, %v4549_v63  ;;  %v4168_v37 = vmul.f32 %v9848_v55, %v9848_v55  ;;  %v4169_v29 = vmul.f32 %v9849_v39, %v9849_v39  ;;  %3440 = vst.msk [vmem:[%s5847_s16 + $0x2d4] sm:$0xf] %vm3258_vm2, %v3183_v34 }
 0x31f   : > { %3488 = vst.msk [vmem:[%s5847_s16 + $0x394] sm:$0xf] %vm3258_vm2, %v3231_v23  ;;  %v4554_v14 = vsel %vm3515_vm3, %v4166_v7, 0.0  ;;  %v3783_v36 = vsel %vm3515_vm3, %v9847_v18, 0.0  ;;  %v4170_v15 = vmul.f32 %v9850_v42, %v9850_v42  ;;  %v4556_v40 = vsel %vm3515_vm3, %v4167_v46, 0.0  ;;  %v9851_v18 = vld [vmem:[#allocation14_spill] sm:$0xff] }
 0x320   : > { %v3782_v28 = vadd.f32 %v3781_v24, %v3780_v48  ;;  %v4553_v19 = vadd.f32 %v4552_v4, %v4551_v58  ;;  %v3785_v62 = vsel %vm3515_vm3, %v9848_v55, 0.0  ;;  %v4558_v26 = vsel %vm3515_vm3, %v4168_v37, 0.0  ;;  %v5702_v37 = vld [vmem:[%s5807_s10 + $0x3e0] sm:$0xff] }
 0x321   : > { %v3787_v52 = vsel %vm3515_vm3, %v9849_v39, 0.0  ;;  %v4560_v13 = vsel %vm3515_vm3, %v4169_v29, 0.0  ;;  %v3789_v22 = vsel %vm3515_vm3, %v9850_v42, 0.0  ;;  %v2048_v6 = vadd.f32 %v8144_v59, %v2047_v3 }
 0x322   : > { %v3784_v51 = vadd.f32 %v3783_v36, %v3782_v28  ;;  %v4555_v30 = vadd.f32 %v4554_v14, %v4553_v19  ;;  %v2049_v63 = vpop.f32.mrf.mxu2  ;;  %v2168_v8 = vadd.f32 %v8144_v59, %v2167_v1  ;;  %v4562_v34 = vsel %vm3515_vm3, %v4170_v15, 0.0  ;;  %v9852_v14 = vld [vmem:[#allocation16_spill] sm:$0xff] }
 0x323   : > { %v2169_v7 = vpop.f32.mrf.mxu3  ;;  %v4171_v46 = vmul.f32 %v9851_v18, %v9851_v18  ;;  %v2050_v48 = vadd.f32 %v8144_v59, %v2049_v63  ;;  %v2672_v24 = vmul.f32 %v5837_v17, %v2048_v6  ;;  %vm2415_vm15 = vcmp.gt.f32.partialorder %v2048_v6, 0.0 }
 0x324   : > { %v3786_v5 = vadd.f32 %v3785_v62, %v3784_v51  ;;  %v4557_v56 = vadd.f32 %v4556_v40, %v4555_v30  ;;  %v2170_v58 = vadd.f32 %v8144_v59, %v2169_v7  ;;  %v2720_v55 = vmul.f32 %v5837_v17, %v2168_v8 }
 0x325   : > { %vm2463_vm1 = vcmp.gt.f32.partialorder %v2168_v8, 0.0  ;;  %vm2416_vm4 = vcmp.gt.f32.partialorder %v2050_v48, 0.0  ;;  %v2673_v3 = vmul.f32 %v5837_v17, %v2050_v48  ;;  %v8626_v29 = vsel %vm2415_vm15, %v2048_v6, %v2672_v24 }
 0x326   : > { %v3788_v23 = vadd.f32 %v3787_v52, %v3786_v5  ;;  %v4559_v4 = vadd.f32 %v4558_v26, %v4557_v56  ;;  %v8628_v28 = vsel %vm2463_vm1, %v2168_v8, %v2720_v55  ;;  %v3791_v19 = vsel %vm3515_vm3, %v9851_v18, 0.0  ;;  %v9853_v26 = vld [vmem:[#allocation18_spill] sm:$0xff]  ;;  %v9854_v18 = vld [vmem:[#allocation20_spill] sm:$0xff] }
 0x327   : > { %v4172_v36 = vmul.f32 %v9852_v14, %v9852_v14  ;;  %v3184_v42 = vpack.c.bf16 %v8626_v29, %v8626_v29  ;;  %v3232_v15 = vpack.c.bf16 %v8628_v28, %v8628_v28  ;;  %v4564_v40 = vsel %vm3515_vm3, %v4171_v46, 0.0 }
 0x328   : > { %v3790_v1 = vadd.f32 %v3789_v22, %v3788_v23  ;;  %v4561_v39 = vadd.f32 %v4560_v13, %v4559_v4  ;;  %5572 = vmatmul.msk.bf16.gmra.mxu3 %vm1198_vm0, %v5702_v37  ;;  %v3793_v62 = vsel %vm3515_vm3, %v9852_v14, 0.0  ;;  %v4173_v52 = vmul.f32 %v9853_v26, %v9853_v26  ;;  %v9855_v23 = vld [vmem:[#allocation22_spill] sm:$0xff] }
 0x329   : > { %3441 = vst.msk [vmem:[%s5847_s16 + $0x2d8] sm:$0xf] %vm3258_vm2, %v3184_v42  ;;  %v8647_v13 = vsel %vm2416_vm4, %v2050_v48, %v2673_v3  ;;  %vm2464_vm5 = vcmp.gt.f32.partialorder %v2170_v58, 0.0  ;;  %v2721_v22 = vmul.f32 %v5837_v17, %v2170_v58  ;;  %v4566_v7 = vsel %vm3515_vm3, %v4172_v36, 0.0 }
 0x32a   : > { %v3792_v51 = vadd.f32 %v3791_v19, %v3790_v1  ;;  %v4563_v30 = vadd.f32 %v4562_v34, %v4561_v39  ;;  %v2052_v63 = vpop.f32.mrf.mxu2  ;;  %3489 = vst.msk [vmem:[%s5847_s16 + $0x398] sm:$0xf] %vm3258_vm2, %v3232_v15  ;;  %v3185_v6 = vpack.c.bf16 %v8647_v13, %v8647_v13  ;;  %v3795_v34 = vsel %vm3515_vm3, %v9853_v26, 0.0  ;;  %v9856_v39 = vld [vmem:[#allocation24_spill] sm:$0xff] }
 0x32b   : > { %v2172_v8 = vpop.f32.mrf.mxu3  ;;  %v4174_v46 = vmul.f32 %v9854_v18, %v9854_v18  ;;  %v8659_v48 = vsel %vm2464_vm5, %v2170_v58, %v2721_v22  ;;  %v4175_v4 = vmul.f32 %v9855_v23, %v9855_v23  ;;  %v4568_v3 = vsel %vm3515_vm3, %v4173_v52, 0.0  ;;  %v9857_v58 = vld [vmem:[#allocation26_spill] sm:$0xff] }
 0x32c   : > { %v3794_v5 = vadd.f32 %v3793_v62, %v3792_v51  ;;  %v4565_v56 = vadd.f32 %v4564_v40, %v4563_v30  ;;  %3442 = vst.msk [vmem:[%s5847_s16 + $0x2dc] sm:$0xf] %vm3258_vm2, %v3185_v6  ;;  %v3233_v37 = vpack.c.bf16 %v8659_v48, %v8659_v48  ;;  %v3797_v1 = vsel %vm3515_vm3, %v9854_v18, 0.0  ;;  %v9858_v62 = vld [vmem:[#allocation29_spill] sm:$0xff] }
 0x32d   : > { %v4176_v19 = vmul.f32 %v9856_v39, %v9856_v39  ;;  %v4177_v14 = vmul.f32 %v9857_v58, %v9857_v58  ;;  %v4570_v15 = vsel %vm3515_vm3, %v4174_v46, 0.0  ;;  %v3799_v40 = vsel %vm3515_vm3, %v9855_v23, 0.0 }
 0x32e   : > { %v3796_v24 = vadd.f32 %v3795_v34, %v3794_v5  ;;  %v4567_v55 = vadd.f32 %v4566_v7, %v4565_v56  ;;  %3490 = vst.msk [vmem:[%s5847_s16 + $0x39c] sm:$0xf] %vm3258_vm2, %v3233_v37  ;;  %v4178_v51 = vmul.f32 %v9858_v62, %v9858_v62  ;;  %v4572_v30 = vsel %vm3515_vm3, %v4175_v4, 0.0  ;;  %v9859_v37 = vld [vmem:[#allocation32_spill] sm:$0xff] }
 0x32f   : > { %v3801_v26 = vsel %vm3515_vm3, %v9856_v39, 0.0  ;;  %v4574_v5 = vsel %vm3515_vm3, %v4176_v19, 0.0  ;;  %v3803_v56 = vsel %vm3515_vm3, %v9857_v58, 0.0  ;;  %v4576_v6 = vsel %vm3515_vm3, %v4177_v14, 0.0 }
 0x330   : > { %v3798_v36 = vadd.f32 %v3797_v1, %v3796_v24  ;;  %v4569_v42 = vadd.f32 %v4568_v3, %v4567_v55  ;;  %v3805_v7 = vsel %vm3515_vm3, %v9858_v62, 0.0  ;;  %v2053_v23 = vadd.f32 %v8144_v59, %v2052_v63 }
 0x331   : > { %v2173_v4 = vadd.f32 %v8144_v59, %v2172_v8  ;;  %v4578_v55 = vsel %vm3515_vm3, %v4178_v51, 0.0  ;;  %v4179_v3 = vmul.f32 %v9859_v37, %v9859_v37  ;;  %v9860_v51 = vld [vmem:[#allocation35_spill] sm:$0xff] }
 0x332   : > { %v3800_v52 = vadd.f32 %v3799_v40, %v3798_v36  ;;  %v4571_v22 = vadd.f32 %v4570_v15, %v4569_v42  ;;  %v2054_v34 = vpop.f32.mrf.mxu2  ;;  %v2674_v14 = vmul.f32 %v5837_v17, %v2053_v23  ;;  %v5703_v42 = vld [vmem:[%s5807_s10 + $0x3e8] sm:$0xff]  ;;  %vm2417_vm6 = vcmp.gt.f32.partialorder %v2053_v23, 0.0 }
 0x333   : > { %v2174_v24 = vpop.f32.mrf.mxu3  ;;  %v2055_v1 = vadd.f32 %v8144_v59, %v2054_v34  ;;  %v2722_v36 = vmul.f32 %v5837_v17, %v2173_v4  ;;  %vm2465_vm7 = vcmp.gt.f32.partialorder %v2173_v4, 0.0 }
 0x334   : > { %v3802_v18 = vadd.f32 %v3801_v26, %v3800_v52  ;;  %v4573_v46 = vadd.f32 %v4572_v30, %v4571_v22  ;;  %v2175_v39 = vadd.f32 %v8144_v59, %v2174_v24  ;;  %v8701_v40 = vsel %vm2417_vm6, %v2053_v23, %v2674_v14 }
 0x335   : > { %vm2418_vm8 = vcmp.gt.f32.partialorder %v2055_v1, 0.0  ;;  %v2675_v63 = vmul.f32 %v5837_v17, %v2055_v1  ;;  %v8703_v62 = vsel %vm2465_vm7, %v2173_v4, %v2722_v36  ;;  %v3807_v59 = vsel %vm3515_vm3, %v9859_v37, 0.0  ;;  %v9863_v36 = vld [vmem:[#allocation44_spill] sm:$0xff] }
 0x336   : > { %v3804_v19 = vadd.f32 %v3803_v56, %v3802_v18  ;;  %v4575_v58 = vadd.f32 %v4574_v5, %v4573_v46  ;;  %v4180_v30 = vmul.f32 %v9860_v51, %v9860_v51  ;;  %v3186_v26 = vpack.c.bf16 %v8701_v40, %v8701_v40 }
 0x337   : > { %v3234_v52 = vpack.c.bf16 %v8703_v62, %v8703_v62  ;;  %v4580_v22 = vsel %vm3515_vm3, %v4179_v3, 0.0  ;;  %v3809_v5 = vsel %vm3515_vm3, %v9860_v51, 0.0  ;;  %v8722_v18 = vsel %vm2418_vm8, %v2055_v1, %v2675_v63 }
 0x338   : > { %v3806_v8 = vadd.f32 %v3805_v7, %v3804_v19  ;;  %v4577_v15 = vadd.f32 %v4576_v6, %v4575_v58  ;;  %5573 = vmatmul.msk.bf16.gmra.mxu3 %vm1198_vm0, %v5703_v42  ;;  %v9861_v7 = vld [vmem:[#allocation38_spill] sm:$0xff]  ;;  %3443 = vst.msk [vmem:[%s5847_s16 + $0x2e0] sm:$0xf] %vm3258_vm2, %v3186_v26  ;;  %vm2466_vm9 = vcmp.gt.f32.partialorder %v2175_v39, 0.0  ;;  %v2723_v46 = vmul.f32 %v5837_v17, %v2175_v39  ;;  %v9862_v19 = vld [vmem:[#allocation41_spill] sm:$0xff] }
 0x339   : > { %v4181_v34 = vmul.f32 %v9861_v7, %v9861_v7  ;;  %3491 = vst.msk [vmem:[%s5847_s16 + $0x3a0] sm:$0xf] %vm3258_vm2, %v3234_v52  ;;  %v4582_v3 = vsel %vm3515_vm3, %v4180_v30, 0.0  ;;  %v3811_v1 = vsel %vm3515_vm3, %v9861_v7, 0.0  ;;  %v4182_v58 = vmul.f32 %v9862_v19, %v9862_v19  ;;  %v9864_v30 = vld [vmem:[#allocation47_spill] sm:$0xff]  ;;  %v9866_v7 = vld [vmem:[#allocation53_spill] sm:$0xff] }
 0x33a   : > { %v3808_v56 = vadd.f32 %v3807_v59, %v3806_v8  ;;  %v4579_v6 = vadd.f32 %v4578_v55, %v4577_v15  ;;  %v2057_v23 = vpop.f32.mrf.mxu2  ;;  %v3187_v55 = vpack.c.bf16 %v8722_v18, %v8722_v18  ;;  %v8734_v14 = vsel %vm2466_vm9, %v2175_v39, %v2723_v46  ;;  %v9865_v39 = vld [vmem:[#allocation50_spill] sm:$0xff] }
 0x33b   : > { %v2177_v37 = vpop.f32.mrf.mxu3  ;;  %v4183_v42 = vmul.f32 %v9863_v36, %v9863_v36  ;;  %v3235_v15 = vpack.c.bf16 %v8734_v14, %v8734_v14  ;;  %v4584_v59 = vsel %vm3515_vm3, %v4181_v34, 0.0  ;;  %v3813_v51 = vsel %vm3515_vm3, %v9862_v19, 0.0 }
 0x33c   : > { %v3810_v4 = vadd.f32 %v3809_v5, %v3808_v56  ;;  %v4581_v24 = vadd.f32 %v4580_v22, %v4579_v6  ;;  %3444 = vst.msk [vmem:[%s5847_s16 + $0x2e4] sm:$0xf] %vm3258_vm2, %v3187_v55  ;;  %v4184_v26 = vmul.f32 %v9864_v30, %v9864_v30  ;;  %v4185_v52 = vmul.f32 %v9865_v39, %v9865_v39 }
 0x33d   : > { %3492 = vst.msk [vmem:[%s5847_s16 + $0x3a4] sm:$0xf] %vm3258_vm2, %v3235_v15  ;;  %v4586_v56 = vsel %vm3515_vm3, %v4182_v58, 0.0  ;;  %v3815_v6 = vsel %vm3515_vm3, %v9863_v36, 0.0  ;;  %v4186_v34 = vmul.f32 %v9866_v7, %v9866_v7  ;;  %v4588_v46 = vsel %vm3515_vm3, %v4183_v42, 0.0 }
 0x33e   : > { %v3812_v63 = vadd.f32 %v3811_v1, %v3810_v4  ;;  %v4583_v8 = vadd.f32 %v4582_v3, %v4581_v24  ;;  %v3817_v4 = vsel %vm3515_vm3, %v9864_v30, 0.0  ;;  %v4590_v3 = vsel %vm3515_vm3, %v4184_v26, 0.0  ;;  %v8768_v42 = vld [vmem:[%s9524_s2] ss:$0 sm:$0xff]  ;;  %v9867_v26 = vld [vmem:[#allocation56_spill] sm:$0xff] }
 0x33f   : > { %v3819_v1 = vsel %vm3515_vm3, %v9865_v39, 0.0  ;;  %v4592_v19 = vsel %vm3515_vm3, %v4185_v52, 0.0  ;;  %v3821_v58 = vsel %vm3515_vm3, %v9866_v7, 0.0  ;;  %v2058_v15 = vadd.f32 %v8768_v42, %v2057_v23 }
 0x340   : > { %v3814_v22 = vadd.f32 %v3813_v51, %v3812_v63  ;;  %v4585_v5 = vadd.f32 %v4584_v59, %v4583_v8  ;;  %v2178_v59 = vadd.f32 %v8768_v42, %v2177_v37  ;;  %v4594_v30 = vsel %vm3515_vm3, %v4186_v34, 0.0 }
 0x341   : > { %v4187_v39 = vmul.f32 %v9867_v26, %v9867_v26  ;;  %vm2419_vm10 = vcmp.gt.f32.partialorder %v2058_v15, 0.0 }
 0x342   : > { %v3816_v24 = vadd.f32 %v3815_v6, %v3814_v22  ;;  %v4587_v55 = vadd.f32 %v4586_v56, %v4585_v5  ;;  %v2059_v36 = vpop.f32.mrf.mxu2  ;;  %v2676_v6 = vmul.f32 %v5837_v17, %v2058_v15  ;;  %v2724_v7 = vmul.f32 %v5837_v17, %v2178_v59 }
 0x343   : > { %v2179_v51 = vpop.f32.mrf.mxu3  ;;  %v2060_v52 = vadd.f32 %v8768_v42, %v2059_v36  ;;  %vm2467_vm11 = vcmp.gt.f32.partialorder %v2178_v59, 0.0 }
 0x344   : > { %v3818_v63 = vadd.f32 %v3817_v4, %v3816_v24  ;;  %v4589_v8 = vadd.f32 %v4588_v46, %v4587_v55  ;;  %v2180_v22 = vadd.f32 %v8768_v42, %v2179_v51  ;;  %v5704_v46 = vld [vmem:[%s5807_s10 + $0x3f0] sm:$0xff]  ;;  %v8781_v4 = vsel %vm2419_vm10, %v2058_v15, %v2676_v6 }
 0x345   : > { %vm2420_vm12 = vcmp.gt.f32.partialorder %v2060_v52, 0.0  ;;  %v2677_v23 = vmul.f32 %v5837_v17, %v2060_v52  ;;  %v8783_v24 = vsel %vm2467_vm11, %v2178_v59, %v2724_v7  ;;  %v3823_v55 = vsel %vm3515_vm3, %v9867_v26, 0.0  ;;  %v9870_v59 = vld [vmem:[#allocation62_spill] sm:$0xff] }
 0x346   : > { %v3820_v5 = vadd.f32 %v3819_v1, %v3818_v63  ;;  %v4591_v56 = vadd.f32 %v4590_v3, %v4589_v8  ;;  %9868 = vst [vmem:[#allocation72_spill] sm:$0xff] %v8783_v24  ;;  %v9869_v3 = vld [vmem:[#allocation59_spill] sm:$0xff]  ;;  %v3188_v36 = vpack.c.bf16 %v8781_v4, %v8781_v4  ;;  %v3236_v63 = vpack.c.bf16 %v8783_v24, %v8783_v24 }
 0x347   : > { %v4188_v1 = vmul.f32 %v9869_v3, %v9869_v3  ;;  %v4189_v51 = vmul.f32 %v9870_v59, %v9870_v59  ;;  %v8802_v26 = vsel %vm2420_vm12, %v2060_v52, %v2677_v23  ;;  %vm2468_vm13 = vcmp.gt.f32.partialorder %v2180_v22, 0.0  ;;  %v9871_v23 = vld [vmem:[#allocation68_spill] sm:$0xff] }
 0x348   : > { %v4593_v37 = vadd.f32 %v4592_v19, %v4591_v56  ;;  %v3822_v34 = vadd.f32 %v3821_v58, %v3820_v5  ;;  %5574 = vmatmul.msk.bf16.gmra.mxu3 %vm1198_vm0, %v5704_v46  ;;  %v4596_v19 = vsel %vm3515_vm3, %v4187_v39, 0.0  ;;  %v3825_v58 = vsel %vm3515_vm3, %v9869_v3, 0.0  ;;  %3445 = vst.msk [vmem:[%s5847_s16 + $0x2e8] sm:$0xf] %vm3258_vm2, %v3188_v36 }
 0x349   : > { %v2725_v5 = vmul.f32 %v5837_v17, %v2180_v22  ;;  %3493 = vst.msk [vmem:[%s5847_s16 + $0x3a8] sm:$0xf] %vm3258_vm2, %v3236_v63  ;;  %v4598_v46 = vsel %vm3515_vm3, %v4188_v1, 0.0  ;;  %v3827_v52 = vsel %vm3515_vm3, %v9870_v59, 0.0  ;;  %v4600_v1 = vsel %vm3515_vm3, %v4189_v51, 0.0 }
 0x34a   : > { %v3824_v8 = vadd.f32 %v3823_v55, %v3822_v34  ;;  %v4595_v15 = vadd.f32 %v4594_v30, %v4593_v37  ;;  %v2062_v56 = vpop.f32.mrf.mxu2  ;;  %v3189_v30 = vpack.c.bf16 %v8802_v26, %v8802_v26  ;;  %v4190_v37 = vmul.f32 %v9871_v23, %v9871_v23  ;;  %v9873_v55 = vld [vmem:[#allocation77_spill] sm:$0xff] }
 0x34b   : > { %v2182_v7 = vpop.f32.mrf.mxu3  ;;  %v8814_v34 = vsel %vm2468_vm13, %v2180_v22, %v2725_v5  ;;  %v4191_v3 = vmul.f32 %v9873_v55, %v9873_v55  ;;  %v9875_v22 = vld [vmem:[#allocation84_spill] sm:$0xff] }
 0x34c   : > { %v3826_v6 = vadd.f32 %v3825_v58, %v3824_v8  ;;  %v4597_v39 = vadd.f32 %v4596_v19, %v4595_v15  ;;  %9872 = vst [vmem:[#allocation71_spill] sm:$0xff] %v8814_v34  ;;  %v3237_v19 = vpack.c.bf16 %v8814_v34, %v8814_v34  ;;  %v3829_v58 = vsel %vm3515_vm3, %v9871_v23, 0.0  ;;  %v9874_v8 = vld [vmem:[#allocation80_spill] sm:$0xff] }
 0x34d   : > { %3446 = vst.msk [vmem:[%s5847_s16 + $0x2ec] sm:$0xf] %vm3258_vm2, %v3189_v30  ;;  %v4192_v15 = vmul.f32 %v9874_v8, %v9874_v8  ;;  %v4193_v59 = vmul.f32 %v9875_v22, %v9875_v22  ;;  %v9876_v30 = vld [vmem:[#allocation87_spill] sm:$0xff] }
 0x34e   : > { %v3828_v36 = vadd.f32 %v3827_v52, %v3826_v6  ;;  %v4599_v63 = vadd.f32 %v4598_v46, %v4597_v39  ;;  %3494 = vst.msk [vmem:[%s5847_s16 + $0x3ac] sm:$0xf] %vm3258_vm2, %v3237_v19  ;;  %v4602_v6 = vsel %vm3515_vm3, %v4190_v37, 0.0  ;;  %v3831_v39 = vsel %vm3515_vm3, %v9873_v55, 0.0 }
 0x34f   : > { %v4194_v51 = vmul.f32 %v9876_v30, %v9876_v30  ;;  %v4604_v46 = vsel %vm3515_vm3, %v4191_v3, 0.0  ;;  %v3833_v52 = vsel %vm3515_vm3, %v9874_v8, 0.0  ;;  %v4608_v37 = vsel %vm3515_vm3, %v4193_v59, 0.0 }
 0x350   : > { %v3830_v5 = vadd.f32 %v3829_v58, %v3828_v36  ;;  %v4601_v24 = vadd.f32 %v4600_v1, %v4599_v63  ;;  %v4606_v36 = vsel %vm3515_vm3, %v4192_v15, 0.0  ;;  %v3835_v63 = vsel %vm3515_vm3, %v9875_v22, 0.0 }
 0x351   : > { %v3837_v55 = vsel %vm3515_vm3, %v9876_v30, 0.0  ;;  %v2063_v3 = vadd.f32 %v8768_v42, %v2062_v56  ;;  %v2183_v8 = vadd.f32 %v8768_v42, %v2182_v7  ;;  %v4195_v15 = vmul.f32 %v7567_v61, %v7567_v61 }
 0x352   : > { %v3832_v23 = vadd.f32 %v3831_v39, %v3830_v5  ;;  %v4603_v34 = vadd.f32 %v4602_v6, %v4601_v24  ;;  %v2064_v19 = vpop.f32.mrf.mxu2  ;;  %v4610_v24 = vsel %vm3515_vm3, %v4194_v51, 0.0 }
 0x353   : > { %v2184_v5 = vpop.f32.mrf.mxu3  ;;  %v2065_v22 = vadd.f32 %v8768_v42, %v2064_v19  ;;  %v2678_v30 = vmul.f32 %v5837_v17, %v2063_v3  ;;  %vm2421_vm14 = vcmp.gt.f32.partialorder %v2063_v3, 0.0  ;;  %vm2469_vm15 = vcmp.gt.f32.partialorder %v2183_v8, 0.0 }
 0x354   : > { %v3834_v1 = vadd.f32 %v3833_v52, %v3832_v23  ;;  %v4605_v58 = vadd.f32 %v4604_v46, %v4603_v34  ;;  %v2185_v59 = vadd.f32 %v8768_v42, %v2184_v5  ;;  %v2726_v34 = vmul.f32 %v5837_v17, %v2183_v8  ;;  %v5705_v46 = vld [vmem:[%s5807_s10 + $0x3f8] sm:$0xff] }
 0x355   : > { %vm2422_vm1 = vcmp.gt.f32.partialorder %v2065_v22, 0.0  ;;  %v2679_v56 = vmul.f32 %v5837_v17, %v2065_v22  ;;  %v8856_v52 = vsel %vm2421_vm14, %v2063_v3, %v2678_v30 }
 0x356   : > { %v3836_v6 = vadd.f32 %v3835_v63, %v3834_v1  ;;  %v4607_v39 = vadd.f32 %v4606_v36, %v4605_v58  ;;  %v8858_v23 = vsel %vm2469_vm15, %v2183_v8, %v2726_v34  ;;  %v3839_v36 = vsel %vm3515_vm3, %v7567_v61, 0.0  ;;  %v9877_v63 = vld [vmem:[#allocation90_spill] sm:$0xff]  ;;  %v9878_v61 = vld [vmem:[#allocation92_spill] sm:$0xff] }
 0x357   : > { %v4196_v19 = vmul.f32 %v9877_v63, %v9877_v63  ;;  %v3190_v1 = vpack.c.bf16 %v8856_v52, %v8856_v52  ;;  %v3238_v58 = vpack.c.bf16 %v8858_v23, %v8858_v23  ;;  %v4197_v5 = vmul.f32 %v9878_v61, %v9878_v61 }
 0x358   : > { %v3838_v7 = vadd.f32 %v3837_v55, %v3836_v6  ;;  %v4609_v51 = vadd.f32 %v4608_v37, %v4607_v39  ;;  %5575 = vmatmul.msk.bf16.gmra.mxu3 %vm1198_vm0, %v5705_v46  ;;  %v4612_v37 = vsel %vm3515_vm3, %v4195_v15, 0.0  ;;  %v3841_v55 = vsel %vm3515_vm3, %v9877_v63, 0.0  ;;  %v9881_v63 = vld [vmem:[#allocation66_spill] sm:$0xff] }
 0x359   : > { %3447 = vst.msk [vmem:[%s5847_s16 + $0x2f0] sm:$0xf] %vm3258_vm2, %v3190_v1  ;;  %v8877_v6 = vsel %vm2422_vm1, %v2065_v22, %v2679_v56  ;;  %vm2470_vm4 = vcmp.gt.f32.partialorder %v2185_v59, 0.0  ;;  %v2727_v39 = vmul.f32 %v5837_v17, %v2185_v59  ;;  %v3843_v22 = vsel %vm3515_vm3, %v9878_v61, 0.0  ;;  %v9879_v56 = vld [vmem:[#allocation64_spill] sm:$0xff] }
 0x35a   : > { %v3840_v3 = vadd.f32 %v3839_v36, %v3838_v7  ;;  %v4611_v8 = vadd.f32 %v4610_v24, %v4609_v51  ;;  %v2067_v30 = vpop.f32.mrf.mxu2  ;;  %3495 = vst.msk [vmem:[%s5847_s16 + $0x3b0] sm:$0xf] %vm3258_vm2, %v3238_v58  ;;  %v3191_v24 = vpack.c.bf16 %v8877_v6, %v8877_v6  ;;  %v4614_v7 = vsel %vm3515_vm3, %v4196_v19, 0.0 }
 0x35b   : > { %v2187_v46 = vpop.f32.mrf.mxu3  ;;  %v4198_v51 = vmul.f32 %v9879_v56, %v9879_v56  ;;  %v8889_v36 = vsel %vm2470_vm4, %v2185_v59, %v2727_v39  ;;  %v4199_v1 = vmul.f32 %v9881_v63, %v9881_v63  ;;  %v4616_v19 = vsel %vm3515_vm3, %v4197_v5, 0.0 }
 0x35c   : > { %v3842_v34 = vadd.f32 %v3841_v55, %v3840_v3  ;;  %v4613_v15 = vadd.f32 %v4612_v37, %v4611_v8  ;;  %9880 = vst [vmem:[#allocation13_spill] sm:$0xff] %v8889_v36  ;;  %v3239_v55 = vpack.c.bf16 %v8889_v36, %v8889_v36  ;;  %v3845_v3 = vsel %vm3515_vm3, %v9879_v56, 0.0 }
 0x35d   : > { %3448 = vst.msk [vmem:[%s5847_s16 + $0x2f4] sm:$0xf] %vm3258_vm2, %v3191_v24  ;;  %v4200_v8 = vmul.f32 %v7917_v0, %v7917_v0  ;;  %v4201_v59 = vmul.f32 %v7985_v44, %v7985_v44  ;;  %v4202_v5 = vmul.f32 %v8055_v21, %v8055_v21  ;;  %v4620_v24 = vsel %vm3515_vm3, %v4199_v1, 0.0 }
 0x35e   : > { %v3844_v37 = vadd.f32 %v3843_v22, %v3842_v34  ;;  %v4615_v58 = vadd.f32 %v4614_v7, %v4613_v15  ;;  %3496 = vst.msk [vmem:[%s5847_s16 + $0x3b4] sm:$0xf] %vm3258_vm2, %v3239_v55  ;;  %v4618_v34 = vsel %vm3515_vm3, %v4198_v51, 0.0  ;;  %v3847_v15 = vsel %vm3515_vm3, %v9881_v63, 0.0 }
 0x35f   : > { %v3849_v7 = vsel %vm3515_vm3, %v7917_v0, 0.0  ;;  %v4624_v51 = vsel %vm3515_vm3, %v4201_v59, 0.0  ;;  %v3853_v63 = vsel %vm3515_vm3, %v8055_v21, 0.0  ;;  %v2068_v1 = vadd.f32 %v8768_v42, %v2067_v30 }
 0x360   : > { %v3846_v61 = vadd.f32 %v3845_v3, %v3844_v37  ;;  %v4617_v39 = vadd.f32 %v4616_v19, %v4615_v58  ;;  %v4622_v37 = vsel %vm3515_vm3, %v4200_v8, 0.0  ;;  %v3851_v58 = vsel %vm3515_vm3, %v7985_v44, 0.0 }
 0x361   : > { %v2188_v36 = vadd.f32 %v8768_v42, %v2187_v46  ;;  %v4203_v8 = vmul.f32 %v8121_v12, %v8121_v12  ;;  %v2680_v21 = vmul.f32 %v5837_v17, %v2068_v1  ;;  %vm2423_vm0 = vcmp.gt.f32.partialorder %v2068_v1, 0.0 }
 0x362   : > { %v3848_v22 = vadd.f32 %v3847_v15, %v3846_v61  ;;  %v4619_v56 = vadd.f32 %v4618_v34, %v4617_v39  ;;  %v2069_v55 = vpop.f32.mrf.mxu2  ;;  %v4626_v61 = vsel %vm3515_vm3, %v4202_v5, 0.0 }
 0x363   : > { %v2189_v0 = vpop.f32.mrf.mxu3  ;;  %v2070_v44 = vadd.f32 %v8768_v42, %v2069_v55  ;;  %v2728_v15 = vmul.f32 %v5837_v17, %v2188_v36  ;;  %vm2471_vm5 = vcmp.gt.f32.partialorder %v2188_v36, 0.0 }
 0x364   : > { %v3850_v19 = vadd.f32 %v3849_v7, %v3848_v22  ;;  %v4621_v3 = vadd.f32 %v4620_v24, %v4619_v56  ;;  %v2190_v59 = vadd.f32 %v8768_v42, %v2189_v0  ;;  %v8930_v24 = vsel %vm2423_vm0, %v2068_v1, %v2680_v21 }
 0x365   : > { %vm2424_vm6 = vcmp.gt.f32.partialorder %v2070_v44, 0.0  ;;  %v2681_v30 = vmul.f32 %v5837_v17, %v2070_v44  ;;  %v8932_v7 = vsel %vm2471_vm5, %v2188_v36, %v2728_v15  ;;  %v3855_v22 = vsel %vm3515_vm3, %v8121_v12, 0.0 }
 0x366   : > { %v3852_v39 = vadd.f32 %v3851_v58, %v3850_v19  ;;  %v4623_v34 = vadd.f32 %v4622_v37, %v4621_v3  ;;  %v4204_v56 = vmul.f32 %v8196_v43, %v8196_v43  ;;  %v3192_v37 = vpack.c.bf16 %v8930_v24, %v8930_v24 }
 0x367   : > { %v3240_v58 = vpack.c.bf16 %v8932_v7, %v8932_v7  ;;  %v4205_v19 = vmul.f32 %v8257_v32, %v8257_v32  ;;  %v8950_v12 = vsel %vm2424_vm6, %v2070_v44, %v2681_v30  ;;  %vm2472_vm7 = vcmp.gt.f32.partialorder %v2190_v59, 0.0 }
 0x368   : > { %v3854_v46 = vadd.f32 %v3853_v63, %v3852_v39  ;;  %v4625_v5 = vadd.f32 %v4624_v51, %v4623_v34  ;;  %v4628_v63 = vsel %vm3515_vm3, %v4203_v8, 0.0  ;;  %v3857_v51 = vsel %vm3515_vm3, %v8196_v43, 0.0  ;;  %3449 = vst.msk [vmem:[%s5847_s16 + $0x2f8] sm:$0xf] %vm3258_vm2, %v3192_v37 }
 0x369   : > { %v2729_v3 = vmul.f32 %v5837_v17, %v2190_v59  ;;  %3497 = vst.msk [vmem:[%s5847_s16 + $0x3b8] sm:$0xf] %vm3258_vm2, %v3240_v58  ;;  %v3193_v43 = vpack.c.bf16 %v8950_v12, %v8950_v12  ;;  %v4630_v8 = vsel %vm3515_vm3, %v4204_v56, 0.0  ;;  %v3859_v39 = vsel %vm3515_vm3, %v8257_v32, 0.0 }
 0x36a   : > { %v3856_v36 = vadd.f32 %v3855_v22, %v3854_v46  ;;  %v4627_v55 = vadd.f32 %v4626_v61, %v4625_v5  ;;  %v4206_v44 = vmul.f32 %v8314_v41, %v8314_v41  ;;  %v4632_v46 = vsel %vm3515_vm3, %v4205_v19, 0.0 }
 0x36b   : > { %v2192_v61 = vpop.f32.mrf.mxu3  ;;  %v8962_v34 = vsel %vm2472_vm7, %v2190_v59, %v2729_v3  ;;  %3450 = vst.msk [vmem:[%s5847_s16 + $0x2fc] sm:$0xf] %vm3258_vm2, %v3193_v43  ;;  %v3861_v5 = vsel %vm3515_vm3, %v8314_v41, 0.0  ;;  %v4207_v32 = vmul.f32 %v8363_v25, %v8363_v25  ;;  %v3863_v37 = vsel %vm3515_vm3, %v8363_v25, 0.0 }
 0x36c   : > { %v3858_v1 = vadd.f32 %v3857_v51, %v3856_v36  ;;  %v4629_v0 = vadd.f32 %v4628_v63, %v4627_v55  ;;  %v3241_v30 = vpack.c.bf16 %v8962_v34, %v8962_v34  ;;  %v4634_v59 = vsel %vm3515_vm3, %v4206_v44, 0.0 }
 0x36d   : > { %v4208_v58 = vmul.f32 %v8409_v33, %v8409_v33  ;;  %v4209_v63 = vmul.f32 %v8436_v38, %v8436_v38  ;;  %v4636_v36 = vsel %vm3515_vm3, %v4207_v32, 0.0  ;;  %v3865_v55 = vsel %vm3515_vm3, %v8409_v33, 0.0 }
 0x36e   : > { %v3860_v21 = vadd.f32 %v3859_v39, %v3858_v1  ;;  %v4631_v15 = vadd.f32 %v4630_v8, %v4629_v0  ;;  %3498 = vst.msk [vmem:[%s5847_s16 + $0x3bc] sm:$0xf] %vm3258_vm2, %v3241_v30  ;;  %v4210_v1 = vmul.f32 %v8469_v45, %v8469_v45  ;;  %v2193_v25 = vadd.f32 %v8768_v42, %v2192_v61 }
 0x36f   : > { %v4638_v43 = vsel %vm3515_vm3, %v4208_v58, 0.0  ;;  %v3867_v8 = vsel %vm3515_vm3, %v8436_v38, 0.0  ;;  %v4640_v39 = vsel %vm3515_vm3, %v4209_v63, 0.0  ;;  %v3869_v33 = vsel %vm3515_vm3, %v8469_v45, 0.0 }
 0x370   : > { %v3862_v22 = vadd.f32 %v3861_v5, %v3860_v21  ;;  %v4633_v56 = vadd.f32 %v4632_v46, %v4631_v15  ;;  %v2730_v30 = vmul.f32 %v5837_v17, %v2193_v25  ;;  %v4211_v61 = vmul.f32 %v8492_v10, %v8492_v10 }
 0x371   : > { %vm2473_vm8 = vcmp.gt.f32.partialorder %v2193_v25, 0.0  ;;  %v4642_v32 = vsel %vm3515_vm3, %v4210_v1, 0.0  ;;  %v3871_v45 = vsel %vm3515_vm3, %v8492_v10, 0.0  ;;  %v4213_v10 = vmul.f32 %v8556_v27, %v8556_v27 }
 0x372   : > { %v3864_v51 = vadd.f32 %v3863_v37, %v3862_v22  ;;  %v4635_v41 = vadd.f32 %v4634_v59, %v4633_v56  ;;  %v9000_v22 = vsel %vm2473_vm8, %v2193_v25, %v2730_v30  ;;  %v4212_v56 = vmul.f32 %v8518_v53, %v8518_v53 }
 0x373   : > { %v2194_v0 = vpop.f32.mrf.mxu3  ;;  %v3242_v59 = vpack.c.bf16 %v9000_v22, %v9000_v22  ;;  %v3875_v25 = vsel %vm3515_vm3, %v8556_v27, 0.0  ;;  %v3879_v27 = vsel %vm3515_vm3, %v8626_v29, 0.0  ;;  %v4216_v30 = vmul.f32 %v8647_v13, %v8647_v13 }
 0x374   : > { %v3866_v19 = vadd.f32 %v3865_v55, %v3864_v51  ;;  %v4637_v3 = vadd.f32 %v4636_v36, %v4635_v41  ;;  %v2195_v44 = vadd.f32 %v8768_v42, %v2194_v0  ;;  %v4644_v41 = vsel %vm3515_vm3, %v4211_v61, 0.0 }
 0x375   : > { %v3873_v36 = vsel %vm3515_vm3, %v8518_v53, 0.0  ;;  %3499 = vst.msk [vmem:[%s5847_s16 + $0x3c0] sm:$0xf] %vm3258_vm2, %v3242_v59  ;;  %v4646_v1 = vsel %vm3515_vm3, %v4212_v56, 0.0  ;;  %v4214_v0 = vmul.f32 %v8569_v57, %v8569_v57  ;;  %v4217_v61 = vmul.f32 %v8701_v40, %v8701_v40 }
 0x376   : > { %v4639_v21 = vadd.f32 %v4638_v43, %v4637_v3  ;;  %v3868_v15 = vadd.f32 %v3867_v8, %v3866_v19  ;;  %vm2474_vm9 = vcmp.gt.f32.partialorder %v2195_v44, 0.0  ;;  %v2731_v46 = vmul.f32 %v5837_v17, %v2195_v44 }
 0x377   : > { %v4648_v8 = vsel %vm3515_vm3, %v4213_v10, 0.0  ;;  %v4218_v56 = vmul.f32 %v8722_v18, %v8722_v18 }
 0x378   : > { %v4641_v38 = vadd.f32 %v4640_v39, %v4639_v21  ;;  %v3870_v5 = vadd.f32 %v3869_v33, %v3868_v15  ;;  %v9008_v37 = vsel %vm2474_vm9, %v2195_v44, %v2731_v46  ;;  %v3877_v39 = vsel %vm3515_vm3, %v8569_v57, 0.0 }
 0x379   : > { %v3243_v51 = vpack.c.bf16 %v9008_v37, %v9008_v37  ;;  %v4215_v44 = vmul.f32 %v8626_v29, %v8626_v29  ;;  %v4650_v33 = vsel %vm3515_vm3, %v4214_v0, 0.0 }
 0x37a   : > { %v4643_v58 = vadd.f32 %v4642_v32, %v4641_v38  ;;  %v3872_v63 = vadd.f32 %v3871_v45, %v3870_v5  ;;  %v3881_v5 = vsel %vm3515_vm3, %v8647_v13, 0.0  ;;  %v3885_v13 = vsel %vm3515_vm3, %v8722_v18, 0.0 }
 0x37b   : > { %3500 = vst.msk [vmem:[%s5847_s16 + $0x3c4] sm:$0xf] %vm3258_vm2, %v3243_v51  ;;  %v2197_v3 = vpop.f32.mrf.mxu3  ;;  %v4652_v57 = vsel %vm3515_vm3, %v4215_v44, 0.0  ;;  %v4656_v51 = vsel %vm3515_vm3, %v4217_v61, 0.0  ;;  %v3887_v18 = vsel %vm3515_vm3, %v8781_v4, 0.0 }
 0x37c   : > { %v4645_v55 = vadd.f32 %v4644_v41, %v4643_v58  ;;  %v3874_v19 = vadd.f32 %v3873_v36, %v3872_v63  ;;  %v2198_v29 = vadd.f32 %v8768_v42, %v2197_v3  ;;  %v4654_v58 = vsel %vm3515_vm3, %v4216_v30, 0.0 }
 0x37d   : > { %v3883_v63 = vsel %vm3515_vm3, %v8701_v40, 0.0 }
 0x37e   : > { %v4647_v43 = vadd.f32 %v4646_v1, %v4645_v55  ;;  %v3876_v53 = vadd.f32 %v3875_v25, %v3874_v19  ;;  %v2732_v55 = vmul.f32 %v5837_v17, %v2198_v29  ;;  %v4219_v19 = vmul.f32 %v8781_v4, %v8781_v4 }
 0x37f   : > { %vm2475_vm10 = vcmp.gt.f32.partialorder %v2198_v29, 0.0  ;;  %v4658_v25 = vsel %vm3515_vm3, %v4218_v56, 0.0  ;;  %v4221_v4 = vmul.f32 %v8856_v52, %v8856_v52  ;;  %v4223_v56 = vmul.f32 %v8930_v24, %v8930_v24 }
 0x380   : > { %v4649_v21 = vadd.f32 %v4648_v8, %v4647_v43  ;;  %v3878_v15 = vadd.f32 %v3877_v39, %v3876_v53  ;;  %v9056_v0 = vsel %vm2475_vm10, %v2198_v29, %v2732_v55  ;;  %v4220_v43 = vmul.f32 %v8802_v26, %v8802_v26  ;;  %v9883_v55 = vld [vmem:[#allocation30_spill] sm:$0xff] }
 0x381   : > { %v3244_v53 = vpack.c.bf16 %v9056_v0, %v9056_v0 }
 0x382   : > { %v4651_v46 = vadd.f32 %v4650_v33, %v4649_v21  ;;  %v3880_v38 = vadd.f32 %v3879_v27, %v3878_v15  ;;  %v4660_v15 = vsel %vm3515_vm3, %v4219_v19, 0.0  ;;  %v3889_v33 = vsel %vm3515_vm3, %v8802_v26, 0.0 }
 0x383   : > { %v2199_v59 = vpop.f32.mrf.mxu3  ;;  %3501 = vst.msk [vmem:[%s5847_s16 + $0x3c8] sm:$0xf] %vm3258_vm2, %v3244_v53  ;;  %v4226_v19 = vmul.f32 %v9883_v55, %v9883_v55 }
 0x384   : > { %v4653_v32 = vadd.f32 %v4652_v57, %v4651_v46  ;;  %v3882_v45 = vadd.f32 %v3881_v5, %v3880_v38  ;;  %v2200_v41 = vadd.f32 %v8768_v42, %v2199_v59  ;;  %v4662_v46 = vsel %vm3515_vm3, %v4220_v43, 0.0 }
 0x385   : > { %v3891_v38 = vsel %vm3515_vm3, %v8856_v52, 0.0  ;;  %v4222_v57 = vmul.f32 %v8877_v6, %v8877_v6 }
 0x386   : > { %v4655_v36 = vadd.f32 %v4654_v58, %v4653_v32  ;;  %v3884_v10 = vadd.f32 %v3883_v63, %v3882_v45  ;;  %vm2476_vm11 = vcmp.gt.f32.partialorder %v2200_v41, 0.0  ;;  %v2733_v3 = vmul.f32 %v5837_v17, %v2200_v41  ;;  %v9882_v58 = vld [vmem:[#allocation27_spill] sm:$0xff] }
 0x387   : > { %v4664_v32 = vsel %vm3515_vm3, %v4221_v4, 0.0  ;;  %v3893_v45 = vsel %vm3515_vm3, %v8877_v6, 0.0  ;;  %v4225_v63 = vmul.f32 %v9882_v58, %v9882_v58  ;;  %v4666_v52 = vsel %vm3515_vm3, %v4222_v57, 0.0  ;;  %v9885_v57 = vld [vmem:[#allocation36_spill] sm:$0xff] }
 0x388   : > { %v4657_v40 = vadd.f32 %v4656_v51, %v4655_v36  ;;  %v3886_v1 = vadd.f32 %v3885_v13, %v3884_v10  ;;  %v9064_v8 = vsel %vm2476_vm11, %v2200_v41, %v2733_v3  ;;  %v3895_v51 = vsel %vm3515_vm3, %v8930_v24, 0.0 }
 0x389   : > { %v3245_v21 = vpack.c.bf16 %v9064_v8, %v9064_v8  ;;  %v4224_v41 = vmul.f32 %v8950_v12, %v8950_v12  ;;  %v4668_v6 = vsel %vm3515_vm3, %v4223_v56, 0.0  ;;  %v3897_v13 = vsel %vm3515_vm3, %v8950_v12, 0.0 }
 0x38a   : > { %v4659_v39 = vadd.f32 %v4658_v25, %v4657_v40  ;;  %v3888_v44 = vadd.f32 %v3887_v18, %v3886_v1  ;;  %v3899_v24 = vsel %vm3515_vm3, %v9882_v58, 0.0  ;;  %v4672_v18 = vsel %vm3515_vm3, %v4225_v63, 0.0  ;;  %v9886_v63 = vld [vmem:[#allocation39_spill] sm:$0xff] }
 0x38b   : > { %3502 = vst.msk [vmem:[%s5847_s16 + $0x3cc] sm:$0xf] %vm3258_vm2, %v3245_v21  ;;  %v2202_v61 = vpop.f32.mrf.mxu3  ;;  %v4670_v43 = vsel %vm3515_vm3, %v4224_v41, 0.0  ;;  %v3901_v12 = vsel %vm3515_vm3, %v9883_v55, 0.0  ;;  %v3905_v58 = vsel %vm3515_vm3, %v9885_v57, 0.0 }
 0x38c   : > { %v4661_v27 = vadd.f32 %v4660_v15, %v4659_v39  ;;  %v3890_v30 = vadd.f32 %v3889_v33, %v3888_v44  ;;  %v2203_v1 = vadd.f32 %v8768_v42, %v2202_v61  ;;  %v9884_v15 = vld [vmem:[#allocation33_spill] sm:$0xff] }
 0x38d   : > { %v4227_v33 = vmul.f32 %v9884_v15, %v9884_v15 }
 0x38e   : > { %v4663_v5 = vadd.f32 %v4662_v46, %v4661_v27  ;;  %v3892_v26 = vadd.f32 %v3891_v38, %v3890_v30  ;;  %v2734_v21 = vmul.f32 %v5837_v17, %v2203_v1  ;;  %vm2477_vm12 = vcmp.gt.f32.partialorder %v2203_v1, 0.0 }
 0x38f   : > { %v4674_v27 = vsel %vm3515_vm3, %v4226_v19, 0.0  ;;  %v3903_v38 = vsel %vm3515_vm3, %v9884_v15, 0.0 }
 0x390   : > { %v4665_v29 = vadd.f32 %v4664_v32, %v4663_v5  ;;  %v3894_v59 = vadd.f32 %v3893_v45, %v3892_v26  ;;  %v9112_v46 = vsel %vm2477_vm12, %v2203_v1, %v2734_v21  ;;  %v4228_v5 = vmul.f32 %v9885_v57, %v9885_v57  ;;  %v9890_v21 = vld [vmem:[#allocation51_spill] sm:$0xff] }
 0x391   : > { %v3246_v26 = vpack.c.bf16 %v9112_v46, %v9112_v46  ;;  %v4233_v15 = vmul.f32 %v9890_v21, %v9890_v21 }
 0x392   : > { %v4667_v36 = vadd.f32 %v4666_v52, %v4665_v29  ;;  %v3896_v10 = vadd.f32 %v3895_v51, %v3894_v59  ;;  %v4676_v59 = vsel %vm3515_vm3, %v4227_v33, 0.0  ;;  %v4229_v52 = vmul.f32 %v9886_v63, %v9886_v63 }
 0x393   : > { %v2204_v25 = vpop.f32.mrf.mxu3  ;;  %3503 = vst.msk [vmem:[%s5847_s16 + $0x3d0] sm:$0xf] %vm3258_vm2, %v3246_v26 }
 0x394   : > { %v4669_v3 = vadd.f32 %v4668_v6, %v4667_v36  ;;  %v3898_v40 = vadd.f32 %v3897_v13, %v3896_v10  ;;  %v2205_v53 = vadd.f32 %v8768_v42, %v2204_v25  ;;  %v4678_v10 = vsel %vm3515_vm3, %v4228_v5, 0.0  ;;  %v9887_v13 = vld [vmem:[#allocation42_spill] sm:$0xff]  ;;  %v9888_v25 = vld [vmem:[#allocation45_spill] sm:$0xff] }
 0x395   : > { %v3907_v6 = vsel %vm3515_vm3, %v9886_v63, 0.0  ;;  %v4230_v55 = vmul.f32 %v9887_v13, %v9887_v13  ;;  %v3909_v1 = vsel %vm3515_vm3, %v9887_v13, 0.0 }
 0x396   : > { %v3900_v39 = vadd.f32 %v3899_v24, %v3898_v40  ;;  %v4671_v44 = vadd.f32 %v4670_v43, %v4669_v3  ;;  %vm2478_vm13 = vcmp.gt.f32.partialorder %v2205_v53, 0.0  ;;  %v2735_v4 = vmul.f32 %v5837_v17, %v2205_v53 }
 0x397   : > { %v4680_v40 = vsel %vm3515_vm3, %v4229_v52, 0.0  ;;  %v4231_v24 = vmul.f32 %v9888_v25, %v9888_v25 }
 0x398   : > { %v3902_v30 = vadd.f32 %v3901_v12, %v3900_v39  ;;  %v4673_v61 = vadd.f32 %v4672_v18, %v4671_v44  ;;  %v9120_v32 = vsel %vm2478_vm13, %v2205_v53, %v2735_v4  ;;  %v4682_v53 = vsel %vm3515_vm3, %v4230_v55, 0.0  ;;  %v9889_v39 = vld [vmem:[#allocation48_spill] sm:$0xff] }
 0x399   : > { %v3247_v29 = vpack.c.bf16 %v9120_v32, %v9120_v32  ;;  %v3911_v12 = vsel %vm3515_vm3, %v9888_v25, 0.0  ;;  %v4232_v44 = vmul.f32 %v9889_v39, %v9889_v39 }
 0x39a   : > { %v3904_v45 = vadd.f32 %v3903_v38, %v3902_v30  ;;  %v4675_v56 = vadd.f32 %v4674_v27, %v4673_v61  ;;  %v4684_v27 = vsel %vm3515_vm3, %v4231_v24, 0.0  ;;  %v3913_v30 = vsel %vm3515_vm3, %v9889_v39, 0.0  ;;  %v9891_v61 = vld [vmem:[#allocation54_spill] sm:$0xff] }
 0x39b   : > { %3504 = vst.msk [vmem:[%s5847_s16 + $0x3d4] sm:$0xf] %vm3258_vm2, %v3247_v29  ;;  %v2207_v36 = vpop.f32.mrf.mxu3  ;;  %v4234_v38 = vmul.f32 %v9891_v61, %v9891_v61  ;;  %v3915_v29 = vsel %vm3515_vm3, %v9890_v21, 0.0  ;;  %v3917_v63 = vsel %vm3515_vm3, %v9891_v61, 0.0  ;;  %v9894_v21 = vld [vmem:[#allocation63_spill] sm:$0xff] }
 0x39c   : > { %v3906_v51 = vadd.f32 %v3905_v58, %v3904_v45  ;;  %v4677_v41 = vadd.f32 %v4676_v59, %v4675_v56  ;;  %v2208_v26 = vadd.f32 %v8768_v42, %v2207_v36  ;;  %v4686_v56 = vsel %vm3515_vm3, %v4232_v44, 0.0 }
 0x39d   : > { %v4688_v59 = vsel %vm3515_vm3, %v4233_v15, 0.0  ;;  %v4690_v13 = vsel %vm3515_vm3, %v4234_v38, 0.0  ;;  %v4237_v15 = vmul.f32 %v9894_v21, %v9894_v21  ;;  %v3923_v61 = vsel %vm3515_vm3, %v9894_v21, 0.0  ;;  %v9895_v38 = vld [vmem:[#allocation75_spill] sm:$0xff] }
 0x39e   : > { %v3908_v19 = vadd.f32 %v3907_v6, %v3906_v51  ;;  %v4679_v3 = vadd.f32 %v4678_v10, %v4677_v41  ;;  %v2736_v41 = vmul.f32 %v5837_v17, %v2208_v26  ;;  %v9892_v10 = vld [vmem:[#allocation57_spill] sm:$0xff]  ;;  %vm2479_vm14 = vcmp.gt.f32.partialorder %v2208_v26, 0.0 }
 0x39f   : > { %v4235_v36 = vmul.f32 %v9892_v10, %v9892_v10 }
 0x3a0   : > { %v3910_v18 = vadd.f32 %v3909_v1, %v3908_v19  ;;  %v4681_v43 = vadd.f32 %v4680_v40, %v4679_v3  ;;  %v9168_v3 = vsel %vm2479_vm14, %v2208_v26, %v2736_v41  ;;  %v3919_v40 = vsel %vm3515_vm3, %v9892_v10, 0.0  ;;  %v9893_v1 = vld [vmem:[#allocation60_spill] sm:$0xff]  ;;  %v9897_v41 = vld [vmem:[#allocation82_spill] sm:$0xff] }
 0x3a1   : > { %v4236_v25 = vmul.f32 %v9893_v1, %v9893_v1  ;;  %v3248_v24 = vpack.c.bf16 %v9168_v3, %v9168_v3  ;;  %v4692_v39 = vsel %vm3515_vm3, %v4235_v36, 0.0  ;;  %v3921_v44 = vsel %vm3515_vm3, %v9893_v1, 0.0  ;;  %v9898_v36 = vld [vmem:[#allocation85_spill] sm:$0xff]  ;;  %v9899_v1 = vld [vmem:[#allocation88_spill] sm:$0xff] }
 0x3a2   : > { %v3912_v33 = vadd.f32 %v3911_v12, %v3910_v18  ;;  %v4683_v4 = vadd.f32 %v4682_v53, %v4681_v43  ;;  %v4240_v10 = vmul.f32 %v9897_v41, %v9897_v41 }
 0x3a3   : > { %v2209_v45 = vpop.f32.mrf.mxu3  ;;  %3505 = vst.msk [vmem:[%s5847_s16 + $0x3d8] sm:$0xf] %vm3258_vm2, %v3248_v24 }
 0x3a4   : > { %v3914_v57 = vadd.f32 %v3913_v30, %v3912_v33  ;;  %v4685_v5 = vadd.f32 %v4684_v27, %v4683_v4  ;;  %v2210_v58 = vadd.f32 %v8768_v42, %v2209_v45  ;;  %v4694_v30 = vsel %vm3515_vm3, %v4236_v25, 0.0 }
 0x3a5   : > { %v4696_v45 = vsel %vm3515_vm3, %v4237_v15, 0.0  ;;  %v4242_v25 = vmul.f32 %v9899_v1, %v9899_v1 }
 0x3a6   : > { %v3916_v52 = vadd.f32 %v3915_v29, %v3914_v57  ;;  %v4687_v51 = vadd.f32 %v4686_v56, %v4685_v5  ;;  %vm2480_vm15 = vcmp.gt.f32.partialorder %v2210_v58, 0.0  ;;  %v2737_v6 = vmul.f32 %v5837_v17, %v2210_v58  ;;  %v9896_v29 = vld [vmem:[#allocation78_spill] sm:$0xff] }
 0x3a7   : > { %v4238_v57 = vmul.f32 %v9895_v38, %v9895_v38  ;;  %v3925_v56 = vsel %vm3515_vm3, %v9895_v38, 0.0  ;;  %v9900_v38 = vld [vmem:[#allocation89_spill] sm:$0xff] }
 0x3a8   : > { %v3918_v55 = vadd.f32 %v3917_v63, %v3916_v52  ;;  %v4689_v19 = vadd.f32 %v4688_v59, %v4687_v51  ;;  %v9176_v18 = vsel %vm2480_vm15, %v2210_v58, %v2737_v6  ;;  %v4239_v59 = vmul.f32 %v9896_v29, %v9896_v29 }
 0x3a9   : > { %v3249_v12 = vpack.c.bf16 %v9176_v18, %v9176_v18  ;;  %v4698_v52 = vsel %vm3515_vm3, %v4238_v57, 0.0  ;;  %v3927_v51 = vsel %vm3515_vm3, %v9896_v29, 0.0  ;;  %v4241_v6 = vmul.f32 %v9898_v36, %v9898_v36 }
 0x3aa   : > { %v3920_v43 = vadd.f32 %v3919_v40, %v3918_v55  ;;  %v4691_v53 = vadd.f32 %v4690_v13, %v4689_v19  ;;  %v4700_v19 = vsel %vm3515_vm3, %v4239_v59, 0.0  ;;  %v3929_v40 = vsel %vm3515_vm3, %v9897_v41, 0.0  ;;  %v9901_v59 = vld [vmem:[#allocation91_spill] sm:$0xff] }
 0x3ab   : > { %3506 = vst.msk [vmem:[%s5847_s16 + $0x3dc] sm:$0xf] %vm3258_vm2, %v3249_v12  ;;  %v2212_v27 = vpop.f32.mrf.mxu3  ;;  %v4704_v21 = vsel %vm3515_vm3, %v4241_v6, 0.0  ;;  %v3935_v29 = vsel %vm3515_vm3, %v9900_v38, 0.0  ;;  %v3937_v6 = vsel %vm3515_vm3, %v9901_v59, 0.0 }
 0x3ac   : > { %v3922_v33 = vadd.f32 %v3921_v44, %v3920_v43  ;;  %v4693_v4 = vadd.f32 %v4692_v39, %v4691_v53  ;;  %v2213_v53 = vadd.f32 %v8768_v42, %v2212_v27  ;;  %v4702_v39 = vsel %vm3515_vm3, %v4240_v10, 0.0 }
 0x3ad   : > { %v3931_v44 = vsel %vm3515_vm3, %v9898_v36, 0.0  ;;  %v4243_v27 = vmul.f32 %v9900_v38, %v9900_v38 }
 0x3ae   : > { %v3924_v5 = vadd.f32 %v3923_v61, %v3922_v33  ;;  %v4695_v26 = vadd.f32 %v4694_v30, %v4693_v4  ;;  %v3933_v33 = vsel %vm3515_vm3, %v9899_v1, 0.0  ;;  %v2738_v61 = vmul.f32 %v5837_v17, %v2213_v53 }
 0x3af   : > { %vm2481_vm1 = vcmp.gt.f32.partialorder %v2213_v53, 0.0  ;;  %v4708_v36 = vsel %vm3515_vm3, %v4243_v27, 0.0  ;;  %v9905_v27 = vld [vmem:[#allocation11_spill] sm:$0xff] }
 0x3b0   : > { %v3926_v58 = vadd.f32 %v3925_v56, %v3924_v5  ;;  %v4697_v63 = vadd.f32 %v4696_v45, %v4695_v26  ;;  %v4706_v5 = vsel %vm3515_vm3, %v4242_v25, 0.0  ;;  %v9224_v56 = vsel %vm2481_vm1, %v2213_v53, %v2738_v61 }
 0x3b2   : > { %v3928_v13 = vadd.f32 %v3927_v51, %v3926_v58  ;;  %v4699_v55 = vadd.f32 %v4698_v52, %v4697_v63  ;;  %v4244_v58 = vmul.f32 %v9901_v59, %v9901_v59  ;;  %v3250_v63 = vpack.c.bf16 %v9224_v56, %v9224_v56 }
 0x3b3   : > { %v2214_v12 = vpop.f32.mrf.mxu3 }
 0x3b4   : > { %v3930_v24 = vadd.f32 %v3929_v40, %v3928_v13  ;;  %v4701_v43 = vadd.f32 %v4700_v19, %v4699_v55  ;;  %v2215_v15 = vadd.f32 %v8768_v42, %v2214_v12  ;;  %v9902_v13 = vld [vmem:[#allocation65_spill] sm:$0xff]  ;;  %3507 = vst.msk [vmem:[%s5847_s16 + $0x3e0] sm:$0xf] %vm3258_vm2, %v3250_v63  ;;  %v4710_v25 = vsel %vm3515_vm3, %v4244_v58, 0.0 }
 0x3b5   : > { %v4245_v55 = vmul.f32 %v9902_v13, %v9902_v13  ;;  %v3945_v58 = vsel %vm3515_vm3, %v9905_v27, 0.0  ;;  %v9907_v63 = vld [vmem:[#allocation69_spill] sm:$0xff] }
 0x3b6   : > { %v3932_v4 = vadd.f32 %v3931_v44, %v3930_v24  ;;  %v4703_v30 = vadd.f32 %v4702_v39, %v4701_v43  ;;  %vm2482_vm4 = vcmp.gt.f32.partialorder %v2215_v15, 0.0  ;;  %v2739_v57 = vmul.f32 %v5837_v17, %v2215_v15  ;;  %v9903_v43 = vld [vmem:[#allocation7_spill] sm:$0xff] }
 0x3b7   : > { %v3939_v24 = vsel %vm3515_vm3, %v9902_v13, 0.0  ;;  %v4246_v53 = vmul.f32 %v9903_v43, %v9903_v43  ;;  %v4712_v44 = vsel %vm3515_vm3, %v4245_v55, 0.0 }
 0x3b8   : > { %v3934_v26 = vadd.f32 %v3933_v33, %v3932_v4  ;;  %v4705_v45 = vadd.f32 %v4704_v21, %v4703_v30  ;;  %v9232_v52 = vsel %vm2482_vm4, %v2215_v15, %v2739_v57  ;;  %v3941_v21 = vsel %vm3515_vm3, %v9903_v43, 0.0  ;;  %v9904_v15 = vld [vmem:[#allocation9_spill] sm:$0xff] }
 0x3b9   : > { %v3251_v10 = vpack.c.bf16 %v9232_v52, %v9232_v52  ;;  %v4247_v33 = vmul.f32 %v9904_v15, %v9904_v15  ;;  %v4714_v61 = vsel %vm3515_vm3, %v4246_v53, 0.0  ;;  %v3943_v38 = vsel %vm3515_vm3, %v9904_v15, 0.0 }
 0x3ba   : > { %v3936_v51 = vadd.f32 %v3935_v29, %v3934_v26  ;;  %v4707_v41 = vadd.f32 %v4706_v5, %v4705_v45  ;;  %v4248_v57 = vmul.f32 %v9905_v27, %v9905_v27  ;;  %v9906_v5 = vld [vmem:[#allocation70_spill] sm:$0xff]  ;;  %v3951_v15 = vsel %vm3515_vm3, %v8161_v11, 0.0 }
 0x3bb   : > { %3508 = vst.msk [vmem:[%s5847_s16 + $0x3e4] sm:$0xf] %vm3258_vm2, %v3251_v10  ;;  %v2217_v1 = vpop.f32.mrf.mxu3  ;;  %v4249_v26 = vmul.f32 %v9906_v5, %v9906_v5  ;;  %v4716_v59 = vsel %vm3515_vm3, %v4247_v33, 0.0  ;;  %v3947_v55 = vsel %vm3515_vm3, %v9906_v5, 0.0  ;;  %v4252_v33 = vmul.f32 %v8228_v49, %v8228_v49 }
 0x3bc   : > { %v3938_v19 = vadd.f32 %v3937_v6, %v3936_v51  ;;  %v4709_v40 = vadd.f32 %v4708_v36, %v4707_v41  ;;  %v4250_v51 = vmul.f32 %v9907_v63, %v9907_v63  ;;  %v2218_v36 = vadd.f32 %v8768_v42, %v2217_v1 }
 0x3bd   : > { %v4718_v13 = vsel %vm3515_vm3, %v4248_v57, 0.0  ;;  %v4251_v1 = vmul.f32 %v8161_v11, %v8161_v11  ;;  %v3953_v5 = vsel %vm3515_vm3, %v8228_v49, 0.0  ;;  %v4253_v11 = vmul.f32 %v8286_v54, %v8286_v54 }
 0x3be   : > { %v3940_v12 = vadd.f32 %v3939_v24, %v3938_v19  ;;  %v4711_v39 = vadd.f32 %v4710_v25, %v4709_v40  ;;  %v4720_v19 = vsel %vm3515_vm3, %v4249_v26, 0.0  ;;  %v3949_v25 = vsel %vm3515_vm3, %v9907_v63, 0.0 }
 0x3bf   : > { %v2740_v53 = vmul.f32 %v5837_v17, %v2218_v36  ;;  %vm2483_vm0 = vcmp.gt.f32.partialorder %v2218_v36, 0.0  ;;  %v4724_v57 = vsel %vm3515_vm3, %v4251_v1, 0.0  ;;  %v4254_v63 = vmul.f32 %v8339_v50, %v8339_v50 }
 0x3c0   : > { %v3942_v4 = vadd.f32 %v3941_v21, %v3940_v12  ;;  %v4713_v30 = vadd.f32 %v4712_v44, %v4711_v39  ;;  %v4722_v39 = vsel %vm3515_vm3, %v4250_v51, 0.0 }
 0x3c1   : > { %v9280_v21 = vsel %vm2483_vm0, %v2218_v36, %v2740_v53  ;;  %v4255_v36 = vmul.f32 %v8385_v35, %v8385_v35  ;;  %v4258_v53 = vmul.f32 %v8477_v60, %v8477_v60 }
 0x3c2   : > { %v3944_v45 = vadd.f32 %v3943_v38, %v3942_v4  ;;  %v4715_v29 = vadd.f32 %v4714_v61, %v4713_v30  ;;  %v3252_v4 = vpack.c.bf16 %v9280_v21, %v9280_v21 }
 0x3c3   : > { %v2219_v6 = vpop.f32.mrf.mxu3 }
 0x3c4   : > { %v4717_v41 = vadd.f32 %v4716_v59, %v4715_v29  ;;  %v3946_v10 = vadd.f32 %v3945_v58, %v3944_v45  ;;  %v2220_v40 = vadd.f32 %v8768_v42, %v2219_v6  ;;  %3509 = vst.msk [vmem:[%s5847_s16 + $0x3e8] sm:$0xf] %vm3258_vm2, %v3252_v4  ;;  %v4726_v59 = vsel %vm3515_vm3, %v4252_v33, 0.0 }
 0x3c5   : > { %v3955_v58 = vsel %vm3515_vm3, %v8286_v54, 0.0  ;;  %v3959_v54 = vsel %vm3515_vm3, %v8385_v35, 0.0  ;;  %v5732_v35 = vld [vmem:[%s9524_s2] ss:$0 sm:$0xff] }
 0x3c6   : > { %v3948_v24 = vadd.f32 %v3947_v55, %v3946_v10  ;;  %v4719_v43 = vadd.f32 %v4718_v13, %v4717_v41  ;;  %vm2484_vm5 = vcmp.gt.f32.partialorder %v2220_v40, 0.0  ;;  %v2741_v12 = vmul.f32 %v5837_v17, %v2220_v40 }
 0x3c7   : > { %v4728_v41 = vsel %vm3515_vm3, %v4253_v11, 0.0  ;;  %v3957_v10 = vsel %vm3515_vm3, %v8339_v50, 0.0  ;;  %v4730_v55 = vsel %vm3515_vm3, %v4254_v63, 0.0  ;;  %v4732_v50 = vsel %vm3515_vm3, %v4255_v36, 0.0 }
 0x3c8   : > { %v3950_v44 = vadd.f32 %v3949_v25, %v3948_v24  ;;  %v4721_v42 = vadd.f32 %v4720_v19, %v4719_v43  ;;  %v9288_v30 = vsel %vm2484_vm5, %v2220_v40, %v2741_v12  ;;  %v4256_v19 = vmul.f32 %v8428_v47, %v8428_v47 }
 0x3c9   : > { %v3253_v27 = vpack.c.bf16 %v9288_v30, %v9288_v30  ;;  %v4257_v40 = vmul.f32 %v8450_v16, %v8450_v16  ;;  %v3961_v43 = vsel %vm3515_vm3, %v8428_v47, 0.0  ;;  %v3965_v47 = vsel %vm3515_vm3, %v8477_v60, 0.0 }
 0x3ca   : > { %v3952_v61 = vadd.f32 %v3951_v15, %v3950_v44  ;;  %v4723_v38 = vadd.f32 %v4722_v39, %v4721_v42  ;;  %v4734_v42 = vsel %vm3515_vm3, %v4256_v19, 0.0  ;;  %v3963_v15 = vsel %vm3515_vm3, %v8450_v16, 0.0 }
 0x3cb   : > { %3510 = vst.msk [vmem:[%s5847_s16 + $0x3ec] sm:$0xf] %vm3258_vm2, %v3253_v27  ;;  %v2222_v29 = vpop.f32.mrf.mxu3  ;;  %v4736_v33 = vsel %vm3515_vm3, %v4257_v40, 0.0  ;;  %v4738_v16 = vsel %vm3515_vm3, %v4258_v53, 0.0  ;;  %v3967_v60 = vsel %vm3515_vm3, %v8509_v31, 0.0  ;;  %v4262_v19 = vmul.f32 %v8571_v2, %v8571_v2 }
 0x3cc   : > { %v3954_v26 = vadd.f32 %v3953_v5, %v3952_v61  ;;  %v4725_v45 = vadd.f32 %v4724_v57, %v4723_v38  ;;  %v2223_v39 = vadd.f32 %v5732_v35, %v2222_v29  ;;  %v4259_v57 = vmul.f32 %v8509_v31, %v8509_v31 }
 0x3cd   : > { %v4260_v29 = vmul.f32 %v8532_v9, %v8532_v9  ;;  %v4261_v31 = vmul.f32 %v8567_v20, %v8567_v20 }
 0x3ce   : > { %v3956_v51 = vadd.f32 %v3955_v58, %v3954_v26  ;;  %v4727_v49 = vadd.f32 %v4726_v59, %v4725_v45  ;;  %v2742_v27 = vmul.f32 %v5837_v17, %v2223_v39  ;;  %vm2485_vm6 = vcmp.gt.f32.partialorder %v2223_v39, 0.0 }
 0x3d0   : > { %v3958_v6 = vadd.f32 %v3957_v10, %v3956_v51  ;;  %v4729_v13 = vadd.f32 %v4728_v41, %v4727_v49  ;;  %v9337_v45 = vsel %vm2485_vm6, %v2223_v39, %v2742_v27  ;;  %v4740_v41 = vsel %vm3515_vm3, %v4259_v57, 0.0 }
 0x3d1   : > { %v3254_v59 = vpack.c.bf16 %v9337_v45, %v9337_v45  ;;  %v3969_v10 = vsel %vm3515_vm3, %v8532_v9, 0.0  ;;  %v4265_v39 = vmul.f32 %v8703_v62, %v8703_v62  ;;  %v3979_v27 = vsel %vm3515_vm3, %v8703_v62, 0.0 }
 0x3d2   : > { %v3960_v25 = vadd.f32 %v3959_v54, %v3958_v6  ;;  %v4731_v24 = vadd.f32 %v4730_v55, %v4729_v13  ;;  %v4742_v55 = vsel %vm3515_vm3, %v4260_v29, 0.0  ;;  %v3971_v54 = vsel %vm3515_vm3, %v8567_v20, 0.0 }
 0x3d3   : > { %v2224_v44 = vpop.f32.mrf.mxu3  ;;  %3511 = vst.msk [vmem:[%s5847_s16 + $0x3f0] sm:$0xf] %vm3258_vm2, %v3254_v59  ;;  %v3975_v20 = vsel %vm3515_vm3, %v8628_v28, 0.0  ;;  %v4752_v57 = vsel %vm3515_vm3, %v4265_v39, 0.0 }
 0x3d4   : > { %v3962_v1 = vadd.f32 %v3961_v43, %v3960_v25  ;;  %v4733_v12 = vadd.f32 %v4732_v50, %v4731_v24  ;;  %v2225_v4 = vadd.f32 %v5732_v35, %v2224_v44  ;;  %v4744_v25 = vsel %vm3515_vm3, %v4261_v31, 0.0 }
 0x3d5   : > { %v3973_v24 = vsel %vm3515_vm3, %v8571_v2, 0.0  ;;  %v4263_v50 = vmul.f32 %v8628_v28, %v8628_v28 }
 0x3d6   : > { %v3964_v61 = vadd.f32 %v3963_v15, %v3962_v1  ;;  %v4735_v38 = vadd.f32 %v4734_v42, %v4733_v12  ;;  %vm2486_vm7 = vcmp.gt.f32.partialorder %v2225_v4, 0.0  ;;  %v2743_v5 = vmul.f32 %v5837_v17, %v2225_v4 }
 0x3d7   : > { %v4746_v1 = vsel %vm3515_vm3, %v4262_v19, 0.0  ;;  %v4264_v12 = vmul.f32 %v8659_v48, %v8659_v48  ;;  %v4748_v2 = vsel %vm3515_vm3, %v4263_v50, 0.0  ;;  %v3977_v15 = vsel %vm3515_vm3, %v8659_v48, 0.0 }
 0x3d8   : > { %v3966_v11 = vadd.f32 %v3965_v47, %v3964_v61  ;;  %v4737_v26 = vadd.f32 %v4736_v33, %v4735_v38  ;;  %v9345_v58 = vsel %vm2486_vm7, %v2225_v4, %v2743_v5  ;;  %v4266_v33 = vmul.f32 %v8734_v14, %v8734_v14 }
 0x3d9   : > { %v3255_v49 = vpack.c.bf16 %v9345_v58, %v9345_v58  ;;  %v4750_v38 = vsel %vm3515_vm3, %v4264_v12, 0.0  ;;  %v4271_v12 = vmul.f32 %v8932_v7, %v8932_v7 }
 0x3da   : > { %v3968_v63 = vadd.f32 %v3967_v60, %v3966_v11  ;;  %v4739_v51 = vadd.f32 %v4738_v16, %v4737_v26  ;;  %v3981_v16 = vsel %vm3515_vm3, %v8734_v14, 0.0  ;;  %v9908_v60 = vld [vmem:[#allocation72_spill] sm:$0xff]  ;;  %v4754_v62 = vsel %vm3515_vm3, %v4266_v33, 0.0 }
 0x3db   : > { %3512 = vst.msk [vmem:[%s5847_s16 + $0x3f4] sm:$0xf] %vm3258_vm2, %v3255_v49  ;;  %v2227_v13 = vpop.f32.mrf.mxu3  ;;  %v4267_v29 = vmul.f32 %v9908_v60, %v9908_v60  ;;  %v3983_v14 = vsel %vm3515_vm3, %v9908_v60, 0.0  ;;  %v9909_v49 = vld [vmem:[#allocation71_spill] sm:$0xff] }
 0x3dc   : > { %v3970_v36 = vadd.f32 %v3969_v10, %v3968_v63  ;;  %v4741_v6 = vadd.f32 %v4740_v41, %v4739_v51  ;;  %v2228_v61 = vadd.f32 %v5732_v35, %v2227_v13  ;;  %v4268_v41 = vmul.f32 %v9909_v49, %v9909_v49 }
 0x3dd   : > { %v4756_v13 = vsel %vm3515_vm3, %v4267_v29, 0.0 }
 0x3de   : > { %v3972_v40 = vadd.f32 %v3971_v54, %v3970_v36  ;;  %v4743_v9 = vadd.f32 %v4742_v55, %v4741_v6  ;;  %v2744_v26 = vmul.f32 %v5837_v17, %v2228_v61  ;;  %vm2487_vm8 = vcmp.gt.f32.partialorder %v2228_v61, 0.0 }
 0x3df   : > { %v3985_v55 = vsel %vm3515_vm3, %v9909_v49, 0.0  ;;  %v4269_v54 = vmul.f32 %v8858_v23, %v8858_v23 }
 0x3e0   : > { %v3974_v43 = vadd.f32 %v3973_v24, %v3972_v40  ;;  %v4745_v53 = vadd.f32 %v4744_v25, %v4743_v9  ;;  %v9391_v51 = vsel %vm2487_vm8, %v2228_v61, %v2744_v26  ;;  %v4758_v9 = vsel %vm3515_vm3, %v4268_v41, 0.0  ;;  %v9910_v24 = vld [vmem:[#allocation13_spill] sm:$0xff] }
 0x3e1   : > { %v3256_v10 = vpack.c.bf16 %v9391_v51, %v9391_v51  ;;  %v3987_v25 = vsel %vm3515_vm3, %v8858_v23, 0.0  ;;  %v4270_v50 = vmul.f32 %v9910_v24, %v9910_v24  ;;  %v3991_v23 = vsel %vm3515_vm3, %v8932_v7, 0.0 }
 0x3e2   : > { %v3976_v44 = vadd.f32 %v3975_v20, %v3974_v43  ;;  %v4747_v42 = vadd.f32 %v4746_v1, %v4745_v53  ;;  %v4760_v1 = vsel %vm3515_vm3, %v4269_v54, 0.0  ;;  %v3989_v20 = vsel %vm3515_vm3, %v9910_v24, 0.0 }
 0x3e3   : > { %v2229_v28 = vpop.f32.mrf.mxu3  ;;  %3513 = vst.msk [vmem:[%s5847_s16 + $0x3f8] sm:$0xf] %vm3258_vm2, %v3256_v10  ;;  %v4273_v61 = vmul.f32 %v9000_v22, %v9000_v22  ;;  %v3995_v7 = vsel %vm3515_vm3, %v9000_v22, 0.0  ;;  %v3999_v22 = vsel %vm3515_vm3, %v9056_v0, 0.0 }
 0x3e4   : > { %v3978_v4 = vadd.f32 %v3977_v15, %v3976_v44  ;;  %v4749_v47 = vadd.f32 %v4748_v2, %v4747_v42  ;;  %v2230_v5 = vadd.f32 %v5732_v35, %v2229_v28  ;;  %v4762_v42 = vsel %vm3515_vm3, %v4270_v50, 0.0 }
 0x3e5   : > { %v4272_v2 = vmul.f32 %v8962_v34, %v8962_v34 }
 0x3e6   : > { %v3980_v11 = vadd.f32 %v3979_v27, %v3978_v4  ;;  %v4751_v48 = vadd.f32 %v4750_v38, %v4749_v47  ;;  %vm2488_vm9 = vcmp.gt.f32.partialorder %v2230_v5, 0.0  ;;  %v2745_v59 = vmul.f32 %v5837_v17, %v2230_v5 }
 0x3e7   : > { %v4764_v4 = vsel %vm3515_vm3, %v4271_v12, 0.0  ;;  %v3993_v47 = vsel %vm3515_vm3, %v8962_v34, 0.0  ;;  %v4766_v27 = vsel %vm3515_vm3, %v4272_v2, 0.0  ;;  %v3997_v34 = vsel %vm3515_vm3, %v9008_v37, 0.0 }
 0x3e8   : > { %v3982_v63 = vadd.f32 %v3981_v16, %v3980_v11  ;;  %v4753_v35 = vadd.f32 %v4752_v57, %v4751_v48  ;;  %v9399_v31 = vsel %vm2488_vm9, %v2230_v5, %v2745_v59  ;;  %v4274_v57 = vmul.f32 %v9008_v37, %v9008_v37 }
 0x3e9   : > { %v3257_v6 = vpack.c.bf16 %v9399_v31, %v9399_v31  ;;  %v4768_v11 = vsel %vm3515_vm3, %v4273_v61, 0.0  ;;  %v4275_v48 = vmul.f32 %v9056_v0, %v9056_v0  ;;  %v4276_v59 = vmul.f32 %v9064_v8, %v9064_v8 }
 0x3ea   : > { %v3984_v36 = vadd.f32 %v3983_v14, %v3982_v63  ;;  %v4755_v17 = vadd.f32 %v4754_v62, %v4753_v35  ;;  %v4770_v29 = vsel %vm3515_vm3, %v4274_v57, 0.0  ;;  %v4001_v37 = vsel %vm3515_vm3, %v9064_v8, 0.0 }
 0x3eb   : > { %3514 = vst.msk [vmem:[%s5847_s16 + $0x3fc] sm:$0xf] %vm3258_vm2, %v3257_v6  ;;  %v4772_v35 = vsel %vm3515_vm3, %v4275_v48, 0.0  ;;  %v4277_v14 = vmul.f32 %v9112_v46, %v9112_v46  ;;  %v4774_v10 = vsel %vm3515_vm3, %v4276_v59, 0.0  ;;  %v4003_v0 = vsel %vm3515_vm3, %v9112_v46, 0.0 }
 0x3ec   : > { %v3986_v19 = vadd.f32 %v3985_v55, %v3984_v36  ;;  %v4757_v40 = vadd.f32 %v4756_v13, %v4755_v17  ;;  %v4278_v36 = vmul.f32 %v9120_v32, %v9120_v32  ;;  %v4005_v8 = vsel %vm3515_vm3, %v9120_v32, 0.0 }
 0x3ed   : > { %v4776_v13 = vsel %vm3515_vm3, %v4277_v14, 0.0  ;;  %v4279_v55 = vmul.f32 %v9168_v3, %v9168_v3  ;;  %v4007_v46 = vsel %vm3515_vm3, %v9168_v3, 0.0  ;;  %v4009_v32 = vsel %vm3515_vm3, %v9176_v18, 0.0 }
 0x3ee   : > { %v3988_v43 = vadd.f32 %v3987_v25, %v3986_v19  ;;  %v4759_v53 = vadd.f32 %v4758_v9, %v4757_v40  ;;  %v4778_v40 = vsel %vm3515_vm3, %v4278_v36, 0.0  ;;  %v4280_v9 = vmul.f32 %v9176_v18, %v9176_v18 }
 0x3ef   : > { %v4780_v50 = vsel %vm3515_vm3, %v4279_v55, 0.0  ;;  %v4011_v3 = vsel %vm3515_vm3, %v9224_v56, 0.0  ;;  %v4282_v12 = vmul.f32 %v9232_v52, %v9232_v52  ;;  %v4013_v18 = vsel %vm3515_vm3, %v9232_v52, 0.0 }
 0x3f0   : > { %v3990_v39 = vadd.f32 %v3989_v20, %v3988_v43  ;;  %v4761_v44 = vadd.f32 %v4760_v1, %v4759_v53  ;;  %v4281_v43 = vmul.f32 %v9224_v56, %v9224_v56  ;;  %v4782_v20 = vsel %vm3515_vm3, %v4280_v9, 0.0 }
 0x3f1   : > { %v4015_v56 = vsel %vm3515_vm3, %v9280_v21, 0.0  ;;  %v4017_v52 = vsel %vm3515_vm3, %v9288_v30, 0.0  ;;  %v4287_v48 = vmul.f32 %v9391_v51, %v9391_v51  ;;  %vm4806_vm2 = vcmask 24576  }
 0x3f2   : > { %v3992_v15 = vadd.f32 %v3991_v23, %v3990_v39  ;;  %v4763_v33 = vadd.f32 %v4762_v42, %v4761_v44  ;;  %v4784_v42 = vsel %vm3515_vm3, %v4281_v43, 0.0  ;;  %v4283_v23 = vmul.f32 %v9280_v21, %v9280_v21 }
 0x3f3   : > { %v4019_v21 = vsel %vm3515_vm3, %v9337_v45, 0.0 }
 0x3f4   : > { %v3994_v28 = vadd.f32 %v3993_v47, %v3992_v15  ;;  %v4765_v38 = vadd.f32 %v4764_v4, %v4763_v33  ;;  %v4786_v33 = vsel %vm3515_vm3, %v4282_v12, 0.0  ;;  %v4284_v4 = vmul.f32 %v9288_v30, %v9288_v30 }
 0x3f5   : > { %v4021_v30 = vsel %vm3515_vm3, %v9345_v58, 0.0 }
 0x3f6   : > { %v4767_v5 = vadd.f32 %v4766_v27, %v4765_v38  ;;  %v3996_v16 = vadd.f32 %v3995_v7, %v3994_v28  ;;  %v4788_v28 = vsel %vm3515_vm3, %v4283_v23, 0.0  ;;  %v4285_v38 = vmul.f32 %v9337_v45, %v9337_v45 }
 0x3f7   : > { %v4790_v57 = vsel %vm3515_vm3, %v4284_v4, 0.0  ;;  %v4023_v45 = vsel %vm3515_vm3, %v9391_v51, 0.0 }
 0x3f8   : > { %v4769_v26 = vadd.f32 %v4768_v11, %v4767_v5  ;;  %v3998_v60 = vadd.f32 %v3997_v34, %v3996_v16  ;;  %v4286_v5 = vmul.f32 %v9345_v58, %v9345_v58  ;;  %v4792_v34 = vsel %vm3515_vm3, %v4285_v38, 0.0 }
 0x3f9   : > { %v4025_v58 = vsel %vm3515_vm3, %v9399_v31, 0.0 }
 0x3fa   : > { %v4771_v62 = vadd.f32 %v4770_v29, %v4769_v26  ;;  %v4000_v63 = vadd.f32 %v3999_v22, %v3998_v60  ;;  %v4794_v29 = vsel %vm3515_vm3, %v4286_v5, 0.0  ;;  %v4288_v22 = vmul.f32 %v9399_v31, %v9399_v31 }
 0x3fc   : > { %v4773_v49 = vadd.f32 %v4772_v35, %v4771_v62  ;;  %v4002_v41 = vadd.f32 %v4001_v37, %v4000_v63  ;;  %v4796_v63 = vsel %vm3515_vm3, %v4287_v48, 0.0  ;;  %v4798_v14 = vsel %vm3515_vm3, %v4288_v22, 0.0 }
 0x3fe   : > { %v4775_v17 = vadd.f32 %v4774_v10, %v4773_v49  ;;  %v4004_v6 = vadd.f32 %v4003_v0, %v4002_v41 }
 0x400   : > { %v4777_v54 = vadd.f32 %v4776_v13, %v4775_v17  ;;  %v4006_v19 = vadd.f32 %v4005_v8, %v4004_v6 }
 0x402   : > { %v4779_v25 = vadd.f32 %v4778_v40, %v4777_v54  ;;  %v4008_v24 = vadd.f32 %v4007_v46, %v4006_v19 }
 0x404   : > { %v4781_v53 = vadd.f32 %v4780_v50, %v4779_v25  ;;  %v4010_v1 = vadd.f32 %v4009_v32, %v4008_v24 }
 0x406   : > { %v4783_v39 = vadd.f32 %v4782_v20, %v4781_v53  ;;  %v4012_v44 = vadd.f32 %v4011_v3, %v4010_v1 }
 0x408   : > { %v4785_v2 = vadd.f32 %v4784_v42, %v4783_v39  ;;  %v4014_v15 = vadd.f32 %v4013_v18, %v4012_v44 }
 0x40a   : > { %v4787_v47 = vadd.f32 %v4786_v33, %v4785_v2  ;;  %v4016_v61 = vadd.f32 %v4015_v56, %v4014_v15 }
 0x40c   : > { %v4789_v27 = vadd.f32 %v4788_v28, %v4787_v47  ;;  %v4018_v7 = vadd.f32 %v4017_v52, %v4016_v61 }
 0x40e   : > { %v4791_v16 = vadd.f32 %v4790_v57, %v4789_v27  ;;  %v4020_v11 = vadd.f32 %v4019_v21, %v4018_v7 }
 0x410   : > { %v4793_v26 = vadd.f32 %v4792_v34, %v4791_v16  ;;  %v4022_v60 = vadd.f32 %v4021_v30, %v4020_v11 }
 0x412   : > { %v4795_v59 = vadd.f32 %v4794_v29, %v4793_v26  ;;  %v4024_v62 = vadd.f32 %v4023_v45, %v4022_v60 }
 0x414   : > { %v4797_v35 = vadd.f32 %v4796_v63, %v4795_v59  ;;  %v4026_v37 = vadd.f32 %v4025_v58, %v4024_v62 }
 0x416   : > { %v4027_v49 = vrot.slane %v4026_v37, 4  ;;  %v4799_v41 = vadd.f32 %v4798_v14, %v4797_v35 }
 0x418   : > { %v4028_v10 = vadd.f32 %v4027_v49, %v4026_v37  ;;  %v4800_v51 = vrot.slane %v4799_v41, 4 }
 0x41a   : > { %v4029_v0 = vrot.slane %v4028_v10, 2  ;;  %v4801_v36 = vadd.f32 %v4800_v51, %v4799_v41 }
 0x41c   : > { %v4030_v17 = vadd.f32 %v4029_v0, %v4028_v10  ;;  %v4802_v6 = vrot.slane %v4801_v36, 2 }
 0x41e   : > { %v4031_v13 = vrot.slane %v4030_v17, 1  ;;  %v4803_v8 = vadd.f32 %v4802_v6, %v4801_v36 }
 0x420   : > { %v4032_v31 = vadd.f32 %v4031_v13, %v4030_v17  ;;  %v4804_v55 = vrot.slane %v4803_v8, 1 }
 0x422   : > { %v4805_v54 = vadd.f32 %v4804_v55, %v4803_v8  ;;  %4807 = vst.msk [vmem:[%s269_s8] sm:$0x1] %vm4806_vm2, %v4032_v31 }
 0x424   : > { %4808 = vst.msk [vmem:[%s272_s11] sm:$0x1] %vm4806_vm2, %v4805_v54 }
 0x425 PF: > { %s18_s23 = sadd.s32 1, %s5739_s23  }
 0x426   : > { %p15_p5 = scmp.ge.s32.totalorder %s18_s23, 6  }
 0x428   :  { %17 = sbr.rel (!%p15_p5) target bundleno = 2 (0x2), region = 90 }

// kernel: unet3d_forward.17
= control target key start
LH: loop header
LB: loop body
LE: loop exit
PB: predicated region body
PF: predicated region fallthrough
CT: control target
= control target key end

     0   :  { %s3288_s15 = smov 0   ;;  %s4350_s0 = inlined_call_operand.vmem [shape: bf16[8192,16], index: 0, kind: input, shape index: {}]   ;;  %s4351_s1 = inlined_call_operand.vmem [shape: bf16[16,2], index: 1, kind: input, shape index: {}]   ;;  %s4352_s2 = inlined_call_operand.vmem [shape: f32[1,2], index: 2, kind: input, shape index: {}]   ;;  %s4353_s3 = inlined_call_operand.<no memory space> [shape: f32[1], index: 3, kind: input, shape index: {}]   ;;  %s4354_s4 = inlined_call_operand.vmem [shape: f32[8192,2], index: 4, kind: output, shape index: {}]  }
   0x1 LB: > { %s2458_s16 = sadd.s32 4294967295, %s3261_s15   ;;  %p2462_p0 = scmp.ge.s32.totalorder %s3261_s15, 1  ;;  %s3261_s15 = sphi %s3288_s15, %s15_s15  }
   0x2   : > { %p164_p1 = scmp.lt.s32.totalorder %s3261_s15, 5 }
   0x4   : > { %p165_p2 = pnand %p2462_p0, %p164_p1 }
   0x5   : > { %s2463_s18 = sshll.u32 (!%p165_p2), %s2458_s16, 8 }
   0x6   : > { %168 = sbr.rel (%p165_p2) target bundleno = 657 (0x291), region = 36  ;;  %p191_p3 = scmp.lt.s32.totalorder (!%p165_p2), %s2463_s18, 1023 }
   0xb   : > { %v3241_v0 = vld [vmem:[%s4351_s1] sm:$0xff]  ;;  %s4356_s18 = smov (!%p191_p3, %s2463_s18), 1023  ;;  %vm1111_vm0 = vcmask 130048   ;;  %vm2145_vm1 = vcmask 15360  }
   0xc   : > { %1503 = vmatpush.bf16.msra.mxu0 %v3241_v0  ;;  %3242 = vmatpush.bf16.msra.mxu1 %v3241_v0  ;;  %s2464_s19 = sshll.u32 %s4356_s18, 2  ;;  %s2466_s23 = sshll.u32 %s4356_s18, 3  ;;  %v3375_v33 = vld [vmem:[%s4352_s2] ss:$0 sm:$0xff] }
   0xd   : > { %3243 = vmatpush.bf16.msra.mxu2 %v3241_v0  ;;  %3244 = vmatpush.bf16.msra.mxu3 %v3241_v0  ;;  %s3305_s22 = scalar_lea.vmem %s4350_s0, %s2464_s19  ;;  %s3382_s28 = scalar_lea.vmem %s4354_s4, %s2466_s23 }
   0xe   : > { %v3113_v1 = vld [vmem:[%s3305_s22] sm:$0xff]  ;;  %v3114_v5 = vld [vmem:[%s3305_s22 + $0x8] sm:$0xff]  ;;  %v3115_v9 = vld [vmem:[%s3305_s22 + $0x10] sm:$0xff] }
   0xf   : > { %v3145_v2 = vld [vmem:[%s3305_s22 + $0x100] sm:$0xff]  ;;  %2983 = vmatmul.msk.bf16.vlgmr.msra.gmra.mxu0 %vm1111_vm0, %v3113_v1  ;;  %v3146_v6 = vld [vmem:[%s3305_s22 + $0x108] sm:$0xff]  ;;  %v3147_v10 = vld [vmem:[%s3305_s22 + $0x110] sm:$0xff] }
  0x10   : > { %v3177_v3 = vld [vmem:[%s3305_s22 + $0x200] sm:$0xff]  ;;  %3015 = vmatmul.msk.bf16.vlgmr.msra.gmra.mxu1 %vm1111_vm0, %v3145_v2  ;;  %v3178_v7 = vld [vmem:[%s3305_s22 + $0x208] sm:$0xff]  ;;  %v3179_v11 = vld [vmem:[%s3305_s22 + $0x210] sm:$0xff] }
  0x11   : > { %v3209_v4 = vld [vmem:[%s3305_s22 + $0x300] sm:$0xff]  ;;  %3047 = vmatmul.msk.bf16.vlgmr.msra.gmra.mxu2 %vm1111_vm0, %v3177_v3  ;;  %v3210_v8 = vld [vmem:[%s3305_s22 + $0x308] sm:$0xff]  ;;  %v3211_v12 = vld [vmem:[%s3305_s22 + $0x310] sm:$0xff] }
  0x12   : > { %3079 = vmatmul.msk.bf16.vlgmr.msra.gmra.mxu3 %vm1111_vm0, %v3209_v4  ;;  %v3116_v13 = vld [vmem:[%s3305_s22 + $0x18] sm:$0xff]  ;;  %v3117_v17 = vld [vmem:[%s3305_s22 + $0x20] sm:$0xff]  ;;  %v3118_v21 = vld [vmem:[%s3305_s22 + $0x28] sm:$0xff] }
  0x13   : > { %v3148_v14 = vld [vmem:[%s3305_s22 + $0x118] sm:$0xff]  ;;  %v3149_v18 = vld [vmem:[%s3305_s22 + $0x120] sm:$0xff]  ;;  %v3150_v22 = vld [vmem:[%s3305_s22 + $0x128] sm:$0xff] }
  0x14   : > { %v3180_v15 = vld [vmem:[%s3305_s22 + $0x218] sm:$0xff]  ;;  %v3181_v19 = vld [vmem:[%s3305_s22 + $0x220] sm:$0xff]  ;;  %v3182_v23 = vld [vmem:[%s3305_s22 + $0x228] sm:$0xff] }
  0x15   : > { %v3212_v16 = vld [vmem:[%s3305_s22 + $0x318] sm:$0xff]  ;;  %v3213_v20 = vld [vmem:[%s3305_s22 + $0x320] sm:$0xff]  ;;  %v3214_v24 = vld [vmem:[%s3305_s22 + $0x328] sm:$0xff] }
  0x16   : > { %v3119_v25 = vld [vmem:[%s3305_s22 + $0x30] sm:$0xff]  ;;  %v3120_v29 = vld [vmem:[%s3305_s22 + $0x38] sm:$0xff]  ;;  %v3121_v34 = vld [vmem:[%s3305_s22 + $0x40] sm:$0xff] }
  0x17   : > { %v3151_v26 = vld [vmem:[%s3305_s22 + $0x130] sm:$0xff]  ;;  %v3152_v30 = vld [vmem:[%s3305_s22 + $0x138] sm:$0xff]  ;;  %v3153_v35 = vld [vmem:[%s3305_s22 + $0x140] sm:$0xff] }
  0x18   : > { %v3183_v27 = vld [vmem:[%s3305_s22 + $0x230] sm:$0xff]  ;;  %v3184_v31 = vld [vmem:[%s3305_s22 + $0x238] sm:$0xff]  ;;  %v3185_v38 = vld [vmem:[%s3305_s22 + $0x240] sm:$0xff] }
  0x19   : > { %v3215_v28 = vld [vmem:[%s3305_s22 + $0x330] sm:$0xff]  ;;  %v3216_v32 = vld [vmem:[%s3305_s22 + $0x338] sm:$0xff]  ;;  %v3217_v39 = vld [vmem:[%s3305_s22 + $0x340] sm:$0xff] }
  0x1a   : > { %v3122_v52 = vld [vmem:[%s3305_s22 + $0x48] sm:$0xff] }
  0x1b   : > { %v3154_v53 = vld [vmem:[%s3305_s22 + $0x148] sm:$0xff] }
  0x1c   : > { %v3186_v58 = vld [vmem:[%s3305_s22 + $0x248] sm:$0xff] }
  0x1d   : > { %v3218_v59 = vld [vmem:[%s3305_s22 + $0x348] sm:$0xff] }
  0x1f   : > { %2984 = vmatmul.msk.bf16.gmra.mxu0 %vm1111_vm0, %v3114_v5 }
  0x20   : > { %3016 = vmatmul.msk.bf16.gmra.mxu1 %vm1111_vm0, %v3146_v6 }
  0x21   : > { %3048 = vmatmul.msk.bf16.gmra.mxu2 %vm1111_vm0, %v3178_v7 }
  0x22   : > { %3080 = vmatmul.msk.bf16.gmra.mxu3 %vm1111_vm0, %v3210_v8  ;;  %v3123_v8 = vld [vmem:[%s3305_s22 + $0x50] sm:$0xff] }
  0x2f   : > { %2985 = vmatmul.msk.bf16.gmra.mxu0 %vm1111_vm0, %v3115_v9  ;;  %v3155_v9 = vld [vmem:[%s3305_s22 + $0x150] sm:$0xff] }
  0x30   : > { %3017 = vmatmul.msk.bf16.gmra.mxu1 %vm1111_vm0, %v3147_v10 }
  0x31   : > { %3049 = vmatmul.msk.bf16.gmra.mxu2 %vm1111_vm0, %v3179_v11 }
  0x32   : > { %3081 = vmatmul.msk.bf16.gmra.mxu3 %vm1111_vm0, %v3211_v12 }
  0x3f   : > { %2986 = vmatmul.msk.bf16.gmra.mxu0 %vm1111_vm0, %v3116_v13 }
  0x40   : > { %3018 = vmatmul.msk.bf16.gmra.mxu1 %vm1111_vm0, %v3148_v14  ;;  %v3187_v14 = vld [vmem:[%s3305_s22 + $0x250] sm:$0xff] }
  0x41   : > { %3050 = vmatmul.msk.bf16.gmra.mxu2 %vm1111_vm0, %v3180_v15  ;;  %v3219_v15 = vld [vmem:[%s3305_s22 + $0x350] sm:$0xff] }
  0x42   : > { %3082 = vmatmul.msk.bf16.gmra.mxu3 %vm1111_vm0, %v3212_v16 }
  0x4f   : > { %2987 = vmatmul.msk.bf16.gmra.mxu0 %vm1111_vm0, %v3117_v17 }
  0x50   : > { %3019 = vmatmul.msk.bf16.gmra.mxu1 %vm1111_vm0, %v3149_v18 }
  0x51   : > { %3051 = vmatmul.msk.bf16.gmra.mxu2 %vm1111_vm0, %v3181_v19 }
  0x52   : > { %3083 = vmatmul.msk.bf16.gmra.mxu3 %vm1111_vm0, %v3213_v20 }
  0x5f   : > { %2988 = vmatmul.msk.bf16.gmra.mxu0 %vm1111_vm0, %v3118_v21 }
  0x60   : > { %3020 = vmatmul.msk.bf16.gmra.mxu1 %vm1111_vm0, %v3150_v22 }
  0x61   : > { %3052 = vmatmul.msk.bf16.gmra.mxu2 %vm1111_vm0, %v3182_v23 }
  0x62   : > { %3084 = vmatmul.msk.bf16.gmra.mxu3 %vm1111_vm0, %v3214_v24 }
  0x6f   : > { %2989 = vmatmul.msk.bf16.gmra.mxu0 %vm1111_vm0, %v3119_v25 }
  0x70   : > { %3021 = vmatmul.msk.bf16.gmra.mxu1 %vm1111_vm0, %v3151_v26 }
  0x71   : > { %3053 = vmatmul.msk.bf16.gmra.mxu2 %vm1111_vm0, %v3183_v27 }
  0x72   : > { %3085 = vmatmul.msk.bf16.gmra.mxu3 %vm1111_vm0, %v3215_v28  ;;  %v3124_v28 = vld [vmem:[%s3305_s22 + $0x58] sm:$0xff] }
  0x7f   : > { %2990 = vmatmul.msk.bf16.gmra.mxu0 %vm1111_vm0, %v3120_v29  ;;  %v3156_v29 = vld [vmem:[%s3305_s22 + $0x158] sm:$0xff] }
  0x80   : > { %3022 = vmatmul.msk.bf16.gmra.mxu1 %vm1111_vm0, %v3152_v30 }
  0x81   : > { %3054 = vmatmul.msk.bf16.gmra.mxu2 %vm1111_vm0, %v3184_v31 }
  0x82   : > { %3086 = vmatmul.msk.bf16.gmra.mxu3 %vm1111_vm0, %v3216_v32 }
  0x8c   : > { %v1505_v36 = vpop.f32.mrf.mxu0 }
  0x8d   : > { %v1665_v37 = vpop.f32.mrf.mxu1  ;;  %v1506_v40 = vadd.f32 %v3375_v33, %v1505_v36  ;;  %v3220_v36 = vld [vmem:[%s3305_s22 + $0x358] sm:$0xff] }
  0x8e   : > { %v1666_v41 = vadd.f32 %v3375_v33, %v1665_v37 }
  0x8f   : > { %2146 = vst.msk [vmem:[%s3382_s28] sm:$0xff] %vm2145_vm1, %v1506_v40  ;;  %2991 = vmatmul.msk.bf16.gmra.mxu0 %vm1111_vm0, %v3121_v34 }
  0x90   : > { %3023 = vmatmul.msk.bf16.gmra.mxu1 %vm1111_vm0, %v3153_v35  ;;  %2210 = vst.msk [vmem:[%s3382_s28 + $0x200] sm:$0xff] %vm2145_vm1, %v1666_v41  ;;  %v3188_v35 = vld [vmem:[%s3305_s22 + $0x258] sm:$0xff] }
  0x91   : > { %3055 = vmatmul.msk.bf16.gmra.mxu2 %vm1111_vm0, %v3185_v38 }
  0x92   : > { %3087 = vmatmul.msk.bf16.gmra.mxu3 %vm1111_vm0, %v3217_v39 }
  0x94   : > { %v1825_v42 = vpop.f32.mrf.mxu2  ;;  %v1507_v46 = vpop.f32.mrf.mxu0 }
  0x95   : > { %v1985_v43 = vpop.f32.mrf.mxu3  ;;  %v1826_v44 = vadd.f32 %v3375_v33, %v1825_v42  ;;  %v1667_v47 = vpop.f32.mrf.mxu1  ;;  %v1508_v48 = vadd.f32 %v3375_v33, %v1507_v46 }
  0x96   : > { %v1986_v45 = vadd.f32 %v3375_v33, %v1985_v43  ;;  %v1668_v49 = vadd.f32 %v3375_v33, %v1667_v47 }
  0x97   : > { %2274 = vst.msk [vmem:[%s3382_s28 + $0x400] sm:$0xff] %vm2145_vm1, %v1826_v44 }
  0x98   : > { %2338 = vst.msk [vmem:[%s3382_s28 + $0x600] sm:$0xff] %vm2145_vm1, %v1986_v45 }
  0x99   : > { %2147 = vst.msk [vmem:[%s3382_s28 + $0x8] sm:$0xff] %vm2145_vm1, %v1508_v48 }
  0x9a   : > { %2211 = vst.msk [vmem:[%s3382_s28 + $0x208] sm:$0xff] %vm2145_vm1, %v1668_v49  ;;  %v3125_v49 = vld [vmem:[%s3305_s22 + $0x60] sm:$0xff] }
  0x9c   : > { %v1827_v50 = vpop.f32.mrf.mxu2  ;;  %v1510_v56 = vpop.f32.mrf.mxu0 }
  0x9d   : > { %v1987_v51 = vpop.f32.mrf.mxu3  ;;  %v1828_v54 = vadd.f32 %v3375_v33, %v1827_v50  ;;  %v1670_v57 = vpop.f32.mrf.mxu1  ;;  %v1511_v60 = vadd.f32 %v3375_v33, %v1510_v56  ;;  %v3157_v50 = vld [vmem:[%s3305_s22 + $0x160] sm:$0xff] }
  0x9e   : > { %v1988_v55 = vadd.f32 %v3375_v33, %v1987_v51  ;;  %v1671_v61 = vadd.f32 %v3375_v33, %v1670_v57  ;;  %v3221_v56 = vld [vmem:[%s3305_s22 + $0x360] sm:$0xff] }
  0x9f   : > { %2275 = vst.msk [vmem:[%s3382_s28 + $0x408] sm:$0xff] %vm2145_vm1, %v1828_v54  ;;  %2992 = vmatmul.msk.bf16.gmra.mxu0 %vm1111_vm0, %v3122_v52 }
  0xa0   : > { %2339 = vst.msk [vmem:[%s3382_s28 + $0x608] sm:$0xff] %vm2145_vm1, %v1988_v55  ;;  %3024 = vmatmul.msk.bf16.gmra.mxu1 %vm1111_vm0, %v3154_v53  ;;  %v3189_v55 = vld [vmem:[%s3305_s22 + $0x260] sm:$0xff] }
  0xa1   : > { %2148 = vst.msk [vmem:[%s3382_s28 + $0x10] sm:$0xff] %vm2145_vm1, %v1511_v60  ;;  %3056 = vmatmul.msk.bf16.gmra.mxu2 %vm1111_vm0, %v3186_v58 }
  0xa2   : > { %3088 = vmatmul.msk.bf16.gmra.mxu3 %vm1111_vm0, %v3218_v59  ;;  %2212 = vst.msk [vmem:[%s3382_s28 + $0x210] sm:$0xff] %vm2145_vm1, %v1671_v61 }
  0xa4   : > { %v1830_v62 = vpop.f32.mrf.mxu2  ;;  %v1512_v2 = vpop.f32.mrf.mxu0 }
  0xa5   : > { %v1990_v63 = vpop.f32.mrf.mxu3  ;;  %v1831_v0 = vadd.f32 %v3375_v33, %v1830_v62  ;;  %v1672_v3 = vpop.f32.mrf.mxu1  ;;  %v1513_v4 = vadd.f32 %v3375_v33, %v1512_v2 }
  0xa6   : > { %v1991_v1 = vadd.f32 %v3375_v33, %v1990_v63  ;;  %v1673_v5 = vadd.f32 %v3375_v33, %v1672_v3 }
  0xa7   : > { %2276 = vst.msk [vmem:[%s3382_s28 + $0x410] sm:$0xff] %vm2145_vm1, %v1831_v0 }
  0xa8   : > { %2340 = vst.msk [vmem:[%s3382_s28 + $0x610] sm:$0xff] %vm2145_vm1, %v1991_v1 }
  0xa9   : > { %2149 = vst.msk [vmem:[%s3382_s28 + $0x18] sm:$0xff] %vm2145_vm1, %v1513_v4 }
  0xaa   : > { %2213 = vst.msk [vmem:[%s3382_s28 + $0x218] sm:$0xff] %vm2145_vm1, %v1673_v5  ;;  %v3126_v5 = vld [vmem:[%s3305_s22 + $0x68] sm:$0xff] }
  0xac   : > { %v1832_v6 = vpop.f32.mrf.mxu2  ;;  %v1515_v12 = vpop.f32.mrf.mxu0 }
  0xad   : > { %v1992_v7 = vpop.f32.mrf.mxu3  ;;  %v1833_v10 = vadd.f32 %v3375_v33, %v1832_v6  ;;  %v1675_v13 = vpop.f32.mrf.mxu1  ;;  %v1516_v16 = vadd.f32 %v3375_v33, %v1515_v12  ;;  %v3158_v6 = vld [vmem:[%s3305_s22 + $0x168] sm:$0xff] }
  0xae   : > { %v1993_v11 = vadd.f32 %v3375_v33, %v1992_v7  ;;  %v1676_v17 = vadd.f32 %v3375_v33, %v1675_v13  ;;  %v3222_v12 = vld [vmem:[%s3305_s22 + $0x368] sm:$0xff] }
  0xaf   : > { %2277 = vst.msk [vmem:[%s3382_s28 + $0x418] sm:$0xff] %vm2145_vm1, %v1833_v10  ;;  %2993 = vmatmul.msk.bf16.gmra.mxu0 %vm1111_vm0, %v3123_v8 }
  0xb0   : > { %2341 = vst.msk [vmem:[%s3382_s28 + $0x618] sm:$0xff] %vm2145_vm1, %v1993_v11  ;;  %3025 = vmatmul.msk.bf16.gmra.mxu1 %vm1111_vm0, %v3155_v9  ;;  %v3190_v11 = vld [vmem:[%s3305_s22 + $0x268] sm:$0xff] }
  0xb1   : > { %2150 = vst.msk [vmem:[%s3382_s28 + $0x20] sm:$0xff] %vm2145_vm1, %v1516_v16  ;;  %3057 = vmatmul.msk.bf16.gmra.mxu2 %vm1111_vm0, %v3187_v14 }
  0xb2   : > { %3089 = vmatmul.msk.bf16.gmra.mxu3 %vm1111_vm0, %v3219_v15  ;;  %2214 = vst.msk [vmem:[%s3382_s28 + $0x220] sm:$0xff] %vm2145_vm1, %v1676_v17 }
  0xb4   : > { %v1835_v18 = vpop.f32.mrf.mxu2  ;;  %v1517_v22 = vpop.f32.mrf.mxu0 }
  0xb5   : > { %v1995_v19 = vpop.f32.mrf.mxu3  ;;  %v1836_v20 = vadd.f32 %v3375_v33, %v1835_v18  ;;  %v1677_v23 = vpop.f32.mrf.mxu1  ;;  %v1518_v24 = vadd.f32 %v3375_v33, %v1517_v22 }
  0xb6   : > { %v1996_v21 = vadd.f32 %v3375_v33, %v1995_v19  ;;  %v1678_v25 = vadd.f32 %v3375_v33, %v1677_v23 }
  0xb7   : > { %2278 = vst.msk [vmem:[%s3382_s28 + $0x420] sm:$0xff] %vm2145_vm1, %v1836_v20 }
  0xb8   : > { %2342 = vst.msk [vmem:[%s3382_s28 + $0x620] sm:$0xff] %vm2145_vm1, %v1996_v21 }
  0xb9   : > { %2151 = vst.msk [vmem:[%s3382_s28 + $0x28] sm:$0xff] %vm2145_vm1, %v1518_v24 }
  0xba   : > { %2215 = vst.msk [vmem:[%s3382_s28 + $0x228] sm:$0xff] %vm2145_vm1, %v1678_v25  ;;  %v3127_v25 = vld [vmem:[%s3305_s22 + $0x70] sm:$0xff] }
  0xbc   : > { %v1837_v26 = vpop.f32.mrf.mxu2  ;;  %v1520_v32 = vpop.f32.mrf.mxu0 }
  0xbd   : > { %v1997_v27 = vpop.f32.mrf.mxu3  ;;  %v1838_v30 = vadd.f32 %v3375_v33, %v1837_v26  ;;  %v1680_v34 = vpop.f32.mrf.mxu1  ;;  %v1521_v37 = vadd.f32 %v3375_v33, %v1520_v32  ;;  %v3159_v26 = vld [vmem:[%s3305_s22 + $0x170] sm:$0xff] }
  0xbe   : > { %v1998_v31 = vadd.f32 %v3375_v33, %v1997_v27  ;;  %v1681_v38 = vadd.f32 %v3375_v33, %v1680_v34  ;;  %v3223_v32 = vld [vmem:[%s3305_s22 + $0x370] sm:$0xff] }
  0xbf   : > { %2279 = vst.msk [vmem:[%s3382_s28 + $0x428] sm:$0xff] %vm2145_vm1, %v1838_v30  ;;  %2994 = vmatmul.msk.bf16.gmra.mxu0 %vm1111_vm0, %v3124_v28 }
  0xc0   : > { %2343 = vst.msk [vmem:[%s3382_s28 + $0x628] sm:$0xff] %vm2145_vm1, %v1998_v31  ;;  %3026 = vmatmul.msk.bf16.gmra.mxu1 %vm1111_vm0, %v3156_v29  ;;  %v3191_v31 = vld [vmem:[%s3305_s22 + $0x270] sm:$0xff] }
  0xc1   : > { %2152 = vst.msk [vmem:[%s3382_s28 + $0x30] sm:$0xff] %vm2145_vm1, %v1521_v37  ;;  %3058 = vmatmul.msk.bf16.gmra.mxu2 %vm1111_vm0, %v3188_v35 }
  0xc2   : > { %3090 = vmatmul.msk.bf16.gmra.mxu3 %vm1111_vm0, %v3220_v36  ;;  %2216 = vst.msk [vmem:[%s3382_s28 + $0x230] sm:$0xff] %vm2145_vm1, %v1681_v38 }
  0xc4   : > { %v1840_v39 = vpop.f32.mrf.mxu2  ;;  %v1522_v43 = vpop.f32.mrf.mxu0 }
  0xc5   : > { %v2000_v40 = vpop.f32.mrf.mxu3  ;;  %v1841_v41 = vadd.f32 %v3375_v33, %v1840_v39  ;;  %v1682_v44 = vpop.f32.mrf.mxu1  ;;  %v1523_v45 = vadd.f32 %v3375_v33, %v1522_v43 }
  0xc6   : > { %v2001_v42 = vadd.f32 %v3375_v33, %v2000_v40  ;;  %v1683_v46 = vadd.f32 %v3375_v33, %v1682_v44 }
  0xc7   : > { %2280 = vst.msk [vmem:[%s3382_s28 + $0x430] sm:$0xff] %vm2145_vm1, %v1841_v41 }
  0xc8   : > { %2344 = vst.msk [vmem:[%s3382_s28 + $0x630] sm:$0xff] %vm2145_vm1, %v2001_v42 }
  0xc9   : > { %2153 = vst.msk [vmem:[%s3382_s28 + $0x38] sm:$0xff] %vm2145_vm1, %v1523_v45 }
  0xca   : > { %2217 = vst.msk [vmem:[%s3382_s28 + $0x238] sm:$0xff] %vm2145_vm1, %v1683_v46  ;;  %v3128_v46 = vld [vmem:[%s3305_s22 + $0x78] sm:$0xff] }
  0xcc   : > { %v1842_v47 = vpop.f32.mrf.mxu2  ;;  %v1525_v53 = vpop.f32.mrf.mxu0 }
  0xcd   : > { %v2002_v48 = vpop.f32.mrf.mxu3  ;;  %v1843_v51 = vadd.f32 %v3375_v33, %v1842_v47  ;;  %v1685_v54 = vpop.f32.mrf.mxu1  ;;  %v1526_v57 = vadd.f32 %v3375_v33, %v1525_v53  ;;  %v3160_v47 = vld [vmem:[%s3305_s22 + $0x178] sm:$0xff] }
  0xce   : > { %v2003_v52 = vadd.f32 %v3375_v33, %v2002_v48  ;;  %v1686_v58 = vadd.f32 %v3375_v33, %v1685_v54  ;;  %v3224_v53 = vld [vmem:[%s3305_s22 + $0x378] sm:$0xff] }
  0xcf   : > { %2281 = vst.msk [vmem:[%s3382_s28 + $0x438] sm:$0xff] %vm2145_vm1, %v1843_v51  ;;  %2995 = vmatmul.msk.bf16.gmra.mxu0 %vm1111_vm0, %v3125_v49 }
  0xd0   : > { %2345 = vst.msk [vmem:[%s3382_s28 + $0x638] sm:$0xff] %vm2145_vm1, %v2003_v52  ;;  %3027 = vmatmul.msk.bf16.gmra.mxu1 %vm1111_vm0, %v3157_v50  ;;  %v3192_v52 = vld [vmem:[%s3305_s22 + $0x278] sm:$0xff] }
  0xd1   : > { %2154 = vst.msk [vmem:[%s3382_s28 + $0x40] sm:$0xff] %vm2145_vm1, %v1526_v57  ;;  %3059 = vmatmul.msk.bf16.gmra.mxu2 %vm1111_vm0, %v3189_v55 }
  0xd2   : > { %3091 = vmatmul.msk.bf16.gmra.mxu3 %vm1111_vm0, %v3221_v56  ;;  %2218 = vst.msk [vmem:[%s3382_s28 + $0x240] sm:$0xff] %vm2145_vm1, %v1686_v58 }
  0xd4   : > { %v1845_v59 = vpop.f32.mrf.mxu2  ;;  %v1527_v63 = vpop.f32.mrf.mxu0 }
  0xd5   : > { %v2005_v60 = vpop.f32.mrf.mxu3  ;;  %v1846_v61 = vadd.f32 %v3375_v33, %v1845_v59  ;;  %v1687_v0 = vpop.f32.mrf.mxu1  ;;  %v1528_v1 = vadd.f32 %v3375_v33, %v1527_v63 }
  0xd6   : > { %v2006_v62 = vadd.f32 %v3375_v33, %v2005_v60  ;;  %v1688_v2 = vadd.f32 %v3375_v33, %v1687_v0 }
  0xd7   : > { %2282 = vst.msk [vmem:[%s3382_s28 + $0x440] sm:$0xff] %vm2145_vm1, %v1846_v61 }
  0xd8   : > { %2346 = vst.msk [vmem:[%s3382_s28 + $0x640] sm:$0xff] %vm2145_vm1, %v2006_v62 }
  0xd9   : > { %2155 = vst.msk [vmem:[%s3382_s28 + $0x48] sm:$0xff] %vm2145_vm1, %v1528_v1 }
  0xda   : > { %2219 = vst.msk [vmem:[%s3382_s28 + $0x248] sm:$0xff] %vm2145_vm1, %v1688_v2  ;;  %v3129_v2 = vld [vmem:[%s3305_s22 + $0x80] sm:$0xff] }
  0xdc   : > { %v1847_v3 = vpop.f32.mrf.mxu2  ;;  %v1530_v9 = vpop.f32.mrf.mxu0 }
  0xdd   : > { %v2007_v4 = vpop.f32.mrf.mxu3  ;;  %v1848_v7 = vadd.f32 %v3375_v33, %v1847_v3  ;;  %v1690_v10 = vpop.f32.mrf.mxu1  ;;  %v1531_v13 = vadd.f32 %v3375_v33, %v1530_v9  ;;  %v3161_v3 = vld [vmem:[%s3305_s22 + $0x180] sm:$0xff] }
  0xde   : > { %v2008_v8 = vadd.f32 %v3375_v33, %v2007_v4  ;;  %v1691_v14 = vadd.f32 %v3375_v33, %v1690_v10  ;;  %v3225_v9 = vld [vmem:[%s3305_s22 + $0x380] sm:$0xff] }
  0xdf   : > { %2283 = vst.msk [vmem:[%s3382_s28 + $0x448] sm:$0xff] %vm2145_vm1, %v1848_v7  ;;  %2996 = vmatmul.msk.bf16.gmra.mxu0 %vm1111_vm0, %v3126_v5 }
  0xe0   : > { %2347 = vst.msk [vmem:[%s3382_s28 + $0x648] sm:$0xff] %vm2145_vm1, %v2008_v8  ;;  %3028 = vmatmul.msk.bf16.gmra.mxu1 %vm1111_vm0, %v3158_v6  ;;  %v3193_v8 = vld [vmem:[%s3305_s22 + $0x280] sm:$0xff] }
  0xe1   : > { %2156 = vst.msk [vmem:[%s3382_s28 + $0x50] sm:$0xff] %vm2145_vm1, %v1531_v13  ;;  %3060 = vmatmul.msk.bf16.gmra.mxu2 %vm1111_vm0, %v3190_v11 }
  0xe2   : > { %3092 = vmatmul.msk.bf16.gmra.mxu3 %vm1111_vm0, %v3222_v12  ;;  %2220 = vst.msk [vmem:[%s3382_s28 + $0x250] sm:$0xff] %vm2145_vm1, %v1691_v14 }
  0xe4   : > { %v1850_v15 = vpop.f32.mrf.mxu2  ;;  %v1532_v19 = vpop.f32.mrf.mxu0 }
  0xe5   : > { %v2010_v16 = vpop.f32.mrf.mxu3  ;;  %v1851_v17 = vadd.f32 %v3375_v33, %v1850_v15  ;;  %v1692_v20 = vpop.f32.mrf.mxu1  ;;  %v1533_v21 = vadd.f32 %v3375_v33, %v1532_v19 }
  0xe6   : > { %v2011_v18 = vadd.f32 %v3375_v33, %v2010_v16  ;;  %v1693_v22 = vadd.f32 %v3375_v33, %v1692_v20 }
  0xe7   : > { %2284 = vst.msk [vmem:[%s3382_s28 + $0x450] sm:$0xff] %vm2145_vm1, %v1851_v17 }
  0xe8   : > { %2348 = vst.msk [vmem:[%s3382_s28 + $0x650] sm:$0xff] %vm2145_vm1, %v2011_v18 }
  0xe9   : > { %2157 = vst.msk [vmem:[%s3382_s28 + $0x58] sm:$0xff] %vm2145_vm1, %v1533_v21 }
  0xea   : > { %2221 = vst.msk [vmem:[%s3382_s28 + $0x258] sm:$0xff] %vm2145_vm1, %v1693_v22  ;;  %v3130_v22 = vld [vmem:[%s3305_s22 + $0x88] sm:$0xff] }
  0xec   : > { %v1852_v23 = vpop.f32.mrf.mxu2  ;;  %v1535_v29 = vpop.f32.mrf.mxu0 }
  0xed   : > { %v2012_v24 = vpop.f32.mrf.mxu3  ;;  %v1853_v27 = vadd.f32 %v3375_v33, %v1852_v23  ;;  %v1695_v30 = vpop.f32.mrf.mxu1  ;;  %v1536_v34 = vadd.f32 %v3375_v33, %v1535_v29  ;;  %v3162_v23 = vld [vmem:[%s3305_s22 + $0x188] sm:$0xff] }
  0xee   : > { %v2013_v28 = vadd.f32 %v3375_v33, %v2012_v24  ;;  %v1696_v35 = vadd.f32 %v3375_v33, %v1695_v30  ;;  %v3226_v29 = vld [vmem:[%s3305_s22 + $0x388] sm:$0xff] }
  0xef   : > { %2285 = vst.msk [vmem:[%s3382_s28 + $0x458] sm:$0xff] %vm2145_vm1, %v1853_v27  ;;  %2997 = vmatmul.msk.bf16.gmra.mxu0 %vm1111_vm0, %v3127_v25 }
  0xf0   : > { %2349 = vst.msk [vmem:[%s3382_s28 + $0x658] sm:$0xff] %vm2145_vm1, %v2013_v28  ;;  %3029 = vmatmul.msk.bf16.gmra.mxu1 %vm1111_vm0, %v3159_v26  ;;  %v3194_v28 = vld [vmem:[%s3305_s22 + $0x288] sm:$0xff] }
  0xf1   : > { %2158 = vst.msk [vmem:[%s3382_s28 + $0x60] sm:$0xff] %vm2145_vm1, %v1536_v34  ;;  %3061 = vmatmul.msk.bf16.gmra.mxu2 %vm1111_vm0, %v3191_v31 }
  0xf2   : > { %3093 = vmatmul.msk.bf16.gmra.mxu3 %vm1111_vm0, %v3223_v32  ;;  %2222 = vst.msk [vmem:[%s3382_s28 + $0x260] sm:$0xff] %vm2145_vm1, %v1696_v35 }
  0xf4   : > { %v1855_v36 = vpop.f32.mrf.mxu2  ;;  %v1537_v40 = vpop.f32.mrf.mxu0 }
  0xf5   : > { %v2015_v37 = vpop.f32.mrf.mxu3  ;;  %v1856_v38 = vadd.f32 %v3375_v33, %v1855_v36  ;;  %v1697_v41 = vpop.f32.mrf.mxu1  ;;  %v1538_v42 = vadd.f32 %v3375_v33, %v1537_v40 }
  0xf6   : > { %v2016_v39 = vadd.f32 %v3375_v33, %v2015_v37  ;;  %v1698_v43 = vadd.f32 %v3375_v33, %v1697_v41 }
  0xf7   : > { %2286 = vst.msk [vmem:[%s3382_s28 + $0x460] sm:$0xff] %vm2145_vm1, %v1856_v38 }
  0xf8   : > { %2350 = vst.msk [vmem:[%s3382_s28 + $0x660] sm:$0xff] %vm2145_vm1, %v2016_v39 }
  0xf9   : > { %2159 = vst.msk [vmem:[%s3382_s28 + $0x68] sm:$0xff] %vm2145_vm1, %v1538_v42 }
  0xfa   : > { %2223 = vst.msk [vmem:[%s3382_s28 + $0x268] sm:$0xff] %vm2145_vm1, %v1698_v43  ;;  %v3131_v43 = vld [vmem:[%s3305_s22 + $0x90] sm:$0xff] }
  0xfc   : > { %v1857_v44 = vpop.f32.mrf.mxu2  ;;  %v1540_v50 = vpop.f32.mrf.mxu0 }
  0xfd   : > { %v2017_v45 = vpop.f32.mrf.mxu3  ;;  %v1858_v48 = vadd.f32 %v3375_v33, %v1857_v44  ;;  %v1700_v51 = vpop.f32.mrf.mxu1  ;;  %v1541_v54 = vadd.f32 %v3375_v33, %v1540_v50  ;;  %v3163_v44 = vld [vmem:[%s3305_s22 + $0x190] sm:$0xff] }
  0xfe   : > { %v2018_v49 = vadd.f32 %v3375_v33, %v2017_v45  ;;  %v1701_v55 = vadd.f32 %v3375_v33, %v1700_v51  ;;  %v3227_v50 = vld [vmem:[%s3305_s22 + $0x390] sm:$0xff] }
  0xff   : > { %2287 = vst.msk [vmem:[%s3382_s28 + $0x468] sm:$0xff] %vm2145_vm1, %v1858_v48  ;;  %2998 = vmatmul.msk.bf16.gmra.mxu0 %vm1111_vm0, %v3128_v46 }
 0x100   : > { %2351 = vst.msk [vmem:[%s3382_s28 + $0x668] sm:$0xff] %vm2145_vm1, %v2018_v49  ;;  %3030 = vmatmul.msk.bf16.gmra.mxu1 %vm1111_vm0, %v3160_v47  ;;  %v3195_v49 = vld [vmem:[%s3305_s22 + $0x290] sm:$0xff] }
 0x101   : > { %2160 = vst.msk [vmem:[%s3382_s28 + $0x70] sm:$0xff] %vm2145_vm1, %v1541_v54  ;;  %3062 = vmatmul.msk.bf16.gmra.mxu2 %vm1111_vm0, %v3192_v52 }
 0x102   : > { %3094 = vmatmul.msk.bf16.gmra.mxu3 %vm1111_vm0, %v3224_v53  ;;  %2224 = vst.msk [vmem:[%s3382_s28 + $0x270] sm:$0xff] %vm2145_vm1, %v1701_v55 }
 0x104   : > { %v1860_v56 = vpop.f32.mrf.mxu2  ;;  %v1542_v60 = vpop.f32.mrf.mxu0 }
 0x105   : > { %v2020_v57 = vpop.f32.mrf.mxu3  ;;  %v1861_v58 = vadd.f32 %v3375_v33, %v1860_v56  ;;  %v1702_v61 = vpop.f32.mrf.mxu1  ;;  %v1543_v62 = vadd.f32 %v3375_v33, %v1542_v60 }
 0x106   : > { %v2021_v59 = vadd.f32 %v3375_v33, %v2020_v57  ;;  %v1703_v63 = vadd.f32 %v3375_v33, %v1702_v61 }
 0x107   : > { %2288 = vst.msk [vmem:[%s3382_s28 + $0x470] sm:$0xff] %vm2145_vm1, %v1861_v58 }
 0x108   : > { %2352 = vst.msk [vmem:[%s3382_s28 + $0x670] sm:$0xff] %vm2145_vm1, %v2021_v59 }
 0x109   : > { %2161 = vst.msk [vmem:[%s3382_s28 + $0x78] sm:$0xff] %vm2145_vm1, %v1543_v62 }
 0x10a   : > { %2225 = vst.msk [vmem:[%s3382_s28 + $0x278] sm:$0xff] %vm2145_vm1, %v1703_v63  ;;  %v3132_v63 = vld [vmem:[%s3305_s22 + $0x98] sm:$0xff] }
 0x10c   : > { %v1862_v0 = vpop.f32.mrf.mxu2  ;;  %v1545_v6 = vpop.f32.mrf.mxu0 }
 0x10d   : > { %v2022_v1 = vpop.f32.mrf.mxu3  ;;  %v1863_v4 = vadd.f32 %v3375_v33, %v1862_v0  ;;  %v1705_v7 = vpop.f32.mrf.mxu1  ;;  %v1546_v10 = vadd.f32 %v3375_v33, %v1545_v6  ;;  %v3164_v0 = vld [vmem:[%s3305_s22 + $0x198] sm:$0xff] }
 0x10e   : > { %v2023_v5 = vadd.f32 %v3375_v33, %v2022_v1  ;;  %v1706_v11 = vadd.f32 %v3375_v33, %v1705_v7  ;;  %v3228_v6 = vld [vmem:[%s3305_s22 + $0x398] sm:$0xff] }
 0x10f   : > { %2289 = vst.msk [vmem:[%s3382_s28 + $0x478] sm:$0xff] %vm2145_vm1, %v1863_v4  ;;  %2999 = vmatmul.msk.bf16.gmra.mxu0 %vm1111_vm0, %v3129_v2 }
 0x110   : > { %2353 = vst.msk [vmem:[%s3382_s28 + $0x678] sm:$0xff] %vm2145_vm1, %v2023_v5  ;;  %3031 = vmatmul.msk.bf16.gmra.mxu1 %vm1111_vm0, %v3161_v3  ;;  %v3196_v5 = vld [vmem:[%s3305_s22 + $0x298] sm:$0xff] }
 0x111   : > { %2162 = vst.msk [vmem:[%s3382_s28 + $0x80] sm:$0xff] %vm2145_vm1, %v1546_v10  ;;  %3063 = vmatmul.msk.bf16.gmra.mxu2 %vm1111_vm0, %v3193_v8 }
 0x112   : > { %3095 = vmatmul.msk.bf16.gmra.mxu3 %vm1111_vm0, %v3225_v9  ;;  %2226 = vst.msk [vmem:[%s3382_s28 + $0x280] sm:$0xff] %vm2145_vm1, %v1706_v11 }
 0x114   : > { %v1865_v12 = vpop.f32.mrf.mxu2  ;;  %v1547_v16 = vpop.f32.mrf.mxu0 }
 0x115   : > { %v2025_v13 = vpop.f32.mrf.mxu3  ;;  %v1866_v14 = vadd.f32 %v3375_v33, %v1865_v12  ;;  %v1707_v17 = vpop.f32.mrf.mxu1  ;;  %v1548_v18 = vadd.f32 %v3375_v33, %v1547_v16 }
 0x116   : > { %v2026_v15 = vadd.f32 %v3375_v33, %v2025_v13  ;;  %v1708_v19 = vadd.f32 %v3375_v33, %v1707_v17 }
 0x117   : > { %2290 = vst.msk [vmem:[%s3382_s28 + $0x480] sm:$0xff] %vm2145_vm1, %v1866_v14 }
 0x118   : > { %2354 = vst.msk [vmem:[%s3382_s28 + $0x680] sm:$0xff] %vm2145_vm1, %v2026_v15 }
 0x119   : > { %2163 = vst.msk [vmem:[%s3382_s28 + $0x88] sm:$0xff] %vm2145_vm1, %v1548_v18 }
 0x11a   : > { %2227 = vst.msk [vmem:[%s3382_s28 + $0x288] sm:$0xff] %vm2145_vm1, %v1708_v19  ;;  %v3133_v19 = vld [vmem:[%s3305_s22 + $0xa0] sm:$0xff] }
 0x11c   : > { %v1867_v20 = vpop.f32.mrf.mxu2  ;;  %v1550_v26 = vpop.f32.mrf.mxu0 }
 0x11d   : > { %v2027_v21 = vpop.f32.mrf.mxu3  ;;  %v1868_v24 = vadd.f32 %v3375_v33, %v1867_v20  ;;  %v1710_v27 = vpop.f32.mrf.mxu1  ;;  %v1551_v30 = vadd.f32 %v3375_v33, %v1550_v26  ;;  %v3165_v20 = vld [vmem:[%s3305_s22 + $0x1a0] sm:$0xff] }
 0x11e   : > { %v2028_v25 = vadd.f32 %v3375_v33, %v2027_v21  ;;  %v1711_v31 = vadd.f32 %v3375_v33, %v1710_v27  ;;  %v3229_v26 = vld [vmem:[%s3305_s22 + $0x3a0] sm:$0xff] }
 0x11f   : > { %2291 = vst.msk [vmem:[%s3382_s28 + $0x488] sm:$0xff] %vm2145_vm1, %v1868_v24  ;;  %3000 = vmatmul.msk.bf16.gmra.mxu0 %vm1111_vm0, %v3130_v22 }
 0x120   : > { %2355 = vst.msk [vmem:[%s3382_s28 + $0x688] sm:$0xff] %vm2145_vm1, %v2028_v25  ;;  %3032 = vmatmul.msk.bf16.gmra.mxu1 %vm1111_vm0, %v3162_v23  ;;  %v3197_v25 = vld [vmem:[%s3305_s22 + $0x2a0] sm:$0xff] }
 0x121   : > { %2164 = vst.msk [vmem:[%s3382_s28 + $0x90] sm:$0xff] %vm2145_vm1, %v1551_v30  ;;  %3064 = vmatmul.msk.bf16.gmra.mxu2 %vm1111_vm0, %v3194_v28 }
 0x122   : > { %3096 = vmatmul.msk.bf16.gmra.mxu3 %vm1111_vm0, %v3226_v29  ;;  %2228 = vst.msk [vmem:[%s3382_s28 + $0x290] sm:$0xff] %vm2145_vm1, %v1711_v31 }
 0x124   : > { %v1870_v32 = vpop.f32.mrf.mxu2  ;;  %v1552_v37 = vpop.f32.mrf.mxu0 }
 0x125   : > { %v2030_v34 = vpop.f32.mrf.mxu3  ;;  %v1871_v35 = vadd.f32 %v3375_v33, %v1870_v32  ;;  %v1712_v38 = vpop.f32.mrf.mxu1  ;;  %v1553_v39 = vadd.f32 %v3375_v33, %v1552_v37 }
 0x126   : > { %v2031_v36 = vadd.f32 %v3375_v33, %v2030_v34  ;;  %v1713_v40 = vadd.f32 %v3375_v33, %v1712_v38 }
 0x127   : > { %2292 = vst.msk [vmem:[%s3382_s28 + $0x490] sm:$0xff] %vm2145_vm1, %v1871_v35 }
 0x128   : > { %2356 = vst.msk [vmem:[%s3382_s28 + $0x690] sm:$0xff] %vm2145_vm1, %v2031_v36 }
 0x129   : > { %2165 = vst.msk [vmem:[%s3382_s28 + $0x98] sm:$0xff] %vm2145_vm1, %v1553_v39 }
 0x12a   : > { %2229 = vst.msk [vmem:[%s3382_s28 + $0x298] sm:$0xff] %vm2145_vm1, %v1713_v40  ;;  %v3134_v40 = vld [vmem:[%s3305_s22 + $0xa8] sm:$0xff] }
 0x12c   : > { %v1872_v41 = vpop.f32.mrf.mxu2  ;;  %v1555_v47 = vpop.f32.mrf.mxu0 }
 0x12d   : > { %v2032_v42 = vpop.f32.mrf.mxu3  ;;  %v1873_v45 = vadd.f32 %v3375_v33, %v1872_v41  ;;  %v1715_v48 = vpop.f32.mrf.mxu1  ;;  %v1556_v51 = vadd.f32 %v3375_v33, %v1555_v47  ;;  %v3166_v41 = vld [vmem:[%s3305_s22 + $0x1a8] sm:$0xff] }
 0x12e   : > { %v2033_v46 = vadd.f32 %v3375_v33, %v2032_v42  ;;  %v1716_v52 = vadd.f32 %v3375_v33, %v1715_v48  ;;  %v3230_v47 = vld [vmem:[%s3305_s22 + $0x3a8] sm:$0xff] }
 0x12f   : > { %2293 = vst.msk [vmem:[%s3382_s28 + $0x498] sm:$0xff] %vm2145_vm1, %v1873_v45  ;;  %3001 = vmatmul.msk.bf16.gmra.mxu0 %vm1111_vm0, %v3131_v43 }
 0x130   : > { %2357 = vst.msk [vmem:[%s3382_s28 + $0x698] sm:$0xff] %vm2145_vm1, %v2033_v46  ;;  %3033 = vmatmul.msk.bf16.gmra.mxu1 %vm1111_vm0, %v3163_v44  ;;  %v3198_v46 = vld [vmem:[%s3305_s22 + $0x2a8] sm:$0xff] }
 0x131   : > { %2166 = vst.msk [vmem:[%s3382_s28 + $0xa0] sm:$0xff] %vm2145_vm1, %v1556_v51  ;;  %3065 = vmatmul.msk.bf16.gmra.mxu2 %vm1111_vm0, %v3195_v49 }
 0x132   : > { %3097 = vmatmul.msk.bf16.gmra.mxu3 %vm1111_vm0, %v3227_v50  ;;  %2230 = vst.msk [vmem:[%s3382_s28 + $0x2a0] sm:$0xff] %vm2145_vm1, %v1716_v52 }
 0x134   : > { %v1875_v53 = vpop.f32.mrf.mxu2  ;;  %v1557_v57 = vpop.f32.mrf.mxu0 }
 0x135   : > { %v2035_v54 = vpop.f32.mrf.mxu3  ;;  %v1876_v55 = vadd.f32 %v3375_v33, %v1875_v53  ;;  %v1717_v58 = vpop.f32.mrf.mxu1  ;;  %v1558_v59 = vadd.f32 %v3375_v33, %v1557_v57 }
 0x136   : > { %v2036_v56 = vadd.f32 %v3375_v33, %v2035_v54  ;;  %v1718_v60 = vadd.f32 %v3375_v33, %v1717_v58 }
 0x137   : > { %2294 = vst.msk [vmem:[%s3382_s28 + $0x4a0] sm:$0xff] %vm2145_vm1, %v1876_v55 }
 0x138   : > { %2358 = vst.msk [vmem:[%s3382_s28 + $0x6a0] sm:$0xff] %vm2145_vm1, %v2036_v56 }
 0x139   : > { %2167 = vst.msk [vmem:[%s3382_s28 + $0xa8] sm:$0xff] %vm2145_vm1, %v1558_v59 }
 0x13a   : > { %2231 = vst.msk [vmem:[%s3382_s28 + $0x2a8] sm:$0xff] %vm2145_vm1, %v1718_v60  ;;  %v3135_v60 = vld [vmem:[%s3305_s22 + $0xb0] sm:$0xff] }
 0x13c   : > { %v1877_v61 = vpop.f32.mrf.mxu2  ;;  %v1560_v3 = vpop.f32.mrf.mxu0 }
 0x13d   : > { %v2037_v62 = vpop.f32.mrf.mxu3  ;;  %v1878_v1 = vadd.f32 %v3375_v33, %v1877_v61  ;;  %v1720_v4 = vpop.f32.mrf.mxu1  ;;  %v1561_v7 = vadd.f32 %v3375_v33, %v1560_v3  ;;  %v3167_v61 = vld [vmem:[%s3305_s22 + $0x1b0] sm:$0xff] }
 0x13e   : > { %v2038_v2 = vadd.f32 %v3375_v33, %v2037_v62  ;;  %v1721_v8 = vadd.f32 %v3375_v33, %v1720_v4  ;;  %v3231_v3 = vld [vmem:[%s3305_s22 + $0x3b0] sm:$0xff] }
 0x13f   : > { %2295 = vst.msk [vmem:[%s3382_s28 + $0x4a8] sm:$0xff] %vm2145_vm1, %v1878_v1  ;;  %3002 = vmatmul.msk.bf16.gmra.mxu0 %vm1111_vm0, %v3132_v63 }
 0x140   : > { %2359 = vst.msk [vmem:[%s3382_s28 + $0x6a8] sm:$0xff] %vm2145_vm1, %v2038_v2  ;;  %3034 = vmatmul.msk.bf16.gmra.mxu1 %vm1111_vm0, %v3164_v0  ;;  %v3199_v2 = vld [vmem:[%s3305_s22 + $0x2b0] sm:$0xff] }
 0x141   : > { %2168 = vst.msk [vmem:[%s3382_s28 + $0xb0] sm:$0xff] %vm2145_vm1, %v1561_v7  ;;  %3066 = vmatmul.msk.bf16.gmra.mxu2 %vm1111_vm0, %v3196_v5 }
 0x142   : > { %3098 = vmatmul.msk.bf16.gmra.mxu3 %vm1111_vm0, %v3228_v6  ;;  %2232 = vst.msk [vmem:[%s3382_s28 + $0x2b0] sm:$0xff] %vm2145_vm1, %v1721_v8 }
 0x144   : > { %v1880_v9 = vpop.f32.mrf.mxu2  ;;  %v1562_v13 = vpop.f32.mrf.mxu0 }
 0x145   : > { %v2040_v10 = vpop.f32.mrf.mxu3  ;;  %v1881_v11 = vadd.f32 %v3375_v33, %v1880_v9  ;;  %v1722_v14 = vpop.f32.mrf.mxu1  ;;  %v1563_v15 = vadd.f32 %v3375_v33, %v1562_v13 }
 0x146   : > { %v2041_v12 = vadd.f32 %v3375_v33, %v2040_v10  ;;  %v1723_v16 = vadd.f32 %v3375_v33, %v1722_v14 }
 0x147   : > { %2296 = vst.msk [vmem:[%s3382_s28 + $0x4b0] sm:$0xff] %vm2145_vm1, %v1881_v11 }
 0x148   : > { %2360 = vst.msk [vmem:[%s3382_s28 + $0x6b0] sm:$0xff] %vm2145_vm1, %v2041_v12 }
 0x149   : > { %2169 = vst.msk [vmem:[%s3382_s28 + $0xb8] sm:$0xff] %vm2145_vm1, %v1563_v15 }
 0x14a   : > { %2233 = vst.msk [vmem:[%s3382_s28 + $0x2b8] sm:$0xff] %vm2145_vm1, %v1723_v16  ;;  %v3136_v16 = vld [vmem:[%s3305_s22 + $0xb8] sm:$0xff] }
 0x14c   : > { %v1882_v17 = vpop.f32.mrf.mxu2  ;;  %v1565_v23 = vpop.f32.mrf.mxu0 }
 0x14d   : > { %v2042_v18 = vpop.f32.mrf.mxu3  ;;  %v1883_v21 = vadd.f32 %v3375_v33, %v1882_v17  ;;  %v1725_v24 = vpop.f32.mrf.mxu1  ;;  %v1566_v27 = vadd.f32 %v3375_v33, %v1565_v23  ;;  %v3168_v17 = vld [vmem:[%s3305_s22 + $0x1b8] sm:$0xff] }
 0x14e   : > { %v2043_v22 = vadd.f32 %v3375_v33, %v2042_v18  ;;  %v1726_v28 = vadd.f32 %v3375_v33, %v1725_v24  ;;  %v3232_v23 = vld [vmem:[%s3305_s22 + $0x3b8] sm:$0xff] }
 0x14f   : > { %2297 = vst.msk [vmem:[%s3382_s28 + $0x4b8] sm:$0xff] %vm2145_vm1, %v1883_v21  ;;  %3003 = vmatmul.msk.bf16.gmra.mxu0 %vm1111_vm0, %v3133_v19 }
 0x150   : > { %2361 = vst.msk [vmem:[%s3382_s28 + $0x6b8] sm:$0xff] %vm2145_vm1, %v2043_v22  ;;  %3035 = vmatmul.msk.bf16.gmra.mxu1 %vm1111_vm0, %v3165_v20  ;;  %v3200_v22 = vld [vmem:[%s3305_s22 + $0x2b8] sm:$0xff] }
 0x151   : > { %2170 = vst.msk [vmem:[%s3382_s28 + $0xc0] sm:$0xff] %vm2145_vm1, %v1566_v27  ;;  %3067 = vmatmul.msk.bf16.gmra.mxu2 %vm1111_vm0, %v3197_v25 }
 0x152   : > { %3099 = vmatmul.msk.bf16.gmra.mxu3 %vm1111_vm0, %v3229_v26  ;;  %2234 = vst.msk [vmem:[%s3382_s28 + $0x2c0] sm:$0xff] %vm2145_vm1, %v1726_v28 }
 0x154   : > { %v1885_v29 = vpop.f32.mrf.mxu2  ;;  %v1567_v34 = vpop.f32.mrf.mxu0 }
 0x155   : > { %v2045_v30 = vpop.f32.mrf.mxu3  ;;  %v1886_v31 = vadd.f32 %v3375_v33, %v1885_v29  ;;  %v1727_v35 = vpop.f32.mrf.mxu1  ;;  %v1568_v36 = vadd.f32 %v3375_v33, %v1567_v34 }
 0x156   : > { %v2046_v32 = vadd.f32 %v3375_v33, %v2045_v30  ;;  %v1728_v37 = vadd.f32 %v3375_v33, %v1727_v35 }
 0x157   : > { %2298 = vst.msk [vmem:[%s3382_s28 + $0x4c0] sm:$0xff] %vm2145_vm1, %v1886_v31 }
 0x158   : > { %2362 = vst.msk [vmem:[%s3382_s28 + $0x6c0] sm:$0xff] %vm2145_vm1, %v2046_v32 }
 0x159   : > { %2171 = vst.msk [vmem:[%s3382_s28 + $0xc8] sm:$0xff] %vm2145_vm1, %v1568_v36 }
 0x15a   : > { %2235 = vst.msk [vmem:[%s3382_s28 + $0x2c8] sm:$0xff] %vm2145_vm1, %v1728_v37  ;;  %v3137_v37 = vld [vmem:[%s3305_s22 + $0xc0] sm:$0xff] }
 0x15c   : > { %v1887_v38 = vpop.f32.mrf.mxu2  ;;  %v1570_v44 = vpop.f32.mrf.mxu0 }
 0x15d   : > { %v2047_v39 = vpop.f32.mrf.mxu3  ;;  %v1888_v42 = vadd.f32 %v3375_v33, %v1887_v38  ;;  %v1730_v45 = vpop.f32.mrf.mxu1  ;;  %v1571_v48 = vadd.f32 %v3375_v33, %v1570_v44  ;;  %v3169_v38 = vld [vmem:[%s3305_s22 + $0x1c0] sm:$0xff] }
 0x15e   : > { %v2048_v43 = vadd.f32 %v3375_v33, %v2047_v39  ;;  %v1731_v49 = vadd.f32 %v3375_v33, %v1730_v45  ;;  %v3893_v39 = vld [vmem:[%s4352_s2] ss:$0 sm:$0xff] }
 0x15f   : > { %2299 = vst.msk [vmem:[%s3382_s28 + $0x4c8] sm:$0xff] %vm2145_vm1, %v1888_v42  ;;  %3004 = vmatmul.msk.bf16.gmra.mxu0 %vm1111_vm0, %v3134_v40  ;;  %v3233_v44 = vld [vmem:[%s3305_s22 + $0x3c0] sm:$0xff] }
 0x160   : > { %2363 = vst.msk [vmem:[%s3382_s28 + $0x6c8] sm:$0xff] %vm2145_vm1, %v2048_v43  ;;  %3036 = vmatmul.msk.bf16.gmra.mxu1 %vm1111_vm0, %v3166_v41  ;;  %v3201_v43 = vld [vmem:[%s3305_s22 + $0x2c0] sm:$0xff] }
 0x161   : > { %2172 = vst.msk [vmem:[%s3382_s28 + $0xd0] sm:$0xff] %vm2145_vm1, %v1571_v48  ;;  %3068 = vmatmul.msk.bf16.gmra.mxu2 %vm1111_vm0, %v3198_v46 }
 0x162   : > { %3100 = vmatmul.msk.bf16.gmra.mxu3 %vm1111_vm0, %v3230_v47  ;;  %2236 = vst.msk [vmem:[%s3382_s28 + $0x2d0] sm:$0xff] %vm2145_vm1, %v1731_v49 }
 0x164   : > { %v1890_v50 = vpop.f32.mrf.mxu2  ;;  %v1572_v54 = vpop.f32.mrf.mxu0 }
 0x165   : > { %v2050_v51 = vpop.f32.mrf.mxu3  ;;  %v1891_v52 = vadd.f32 %v3375_v33, %v1890_v50  ;;  %v1732_v55 = vpop.f32.mrf.mxu1  ;;  %v1573_v56 = vadd.f32 %v3375_v33, %v1572_v54 }
 0x166   : > { %v2051_v53 = vadd.f32 %v3375_v33, %v2050_v51  ;;  %v1733_v57 = vadd.f32 %v3375_v33, %v1732_v55 }
 0x167   : > { %2300 = vst.msk [vmem:[%s3382_s28 + $0x4d0] sm:$0xff] %vm2145_vm1, %v1891_v52 }
 0x168   : > { %2364 = vst.msk [vmem:[%s3382_s28 + $0x6d0] sm:$0xff] %vm2145_vm1, %v2051_v53 }
 0x169   : > { %2173 = vst.msk [vmem:[%s3382_s28 + $0xd8] sm:$0xff] %vm2145_vm1, %v1573_v56 }
 0x16a   : > { %2237 = vst.msk [vmem:[%s3382_s28 + $0x2d8] sm:$0xff] %vm2145_vm1, %v1733_v57  ;;  %v3138_v57 = vld [vmem:[%s3305_s22 + $0xc8] sm:$0xff] }
 0x16c   : > { %v1892_v58 = vpop.f32.mrf.mxu2  ;;  %v1575_v0 = vpop.f32.mrf.mxu0 }
 0x16d   : > { %v2052_v59 = vpop.f32.mrf.mxu3  ;;  %v1893_v62 = vadd.f32 %v3375_v33, %v1892_v58  ;;  %v1735_v1 = vpop.f32.mrf.mxu1  ;;  %v1576_v4 = vadd.f32 %v3375_v33, %v1575_v0  ;;  %v3170_v58 = vld [vmem:[%s3305_s22 + $0x1c8] sm:$0xff] }
 0x16e   : > { %v2053_v63 = vadd.f32 %v3375_v33, %v2052_v59  ;;  %v1736_v5 = vadd.f32 %v3375_v33, %v1735_v1  ;;  %v3234_v0 = vld [vmem:[%s3305_s22 + $0x3c8] sm:$0xff] }
 0x16f   : > { %2301 = vst.msk [vmem:[%s3382_s28 + $0x4d8] sm:$0xff] %vm2145_vm1, %v1893_v62  ;;  %3005 = vmatmul.msk.bf16.gmra.mxu0 %vm1111_vm0, %v3135_v60 }
 0x170   : > { %2365 = vst.msk [vmem:[%s3382_s28 + $0x6d8] sm:$0xff] %vm2145_vm1, %v2053_v63  ;;  %3037 = vmatmul.msk.bf16.gmra.mxu1 %vm1111_vm0, %v3167_v61  ;;  %v3202_v63 = vld [vmem:[%s3305_s22 + $0x2c8] sm:$0xff] }
 0x171   : > { %2174 = vst.msk [vmem:[%s3382_s28 + $0xe0] sm:$0xff] %vm2145_vm1, %v1576_v4  ;;  %3069 = vmatmul.msk.bf16.gmra.mxu2 %vm1111_vm0, %v3199_v2 }
 0x172   : > { %3101 = vmatmul.msk.bf16.gmra.mxu3 %vm1111_vm0, %v3231_v3  ;;  %2238 = vst.msk [vmem:[%s3382_s28 + $0x2e0] sm:$0xff] %vm2145_vm1, %v1736_v5 }
 0x174   : > { %v1895_v6 = vpop.f32.mrf.mxu2  ;;  %v1577_v10 = vpop.f32.mrf.mxu0 }
 0x175   : > { %v2055_v7 = vpop.f32.mrf.mxu3  ;;  %v1896_v8 = vadd.f32 %v3375_v33, %v1895_v6  ;;  %v1737_v11 = vpop.f32.mrf.mxu1  ;;  %v1578_v12 = vadd.f32 %v3375_v33, %v1577_v10 }
 0x176   : > { %v2056_v9 = vadd.f32 %v3375_v33, %v2055_v7  ;;  %v1738_v13 = vadd.f32 %v3375_v33, %v1737_v11 }
 0x177   : > { %2302 = vst.msk [vmem:[%s3382_s28 + $0x4e0] sm:$0xff] %vm2145_vm1, %v1896_v8 }
 0x178   : > { %2366 = vst.msk [vmem:[%s3382_s28 + $0x6e0] sm:$0xff] %vm2145_vm1, %v2056_v9 }
 0x179   : > { %2175 = vst.msk [vmem:[%s3382_s28 + $0xe8] sm:$0xff] %vm2145_vm1, %v1578_v12 }
 0x17a   : > { %2239 = vst.msk [vmem:[%s3382_s28 + $0x2e8] sm:$0xff] %vm2145_vm1, %v1738_v13  ;;  %v3139_v13 = vld [vmem:[%s3305_s22 + $0xd0] sm:$0xff] }
 0x17c   : > { %v1897_v14 = vpop.f32.mrf.mxu2  ;;  %v1580_v20 = vpop.f32.mrf.mxu0 }
 0x17d   : > { %v2057_v15 = vpop.f32.mrf.mxu3  ;;  %v1898_v18 = vadd.f32 %v3375_v33, %v1897_v14  ;;  %v1740_v21 = vpop.f32.mrf.mxu1  ;;  %v1581_v24 = vadd.f32 %v3375_v33, %v1580_v20  ;;  %v3171_v14 = vld [vmem:[%s3305_s22 + $0x1d0] sm:$0xff] }
 0x17e   : > { %v2058_v19 = vadd.f32 %v3375_v33, %v2057_v15  ;;  %v1741_v25 = vadd.f32 %v3375_v33, %v1740_v21  ;;  %v3235_v20 = vld [vmem:[%s3305_s22 + $0x3d0] sm:$0xff] }
 0x17f   : > { %2303 = vst.msk [vmem:[%s3382_s28 + $0x4e8] sm:$0xff] %vm2145_vm1, %v1898_v18  ;;  %3006 = vmatmul.msk.bf16.gmra.mxu0 %vm1111_vm0, %v3136_v16 }
 0x180   : > { %2367 = vst.msk [vmem:[%s3382_s28 + $0x6e8] sm:$0xff] %vm2145_vm1, %v2058_v19  ;;  %3038 = vmatmul.msk.bf16.gmra.mxu1 %vm1111_vm0, %v3168_v17  ;;  %v3203_v19 = vld [vmem:[%s3305_s22 + $0x2d0] sm:$0xff] }
 0x181   : > { %2176 = vst.msk [vmem:[%s3382_s28 + $0xf0] sm:$0xff] %vm2145_vm1, %v1581_v24  ;;  %3070 = vmatmul.msk.bf16.gmra.mxu2 %vm1111_vm0, %v3200_v22 }
 0x182   : > { %3102 = vmatmul.msk.bf16.gmra.mxu3 %vm1111_vm0, %v3232_v23  ;;  %2240 = vst.msk [vmem:[%s3382_s28 + $0x2f0] sm:$0xff] %vm2145_vm1, %v1741_v25 }
 0x184   : > { %v1900_v26 = vpop.f32.mrf.mxu2  ;;  %v1582_v30 = vpop.f32.mrf.mxu0 }
 0x185   : > { %v2060_v27 = vpop.f32.mrf.mxu3  ;;  %v1901_v28 = vadd.f32 %v3375_v33, %v1900_v26  ;;  %v1742_v31 = vpop.f32.mrf.mxu1  ;;  %v1583_v32 = vadd.f32 %v3375_v33, %v1582_v30 }
 0x186   : > { %v2061_v29 = vadd.f32 %v3375_v33, %v2060_v27  ;;  %v1743_v34 = vadd.f32 %v3375_v33, %v1742_v31 }
 0x187   : > { %2304 = vst.msk [vmem:[%s3382_s28 + $0x4f0] sm:$0xff] %vm2145_vm1, %v1901_v28 }
 0x188   : > { %2368 = vst.msk [vmem:[%s3382_s28 + $0x6f0] sm:$0xff] %vm2145_vm1, %v2061_v29 }
 0x189   : > { %2177 = vst.msk [vmem:[%s3382_s28 + $0xf8] sm:$0xff] %vm2145_vm1, %v1583_v32 }
 0x18a   : > { %2241 = vst.msk [vmem:[%s3382_s28 + $0x2f8] sm:$0xff] %vm2145_vm1, %v1743_v34  ;;  %v3140_v34 = vld [vmem:[%s3305_s22 + $0xd8] sm:$0xff] }
 0x18c   : > { %v1902_v35 = vpop.f32.mrf.mxu2  ;;  %v1585_v41 = vpop.f32.mrf.mxu0 }
 0x18d   : > { %v2062_v36 = vpop.f32.mrf.mxu3  ;;  %v1903_v33 = vadd.f32 %v3893_v39, %v1902_v35  ;;  %v1745_v42 = vpop.f32.mrf.mxu1  ;;  %v1586_v45 = vadd.f32 %v3893_v39, %v1585_v41  ;;  %v3172_v35 = vld [vmem:[%s3305_s22 + $0x1d8] sm:$0xff] }
 0x18e   : > { %v2063_v40 = vadd.f32 %v3893_v39, %v2062_v36  ;;  %v1746_v46 = vadd.f32 %v3893_v39, %v1745_v42  ;;  %v3236_v41 = vld [vmem:[%s3305_s22 + $0x3d8] sm:$0xff] }
 0x18f   : > { %2305 = vst.msk [vmem:[%s3382_s28 + $0x4f8] sm:$0xff] %vm2145_vm1, %v1903_v33  ;;  %3007 = vmatmul.msk.bf16.gmra.mxu0 %vm1111_vm0, %v3137_v37 }
 0x190   : > { %2369 = vst.msk [vmem:[%s3382_s28 + $0x6f8] sm:$0xff] %vm2145_vm1, %v2063_v40  ;;  %3039 = vmatmul.msk.bf16.gmra.mxu1 %vm1111_vm0, %v3169_v38  ;;  %v3204_v40 = vld [vmem:[%s3305_s22 + $0x2d8] sm:$0xff] }
 0x191   : > { %2178 = vst.msk [vmem:[%s3382_s28 + $0x100] sm:$0xff] %vm2145_vm1, %v1586_v45  ;;  %3071 = vmatmul.msk.bf16.gmra.mxu2 %vm1111_vm0, %v3201_v43 }
 0x192   : > { %3103 = vmatmul.msk.bf16.gmra.mxu3 %vm1111_vm0, %v3233_v44  ;;  %2242 = vst.msk [vmem:[%s3382_s28 + $0x300] sm:$0xff] %vm2145_vm1, %v1746_v46 }
 0x194   : > { %v1905_v47 = vpop.f32.mrf.mxu2  ;;  %v1587_v51 = vpop.f32.mrf.mxu0 }
 0x195   : > { %v2065_v48 = vpop.f32.mrf.mxu3  ;;  %v1906_v49 = vadd.f32 %v3893_v39, %v1905_v47  ;;  %v1747_v52 = vpop.f32.mrf.mxu1  ;;  %v1588_v53 = vadd.f32 %v3893_v39, %v1587_v51 }
 0x196   : > { %v2066_v50 = vadd.f32 %v3893_v39, %v2065_v48  ;;  %v1748_v54 = vadd.f32 %v3893_v39, %v1747_v52 }
 0x197   : > { %2306 = vst.msk [vmem:[%s3382_s28 + $0x500] sm:$0xff] %vm2145_vm1, %v1906_v49 }
 0x198   : > { %2370 = vst.msk [vmem:[%s3382_s28 + $0x700] sm:$0xff] %vm2145_vm1, %v2066_v50 }
 0x199   : > { %2179 = vst.msk [vmem:[%s3382_s28 + $0x108] sm:$0xff] %vm2145_vm1, %v1588_v53 }
 0x19a   : > { %2243 = vst.msk [vmem:[%s3382_s28 + $0x308] sm:$0xff] %vm2145_vm1, %v1748_v54  ;;  %v3141_v54 = vld [vmem:[%s3305_s22 + $0xe0] sm:$0xff] }
 0x19c   : > { %v1907_v55 = vpop.f32.mrf.mxu2  ;;  %v1590_v61 = vpop.f32.mrf.mxu0 }
 0x19d   : > { %v2067_v56 = vpop.f32.mrf.mxu3  ;;  %v1908_v59 = vadd.f32 %v3893_v39, %v1907_v55  ;;  %v1750_v62 = vpop.f32.mrf.mxu1  ;;  %v1591_v1 = vadd.f32 %v3893_v39, %v1590_v61  ;;  %v3173_v55 = vld [vmem:[%s3305_s22 + $0x1e0] sm:$0xff] }
 0x19e   : > { %v2068_v60 = vadd.f32 %v3893_v39, %v2067_v56  ;;  %v1751_v2 = vadd.f32 %v3893_v39, %v1750_v62  ;;  %v3237_v61 = vld [vmem:[%s3305_s22 + $0x3e0] sm:$0xff] }
 0x19f   : > { %2307 = vst.msk [vmem:[%s3382_s28 + $0x508] sm:$0xff] %vm2145_vm1, %v1908_v59  ;;  %3008 = vmatmul.msk.bf16.gmra.mxu0 %vm1111_vm0, %v3138_v57 }
 0x1a0   : > { %2371 = vst.msk [vmem:[%s3382_s28 + $0x708] sm:$0xff] %vm2145_vm1, %v2068_v60  ;;  %3040 = vmatmul.msk.bf16.gmra.mxu1 %vm1111_vm0, %v3170_v58  ;;  %v3205_v60 = vld [vmem:[%s3305_s22 + $0x2e0] sm:$0xff] }
 0x1a1   : > { %2180 = vst.msk [vmem:[%s3382_s28 + $0x110] sm:$0xff] %vm2145_vm1, %v1591_v1  ;;  %3072 = vmatmul.msk.bf16.gmra.mxu2 %vm1111_vm0, %v3202_v63 }
 0x1a2   : > { %3104 = vmatmul.msk.bf16.gmra.mxu3 %vm1111_vm0, %v3234_v0  ;;  %2244 = vst.msk [vmem:[%s3382_s28 + $0x310] sm:$0xff] %vm2145_vm1, %v1751_v2 }
 0x1a4   : > { %v1910_v3 = vpop.f32.mrf.mxu2  ;;  %v1592_v7 = vpop.f32.mrf.mxu0 }
 0x1a5   : > { %v2070_v4 = vpop.f32.mrf.mxu3  ;;  %v1911_v5 = vadd.f32 %v3893_v39, %v1910_v3  ;;  %v1752_v8 = vpop.f32.mrf.mxu1  ;;  %v1593_v9 = vadd.f32 %v3893_v39, %v1592_v7 }
 0x1a6   : > { %v2071_v6 = vadd.f32 %v3893_v39, %v2070_v4  ;;  %v1753_v10 = vadd.f32 %v3893_v39, %v1752_v8 }
 0x1a7   : > { %2308 = vst.msk [vmem:[%s3382_s28 + $0x510] sm:$0xff] %vm2145_vm1, %v1911_v5 }
 0x1a8   : > { %2372 = vst.msk [vmem:[%s3382_s28 + $0x710] sm:$0xff] %vm2145_vm1, %v2071_v6 }
 0x1a9   : > { %2181 = vst.msk [vmem:[%s3382_s28 + $0x118] sm:$0xff] %vm2145_vm1, %v1593_v9 }
 0x1aa   : > { %2245 = vst.msk [vmem:[%s3382_s28 + $0x318] sm:$0xff] %vm2145_vm1, %v1753_v10  ;;  %v3142_v10 = vld [vmem:[%s3305_s22 + $0xe8] sm:$0xff] }
 0x1ac   : > { %v1912_v11 = vpop.f32.mrf.mxu2  ;;  %v1595_v17 = vpop.f32.mrf.mxu0 }
 0x1ad   : > { %v2072_v12 = vpop.f32.mrf.mxu3  ;;  %v1913_v15 = vadd.f32 %v3893_v39, %v1912_v11  ;;  %v1755_v18 = vpop.f32.mrf.mxu1  ;;  %v1596_v21 = vadd.f32 %v3893_v39, %v1595_v17  ;;  %v3174_v11 = vld [vmem:[%s3305_s22 + $0x1e8] sm:$0xff] }
 0x1ae   : > { %v2073_v16 = vadd.f32 %v3893_v39, %v2072_v12  ;;  %v1756_v22 = vadd.f32 %v3893_v39, %v1755_v18  ;;  %v3238_v17 = vld [vmem:[%s3305_s22 + $0x3e8] sm:$0xff] }
 0x1af   : > { %2309 = vst.msk [vmem:[%s3382_s28 + $0x518] sm:$0xff] %vm2145_vm1, %v1913_v15  ;;  %3009 = vmatmul.msk.bf16.gmra.mxu0 %vm1111_vm0, %v3139_v13 }
 0x1b0   : > { %2373 = vst.msk [vmem:[%s3382_s28 + $0x718] sm:$0xff] %vm2145_vm1, %v2073_v16  ;;  %3041 = vmatmul.msk.bf16.gmra.mxu1 %vm1111_vm0, %v3171_v14  ;;  %v3206_v16 = vld [vmem:[%s3305_s22 + $0x2e8] sm:$0xff] }
 0x1b1   : > { %2182 = vst.msk [vmem:[%s3382_s28 + $0x120] sm:$0xff] %vm2145_vm1, %v1596_v21  ;;  %3073 = vmatmul.msk.bf16.gmra.mxu2 %vm1111_vm0, %v3203_v19 }
 0x1b2   : > { %3105 = vmatmul.msk.bf16.gmra.mxu3 %vm1111_vm0, %v3235_v20  ;;  %2246 = vst.msk [vmem:[%s3382_s28 + $0x320] sm:$0xff] %vm2145_vm1, %v1756_v22 }
 0x1b4   : > { %v1915_v23 = vpop.f32.mrf.mxu2  ;;  %v1597_v27 = vpop.f32.mrf.mxu0 }
 0x1b5   : > { %v2075_v24 = vpop.f32.mrf.mxu3  ;;  %v1916_v25 = vadd.f32 %v3893_v39, %v1915_v23  ;;  %v1757_v28 = vpop.f32.mrf.mxu1  ;;  %v1598_v29 = vadd.f32 %v3893_v39, %v1597_v27 }
 0x1b6   : > { %v2076_v26 = vadd.f32 %v3893_v39, %v2075_v24  ;;  %v1758_v30 = vadd.f32 %v3893_v39, %v1757_v28 }
 0x1b7   : > { %2310 = vst.msk [vmem:[%s3382_s28 + $0x520] sm:$0xff] %vm2145_vm1, %v1916_v25 }
 0x1b8   : > { %2374 = vst.msk [vmem:[%s3382_s28 + $0x720] sm:$0xff] %vm2145_vm1, %v2076_v26 }
 0x1b9   : > { %2183 = vst.msk [vmem:[%s3382_s28 + $0x128] sm:$0xff] %vm2145_vm1, %v1598_v29 }
 0x1ba   : > { %2247 = vst.msk [vmem:[%s3382_s28 + $0x328] sm:$0xff] %vm2145_vm1, %v1758_v30  ;;  %v3143_v30 = vld [vmem:[%s3305_s22 + $0xf0] sm:$0xff] }
 0x1bc   : > { %v1917_v31 = vpop.f32.mrf.mxu2  ;;  %v1600_v38 = vpop.f32.mrf.mxu0 }
 0x1bd   : > { %v2077_v32 = vpop.f32.mrf.mxu3  ;;  %v1918_v36 = vadd.f32 %v3893_v39, %v1917_v31  ;;  %v1760_v33 = vpop.f32.mrf.mxu1  ;;  %v1601_v42 = vadd.f32 %v3893_v39, %v1600_v38  ;;  %v3175_v31 = vld [vmem:[%s3305_s22 + $0x1f0] sm:$0xff] }
 0x1be   : > { %v2078_v37 = vadd.f32 %v3893_v39, %v2077_v32  ;;  %v1761_v43 = vadd.f32 %v3893_v39, %v1760_v33  ;;  %v3239_v38 = vld [vmem:[%s3305_s22 + $0x3f0] sm:$0xff] }
 0x1bf   : > { %2311 = vst.msk [vmem:[%s3382_s28 + $0x528] sm:$0xff] %vm2145_vm1, %v1918_v36  ;;  %3010 = vmatmul.msk.bf16.gmra.mxu0 %vm1111_vm0, %v3140_v34 }
 0x1c0   : > { %2375 = vst.msk [vmem:[%s3382_s28 + $0x728] sm:$0xff] %vm2145_vm1, %v2078_v37  ;;  %3042 = vmatmul.msk.bf16.gmra.mxu1 %vm1111_vm0, %v3172_v35  ;;  %v3207_v37 = vld [vmem:[%s3305_s22 + $0x2f0] sm:$0xff] }
 0x1c1   : > { %2184 = vst.msk [vmem:[%s3382_s28 + $0x130] sm:$0xff] %vm2145_vm1, %v1601_v42  ;;  %3074 = vmatmul.msk.bf16.gmra.mxu2 %vm1111_vm0, %v3204_v40 }
 0x1c2   : > { %3106 = vmatmul.msk.bf16.gmra.mxu3 %vm1111_vm0, %v3236_v41  ;;  %2248 = vst.msk [vmem:[%s3382_s28 + $0x330] sm:$0xff] %vm2145_vm1, %v1761_v43 }
 0x1c4   : > { %v1920_v44 = vpop.f32.mrf.mxu2  ;;  %v1602_v48 = vpop.f32.mrf.mxu0 }
 0x1c5   : > { %v2080_v45 = vpop.f32.mrf.mxu3  ;;  %v1921_v46 = vadd.f32 %v3893_v39, %v1920_v44  ;;  %v1762_v49 = vpop.f32.mrf.mxu1  ;;  %v1603_v50 = vadd.f32 %v3893_v39, %v1602_v48 }
 0x1c6   : > { %v2081_v47 = vadd.f32 %v3893_v39, %v2080_v45  ;;  %v1763_v51 = vadd.f32 %v3893_v39, %v1762_v49 }
 0x1c7   : > { %2312 = vst.msk [vmem:[%s3382_s28 + $0x530] sm:$0xff] %vm2145_vm1, %v1921_v46 }
 0x1c8   : > { %2376 = vst.msk [vmem:[%s3382_s28 + $0x730] sm:$0xff] %vm2145_vm1, %v2081_v47 }
 0x1c9   : > { %2185 = vst.msk [vmem:[%s3382_s28 + $0x138] sm:$0xff] %vm2145_vm1, %v1603_v50 }
 0x1ca   : > { %2249 = vst.msk [vmem:[%s3382_s28 + $0x338] sm:$0xff] %vm2145_vm1, %v1763_v51  ;;  %v3144_v51 = vld [vmem:[%s3305_s22 + $0xf8] sm:$0xff] }
 0x1cc   : > { %v1922_v52 = vpop.f32.mrf.mxu2  ;;  %v1605_v58 = vpop.f32.mrf.mxu0 }
 0x1cd   : > { %v2082_v53 = vpop.f32.mrf.mxu3  ;;  %v1923_v56 = vadd.f32 %v3893_v39, %v1922_v52  ;;  %v1765_v59 = vpop.f32.mrf.mxu1  ;;  %v1606_v62 = vadd.f32 %v3893_v39, %v1605_v58  ;;  %v3176_v52 = vld [vmem:[%s3305_s22 + $0x1f8] sm:$0xff] }
 0x1ce   : > { %v2083_v57 = vadd.f32 %v3893_v39, %v2082_v53  ;;  %v1766_v63 = vadd.f32 %v3893_v39, %v1765_v59  ;;  %v3240_v58 = vld [vmem:[%s3305_s22 + $0x3f8] sm:$0xff] }
 0x1cf   : > { %2313 = vst.msk [vmem:[%s3382_s28 + $0x538] sm:$0xff] %vm2145_vm1, %v1923_v56  ;;  %3011 = vmatmul.msk.bf16.gmra.mxu0 %vm1111_vm0, %v3141_v54 }
 0x1d0   : > { %2377 = vst.msk [vmem:[%s3382_s28 + $0x738] sm:$0xff] %vm2145_vm1, %v2083_v57  ;;  %3043 = vmatmul.msk.bf16.gmra.mxu1 %vm1111_vm0, %v3173_v55  ;;  %v3208_v57 = vld [vmem:[%s3305_s22 + $0x2f8] sm:$0xff] }
 0x1d1   : > { %2186 = vst.msk [vmem:[%s3382_s28 + $0x140] sm:$0xff] %vm2145_vm1, %v1606_v62  ;;  %3075 = vmatmul.msk.bf16.gmra.mxu2 %vm1111_vm0, %v3205_v60 }
 0x1d2   : > { %3107 = vmatmul.msk.bf16.gmra.mxu3 %vm1111_vm0, %v3237_v61  ;;  %2250 = vst.msk [vmem:[%s3382_s28 + $0x340] sm:$0xff] %vm2145_vm1, %v1766_v63 }
 0x1d4   : > { %v1925_v0 = vpop.f32.mrf.mxu2  ;;  %v1607_v4 = vpop.f32.mrf.mxu0 }
 0x1d5   : > { %v2085_v1 = vpop.f32.mrf.mxu3  ;;  %v1926_v2 = vadd.f32 %v3893_v39, %v1925_v0  ;;  %v1767_v5 = vpop.f32.mrf.mxu1  ;;  %v1608_v6 = vadd.f32 %v3893_v39, %v1607_v4 }
 0x1d6   : > { %v2086_v3 = vadd.f32 %v3893_v39, %v2085_v1  ;;  %v1768_v7 = vadd.f32 %v3893_v39, %v1767_v5 }
 0x1d7   : > { %2314 = vst.msk [vmem:[%s3382_s28 + $0x540] sm:$0xff] %vm2145_vm1, %v1926_v2 }
 0x1d8   : > { %2378 = vst.msk [vmem:[%s3382_s28 + $0x740] sm:$0xff] %vm2145_vm1, %v2086_v3 }
 0x1d9   : > { %2187 = vst.msk [vmem:[%s3382_s28 + $0x148] sm:$0xff] %vm2145_vm1, %v1608_v6 }
 0x1da   : > { %2251 = vst.msk [vmem:[%s3382_s28 + $0x348] sm:$0xff] %vm2145_vm1, %v1768_v7 }
 0x1dc   : > { %v1927_v8 = vpop.f32.mrf.mxu2  ;;  %v1610_v14 = vpop.f32.mrf.mxu0 }
 0x1dd   : > { %v2087_v9 = vpop.f32.mrf.mxu3  ;;  %v1928_v12 = vadd.f32 %v3893_v39, %v1927_v8  ;;  %v1770_v15 = vpop.f32.mrf.mxu1  ;;  %v1611_v18 = vadd.f32 %v3893_v39, %v1610_v14 }
 0x1de   : > { %v2088_v13 = vadd.f32 %v3893_v39, %v2087_v9  ;;  %v1771_v19 = vadd.f32 %v3893_v39, %v1770_v15 }
 0x1df   : > { %2315 = vst.msk [vmem:[%s3382_s28 + $0x548] sm:$0xff] %vm2145_vm1, %v1928_v12  ;;  %3012 = vmatmul.msk.bf16.gmra.mxu0 %vm1111_vm0, %v3142_v10 }
 0x1e0   : > { %2379 = vst.msk [vmem:[%s3382_s28 + $0x748] sm:$0xff] %vm2145_vm1, %v2088_v13  ;;  %3044 = vmatmul.msk.bf16.gmra.mxu1 %vm1111_vm0, %v3174_v11 }
 0x1e1   : > { %2188 = vst.msk [vmem:[%s3382_s28 + $0x150] sm:$0xff] %vm2145_vm1, %v1611_v18  ;;  %3076 = vmatmul.msk.bf16.gmra.mxu2 %vm1111_vm0, %v3206_v16 }
 0x1e2   : > { %3108 = vmatmul.msk.bf16.gmra.mxu3 %vm1111_vm0, %v3238_v17  ;;  %2252 = vst.msk [vmem:[%s3382_s28 + $0x350] sm:$0xff] %vm2145_vm1, %v1771_v19 }
 0x1e4   : > { %v1930_v20 = vpop.f32.mrf.mxu2  ;;  %v1612_v24 = vpop.f32.mrf.mxu0 }
 0x1e5   : > { %v2090_v21 = vpop.f32.mrf.mxu3  ;;  %v1931_v22 = vadd.f32 %v3893_v39, %v1930_v20  ;;  %v1772_v25 = vpop.f32.mrf.mxu1  ;;  %v1613_v26 = vadd.f32 %v3893_v39, %v1612_v24 }
 0x1e6   : > { %v2091_v23 = vadd.f32 %v3893_v39, %v2090_v21  ;;  %v1773_v27 = vadd.f32 %v3893_v39, %v1772_v25 }
 0x1e7   : > { %2316 = vst.msk [vmem:[%s3382_s28 + $0x550] sm:$0xff] %vm2145_vm1, %v1931_v22 }
 0x1e8   : > { %2380 = vst.msk [vmem:[%s3382_s28 + $0x750] sm:$0xff] %vm2145_vm1, %v2091_v23 }
 0x1e9   : > { %2189 = vst.msk [vmem:[%s3382_s28 + $0x158] sm:$0xff] %vm2145_vm1, %v1613_v26 }
 0x1ea   : > { %2253 = vst.msk [vmem:[%s3382_s28 + $0x358] sm:$0xff] %vm2145_vm1, %v1773_v27 }
 0x1ec   : > { %v1932_v28 = vpop.f32.mrf.mxu2  ;;  %v1615_v35 = vpop.f32.mrf.mxu0 }
 0x1ed   : > { %v2092_v29 = vpop.f32.mrf.mxu3  ;;  %v1933_v32 = vadd.f32 %v3893_v39, %v1932_v28  ;;  %v1775_v36 = vpop.f32.mrf.mxu1  ;;  %v1616_v33 = vadd.f32 %v3893_v39, %v1615_v35 }
 0x1ee   : > { %v2093_v34 = vadd.f32 %v3893_v39, %v2092_v29  ;;  %v1776_v40 = vadd.f32 %v3893_v39, %v1775_v36 }
 0x1ef   : > { %2317 = vst.msk [vmem:[%s3382_s28 + $0x558] sm:$0xff] %vm2145_vm1, %v1933_v32  ;;  %3013 = vmatmul.msk.bf16.gmra.mxu0 %vm1111_vm0, %v3143_v30 }
 0x1f0   : > { %2381 = vst.msk [vmem:[%s3382_s28 + $0x758] sm:$0xff] %vm2145_vm1, %v2093_v34  ;;  %3045 = vmatmul.msk.bf16.gmra.mxu1 %vm1111_vm0, %v3175_v31 }
 0x1f1   : > { %2190 = vst.msk [vmem:[%s3382_s28 + $0x160] sm:$0xff] %vm2145_vm1, %v1616_v33  ;;  %3077 = vmatmul.msk.bf16.gmra.mxu2 %vm1111_vm0, %v3207_v37 }
 0x1f2   : > { %3109 = vmatmul.msk.bf16.gmra.mxu3 %vm1111_vm0, %v3239_v38  ;;  %2254 = vst.msk [vmem:[%s3382_s28 + $0x360] sm:$0xff] %vm2145_vm1, %v1776_v40 }
 0x1f4   : > { %v1935_v41 = vpop.f32.mrf.mxu2  ;;  %v1617_v45 = vpop.f32.mrf.mxu0 }
 0x1f5   : > { %v2095_v42 = vpop.f32.mrf.mxu3  ;;  %v1936_v43 = vadd.f32 %v3893_v39, %v1935_v41  ;;  %v1777_v46 = vpop.f32.mrf.mxu1  ;;  %v1618_v47 = vadd.f32 %v3893_v39, %v1617_v45 }
 0x1f6   : > { %v2096_v44 = vadd.f32 %v3893_v39, %v2095_v42  ;;  %v1778_v48 = vadd.f32 %v3893_v39, %v1777_v46 }
 0x1f7   : > { %2318 = vst.msk [vmem:[%s3382_s28 + $0x560] sm:$0xff] %vm2145_vm1, %v1936_v43 }
 0x1f8   : > { %2382 = vst.msk [vmem:[%s3382_s28 + $0x760] sm:$0xff] %vm2145_vm1, %v2096_v44 }
 0x1f9   : > { %2191 = vst.msk [vmem:[%s3382_s28 + $0x168] sm:$0xff] %vm2145_vm1, %v1618_v47 }
 0x1fa   : > { %2255 = vst.msk [vmem:[%s3382_s28 + $0x368] sm:$0xff] %vm2145_vm1, %v1778_v48 }
 0x1fc   : > { %v1937_v49 = vpop.f32.mrf.mxu2  ;;  %v1620_v55 = vpop.f32.mrf.mxu0 }
 0x1fd   : > { %v2097_v50 = vpop.f32.mrf.mxu3  ;;  %v1938_v53 = vadd.f32 %v3893_v39, %v1937_v49  ;;  %v1780_v56 = vpop.f32.mrf.mxu1  ;;  %v1621_v59 = vadd.f32 %v3893_v39, %v1620_v55 }
 0x1fe   : > { %v2098_v54 = vadd.f32 %v3893_v39, %v2097_v50  ;;  %v1781_v60 = vadd.f32 %v3893_v39, %v1780_v56 }
 0x1ff   : > { %2319 = vst.msk [vmem:[%s3382_s28 + $0x568] sm:$0xff] %vm2145_vm1, %v1938_v53  ;;  %3014 = vmatmul.msk.bf16.gmra.mxu0 %vm1111_vm0, %v3144_v51 }
 0x200   : > { %2383 = vst.msk [vmem:[%s3382_s28 + $0x768] sm:$0xff] %vm2145_vm1, %v2098_v54  ;;  %3046 = vmatmul.msk.bf16.gmra.mxu1 %vm1111_vm0, %v3176_v52 }
 0x201   : > { %2192 = vst.msk [vmem:[%s3382_s28 + $0x170] sm:$0xff] %vm2145_vm1, %v1621_v59  ;;  %3078 = vmatmul.msk.bf16.gmra.mxu2 %vm1111_vm0, %v3208_v57 }
 0x202   : > { %3110 = vmatmul.msk.bf16.gmra.mxu3 %vm1111_vm0, %v3240_v58  ;;  %2256 = vst.msk [vmem:[%s3382_s28 + $0x370] sm:$0xff] %vm2145_vm1, %v1781_v60 }
 0x204   : > { %v1940_v61 = vpop.f32.mrf.mxu2  ;;  %v1622_v1 = vpop.f32.mrf.mxu0 }
 0x205   : > { %v2100_v62 = vpop.f32.mrf.mxu3  ;;  %v1941_v63 = vadd.f32 %v3893_v39, %v1940_v61  ;;  %v1782_v2 = vpop.f32.mrf.mxu1  ;;  %v1623_v3 = vadd.f32 %v3893_v39, %v1622_v1 }
 0x206   : > { %v2101_v0 = vadd.f32 %v3893_v39, %v2100_v62  ;;  %v1783_v4 = vadd.f32 %v3893_v39, %v1782_v2 }
 0x207   : > { %2320 = vst.msk [vmem:[%s3382_s28 + $0x570] sm:$0xff] %vm2145_vm1, %v1941_v63 }
 0x208   : > { %2384 = vst.msk [vmem:[%s3382_s28 + $0x770] sm:$0xff] %vm2145_vm1, %v2101_v0 }
 0x209   : > { %2193 = vst.msk [vmem:[%s3382_s28 + $0x178] sm:$0xff] %vm2145_vm1, %v1623_v3 }
 0x20a   : > { %2257 = vst.msk [vmem:[%s3382_s28 + $0x378] sm:$0xff] %vm2145_vm1, %v1783_v4 }
 0x20c   : > { %v1942_v5 = vpop.f32.mrf.mxu2  ;;  %v1625_v9 = vpop.f32.mrf.mxu0 }
 0x20d   : > { %v2102_v6 = vpop.f32.mrf.mxu3  ;;  %v1943_v7 = vadd.f32 %v3893_v39, %v1942_v5  ;;  %v1785_v10 = vpop.f32.mrf.mxu1  ;;  %v1626_v11 = vadd.f32 %v3893_v39, %v1625_v9 }
 0x20e   : > { %v2103_v8 = vadd.f32 %v3893_v39, %v2102_v6  ;;  %v1786_v12 = vadd.f32 %v3893_v39, %v1785_v10 }
 0x20f   : > { %2321 = vst.msk [vmem:[%s3382_s28 + $0x578] sm:$0xff] %vm2145_vm1, %v1943_v7 }
 0x210   : > { %2385 = vst.msk [vmem:[%s3382_s28 + $0x778] sm:$0xff] %vm2145_vm1, %v2103_v8 }
 0x211   : > { %2194 = vst.msk [vmem:[%s3382_s28 + $0x180] sm:$0xff] %vm2145_vm1, %v1626_v11 }
 0x212   : > { %2258 = vst.msk [vmem:[%s3382_s28 + $0x380] sm:$0xff] %vm2145_vm1, %v1786_v12 }
 0x214   : > { %v1945_v13 = vpop.f32.mrf.mxu2  ;;  %v1627_v17 = vpop.f32.mrf.mxu0 }
 0x215   : > { %v2105_v14 = vpop.f32.mrf.mxu3  ;;  %v1946_v15 = vadd.f32 %v3893_v39, %v1945_v13  ;;  %v1787_v18 = vpop.f32.mrf.mxu1  ;;  %v1628_v19 = vadd.f32 %v3893_v39, %v1627_v17 }
 0x216   : > { %v2106_v16 = vadd.f32 %v3893_v39, %v2105_v14  ;;  %v1788_v20 = vadd.f32 %v3893_v39, %v1787_v18 }
 0x217   : > { %2322 = vst.msk [vmem:[%s3382_s28 + $0x580] sm:$0xff] %vm2145_vm1, %v1946_v15 }
 0x218   : > { %2386 = vst.msk [vmem:[%s3382_s28 + $0x780] sm:$0xff] %vm2145_vm1, %v2106_v16 }
 0x219   : > { %2195 = vst.msk [vmem:[%s3382_s28 + $0x188] sm:$0xff] %vm2145_vm1, %v1628_v19 }
 0x21a   : > { %2259 = vst.msk [vmem:[%s3382_s28 + $0x388] sm:$0xff] %vm2145_vm1, %v1788_v20 }
 0x21c   : > { %v1947_v21 = vpop.f32.mrf.mxu2  ;;  %v1630_v25 = vpop.f32.mrf.mxu0 }
 0x21d   : > { %v2107_v22 = vpop.f32.mrf.mxu3  ;;  %v1948_v23 = vadd.f32 %v3893_v39, %v1947_v21  ;;  %v1790_v26 = vpop.f32.mrf.mxu1  ;;  %v1631_v27 = vadd.f32 %v3893_v39, %v1630_v25 }
 0x21e   : > { %v2108_v24 = vadd.f32 %v3893_v39, %v2107_v22  ;;  %v1791_v28 = vadd.f32 %v3893_v39, %v1790_v26 }
 0x21f   : > { %2323 = vst.msk [vmem:[%s3382_s28 + $0x588] sm:$0xff] %vm2145_vm1, %v1948_v23 }
 0x220   : > { %2387 = vst.msk [vmem:[%s3382_s28 + $0x788] sm:$0xff] %vm2145_vm1, %v2108_v24 }
 0x221   : > { %2196 = vst.msk [vmem:[%s3382_s28 + $0x190] sm:$0xff] %vm2145_vm1, %v1631_v27 }
 0x222   : > { %2260 = vst.msk [vmem:[%s3382_s28 + $0x390] sm:$0xff] %vm2145_vm1, %v1791_v28 }
 0x224   : > { %v1950_v29 = vpop.f32.mrf.mxu2  ;;  %v1632_v34 = vpop.f32.mrf.mxu0 }
 0x225   : > { %v2110_v30 = vpop.f32.mrf.mxu3  ;;  %v1951_v31 = vadd.f32 %v3893_v39, %v1950_v29  ;;  %v1792_v35 = vpop.f32.mrf.mxu1  ;;  %v1633_v36 = vadd.f32 %v3893_v39, %v1632_v34 }
 0x226   : > { %v2111_v32 = vadd.f32 %v3893_v39, %v2110_v30  ;;  %v1793_v37 = vadd.f32 %v3893_v39, %v1792_v35 }
 0x227   : > { %2324 = vst.msk [vmem:[%s3382_s28 + $0x590] sm:$0xff] %vm2145_vm1, %v1951_v31 }
 0x228   : > { %2388 = vst.msk [vmem:[%s3382_s28 + $0x790] sm:$0xff] %vm2145_vm1, %v2111_v32 }
 0x229   : > { %2197 = vst.msk [vmem:[%s3382_s28 + $0x198] sm:$0xff] %vm2145_vm1, %v1633_v36 }
 0x22a   : > { %2261 = vst.msk [vmem:[%s3382_s28 + $0x398] sm:$0xff] %vm2145_vm1, %v1793_v37 }
 0x22c   : > { %v1952_v38 = vpop.f32.mrf.mxu2  ;;  %v1635_v42 = vpop.f32.mrf.mxu0 }
 0x22d   : > { %v2112_v33 = vpop.f32.mrf.mxu3  ;;  %v1953_v40 = vadd.f32 %v3893_v39, %v1952_v38  ;;  %v1795_v43 = vpop.f32.mrf.mxu1  ;;  %v1636_v44 = vadd.f32 %v3893_v39, %v1635_v42 }
 0x22e   : > { %v2113_v41 = vadd.f32 %v3893_v39, %v2112_v33  ;;  %v1796_v45 = vadd.f32 %v3893_v39, %v1795_v43 }
 0x22f   : > { %2325 = vst.msk [vmem:[%s3382_s28 + $0x598] sm:$0xff] %vm2145_vm1, %v1953_v40 }
 0x230   : > { %2389 = vst.msk [vmem:[%s3382_s28 + $0x798] sm:$0xff] %vm2145_vm1, %v2113_v41 }
 0x231   : > { %2198 = vst.msk [vmem:[%s3382_s28 + $0x1a0] sm:$0xff] %vm2145_vm1, %v1636_v44 }
 0x232   : > { %2262 = vst.msk [vmem:[%s3382_s28 + $0x3a0] sm:$0xff] %vm2145_vm1, %v1796_v45 }
 0x234   : > { %v1955_v46 = vpop.f32.mrf.mxu2  ;;  %v1637_v50 = vpop.f32.mrf.mxu0 }
 0x235   : > { %v2115_v47 = vpop.f32.mrf.mxu3  ;;  %v1956_v48 = vadd.f32 %v3893_v39, %v1955_v46  ;;  %v1797_v51 = vpop.f32.mrf.mxu1  ;;  %v1638_v52 = vadd.f32 %v3893_v39, %v1637_v50 }
 0x236   : > { %v2116_v49 = vadd.f32 %v3893_v39, %v2115_v47  ;;  %v1798_v53 = vadd.f32 %v3893_v39, %v1797_v51 }
 0x237   : > { %2326 = vst.msk [vmem:[%s3382_s28 + $0x5a0] sm:$0xff] %vm2145_vm1, %v1956_v48 }
 0x238   : > { %2390 = vst.msk [vmem:[%s3382_s28 + $0x7a0] sm:$0xff] %vm2145_vm1, %v2116_v49 }
 0x239   : > { %2199 = vst.msk [vmem:[%s3382_s28 + $0x1a8] sm:$0xff] %vm2145_vm1, %v1638_v52 }
 0x23a   : > { %2263 = vst.msk [vmem:[%s3382_s28 + $0x3a8] sm:$0xff] %vm2145_vm1, %v1798_v53 }
 0x23c   : > { %v1957_v54 = vpop.f32.mrf.mxu2  ;;  %v1640_v58 = vpop.f32.mrf.mxu0 }
 0x23d   : > { %v2117_v55 = vpop.f32.mrf.mxu3  ;;  %v1958_v56 = vadd.f32 %v3893_v39, %v1957_v54  ;;  %v1800_v59 = vpop.f32.mrf.mxu1  ;;  %v1641_v60 = vadd.f32 %v3893_v39, %v1640_v58 }
 0x23e   : > { %v2118_v57 = vadd.f32 %v3893_v39, %v2117_v55  ;;  %v1801_v61 = vadd.f32 %v3893_v39, %v1800_v59 }
 0x23f   : > { %2327 = vst.msk [vmem:[%s3382_s28 + $0x5a8] sm:$0xff] %vm2145_vm1, %v1958_v56 }
 0x240   : > { %2391 = vst.msk [vmem:[%s3382_s28 + $0x7a8] sm:$0xff] %vm2145_vm1, %v2118_v57 }
 0x241   : > { %2200 = vst.msk [vmem:[%s3382_s28 + $0x1b0] sm:$0xff] %vm2145_vm1, %v1641_v60 }
 0x242   : > { %2264 = vst.msk [vmem:[%s3382_s28 + $0x3b0] sm:$0xff] %vm2145_vm1, %v1801_v61 }
 0x244   : > { %v1960_v62 = vpop.f32.mrf.mxu2  ;;  %v1642_v2 = vpop.f32.mrf.mxu0 }
 0x245   : > { %v2120_v63 = vpop.f32.mrf.mxu3  ;;  %v1961_v0 = vadd.f32 %v3893_v39, %v1960_v62  ;;  %v1802_v3 = vpop.f32.mrf.mxu1  ;;  %v1643_v4 = vadd.f32 %v3893_v39, %v1642_v2 }
 0x246   : > { %v2121_v1 = vadd.f32 %v3893_v39, %v2120_v63  ;;  %v1803_v5 = vadd.f32 %v3893_v39, %v1802_v3 }
 0x247   : > { %2328 = vst.msk [vmem:[%s3382_s28 + $0x5b0] sm:$0xff] %vm2145_vm1, %v1961_v0 }
 0x248   : > { %2392 = vst.msk [vmem:[%s3382_s28 + $0x7b0] sm:$0xff] %vm2145_vm1, %v2121_v1 }
 0x249   : > { %2201 = vst.msk [vmem:[%s3382_s28 + $0x1b8] sm:$0xff] %vm2145_vm1, %v1643_v4 }
 0x24a   : > { %2265 = vst.msk [vmem:[%s3382_s28 + $0x3b8] sm:$0xff] %vm2145_vm1, %v1803_v5 }
 0x24c   : > { %v1962_v6 = vpop.f32.mrf.mxu2  ;;  %v1645_v10 = vpop.f32.mrf.mxu0 }
 0x24d   : > { %v2122_v7 = vpop.f32.mrf.mxu3  ;;  %v1963_v8 = vadd.f32 %v3893_v39, %v1962_v6  ;;  %v1805_v11 = vpop.f32.mrf.mxu1  ;;  %v1646_v12 = vadd.f32 %v3893_v39, %v1645_v10 }
 0x24e   : > { %v2123_v9 = vadd.f32 %v3893_v39, %v2122_v7  ;;  %v1806_v13 = vadd.f32 %v3893_v39, %v1805_v11 }
 0x24f   : > { %2329 = vst.msk [vmem:[%s3382_s28 + $0x5b8] sm:$0xff] %vm2145_vm1, %v1963_v8 }
 0x250   : > { %2393 = vst.msk [vmem:[%s3382_s28 + $0x7b8] sm:$0xff] %vm2145_vm1, %v2123_v9 }
 0x251   : > { %2202 = vst.msk [vmem:[%s3382_s28 + $0x1c0] sm:$0xff] %vm2145_vm1, %v1646_v12 }
 0x252   : > { %2266 = vst.msk [vmem:[%s3382_s28 + $0x3c0] sm:$0xff] %vm2145_vm1, %v1806_v13 }
 0x254   : > { %v1965_v14 = vpop.f32.mrf.mxu2  ;;  %v1647_v18 = vpop.f32.mrf.mxu0 }
 0x255   : > { %v2125_v15 = vpop.f32.mrf.mxu3  ;;  %v1966_v16 = vadd.f32 %v3893_v39, %v1965_v14  ;;  %v1807_v19 = vpop.f32.mrf.mxu1  ;;  %v1648_v20 = vadd.f32 %v3893_v39, %v1647_v18 }
 0x256   : > { %v2126_v17 = vadd.f32 %v3893_v39, %v2125_v15  ;;  %v1808_v21 = vadd.f32 %v3893_v39, %v1807_v19 }
 0x257   : > { %2330 = vst.msk [vmem:[%s3382_s28 + $0x5c0] sm:$0xff] %vm2145_vm1, %v1966_v16 }
 0x258   : > { %2394 = vst.msk [vmem:[%s3382_s28 + $0x7c0] sm:$0xff] %vm2145_vm1, %v2126_v17 }
 0x259   : > { %2203 = vst.msk [vmem:[%s3382_s28 + $0x1c8] sm:$0xff] %vm2145_vm1, %v1648_v20 }
 0x25a   : > { %2267 = vst.msk [vmem:[%s3382_s28 + $0x3c8] sm:$0xff] %vm2145_vm1, %v1808_v21 }
 0x25c   : > { %v1967_v22 = vpop.f32.mrf.mxu2  ;;  %v1650_v26 = vpop.f32.mrf.mxu0 }
 0x25d   : > { %v2127_v23 = vpop.f32.mrf.mxu3  ;;  %v1968_v24 = vadd.f32 %v3893_v39, %v1967_v22  ;;  %v1810_v27 = vpop.f32.mrf.mxu1  ;;  %v1651_v28 = vadd.f32 %v3893_v39, %v1650_v26 }
 0x25e   : > { %v2128_v25 = vadd.f32 %v3893_v39, %v2127_v23  ;;  %v1811_v29 = vadd.f32 %v3893_v39, %v1810_v27 }
 0x25f   : > { %2331 = vst.msk [vmem:[%s3382_s28 + $0x5c8] sm:$0xff] %vm2145_vm1, %v1968_v24 }
 0x260   : > { %2395 = vst.msk [vmem:[%s3382_s28 + $0x7c8] sm:$0xff] %vm2145_vm1, %v2128_v25 }
 0x261   : > { %2204 = vst.msk [vmem:[%s3382_s28 + $0x1d0] sm:$0xff] %vm2145_vm1, %v1651_v28 }
 0x262   : > { %2268 = vst.msk [vmem:[%s3382_s28 + $0x3d0] sm:$0xff] %vm2145_vm1, %v1811_v29 }
 0x264   : > { %v1970_v30 = vpop.f32.mrf.mxu2  ;;  %v1652_v35 = vpop.f32.mrf.mxu0 }
 0x265   : > { %v2130_v31 = vpop.f32.mrf.mxu3  ;;  %v1971_v32 = vadd.f32 %v3893_v39, %v1970_v30  ;;  %v1812_v36 = vpop.f32.mrf.mxu1  ;;  %v1653_v37 = vadd.f32 %v3893_v39, %v1652_v35 }
 0x266   : > { %v2131_v34 = vadd.f32 %v3893_v39, %v2130_v31  ;;  %v1813_v38 = vadd.f32 %v3893_v39, %v1812_v36 }
 0x267   : > { %2332 = vst.msk [vmem:[%s3382_s28 + $0x5d0] sm:$0xff] %vm2145_vm1, %v1971_v32 }
 0x268   : > { %2396 = vst.msk [vmem:[%s3382_s28 + $0x7d0] sm:$0xff] %vm2145_vm1, %v2131_v34 }
 0x269   : > { %2205 = vst.msk [vmem:[%s3382_s28 + $0x1d8] sm:$0xff] %vm2145_vm1, %v1653_v37 }
 0x26a   : > { %2269 = vst.msk [vmem:[%s3382_s28 + $0x3d8] sm:$0xff] %vm2145_vm1, %v1813_v38 }
 0x26c   : > { %v1972_v33 = vpop.f32.mrf.mxu2  ;;  %v1655_v43 = vpop.f32.mrf.mxu0 }
 0x26d   : > { %v2132_v40 = vpop.f32.mrf.mxu3  ;;  %v1973_v41 = vadd.f32 %v3893_v39, %v1972_v33  ;;  %v1815_v44 = vpop.f32.mrf.mxu1  ;;  %v1656_v45 = vadd.f32 %v3893_v39, %v1655_v43 }
 0x26e   : > { %v2133_v42 = vadd.f32 %v3893_v39, %v2132_v40  ;;  %v1816_v46 = vadd.f32 %v3893_v39, %v1815_v44 }
 0x26f   : > { %2333 = vst.msk [vmem:[%s3382_s28 + $0x5d8] sm:$0xff] %vm2145_vm1, %v1973_v41 }
 0x270   : > { %2397 = vst.msk [vmem:[%s3382_s28 + $0x7d8] sm:$0xff] %vm2145_vm1, %v2133_v42 }
 0x271   : > { %2206 = vst.msk [vmem:[%s3382_s28 + $0x1e0] sm:$0xff] %vm2145_vm1, %v1656_v45 }
 0x272   : > { %2270 = vst.msk [vmem:[%s3382_s28 + $0x3e0] sm:$0xff] %vm2145_vm1, %v1816_v46 }
 0x274   : > { %v1975_v47 = vpop.f32.mrf.mxu2  ;;  %v1657_v51 = vpop.f32.mrf.mxu0 }
 0x275   : > { %v2135_v48 = vpop.f32.mrf.mxu3  ;;  %v1976_v49 = vadd.f32 %v3893_v39, %v1975_v47  ;;  %v1817_v52 = vpop.f32.mrf.mxu1  ;;  %v1658_v53 = vadd.f32 %v3893_v39, %v1657_v51 }
 0x276   : > { %v2136_v50 = vadd.f32 %v3893_v39, %v2135_v48  ;;  %v1818_v54 = vadd.f32 %v3893_v39, %v1817_v52 }
 0x277   : > { %2334 = vst.msk [vmem:[%s3382_s28 + $0x5e0] sm:$0xff] %vm2145_vm1, %v1976_v49 }
 0x278   : > { %2398 = vst.msk [vmem:[%s3382_s28 + $0x7e0] sm:$0xff] %vm2145_vm1, %v2136_v50 }
 0x279   : > { %2207 = vst.msk [vmem:[%s3382_s28 + $0x1e8] sm:$0xff] %vm2145_vm1, %v1658_v53 }
 0x27a   : > { %2271 = vst.msk [vmem:[%s3382_s28 + $0x3e8] sm:$0xff] %vm2145_vm1, %v1818_v54 }
 0x27c   : > { %v1977_v55 = vpop.f32.mrf.mxu2  ;;  %v1660_v59 = vpop.f32.mrf.mxu0 }
 0x27d   : > { %v2137_v56 = vpop.f32.mrf.mxu3  ;;  %v1978_v57 = vadd.f32 %v3893_v39, %v1977_v55  ;;  %v1820_v60 = vpop.f32.mrf.mxu1  ;;  %v1661_v61 = vadd.f32 %v3893_v39, %v1660_v59 }
 0x27e   : > { %v2138_v58 = vadd.f32 %v3893_v39, %v2137_v56  ;;  %v1821_v62 = vadd.f32 %v3893_v39, %v1820_v60 }
 0x27f   : > { %2335 = vst.msk [vmem:[%s3382_s28 + $0x5e8] sm:$0xff] %vm2145_vm1, %v1978_v57 }
 0x280   : > { %2399 = vst.msk [vmem:[%s3382_s28 + $0x7e8] sm:$0xff] %vm2145_vm1, %v2138_v58 }
 0x281   : > { %2208 = vst.msk [vmem:[%s3382_s28 + $0x1f0] sm:$0xff] %vm2145_vm1, %v1661_v61 }
 0x282   : > { %2272 = vst.msk [vmem:[%s3382_s28 + $0x3f0] sm:$0xff] %vm2145_vm1, %v1821_v62 }
 0x284   : > { %v1980_v63 = vpop.f32.mrf.mxu2  ;;  %v1662_v3 = vpop.f32.mrf.mxu0 }
 0x285   : > { %v2140_v0 = vpop.f32.mrf.mxu3  ;;  %v1981_v1 = vadd.f32 %v3893_v39, %v1980_v63  ;;  %v1822_v4 = vpop.f32.mrf.mxu1  ;;  %v1663_v5 = vadd.f32 %v3893_v39, %v1662_v3 }
 0x286   : > { %v2141_v2 = vadd.f32 %v3893_v39, %v2140_v0  ;;  %v1823_v6 = vadd.f32 %v3893_v39, %v1822_v4 }
 0x287   : > { %2336 = vst.msk [vmem:[%s3382_s28 + $0x5f0] sm:$0xff] %vm2145_vm1, %v1981_v1 }
 0x288   : > { %2400 = vst.msk [vmem:[%s3382_s28 + $0x7f0] sm:$0xff] %vm2145_vm1, %v2141_v2 }
 0x289   : > { %2209 = vst.msk [vmem:[%s3382_s28 + $0x1f8] sm:$0xff] %vm2145_vm1, %v1663_v5 }
 0x28a   : > { %2273 = vst.msk [vmem:[%s3382_s28 + $0x3f8] sm:$0xff] %vm2145_vm1, %v1823_v6 }
 0x28c   : > { %v1982_v7 = vpop.f32.mrf.mxu2 }
 0x28d   : > { %v2142_v8 = vpop.f32.mrf.mxu3  ;;  %v1983_v9 = vadd.f32 %v3893_v39, %v1982_v7 }
 0x28e   : > { %v2143_v10 = vadd.f32 %v3893_v39, %v2142_v8 }
 0x28f   : > { %2337 = vst.msk [vmem:[%s3382_s28 + $0x5f8] sm:$0xff] %vm2145_vm1, %v1983_v9 }
 0x290   : > { %2401 = vst.msk [vmem:[%s3382_s28 + $0x7f8] sm:$0xff] %vm2145_vm1, %v2143_v10 }
 0x291 PF: > { %s15_s15 = sadd.s32 1, %s3261_s15  }
 0x292   : > { %p12_p4 = scmp.ge.s32.totalorder %s15_s15, 6  }
 0x294   :  { %14 = sbr.rel (!%p12_p4) target bundleno = 1 (0x1), region = 66 }

</bundles_post_ra>
